<compile_context>
chip_gen: v5e
topology: v5e:2x2
jax: 0.10.0
libtpu: 0.0.40
codegen_flags: <defaults>
</compile_context>

<pallas_src>
import jax
import jax.numpy as jnp
from jax import lax
from jax.experimental import pallas as pl
from jax.experimental.pallas import tpu as pltpu

# ----------------------- small config consistent with the module ----------------------
BATCH       = 2
SEED_LEN    = 20     # config.seed_seq_len
TARGET_LEN  = 8      # config.target_seq_len
KERNEL_SIZE = 4      # config.kernel_size (must be even)
POSE        = 16     # config.pose_size (== GCN node_n)
HIDDEN      = 256    # hard-coded hidden_feature
NUM_STAGE   = 12     # hard-coded gcn_num_stage
N_DCT       = KERNEL_SIZE + TARGET_LEN                   # n_dct_freq
VL          = KERNEL_SIZE + TARGET_LEN                   # sub-sequence length
VN          = SEED_LEN - KERNEL_SIZE - TARGET_LEN + 1    # number of sub-sequences


# ------------------------------- fused Pallas kernel ----------------------------------
def _fused_kernel(src_ref, srcT_ref,                       # per-batch activations
                  dctT_ref, dctg_ref, idctp_ref,           # DCT bases
                  wk1_ref, wk2_ref, wq1_ref, wq2_ref,      # conv weights (tap-major)
                  w1a_ref, w1b_ref, a1_ref, b1_ref, s1s_ref, s1t_ref,
                  wg1_ref, ag1_ref, bg1_ref, g1s_ref, g1t_ref,
                  wg2_ref, ag2_ref, bg2_ref, g2s_ref, g2t_ref,
                  w7a_ref, a7_ref, b7a_ref,
                  out_ref):
    f32 = jnp.float32
    src = src_ref[0]            # (SEED, POSE)  time-major
    srcT = srcT_ref[0]          # (POSE, SEED)  pose-major

    def mm(a, b):
        return jnp.dot(a, b, preferred_element_type=f32)

    def conv_relu(x, w_ref):
        # PyTorch Conv1d (stride 1, no pad, no bias) + ReLU on a time-major (L, Cin)
        # tile, expressed as a sum of per-tap matmuls: y[l] = sum_j x[l+j] @ W_j.
        k = w_ref.shape[0]
        lout = x.shape[0] - k + 1
        y = mm(x[0:lout, :], w_ref[0])
        for j in range(1, k):
            y = y + mm(x[j:j + lout, :], w_ref[j])
        return jnp.maximum(y, 0.0)

    # ---------------- convK / convQ -> key (VN, H), query (1, H) ----------------------
    key = conv_relu(conv_relu(src[0:SEED_LEN - TARGET_LEN, :], wk1_ref), wk2_ref)
    query = conv_relu(conv_relu(src[SEED_LEN - KERNEL_SIZE:SEED_LEN, :], wq1_ref), wq2_ref)

    # attention weights over the VN value sub-sequences (matches the PyTorch model:
    # raw-score normalization, scores are non-negative thanks to the ReLU convs)
    score = lax.dot_general(query, key, (((1,), (1,)), ((), ())),
                            preferred_element_type=f32) + 1e-15        # (1, VN)
    att = score / jnp.sum(score, axis=1, keepdims=True)                # (1, VN)

    # ------------- DCT of the attention-weighted sub-sequence window ------------------
    # DCT is linear, so weighting the windows first and transforming once is exact math.
    wsubT = att[:, 0:1] * srcT[:, 0:VL]
    for i in range(1, VN):
        wsubT = wsubT + att[:, i:i + 1] * srcT[:, i:i + VL]            # (POSE, VL)
    dct_att = mm(wsubT, dctT_ref[...])                                 # (POSE, N_DCT)

    # DCT of [last K frames, last frame repeated TARGET times]; the frame selection is
    # folded into the precomputed (SEED, N_DCT) matrix dctg.
    dct_in = mm(srcT, dctg_ref[...])                                   # (POSE, N_DCT)

    # ---------------- GCN: gc1 -> NUM_STAGE GC_Blocks -> gc7 + residual ---------------
    def gconv(z, w, a, b):
        return mm(a, mm(z, w)) + b

    # gc1 on the concatenated input [dct_in | dct_att] (split matmul == concat @ w1)
    support = mm(dct_in, w1a_ref[...]) + mm(dct_att, w1b_ref[...])     # (POSE, HIDDEN)
    y = mm(a1_ref[...], support) + b1_ref[...]
    y = jnp.tanh(y * s1s_ref[...] + s1t_ref[...])   # eval BatchNorm folded; dropout no-op

    for s in range(NUM_STAGE):                      # fully unrolled, static weight index
        z = gconv(y, wg1_ref[s], ag1_ref[s], bg1_ref[s])
        z = jnp.tanh(z * g1s_ref[s] + g1t_ref[s])
        z = gconv(z, wg2_ref[s], ag2_ref[s], bg2_ref[s])
        z = jnp.tanh(z * g2s_ref[s] + g2t_ref[s])
        y = y + z                                   # GC_Block residual

    # gc7 + global residual: only the first N_DCT output features feed the inverse DCT.
    out_coeff = gconv(y, w7a_ref[...], a7_ref[...], b7a_ref[...]) + dct_in   # (POSE, N_DCT)

    # inverse DCT of the predicted frames only (rows KERNEL_SIZE.. of idct_mat)
    preds = lax.dot_general(idctp_ref[...], out_coeff, (((1,), (1,)), ((), ())),
                            preferred_element_type=f32)                # (TARGET, POSE)
    out_ref[0] = preds.astype(out_ref.dtype)


# ------------------------------- wrapper ----------------------------------------------
def dct_att_gcn_forward(poses, params, dct_mat, idct_mat):
    """Eval-mode forward of DCT_ATT_GCN. poses: (B, T>=SEED_LEN, POSE)."""
    B = poses.shape[0]
    src = poses[:, :SEED_LEN, :]                        # (B, SEED, POSE)
    srcT = jnp.transpose(src, (0, 2, 1))                # (B, POSE, SEED)

    # constant DCT bases (built once in XLA, shared across batch)
    dctT = dct_mat[:N_DCT].T                            # (VL, N_DCT)
    idx = jnp.array(list(range(SEED_LEN - KERNEL_SIZE, SEED_LEN))
                    + [SEED_LEN - 1] * TARGET_LEN)      # (VL,) frame-selection indices
    sel = jax.nn.one_hot(idx, SEED_LEN, dtype=jnp.float32)   # (VL, SEED)
    dctg = sel.T @ dctT                                 # (SEED, N_DCT)
    idctp = idct_mat[KERNEL_SIZE:, :N_DCT]              # (TARGET, N_DCT)

    consts = [
        dctT, dctg, idctp,
        # conv weights rearranged tap-major + transposed: (k, Cin, Cout)
        jnp.transpose(params["wk1"], (2, 1, 0)), jnp.transpose(params["wk2"], (2, 1, 0)),
        jnp.transpose(params["wq1"], (2, 1, 0)), jnp.transpose(params["wq2"], (2, 1, 0)),
        # gc1 split so that [dct_in | dct_att] @ w1 needs no in-kernel concat
        params["w1"][:N_DCT], params["w1"][N_DCT:],
        params["a1"], params["b1"], params["s1s"], params["s1t"],
        params["wg1"], params["ag1"], params["bg1"], params["g1s"], params["g1t"],
        params["wg2"], params["ag2"], params["bg2"], params["g2s"], params["g2t"],
        # gc7: only the first N_DCT output columns are consumed downstream
        params["w7"][:, :N_DCT], params["a7"], params["b7"][:, :N_DCT],
    ]
    const_specs = [pl.BlockSpec(c.shape, lambda b, nd=c.ndim: (0,) * nd) for c in consts]

    preds = pl.pallas_call(
        _fused_kernel,
        out_shape=jax.ShapeDtypeStruct((B, TARGET_LEN, POSE), jnp.float32),
        grid=(B,),
        in_specs=[pl.BlockSpec((1, SEED_LEN, POSE), lambda b: (b, 0, 0)),
                  pl.BlockSpec((1, POSE, SEED_LEN), lambda b: (b, 0, 0))] + const_specs,
        out_specs=pl.BlockSpec((1, TARGET_LEN, POSE), lambda b: (b, 0, 0)),
        compiler_params=pltpu.CompilerParams(
            dimension_semantics=("parallel",),            # v7x: batch across both TCs
            vmem_limit_bytes=40 * 1024 * 1024),
    )(src, srcT, *consts)

    # TODO(synk): training-mode dropout / BatchNorm statistic updates are not modeled.
    return {"seed": src, "predictions": preds}


# ------------------------------- parameters / DCT --------------------------------------
def get_dct_matrix(n):
    k = jnp.arange(n, dtype=jnp.float32)[:, None]
    i = jnp.arange(n, dtype=jnp.float32)[None, :]
    w = jnp.where(k == 0, jnp.sqrt(1.0 / n), jnp.sqrt(2.0 / n))
    dct = w * jnp.cos(jnp.pi * (i + 0.5) * k / n)
    idct = jnp.linalg.inv(dct)
    return dct.astype(jnp.float32), idct.astype(jnp.float32)


def init_params(key):
    ks = jax.random.split(key, 16)

    def unif(k, shape, bound):
        return jax.random.uniform(k, shape, jnp.float32, -bound, bound)

    k_half = KERNEL_SIZE // 2
    fin = 2 * N_DCT
    p = {}
    # Conv1d weights (no bias), PyTorch default-style uniform init
    p["wk1"] = unif(ks[0], (HIDDEN, POSE, k_half + 1), 1.0 / (POSE * (k_half + 1)) ** 0.5)
    p["wk2"] = unif(ks[1], (HIDDEN, HIDDEN, k_half),   1.0 / (HIDDEN * k_half) ** 0.5)
    p["wq1"] = unif(ks[2], (HIDDEN, POSE, k_half + 1), 1.0 / (POSE * (k_half + 1)) ** 0.5)
    p["wq2"] = unif(ks[3], (HIDDEN, HIDDEN, k_half),   1.0 / (HIDDEN * k_half) ** 0.5)
    # GCN (LTD-style GraphConvolution weights, att adjacency, bias)
    std = 1.0 / HIDDEN ** 0.5
    p["w1"] = unif(ks[4], (fin, HIDDEN), std)
    p["a1"] = unif(ks[5], (POSE, POSE), std)
    p["b1"] = unif(ks[6], (1, HIDDEN), std)
    p["wg1"] = unif(ks[7],  (NUM_STAGE, HIDDEN, HIDDEN), std)
    p["ag1"] = unif(ks[8],  (NUM_STAGE, POSE, POSE), std)
    p["bg1"] = unif(ks[9],  (NUM_STAGE, 1, HIDDEN), std)
    p["wg2"] = unif(ks[10], (NUM_STAGE, HIDDEN, HIDDEN), std)
    p["ag2"] = unif(ks[11], (NUM_STAGE, POSE, POSE), std)
    p["bg2"] = unif(ks[12], (NUM_STAGE, 1, HIDDEN), std)
    std7 = 1.0 / fin ** 0.5
    p["w7"] = unif(ks[13], (HIDDEN, fin), std7)
    p["a7"] = unif(ks[14], (POSE, POSE), std7)
    p["b7"] = unif(ks[15], (1, fin), std7)
    # eval-mode BatchNorm1d folded to per-element scale/shift
    # (default init: gamma=1, beta=0, running_mean=0, running_var=1)
    bn_scale = 1.0 / (1.0 + 1e-5) ** 0.5
    p["s1s"] = jnp.full((POSE, HIDDEN), bn_scale, jnp.float32)
    p["s1t"] = jnp.zeros((POSE, HIDDEN), jnp.float32)
    p["g1s"] = jnp.full((NUM_STAGE, POSE, HIDDEN), bn_scale, jnp.float32)
    p["g1t"] = jnp.zeros((NUM_STAGE, POSE, HIDDEN), jnp.float32)
    p["g2s"] = jnp.full((NUM_STAGE, POSE, HIDDEN), bn_scale, jnp.float32)
    p["g2t"] = jnp.zeros((NUM_STAGE, POSE, HIDDEN), jnp.float32)
    return p


if __name__ == "__main__":
    key = jax.random.PRNGKey(0)
    k_data, k_param = jax.random.split(key)
    poses = jax.random.normal(k_data, (BATCH, SEED_LEN, POSE), jnp.float32)
    params = init_params(k_param)
    dct_mat, idct_mat = get_dct_matrix(VL)

    fwd = jax.jit(dct_att_gcn_forward)
    out = fwd(poses, params, dct_mat, idct_mat)
    preds = jax.block_until_ready(out["predictions"])
    assert preds.shape == (BATCH, TARGET_LEN, POSE)
    assert bool(jnp.all(jnp.isfinite(preds)))
    print("KERNEL_OK")
</pallas_src>

<mosaic_0001>
module attributes {stable_mosaic.version = 11 : i64} {
  func.func @_fused_kernel(%arg0: i32, %arg1: memref<1x20x16xf32, #tpu.memory_space<vmem>>, %arg2: memref<1x16x20xf32, #tpu.memory_space<vmem>>, %arg3: memref<12x12xf32, #tpu.memory_space<vmem>>, %arg4: memref<20x12xf32, #tpu.memory_space<vmem>>, %arg5: memref<8x12xf32, #tpu.memory_space<vmem>>, %arg6: memref<3x16x256xf32, #tpu.memory_space<vmem>>, %arg7: memref<2x256x256xf32, #tpu.memory_space<vmem>>, %arg8: memref<3x16x256xf32, #tpu.memory_space<vmem>>, %arg9: memref<2x256x256xf32, #tpu.memory_space<vmem>>, %arg10: memref<12x256xf32, #tpu.memory_space<vmem>>, %arg11: memref<12x256xf32, #tpu.memory_space<vmem>>, %arg12: memref<16x16xf32, #tpu.memory_space<vmem>>, %arg13: memref<1x256xf32, #tpu.memory_space<vmem>>, %arg14: memref<16x256xf32, #tpu.memory_space<vmem>>, %arg15: memref<16x256xf32, #tpu.memory_space<vmem>>, %arg16: memref<12x256x256xf32, #tpu.memory_space<vmem>>, %arg17: memref<12x16x16xf32, #tpu.memory_space<vmem>>, %arg18: memref<12x1x256xf32, #tpu.memory_space<vmem>>, %arg19: memref<12x16x256xf32, #tpu.memory_space<vmem>>, %arg20: memref<12x16x256xf32, #tpu.memory_space<vmem>>, %arg21: memref<12x256x256xf32, #tpu.memory_space<vmem>>, %arg22: memref<12x16x16xf32, #tpu.memory_space<vmem>>, %arg23: memref<12x1x256xf32, #tpu.memory_space<vmem>>, %arg24: memref<12x16x256xf32, #tpu.memory_space<vmem>>, %arg25: memref<12x16x256xf32, #tpu.memory_space<vmem>>, %arg26: memref<256x12xf32, #tpu.memory_space<vmem>>, %arg27: memref<16x16xf32, #tpu.memory_space<vmem>>, %arg28: memref<1x12xf32, #tpu.memory_space<vmem>>, %arg29: memref<1x8x16xf32, #tpu.memory_space<vmem>>) attributes {dimension_semantics = [#tpu.dimension_semantics<parallel>], iteration_bounds = array<i64: 2>, scalar_prefetch = 0 : i64, scratch_operands = 0 : i64, tpu.core_type = #tpu.core_type<tc>, window_params = [{transform_indices = @transform_0, window_bounds = array<i64: 1, 20, 16>}, {transform_indices = @transform_1, window_bounds = array<i64: 1, 16, 20>}, {pipeline_mode = #tpu.pipeline_mode<synchronous>, transform_indices = @transform_2, window_bounds = array<i64: 12, 12>}, {pipeline_mode = #tpu.pipeline_mode<synchronous>, transform_indices = @transform_3, window_bounds = array<i64: 20, 12>}, {pipeline_mode = #tpu.pipeline_mode<synchronous>, transform_indices = @transform_4, window_bounds = array<i64: 8, 12>}, {pipeline_mode = #tpu.pipeline_mode<synchronous>, transform_indices = @transform_5, window_bounds = array<i64: 3, 16, 256>}, {pipeline_mode = #tpu.pipeline_mode<synchronous>, transform_indices = @transform_6, window_bounds = array<i64: 2, 256, 256>}, {pipeline_mode = #tpu.pipeline_mode<synchronous>, transform_indices = @transform_7, window_bounds = array<i64: 3, 16, 256>}, {pipeline_mode = #tpu.pipeline_mode<synchronous>, transform_indices = @transform_8, window_bounds = array<i64: 2, 256, 256>}, {pipeline_mode = #tpu.pipeline_mode<synchronous>, transform_indices = @transform_9, window_bounds = array<i64: 12, 256>}, {pipeline_mode = #tpu.pipeline_mode<synchronous>, transform_indices = @transform_10, window_bounds = array<i64: 12, 256>}, {pipeline_mode = #tpu.pipeline_mode<synchronous>, transform_indices = @transform_11, window_bounds = array<i64: 16, 16>}, {pipeline_mode = #tpu.pipeline_mode<synchronous>, transform_indices = @transform_12, window_bounds = array<i64: 1, 256>}, {pipeline_mode = #tpu.pipeline_mode<synchronous>, transform_indices = @transform_13, window_bounds = array<i64: 16, 256>}, {pipeline_mode = #tpu.pipeline_mode<synchronous>, transform_indices = @transform_14, window_bounds = array<i64: 16, 256>}, {pipeline_mode = #tpu.pipeline_mode<synchronous>, transform_indices = @transform_15, window_bounds = array<i64: 12, 256, 256>}, {pipeline_mode = #tpu.pipeline_mode<synchronous>, transform_indices = @transform_16, window_bounds = array<i64: 12, 16, 16>}, {pipeline_mode = #tpu.pipeline_mode<synchronous>, transform_indices = @transform_17, window_bounds = array<i64: 12, 1, 256>}, {pipeline_mode = #tpu.pipeline_mode<synchronous>, transform_indices = @transform_18, window_bounds = array<i64: 12, 16, 256>}, {pipeline_mode = #tpu.pipeline_mode<synchronous>, transform_indices = @transform_19, window_bounds = array<i64: 12, 16, 256>}, {pipeline_mode = #tpu.pipeline_mode<synchronous>, transform_indices = @transform_20, window_bounds = array<i64: 12, 256, 256>}, {pipeline_mode = #tpu.pipeline_mode<synchronous>, transform_indices = @transform_21, window_bounds = array<i64: 12, 16, 16>}, {pipeline_mode = #tpu.pipeline_mode<synchronous>, transform_indices = @transform_22, window_bounds = array<i64: 12, 1, 256>}, {pipeline_mode = #tpu.pipeline_mode<synchronous>, transform_indices = @transform_23, window_bounds = array<i64: 12, 16, 256>}, {pipeline_mode = #tpu.pipeline_mode<synchronous>, transform_indices = @transform_24, window_bounds = array<i64: 12, 16, 256>}, {pipeline_mode = #tpu.pipeline_mode<synchronous>, transform_indices = @transform_25, window_bounds = array<i64: 256, 12>}, {pipeline_mode = #tpu.pipeline_mode<synchronous>, transform_indices = @transform_26, window_bounds = array<i64: 16, 16>}, {pipeline_mode = #tpu.pipeline_mode<synchronous>, transform_indices = @transform_27, window_bounds = array<i64: 1, 12>}, {transform_indices = @transform_28, window_bounds = array<i64: 1, 8, 16>}]} {
    %c0 = arith.constant 0 : index
    %c0_0 = arith.constant 0 : index
    %c0_1 = arith.constant 0 : index
    %0 = vector.load %arg1[%c0, %c0_0, %c0_1] : memref<1x20x16xf32, #tpu.memory_space<vmem>>, vector<1x20x16xf32>
    %1 = vector.shape_cast %0 : vector<1x20x16xf32> to vector<20x16xf32>
    %c0_2 = arith.constant 0 : index
    %c0_3 = arith.constant 0 : index
    %c0_4 = arith.constant 0 : index
    %2 = vector.load %arg2[%c0_2, %c0_3, %c0_4] : memref<1x16x20xf32, #tpu.memory_space<vmem>>, vector<1x16x20xf32>
    %3 = vector.shape_cast %2 : vector<1x16x20xf32> to vector<16x20xf32>
    %4 = vector.extract_strided_slice %1 {offsets = [0, 0], sizes = [12, 16], strides = [1, 1]} : vector<20x16xf32> to vector<12x16xf32>
    %5 = vector.extract_strided_slice %4 {offsets = [0, 0], sizes = [10, 16], strides = [1, 1]} : vector<12x16xf32> to vector<10x16xf32>
    %c0_5 = arith.constant 0 : index
    %c0_6 = arith.constant 0 : index
    %c0_7 = arith.constant 0 : index
    %6 = vector.load %arg6[%c0_5, %c0_6, %c0_7] : memref<3x16x256xf32, #tpu.memory_space<vmem>>, vector<1x16x256xf32>
    %7 = vector.shape_cast %6 : vector<1x16x256xf32> to vector<16x256xf32>
    %cst = arith.constant dense<0.000000e+00> : vector<10x256xf32>
    %8 = tpu.matmul %5, %7, %cst {dimension_numbers = #tpu.dot_dimension_numbers<[1], [0], [0], [1], [0, 0, 1, 1], [], []>} : vector<10x16xf32>, vector<16x256xf32>, vector<10x256xf32> -> vector<10x256xf32>
    %9 = vector.extract_strided_slice %4 {offsets = [1, 0], sizes = [10, 16], strides = [1, 1]} : vector<12x16xf32> to vector<10x16xf32>
    %c1 = arith.constant 1 : index
    %c0_8 = arith.constant 0 : index
    %c0_9 = arith.constant 0 : index
    %10 = vector.load %arg6[%c1, %c0_8, %c0_9] : memref<3x16x256xf32, #tpu.memory_space<vmem>>, vector<1x16x256xf32>
    %11 = vector.shape_cast %10 : vector<1x16x256xf32> to vector<16x256xf32>
    %cst_10 = arith.constant dense<0.000000e+00> : vector<10x256xf32>
    %12 = tpu.matmul %9, %11, %cst_10 {dimension_numbers = #tpu.dot_dimension_numbers<[1], [0], [0], [1], [0, 0, 1, 1], [], []>} : vector<10x16xf32>, vector<16x256xf32>, vector<10x256xf32> -> vector<10x256xf32>
    %13 = arith.addf %8, %12 : vector<10x256xf32>
    %14 = vector.extract_strided_slice %4 {offsets = [2, 0], sizes = [10, 16], strides = [1, 1]} : vector<12x16xf32> to vector<10x16xf32>
    %c2 = arith.constant 2 : index
    %c0_11 = arith.constant 0 : index
    %c0_12 = arith.constant 0 : index
    %15 = vector.load %arg6[%c2, %c0_11, %c0_12] : memref<3x16x256xf32, #tpu.memory_space<vmem>>, vector<1x16x256xf32>
    %16 = vector.shape_cast %15 : vector<1x16x256xf32> to vector<16x256xf32>
    %cst_13 = arith.constant dense<0.000000e+00> : vector<10x256xf32>
    %17 = tpu.matmul %14, %16, %cst_13 {dimension_numbers = #tpu.dot_dimension_numbers<[1], [0], [0], [1], [0, 0, 1, 1], [], []>} : vector<10x16xf32>, vector<16x256xf32>, vector<10x256xf32> -> vector<10x256xf32>
    %18 = arith.addf %13, %17 : vector<10x256xf32>
    %cst_14 = arith.constant 0.000000e+00 : f32
    %19 = vector.broadcast %cst_14 : f32 to vector<10x256xf32>
    %20 = arith.maximumf %18, %19 : vector<10x256xf32>
    %21 = vector.extract_strided_slice %20 {offsets = [0, 0], sizes = [9, 256], strides = [1, 1]} : vector<10x256xf32> to vector<9x256xf32>
    %c0_15 = arith.constant 0 : index
    %c0_16 = arith.constant 0 : index
    %c0_17 = arith.constant 0 : index
    %22 = vector.load %arg7[%c0_15, %c0_16, %c0_17] : memref<2x256x256xf32, #tpu.memory_space<vmem>>, vector<1x256x256xf32>
    %23 = vector.shape_cast %22 : vector<1x256x256xf32> to vector<256x256xf32>
    %cst_18 = arith.constant dense<0.000000e+00> : vector<9x256xf32>
    %24 = tpu.matmul %21, %23, %cst_18 {dimension_numbers = #tpu.dot_dimension_numbers<[1], [0], [0], [1], [0, 0, 1, 1], [], []>} : vector<9x256xf32>, vector<256x256xf32>, vector<9x256xf32> -> vector<9x256xf32>
    %25 = vector.extract_strided_slice %20 {offsets = [1, 0], sizes = [9, 256], strides = [1, 1]} : vector<10x256xf32> to vector<9x256xf32>
    %c1_19 = arith.constant 1 : index
    %c0_20 = arith.constant 0 : index
    %c0_21 = arith.constant 0 : index
    %26 = vector.load %arg7[%c1_19, %c0_20, %c0_21] : memref<2x256x256xf32, #tpu.memory_space<vmem>>, vector<1x256x256xf32>
    %27 = vector.shape_cast %26 : vector<1x256x256xf32> to vector<256x256xf32>
    %cst_22 = arith.constant dense<0.000000e+00> : vector<9x256xf32>
    %28 = tpu.matmul %25, %27, %cst_22 {dimension_numbers = #tpu.dot_dimension_numbers<[1], [0], [0], [1], [0, 0, 1, 1], [], []>} : vector<9x256xf32>, vector<256x256xf32>, vector<9x256xf32> -> vector<9x256xf32>
    %29 = arith.addf %24, %28 : vector<9x256xf32>
    %cst_23 = arith.constant 0.000000e+00 : f32
    %30 = vector.broadcast %cst_23 : f32 to vector<9x256xf32>
    %31 = arith.maximumf %29, %30 : vector<9x256xf32>
    %32 = vector.extract_strided_slice %1 {offsets = [16, 0], sizes = [4, 16], strides = [1, 1]} : vector<20x16xf32> to vector<4x16xf32>
    %33 = vector.extract_strided_slice %32 {offsets = [0, 0], sizes = [2, 16], strides = [1, 1]} : vector<4x16xf32> to vector<2x16xf32>
    %c0_24 = arith.constant 0 : index
    %c0_25 = arith.constant 0 : index
    %c0_26 = arith.constant 0 : index
    %34 = vector.load %arg8[%c0_24, %c0_25, %c0_26] : memref<3x16x256xf32, #tpu.memory_space<vmem>>, vector<1x16x256xf32>
    %35 = vector.shape_cast %34 : vector<1x16x256xf32> to vector<16x256xf32>
    %cst_27 = arith.constant dense<0.000000e+00> : vector<2x256xf32>
    %36 = tpu.matmul %33, %35, %cst_27 {dimension_numbers = #tpu.dot_dimension_numbers<[1], [0], [0], [1], [0, 0, 1, 1], [], []>} : vector<2x16xf32>, vector<16x256xf32>, vector<2x256xf32> -> vector<2x256xf32>
    %37 = vector.extract_strided_slice %32 {offsets = [1, 0], sizes = [2, 16], strides = [1, 1]} : vector<4x16xf32> to vector<2x16xf32>
    %c1_28 = arith.constant 1 : index
    %c0_29 = arith.constant 0 : index
    %c0_30 = arith.constant 0 : index
    %38 = vector.load %arg8[%c1_28, %c0_29, %c0_30] : memref<3x16x256xf32, #tpu.memory_space<vmem>>, vector<1x16x256xf32>
    %39 = vector.shape_cast %38 : vector<1x16x256xf32> to vector<16x256xf32>
    %cst_31 = arith.constant dense<0.000000e+00> : vector<2x256xf32>
    %40 = tpu.matmul %37, %39, %cst_31 {dimension_numbers = #tpu.dot_dimension_numbers<[1], [0], [0], [1], [0, 0, 1, 1], [], []>} : vector<2x16xf32>, vector<16x256xf32>, vector<2x256xf32> -> vector<2x256xf32>
    %41 = arith.addf %36, %40 : vector<2x256xf32>
    %42 = vector.extract_strided_slice %32 {offsets = [2, 0], sizes = [2, 16], strides = [1, 1]} : vector<4x16xf32> to vector<2x16xf32>
    %c2_32 = arith.constant 2 : index
    %c0_33 = arith.constant 0 : index
    %c0_34 = arith.constant 0 : index
    %43 = vector.load %arg8[%c2_32, %c0_33, %c0_34] : memref<3x16x256xf32, #tpu.memory_space<vmem>>, vector<1x16x256xf32>
    %44 = vector.shape_cast %43 : vector<1x16x256xf32> to vector<16x256xf32>
    %cst_35 = arith.constant dense<0.000000e+00> : vector<2x256xf32>
    %45 = tpu.matmul %42, %44, %cst_35 {dimension_numbers = #tpu.dot_dimension_numbers<[1], [0], [0], [1], [0, 0, 1, 1], [], []>} : vector<2x16xf32>, vector<16x256xf32>, vector<2x256xf32> -> vector<2x256xf32>
    %46 = arith.addf %41, %45 : vector<2x256xf32>
    %cst_36 = arith.constant 0.000000e+00 : f32
    %47 = vector.broadcast %cst_36 : f32 to vector<2x256xf32>
    %48 = arith.maximumf %46, %47 : vector<2x256xf32>
    %49 = vector.extract_strided_slice %48 {offsets = [0, 0], sizes = [1, 256], strides = [1, 1]} : vector<2x256xf32> to vector<1x256xf32>
    %c0_37 = arith.constant 0 : index
    %c0_38 = arith.constant 0 : index
    %c0_39 = arith.constant 0 : index
    %50 = vector.load %arg9[%c0_37, %c0_38, %c0_39] : memref<2x256x256xf32, #tpu.memory_space<vmem>>, vector<1x256x256xf32>
    %51 = vector.shape_cast %50 : vector<1x256x256xf32> to vector<256x256xf32>
    %cst_40 = arith.constant dense<0.000000e+00> : vector<1x256xf32>
    %52 = tpu.matmul %49, %51, %cst_40 {dimension_numbers = #tpu.dot_dimension_numbers<[1], [0], [0], [1], [0, 0, 1, 1], [], []>} : vector<1x256xf32>, vector<256x256xf32>, vector<1x256xf32> -> vector<1x256xf32>
    %53 = vector.extract_strided_slice %48 {offsets = [1, 0], sizes = [1, 256], strides = [1, 1]} : vector<2x256xf32> to vector<1x256xf32>
    %c1_41 = arith.constant 1 : index
    %c0_42 = arith.constant 0 : index
    %c0_43 = arith.constant 0 : index
    %54 = vector.load %arg9[%c1_41, %c0_42, %c0_43] : memref<2x256x256xf32, #tpu.memory_space<vmem>>, vector<1x256x256xf32>
    %55 = vector.shape_cast %54 : vector<1x256x256xf32> to vector<256x256xf32>
    %cst_44 = arith.constant dense<0.000000e+00> : vector<1x256xf32>
    %56 = tpu.matmul %53, %55, %cst_44 {dimension_numbers = #tpu.dot_dimension_numbers<[1], [0], [0], [1], [0, 0, 1, 1], [], []>} : vector<1x256xf32>, vector<256x256xf32>, vector<1x256xf32> -> vector<1x256xf32>
    %57 = arith.addf %52, %56 : vector<1x256xf32>
    %cst_45 = arith.constant 0.000000e+00 : f32
    %58 = vector.broadcast %cst_45 : f32 to vector<1x256xf32>
    %59 = arith.maximumf %57, %58 : vector<1x256xf32>
    %cst_46 = arith.constant dense<0.000000e+00> : vector<1x9xf32>
    %60 = tpu.matmul %59, %31, %cst_46 {dimension_numbers = #tpu.dot_dimension_numbers<[1], [1], [0], [0], [0, 0, 1, 0], [], []>} : vector<1x256xf32>, vector<9x256xf32>, vector<1x9xf32> -> vector<1x9xf32>
    %cst_47 = arith.constant 1.000000e-15 : f32
    %61 = vector.broadcast %cst_47 : f32 to vector<1x9xf32>
    %62 = arith.addf %60, %61 : vector<1x9xf32>
    %cst_48 = arith.constant dense<0.000000e+00> : vector<1xf32>
    %63 = vector.multi_reduction <add>, %62, %cst_48 [1] : vector<1x9xf32> to vector<1xf32>
    %64 = vector.shape_cast %63 : vector<1xf32> to vector<1x1xf32>
    %65 = vector.broadcast %64 : vector<1x1xf32> to vector<1x9xf32>
    %66 = arith.divf %62, %65 : vector<1x9xf32>
    %67 = vector.extract_strided_slice %66 {offsets = [0, 0], sizes = [1, 1], strides = [1, 1]} : vector<1x9xf32> to vector<1x1xf32>
    %68 = vector.extract_strided_slice %3 {offsets = [0, 0], sizes = [16, 12], strides = [1, 1]} : vector<16x20xf32> to vector<16x12xf32>
    %69 = vector.broadcast %67 : vector<1x1xf32> to vector<16x12xf32>
    %70 = arith.mulf %69, %68 : vector<16x12xf32>
    %71 = vector.extract_strided_slice %66 {offsets = [0, 1], sizes = [1, 1], strides = [1, 1]} : vector<1x9xf32> to vector<1x1xf32>
    %72 = vector.extract_strided_slice %3 {offsets = [0, 1], sizes = [16, 12], strides = [1, 1]} : vector<16x20xf32> to vector<16x12xf32>
    %73 = vector.broadcast %71 : vector<1x1xf32> to vector<16x12xf32>
    %74 = arith.mulf %73, %72 : vector<16x12xf32>
    %75 = arith.addf %70, %74 : vector<16x12xf32>
    %76 = vector.extract_strided_slice %66 {offsets = [0, 2], sizes = [1, 1], strides = [1, 1]} : vector<1x9xf32> to vector<1x1xf32>
    %77 = vector.extract_strided_slice %3 {offsets = [0, 2], sizes = [16, 12], strides = [1, 1]} : vector<16x20xf32> to vector<16x12xf32>
    %78 = vector.broadcast %76 : vector<1x1xf32> to vector<16x12xf32>
    %79 = arith.mulf %78, %77 : vector<16x12xf32>
    %80 = arith.addf %75, %79 : vector<16x12xf32>
    %81 = vector.extract_strided_slice %66 {offsets = [0, 3], sizes = [1, 1], strides = [1, 1]} : vector<1x9xf32> to vector<1x1xf32>
    %82 = vector.extract_strided_slice %3 {offsets = [0, 3], sizes = [16, 12], strides = [1, 1]} : vector<16x20xf32> to vector<16x12xf32>
    %83 = vector.broadcast %81 : vector<1x1xf32> to vector<16x12xf32>
    %84 = arith.mulf %83, %82 : vector<16x12xf32>
    %85 = arith.addf %80, %84 : vector<16x12xf32>
    %86 = vector.extract_strided_slice %66 {offsets = [0, 4], sizes = [1, 1], strides = [1, 1]} : vector<1x9xf32> to vector<1x1xf32>
    %87 = vector.extract_strided_slice %3 {offsets = [0, 4], sizes = [16, 12], strides = [1, 1]} : vector<16x20xf32> to vector<16x12xf32>
    %88 = vector.broadcast %86 : vector<1x1xf32> to vector<16x12xf32>
    %89 = arith.mulf %88, %87 : vector<16x12xf32>
    %90 = arith.addf %85, %89 : vector<16x12xf32>
    %91 = vector.extract_strided_slice %66 {offsets = [0, 5], sizes = [1, 1], strides = [1, 1]} : vector<1x9xf32> to vector<1x1xf32>
    %92 = vector.extract_strided_slice %3 {offsets = [0, 5], sizes = [16, 12], strides = [1, 1]} : vector<16x20xf32> to vector<16x12xf32>
    %93 = vector.broadcast %91 : vector<1x1xf32> to vector<16x12xf32>
    %94 = arith.mulf %93, %92 : vector<16x12xf32>
    %95 = arith.addf %90, %94 : vector<16x12xf32>
    %96 = vector.extract_strided_slice %66 {offsets = [0, 6], sizes = [1, 1], strides = [1, 1]} : vector<1x9xf32> to vector<1x1xf32>
    %97 = vector.extract_strided_slice %3 {offsets = [0, 6], sizes = [16, 12], strides = [1, 1]} : vector<16x20xf32> to vector<16x12xf32>
    %98 = vector.broadcast %96 : vector<1x1xf32> to vector<16x12xf32>
    %99 = arith.mulf %98, %97 : vector<16x12xf32>
    %100 = arith.addf %95, %99 : vector<16x12xf32>
    %101 = vector.extract_strided_slice %66 {offsets = [0, 7], sizes = [1, 1], strides = [1, 1]} : vector<1x9xf32> to vector<1x1xf32>
    %102 = vector.extract_strided_slice %3 {offsets = [0, 7], sizes = [16, 12], strides = [1, 1]} : vector<16x20xf32> to vector<16x12xf32>
    %103 = vector.broadcast %101 : vector<1x1xf32> to vector<16x12xf32>
    %104 = arith.mulf %103, %102 : vector<16x12xf32>
    %105 = arith.addf %100, %104 : vector<16x12xf32>
    %106 = vector.extract_strided_slice %66 {offsets = [0, 8], sizes = [1, 1], strides = [1, 1]} : vector<1x9xf32> to vector<1x1xf32>
    %107 = vector.extract_strided_slice %3 {offsets = [0, 8], sizes = [16, 12], strides = [1, 1]} : vector<16x20xf32> to vector<16x12xf32>
    %108 = vector.broadcast %106 : vector<1x1xf32> to vector<16x12xf32>
    %109 = arith.mulf %108, %107 : vector<16x12xf32>
    %110 = arith.addf %105, %109 : vector<16x12xf32>
    %c0_49 = arith.constant 0 : index
    %c0_50 = arith.constant 0 : index
    %111 = vector.load %arg3[%c0_49, %c0_50] : memref<12x12xf32, #tpu.memory_space<vmem>>, vector<12x12xf32>
    %cst_51 = arith.constant dense<0.000000e+00> : vector<16x12xf32>
    %112 = tpu.matmul %110, %111, %cst_51 {dimension_numbers = #tpu.dot_dimension_numbers<[1], [0], [0], [1], [0, 0, 1, 1], [], []>} : vector<16x12xf32>, vector<12x12xf32>, vector<16x12xf32> -> vector<16x12xf32>
    %c0_52 = arith.constant 0 : index
    %c0_53 = arith.constant 0 : index
    %113 = vector.load %arg4[%c0_52, %c0_53] : memref<20x12xf32, #tpu.memory_space<vmem>>, vector<20x12xf32>
    %cst_54 = arith.constant dense<0.000000e+00> : vector<16x12xf32>
    %114 = tpu.matmul %3, %113, %cst_54 {dimension_numbers = #tpu.dot_dimension_numbers<[1], [0], [0], [1], [0, 0, 1, 1], [], []>} : vector<16x20xf32>, vector<20x12xf32>, vector<16x12xf32> -> vector<16x12xf32>
    %c0_55 = arith.constant 0 : index
    %c0_56 = arith.constant 0 : index
    %115 = vector.load %arg10[%c0_55, %c0_56] : memref<12x256xf32, #tpu.memory_space<vmem>>, vector<12x256xf32>
    %cst_57 = arith.constant dense<0.000000e+00> : vector<16x256xf32>
    %116 = tpu.matmul %114, %115, %cst_57 {dimension_numbers = #tpu.dot_dimension_numbers<[1], [0], [0], [1], [0, 0, 1, 1], [], []>} : vector<16x12xf32>, vector<12x256xf32>, vector<16x256xf32> -> vector<16x256xf32>
    %c0_58 = arith.constant 0 : index
    %c0_59 = arith.constant 0 : index
    %117 = vector.load %arg11[%c0_58, %c0_59] : memref<12x256xf32, #tpu.memory_space<vmem>>, vector<12x256xf32>
    %cst_60 = arith.constant dense<0.000000e+00> : vector<16x256xf32>
    %118 = tpu.matmul %112, %117, %cst_60 {dimension_numbers = #tpu.dot_dimension_numbers<[1], [0], [0], [1], [0, 0, 1, 1], [], []>} : vector<16x12xf32>, vector<12x256xf32>, vector<16x256xf32> -> vector<16x256xf32>
    %119 = arith.addf %116, %118 : vector<16x256xf32>
    %c0_61 = arith.constant 0 : index
    %c0_62 = arith.constant 0 : index
    %120 = vector.load %arg12[%c0_61, %c0_62] : memref<16x16xf32, #tpu.memory_space<vmem>>, vector<16x16xf32>
    %cst_63 = arith.constant dense<0.000000e+00> : vector<16x256xf32>
    %121 = tpu.matmul %120, %119, %cst_63 {dimension_numbers = #tpu.dot_dimension_numbers<[1], [0], [0], [1], [0, 0, 1, 1], [], []>} : vector<16x16xf32>, vector<16x256xf32>, vector<16x256xf32> -> vector<16x256xf32>
    %c0_64 = arith.constant 0 : index
    %c0_65 = arith.constant 0 : index
    %122 = vector.load %arg13[%c0_64, %c0_65] : memref<1x256xf32, #tpu.memory_space<vmem>>, vector<1x256xf32>
    %123 = vector.broadcast %122 : vector<1x256xf32> to vector<16x256xf32>
    %124 = arith.addf %121, %123 : vector<16x256xf32>
    %c0_66 = arith.constant 0 : index
    %c0_67 = arith.constant 0 : index
    %125 = vector.load %arg14[%c0_66, %c0_67] : memref<16x256xf32, #tpu.memory_space<vmem>>, vector<16x256xf32>
    %126 = arith.mulf %124, %125 : vector<16x256xf32>
    %c0_68 = arith.constant 0 : index
    %c0_69 = arith.constant 0 : index
    %127 = vector.load %arg15[%c0_68, %c0_69] : memref<16x256xf32, #tpu.memory_space<vmem>>, vector<16x256xf32>
    %128 = arith.addf %126, %127 : vector<16x256xf32>
    %129 = math.tanh %128 : vector<16x256xf32>
    %c0_70 = arith.constant 0 : index
    %c0_71 = arith.constant 0 : index
    %c0_72 = arith.constant 0 : index
    %130 = vector.load %arg16[%c0_70, %c0_71, %c0_72] : memref<12x256x256xf32, #tpu.memory_space<vmem>>, vector<1x256x256xf32>
    %131 = vector.shape_cast %130 : vector<1x256x256xf32> to vector<256x256xf32>
    %c0_73 = arith.constant 0 : index
    %c0_74 = arith.constant 0 : index
    %c0_75 = arith.constant 0 : index
    %132 = vector.load %arg17[%c0_73, %c0_74, %c0_75] : memref<12x16x16xf32, #tpu.memory_space<vmem>>, vector<1x16x16xf32>
    %133 = vector.shape_cast %132 : vector<1x16x16xf32> to vector<16x16xf32>
    %c0_76 = arith.constant 0 : index
    %c0_77 = arith.constant 0 : index
    %c0_78 = arith.constant 0 : index
    %134 = vector.load %arg18[%c0_76, %c0_77, %c0_78] : memref<12x1x256xf32, #tpu.memory_space<vmem>>, vector<1x1x256xf32>
    %135 = vector.shape_cast %134 : vector<1x1x256xf32> to vector<1x256xf32>
    %cst_79 = arith.constant dense<0.000000e+00> : vector<16x256xf32>
    %136 = tpu.matmul %129, %131, %cst_79 {dimension_numbers = #tpu.dot_dimension_numbers<[1], [0], [0], [1], [0, 0, 1, 1], [], []>} : vector<16x256xf32>, vector<256x256xf32>, vector<16x256xf32> -> vector<16x256xf32>
    %cst_80 = arith.constant dense<0.000000e+00> : vector<16x256xf32>
    %137 = tpu.matmul %133, %136, %cst_80 {dimension_numbers = #tpu.dot_dimension_numbers<[1], [0], [0], [1], [0, 0, 1, 1], [], []>} : vector<16x16xf32>, vector<16x256xf32>, vector<16x256xf32> -> vector<16x256xf32>
    %138 = vector.broadcast %135 : vector<1x256xf32> to vector<16x256xf32>
    %139 = arith.addf %137, %138 : vector<16x256xf32>
    %c0_81 = arith.constant 0 : index
    %c0_82 = arith.constant 0 : index
    %c0_83 = arith.constant 0 : index
    %140 = vector.load %arg19[%c0_81, %c0_82, %c0_83] : memref<12x16x256xf32, #tpu.memory_space<vmem>>, vector<1x16x256xf32>
    %141 = vector.shape_cast %140 : vector<1x16x256xf32> to vector<16x256xf32>
    %142 = arith.mulf %139, %141 : vector<16x256xf32>
    %c0_84 = arith.constant 0 : index
    %c0_85 = arith.constant 0 : index
    %c0_86 = arith.constant 0 : index
    %143 = vector.load %arg20[%c0_84, %c0_85, %c0_86] : memref<12x16x256xf32, #tpu.memory_space<vmem>>, vector<1x16x256xf32>
    %144 = vector.shape_cast %143 : vector<1x16x256xf32> to vector<16x256xf32>
    %145 = arith.addf %142, %144 : vector<16x256xf32>
    %146 = math.tanh %145 : vector<16x256xf32>
    %c0_87 = arith.constant 0 : index
    %c0_88 = arith.constant 0 : index
    %c0_89 = arith.constant 0 : index
    %147 = vector.load %arg21[%c0_87, %c0_88, %c0_89] : memref<12x256x256xf32, #tpu.memory_space<vmem>>, vector<1x256x256xf32>
    %148 = vector.shape_cast %147 : vector<1x256x256xf32> to vector<256x256xf32>
    %c0_90 = arith.constant 0 : index
    %c0_91 = arith.constant 0 : index
    %c0_92 = arith.constant 0 : index
    %149 = vector.load %arg22[%c0_90, %c0_91, %c0_92] : memref<12x16x16xf32, #tpu.memory_space<vmem>>, vector<1x16x16xf32>
    %150 = vector.shape_cast %149 : vector<1x16x16xf32> to vector<16x16xf32>
    %c0_93 = arith.constant 0 : index
    %c0_94 = arith.constant 0 : index
    %c0_95 = arith.constant 0 : index
    %151 = vector.load %arg23[%c0_93, %c0_94, %c0_95] : memref<12x1x256xf32, #tpu.memory_space<vmem>>, vector<1x1x256xf32>
    %152 = vector.shape_cast %151 : vector<1x1x256xf32> to vector<1x256xf32>
    %cst_96 = arith.constant dense<0.000000e+00> : vector<16x256xf32>
    %153 = tpu.matmul %146, %148, %cst_96 {dimension_numbers = #tpu.dot_dimension_numbers<[1], [0], [0], [1], [0, 0, 1, 1], [], []>} : vector<16x256xf32>, vector<256x256xf32>, vector<16x256xf32> -> vector<16x256xf32>
    %cst_97 = arith.constant dense<0.000000e+00> : vector<16x256xf32>
    %154 = tpu.matmul %150, %153, %cst_97 {dimension_numbers = #tpu.dot_dimension_numbers<[1], [0], [0], [1], [0, 0, 1, 1], [], []>} : vector<16x16xf32>, vector<16x256xf32>, vector<16x256xf32> -> vector<16x256xf32>
    %155 = vector.broadcast %152 : vector<1x256xf32> to vector<16x256xf32>
    %156 = arith.addf %154, %155 : vector<16x256xf32>
    %c0_98 = arith.constant 0 : index
    %c0_99 = arith.constant 0 : index
    %c0_100 = arith.constant 0 : index
    %157 = vector.load %arg24[%c0_98, %c0_99, %c0_100] : memref<12x16x256xf32, #tpu.memory_space<vmem>>, vector<1x16x256xf32>
    %158 = vector.shape_cast %157 : vector<1x16x256xf32> to vector<16x256xf32>
    %159 = arith.mulf %156, %158 : vector<16x256xf32>
    %c0_101 = arith.constant 0 : index
    %c0_102 = arith.constant 0 : index
    %c0_103 = arith.constant 0 : index
    %160 = vector.load %arg25[%c0_101, %c0_102, %c0_103] : memref<12x16x256xf32, #tpu.memory_space<vmem>>, vector<1x16x256xf32>
    %161 = vector.shape_cast %160 : vector<1x16x256xf32> to vector<16x256xf32>
    %162 = arith.addf %159, %161 : vector<16x256xf32>
    %163 = math.tanh %162 : vector<16x256xf32>
    %164 = arith.addf %129, %163 : vector<16x256xf32>
    %c1_104 = arith.constant 1 : index
    %c0_105 = arith.constant 0 : index
    %c0_106 = arith.constant 0 : index
    %165 = vector.load %arg16[%c1_104, %c0_105, %c0_106] : memref<12x256x256xf32, #tpu.memory_space<vmem>>, vector<1x256x256xf32>
    %166 = vector.shape_cast %165 : vector<1x256x256xf32> to vector<256x256xf32>
    %c1_107 = arith.constant 1 : index
    %c0_108 = arith.constant 0 : index
    %c0_109 = arith.constant 0 : index
    %167 = vector.load %arg17[%c1_107, %c0_108, %c0_109] : memref<12x16x16xf32, #tpu.memory_space<vmem>>, vector<1x16x16xf32>
    %168 = vector.shape_cast %167 : vector<1x16x16xf32> to vector<16x16xf32>
    %c1_110 = arith.constant 1 : index
    %c0_111 = arith.constant 0 : index
    %c0_112 = arith.constant 0 : index
    %169 = vector.load %arg18[%c1_110, %c0_111, %c0_112] : memref<12x1x256xf32, #tpu.memory_space<vmem>>, vector<1x1x256xf32>
    %170 = vector.shape_cast %169 : vector<1x1x256xf32> to vector<1x256xf32>
    %cst_113 = arith.constant dense<0.000000e+00> : vector<16x256xf32>
    %171 = tpu.matmul %164, %166, %cst_113 {dimension_numbers = #tpu.dot_dimension_numbers<[1], [0], [0], [1], [0, 0, 1, 1], [], []>} : vector<16x256xf32>, vector<256x256xf32>, vector<16x256xf32> -> vector<16x256xf32>
    %cst_114 = arith.constant dense<0.000000e+00> : vector<16x256xf32>
    %172 = tpu.matmul %168, %171, %cst_114 {dimension_numbers = #tpu.dot_dimension_numbers<[1], [0], [0], [1], [0, 0, 1, 1], [], []>} : vector<16x16xf32>, vector<16x256xf32>, vector<16x256xf32> -> vector<16x256xf32>
    %173 = vector.broadcast %170 : vector<1x256xf32> to vector<16x256xf32>
    %174 = arith.addf %172, %173 : vector<16x256xf32>
    %c1_115 = arith.constant 1 : index
    %c0_116 = arith.constant 0 : index
    %c0_117 = arith.constant 0 : index
    %175 = vector.load %arg19[%c1_115, %c0_116, %c0_117] : memref<12x16x256xf32, #tpu.memory_space<vmem>>, vector<1x16x256xf32>
    %176 = vector.shape_cast %175 : vector<1x16x256xf32> to vector<16x256xf32>
    %177 = arith.mulf %174, %176 : vector<16x256xf32>
    %c1_118 = arith.constant 1 : index
    %c0_119 = arith.constant 0 : index
    %c0_120 = arith.constant 0 : index
    %178 = vector.load %arg20[%c1_118, %c0_119, %c0_120] : memref<12x16x256xf32, #tpu.memory_space<vmem>>, vector<1x16x256xf32>
    %179 = vector.shape_cast %178 : vector<1x16x256xf32> to vector<16x256xf32>
    %180 = arith.addf %177, %179 : vector<16x256xf32>
    %181 = math.tanh %180 : vector<16x256xf32>
    %c1_121 = arith.constant 1 : index
    %c0_122 = arith.constant 0 : index
    %c0_123 = arith.constant 0 : index
    %182 = vector.load %arg21[%c1_121, %c0_122, %c0_123] : memref<12x256x256xf32, #tpu.memory_space<vmem>>, vector<1x256x256xf32>
    %183 = vector.shape_cast %182 : vector<1x256x256xf32> to vector<256x256xf32>
    %c1_124 = arith.constant 1 : index
    %c0_125 = arith.constant 0 : index
    %c0_126 = arith.constant 0 : index
    %184 = vector.load %arg22[%c1_124, %c0_125, %c0_126] : memref<12x16x16xf32, #tpu.memory_space<vmem>>, vector<1x16x16xf32>
    %185 = vector.shape_cast %184 : vector<1x16x16xf32> to vector<16x16xf32>
    %c1_127 = arith.constant 1 : index
    %c0_128 = arith.constant 0 : index
    %c0_129 = arith.constant 0 : index
    %186 = vector.load %arg23[%c1_127, %c0_128, %c0_129] : memref<12x1x256xf32, #tpu.memory_space<vmem>>, vector<1x1x256xf32>
    %187 = vector.shape_cast %186 : vector<1x1x256xf32> to vector<1x256xf32>
    %cst_130 = arith.constant dense<0.000000e+00> : vector<16x256xf32>
    %188 = tpu.matmul %181, %183, %cst_130 {dimension_numbers = #tpu.dot_dimension_numbers<[1], [0], [0], [1], [0, 0, 1, 1], [], []>} : vector<16x256xf32>, vector<256x256xf32>, vector<16x256xf32> -> vector<16x256xf32>
    %cst_131 = arith.constant dense<0.000000e+00> : vector<16x256xf32>
    %189 = tpu.matmul %185, %188, %cst_131 {dimension_numbers = #tpu.dot_dimension_numbers<[1], [0], [0], [1], [0, 0, 1, 1], [], []>} : vector<16x16xf32>, vector<16x256xf32>, vector<16x256xf32> -> vector<16x256xf32>
    %190 = vector.broadcast %187 : vector<1x256xf32> to vector<16x256xf32>
    %191 = arith.addf %189, %190 : vector<16x256xf32>
    %c1_132 = arith.constant 1 : index
    %c0_133 = arith.constant 0 : index
    %c0_134 = arith.constant 0 : index
    %192 = vector.load %arg24[%c1_132, %c0_133, %c0_134] : memref<12x16x256xf32, #tpu.memory_space<vmem>>, vector<1x16x256xf32>
    %193 = vector.shape_cast %192 : vector<1x16x256xf32> to vector<16x256xf32>
    %194 = arith.mulf %191, %193 : vector<16x256xf32>
    %c1_135 = arith.constant 1 : index
    %c0_136 = arith.constant 0 : index
    %c0_137 = arith.constant 0 : index
    %195 = vector.load %arg25[%c1_135, %c0_136, %c0_137] : memref<12x16x256xf32, #tpu.memory_space<vmem>>, vector<1x16x256xf32>
    %196 = vector.shape_cast %195 : vector<1x16x256xf32> to vector<16x256xf32>
    %197 = arith.addf %194, %196 : vector<16x256xf32>
    %198 = math.tanh %197 : vector<16x256xf32>
    %199 = arith.addf %164, %198 : vector<16x256xf32>
    %c2_138 = arith.constant 2 : index
    %c0_139 = arith.constant 0 : index
    %c0_140 = arith.constant 0 : index
    %200 = vector.load %arg16[%c2_138, %c0_139, %c0_140] : memref<12x256x256xf32, #tpu.memory_space<vmem>>, vector<1x256x256xf32>
    %201 = vector.shape_cast %200 : vector<1x256x256xf32> to vector<256x256xf32>
    %c2_141 = arith.constant 2 : index
    %c0_142 = arith.constant 0 : index
    %c0_143 = arith.constant 0 : index
    %202 = vector.load %arg17[%c2_141, %c0_142, %c0_143] : memref<12x16x16xf32, #tpu.memory_space<vmem>>, vector<1x16x16xf32>
    %203 = vector.shape_cast %202 : vector<1x16x16xf32> to vector<16x16xf32>
    %c2_144 = arith.constant 2 : index
    %c0_145 = arith.constant 0 : index
    %c0_146 = arith.constant 0 : index
    %204 = vector.load %arg18[%c2_144, %c0_145, %c0_146] : memref<12x1x256xf32, #tpu.memory_space<vmem>>, vector<1x1x256xf32>
    %205 = vector.shape_cast %204 : vector<1x1x256xf32> to vector<1x256xf32>
    %cst_147 = arith.constant dense<0.000000e+00> : vector<16x256xf32>
    %206 = tpu.matmul %199, %201, %cst_147 {dimension_numbers = #tpu.dot_dimension_numbers<[1], [0], [0], [1], [0, 0, 1, 1], [], []>} : vector<16x256xf32>, vector<256x256xf32>, vector<16x256xf32> -> vector<16x256xf32>
    %cst_148 = arith.constant dense<0.000000e+00> : vector<16x256xf32>
    %207 = tpu.matmul %203, %206, %cst_148 {dimension_numbers = #tpu.dot_dimension_numbers<[1], [0], [0], [1], [0, 0, 1, 1], [], []>} : vector<16x16xf32>, vector<16x256xf32>, vector<16x256xf32> -> vector<16x256xf32>
    %208 = vector.broadcast %205 : vector<1x256xf32> to vector<16x256xf32>
    %209 = arith.addf %207, %208 : vector<16x256xf32>
    %c2_149 = arith.constant 2 : index
    %c0_150 = arith.constant 0 : index
    %c0_151 = arith.constant 0 : index
    %210 = vector.load %arg19[%c2_149, %c0_150, %c0_151] : memref<12x16x256xf32, #tpu.memory_space<vmem>>, vector<1x16x256xf32>
    %211 = vector.shape_cast %210 : vector<1x16x256xf32> to vector<16x256xf32>
    %212 = arith.mulf %209, %211 : vector<16x256xf32>
    %c2_152 = arith.constant 2 : index
    %c0_153 = arith.constant 0 : index
    %c0_154 = arith.constant 0 : index
    %213 = vector.load %arg20[%c2_152, %c0_153, %c0_154] : memref<12x16x256xf32, #tpu.memory_space<vmem>>, vector<1x16x256xf32>
    %214 = vector.shape_cast %213 : vector<1x16x256xf32> to vector<16x256xf32>
    %215 = arith.addf %212, %214 : vector<16x256xf32>
    %216 = math.tanh %215 : vector<16x256xf32>
    %c2_155 = arith.constant 2 : index
    %c0_156 = arith.constant 0 : index
    %c0_157 = arith.constant 0 : index
    %217 = vector.load %arg21[%c2_155, %c0_156, %c0_157] : memref<12x256x256xf32, #tpu.memory_space<vmem>>, vector<1x256x256xf32>
    %218 = vector.shape_cast %217 : vector<1x256x256xf32> to vector<256x256xf32>
    %c2_158 = arith.constant 2 : index
    %c0_159 = arith.constant 0 : index
    %c0_160 = arith.constant 0 : index
    %219 = vector.load %arg22[%c2_158, %c0_159, %c0_160] : memref<12x16x16xf32, #tpu.memory_space<vmem>>, vector<1x16x16xf32>
    %220 = vector.shape_cast %219 : vector<1x16x16xf32> to vector<16x16xf32>
    %c2_161 = arith.constant 2 : index
    %c0_162 = arith.constant 0 : index
    %c0_163 = arith.constant 0 : index
    %221 = vector.load %arg23[%c2_161, %c0_162, %c0_163] : memref<12x1x256xf32, #tpu.memory_space<vmem>>, vector<1x1x256xf32>
    %222 = vector.shape_cast %221 : vector<1x1x256xf32> to vector<1x256xf32>
    %cst_164 = arith.constant dense<0.000000e+00> : vector<16x256xf32>
    %223 = tpu.matmul %216, %218, %cst_164 {dimension_numbers = #tpu.dot_dimension_numbers<[1], [0], [0], [1], [0, 0, 1, 1], [], []>} : vector<16x256xf32>, vector<256x256xf32>, vector<16x256xf32> -> vector<16x256xf32>
    %cst_165 = arith.constant dense<0.000000e+00> : vector<16x256xf32>
    %224 = tpu.matmul %220, %223, %cst_165 {dimension_numbers = #tpu.dot_dimension_numbers<[1], [0], [0], [1], [0, 0, 1, 1], [], []>} : vector<16x16xf32>, vector<16x256xf32>, vector<16x256xf32> -> vector<16x256xf32>
    %225 = vector.broadcast %222 : vector<1x256xf32> to vector<16x256xf32>
    %226 = arith.addf %224, %225 : vector<16x256xf32>
    %c2_166 = arith.constant 2 : index
    %c0_167 = arith.constant 0 : index
    %c0_168 = arith.constant 0 : index
    %227 = vector.load %arg24[%c2_166, %c0_167, %c0_168] : memref<12x16x256xf32, #tpu.memory_space<vmem>>, vector<1x16x256xf32>
    %228 = vector.shape_cast %227 : vector<1x16x256xf32> to vector<16x256xf32>
    %229 = arith.mulf %226, %228 : vector<16x256xf32>
    %c2_169 = arith.constant 2 : index
    %c0_170 = arith.constant 0 : index
    %c0_171 = arith.constant 0 : index
    %230 = vector.load %arg25[%c2_169, %c0_170, %c0_171] : memref<12x16x256xf32, #tpu.memory_space<vmem>>, vector<1x16x256xf32>
    %231 = vector.shape_cast %230 : vector<1x16x256xf32> to vector<16x256xf32>
    %232 = arith.addf %229, %231 : vector<16x256xf32>
    %233 = math.tanh %232 : vector<16x256xf32>
    %234 = arith.addf %199, %233 : vector<16x256xf32>
    %c3 = arith.constant 3 : index
    %c0_172 = arith.constant 0 : index
    %c0_173 = arith.constant 0 : index
    %235 = vector.load %arg16[%c3, %c0_172, %c0_173] : memref<12x256x256xf32, #tpu.memory_space<vmem>>, vector<1x256x256xf32>
    %236 = vector.shape_cast %235 : vector<1x256x256xf32> to vector<256x256xf32>
    %c3_174 = arith.constant 3 : index
    %c0_175 = arith.constant 0 : index
    %c0_176 = arith.constant 0 : index
    %237 = vector.load %arg17[%c3_174, %c0_175, %c0_176] : memref<12x16x16xf32, #tpu.memory_space<vmem>>, vector<1x16x16xf32>
    %238 = vector.shape_cast %237 : vector<1x16x16xf32> to vector<16x16xf32>
    %c3_177 = arith.constant 3 : index
    %c0_178 = arith.constant 0 : index
    %c0_179 = arith.constant 0 : index
    %239 = vector.load %arg18[%c3_177, %c0_178, %c0_179] : memref<12x1x256xf32, #tpu.memory_space<vmem>>, vector<1x1x256xf32>
    %240 = vector.shape_cast %239 : vector<1x1x256xf32> to vector<1x256xf32>
    %cst_180 = arith.constant dense<0.000000e+00> : vector<16x256xf32>
    %241 = tpu.matmul %234, %236, %cst_180 {dimension_numbers = #tpu.dot_dimension_numbers<[1], [0], [0], [1], [0, 0, 1, 1], [], []>} : vector<16x256xf32>, vector<256x256xf32>, vector<16x256xf32> -> vector<16x256xf32>
    %cst_181 = arith.constant dense<0.000000e+00> : vector<16x256xf32>
    %242 = tpu.matmul %238, %241, %cst_181 {dimension_numbers = #tpu.dot_dimension_numbers<[1], [0], [0], [1], [0, 0, 1, 1], [], []>} : vector<16x16xf32>, vector<16x256xf32>, vector<16x256xf32> -> vector<16x256xf32>
    %243 = vector.broadcast %240 : vector<1x256xf32> to vector<16x256xf32>
    %244 = arith.addf %242, %243 : vector<16x256xf32>
    %c3_182 = arith.constant 3 : index
    %c0_183 = arith.constant 0 : index
    %c0_184 = arith.constant 0 : index
    %245 = vector.load %arg19[%c3_182, %c0_183, %c0_184] : memref<12x16x256xf32, #tpu.memory_space<vmem>>, vector<1x16x256xf32>
    %246 = vector.shape_cast %245 : vector<1x16x256xf32> to vector<16x256xf32>
    %247 = arith.mulf %244, %246 : vector<16x256xf32>
    %c3_185 = arith.constant 3 : index
    %c0_186 = arith.constant 0 : index
    %c0_187 = arith.constant 0 : index
    %248 = vector.load %arg20[%c3_185, %c0_186, %c0_187] : memref<12x16x256xf32, #tpu.memory_space<vmem>>, vector<1x16x256xf32>
    %249 = vector.shape_cast %248 : vector<1x16x256xf32> to vector<16x256xf32>
    %250 = arith.addf %247, %249 : vector<16x256xf32>
    %251 = math.tanh %250 : vector<16x256xf32>
    %c3_188 = arith.constant 3 : index
    %c0_189 = arith.constant 0 : index
    %c0_190 = arith.constant 0 : index
    %252 = vector.load %arg21[%c3_188, %c0_189, %c0_190] : memref<12x256x256xf32, #tpu.memory_space<vmem>>, vector<1x256x256xf32>
    %253 = vector.shape_cast %252 : vector<1x256x256xf32> to vector<256x256xf32>
    %c3_191 = arith.constant 3 : index
    %c0_192 = arith.constant 0 : index
    %c0_193 = arith.constant 0 : index
    %254 = vector.load %arg22[%c3_191, %c0_192, %c0_193] : memref<12x16x16xf32, #tpu.memory_space<vmem>>, vector<1x16x16xf32>
    %255 = vector.shape_cast %254 : vector<1x16x16xf32> to vector<16x16xf32>
    %c3_194 = arith.constant 3 : index
    %c0_195 = arith.constant 0 : index
    %c0_196 = arith.constant 0 : index
    %256 = vector.load %arg23[%c3_194, %c0_195, %c0_196] : memref<12x1x256xf32, #tpu.memory_space<vmem>>, vector<1x1x256xf32>
    %257 = vector.shape_cast %256 : vector<1x1x256xf32> to vector<1x256xf32>
    %cst_197 = arith.constant dense<0.000000e+00> : vector<16x256xf32>
    %258 = tpu.matmul %251, %253, %cst_197 {dimension_numbers = #tpu.dot_dimension_numbers<[1], [0], [0], [1], [0, 0, 1, 1], [], []>} : vector<16x256xf32>, vector<256x256xf32>, vector<16x256xf32> -> vector<16x256xf32>
    %cst_198 = arith.constant dense<0.000000e+00> : vector<16x256xf32>
    %259 = tpu.matmul %255, %258, %cst_198 {dimension_numbers = #tpu.dot_dimension_numbers<[1], [0], [0], [1], [0, 0, 1, 1], [], []>} : vector<16x16xf32>, vector<16x256xf32>, vector<16x256xf32> -> vector<16x256xf32>
    %260 = vector.broadcast %257 : vector<1x256xf32> to vector<16x256xf32>
    %261 = arith.addf %259, %260 : vector<16x256xf32>
    %c3_199 = arith.constant 3 : index
    %c0_200 = arith.constant 0 : index
    %c0_201 = arith.constant 0 : index
    %262 = vector.load %arg24[%c3_199, %c0_200, %c0_201] : memref<12x16x256xf32, #tpu.memory_space<vmem>>, vector<1x16x256xf32>
    %263 = vector.shape_cast %262 : vector<1x16x256xf32> to vector<16x256xf32>
    %264 = arith.mulf %261, %263 : vector<16x256xf32>
    %c3_202 = arith.constant 3 : index
    %c0_203 = arith.constant 0 : index
    %c0_204 = arith.constant 0 : index
    %265 = vector.load %arg25[%c3_202, %c0_203, %c0_204] : memref<12x16x256xf32, #tpu.memory_space<vmem>>, vector<1x16x256xf32>
    %266 = vector.shape_cast %265 : vector<1x16x256xf32> to vector<16x256xf32>
    %267 = arith.addf %264, %266 : vector<16x256xf32>
    %268 = math.tanh %267 : vector<16x256xf32>
    %269 = arith.addf %234, %268 : vector<16x256xf32>
    %c4 = arith.constant 4 : index
    %c0_205 = arith.constant 0 : index
    %c0_206 = arith.constant 0 : index
    %270 = vector.load %arg16[%c4, %c0_205, %c0_206] : memref<12x256x256xf32, #tpu.memory_space<vmem>>, vector<1x256x256xf32>
    %271 = vector.shape_cast %270 : vector<1x256x256xf32> to vector<256x256xf32>
    %c4_207 = arith.constant 4 : index
    %c0_208 = arith.constant 0 : index
    %c0_209 = arith.constant 0 : index
    %272 = vector.load %arg17[%c4_207, %c0_208, %c0_209] : memref<12x16x16xf32, #tpu.memory_space<vmem>>, vector<1x16x16xf32>
    %273 = vector.shape_cast %272 : vector<1x16x16xf32> to vector<16x16xf32>
    %c4_210 = arith.constant 4 : index
    %c0_211 = arith.constant 0 : index
    %c0_212 = arith.constant 0 : index
    %274 = vector.load %arg18[%c4_210, %c0_211, %c0_212] : memref<12x1x256xf32, #tpu.memory_space<vmem>>, vector<1x1x256xf32>
    %275 = vector.shape_cast %274 : vector<1x1x256xf32> to vector<1x256xf32>
    %cst_213 = arith.constant dense<0.000000e+00> : vector<16x256xf32>
    %276 = tpu.matmul %269, %271, %cst_213 {dimension_numbers = #tpu.dot_dimension_numbers<[1], [0], [0], [1], [0, 0, 1, 1], [], []>} : vector<16x256xf32>, vector<256x256xf32>, vector<16x256xf32> -> vector<16x256xf32>
    %cst_214 = arith.constant dense<0.000000e+00> : vector<16x256xf32>
    %277 = tpu.matmul %273, %276, %cst_214 {dimension_numbers = #tpu.dot_dimension_numbers<[1], [0], [0], [1], [0, 0, 1, 1], [], []>} : vector<16x16xf32>, vector<16x256xf32>, vector<16x256xf32> -> vector<16x256xf32>
    %278 = vector.broadcast %275 : vector<1x256xf32> to vector<16x256xf32>
    %279 = arith.addf %277, %278 : vector<16x256xf32>
    %c4_215 = arith.constant 4 : index
    %c0_216 = arith.constant 0 : index
    %c0_217 = arith.constant 0 : index
    %280 = vector.load %arg19[%c4_215, %c0_216, %c0_217] : memref<12x16x256xf32, #tpu.memory_space<vmem>>, vector<1x16x256xf32>
    %281 = vector.shape_cast %280 : vector<1x16x256xf32> to vector<16x256xf32>
    %282 = arith.mulf %279, %281 : vector<16x256xf32>
    %c4_218 = arith.constant 4 : index
    %c0_219 = arith.constant 0 : index
    %c0_220 = arith.constant 0 : index
    %283 = vector.load %arg20[%c4_218, %c0_219, %c0_220] : memref<12x16x256xf32, #tpu.memory_space<vmem>>, vector<1x16x256xf32>
    %284 = vector.shape_cast %283 : vector<1x16x256xf32> to vector<16x256xf32>
    %285 = arith.addf %282, %284 : vector<16x256xf32>
    %286 = math.tanh %285 : vector<16x256xf32>
    %c4_221 = arith.constant 4 : index
    %c0_222 = arith.constant 0 : index
    %c0_223 = arith.constant 0 : index
    %287 = vector.load %arg21[%c4_221, %c0_222, %c0_223] : memref<12x256x256xf32, #tpu.memory_space<vmem>>, vector<1x256x256xf32>
    %288 = vector.shape_cast %287 : vector<1x256x256xf32> to vector<256x256xf32>
    %c4_224 = arith.constant 4 : index
    %c0_225 = arith.constant 0 : index
    %c0_226 = arith.constant 0 : index
    %289 = vector.load %arg22[%c4_224, %c0_225, %c0_226] : memref<12x16x16xf32, #tpu.memory_space<vmem>>, vector<1x16x16xf32>
    %290 = vector.shape_cast %289 : vector<1x16x16xf32> to vector<16x16xf32>
    %c4_227 = arith.constant 4 : index
    %c0_228 = arith.constant 0 : index
    %c0_229 = arith.constant 0 : index
    %291 = vector.load %arg23[%c4_227, %c0_228, %c0_229] : memref<12x1x256xf32, #tpu.memory_space<vmem>>, vector<1x1x256xf32>
    %292 = vector.shape_cast %291 : vector<1x1x256xf32> to vector<1x256xf32>
    %cst_230 = arith.constant dense<0.000000e+00> : vector<16x256xf32>
    %293 = tpu.matmul %286, %288, %cst_230 {dimension_numbers = #tpu.dot_dimension_numbers<[1], [0], [0], [1], [0, 0, 1, 1], [], []>} : vector<16x256xf32>, vector<256x256xf32>, vector<16x256xf32> -> vector<16x256xf32>
    %cst_231 = arith.constant dense<0.000000e+00> : vector<16x256xf32>
    %294 = tpu.matmul %290, %293, %cst_231 {dimension_numbers = #tpu.dot_dimension_numbers<[1], [0], [0], [1], [0, 0, 1, 1], [], []>} : vector<16x16xf32>, vector<16x256xf32>, vector<16x256xf32> -> vector<16x256xf32>
    %295 = vector.broadcast %292 : vector<1x256xf32> to vector<16x256xf32>
    %296 = arith.addf %294, %295 : vector<16x256xf32>
    %c4_232 = arith.constant 4 : index
    %c0_233 = arith.constant 0 : index
    %c0_234 = arith.constant 0 : index
    %297 = vector.load %arg24[%c4_232, %c0_233, %c0_234] : memref<12x16x256xf32, #tpu.memory_space<vmem>>, vector<1x16x256xf32>
    %298 = vector.shape_cast %297 : vector<1x16x256xf32> to vector<16x256xf32>
    %299 = arith.mulf %296, %298 : vector<16x256xf32>
    %c4_235 = arith.constant 4 : index
    %c0_236 = arith.constant 0 : index
    %c0_237 = arith.constant 0 : index
    %300 = vector.load %arg25[%c4_235, %c0_236, %c0_237] : memref<12x16x256xf32, #tpu.memory_space<vmem>>, vector<1x16x256xf32>
    %301 = vector.shape_cast %300 : vector<1x16x256xf32> to vector<16x256xf32>
    %302 = arith.addf %299, %301 : vector<16x256xf32>
    %303 = math.tanh %302 : vector<16x256xf32>
    %304 = arith.addf %269, %303 : vector<16x256xf32>
    %c5 = arith.constant 5 : index
    %c0_238 = arith.constant 0 : index
    %c0_239 = arith.constant 0 : index
    %305 = vector.load %arg16[%c5, %c0_238, %c0_239] : memref<12x256x256xf32, #tpu.memory_space<vmem>>, vector<1x256x256xf32>
    %306 = vector.shape_cast %305 : vector<1x256x256xf32> to vector<256x256xf32>
    %c5_240 = arith.constant 5 : index
    %c0_241 = arith.constant 0 : index
    %c0_242 = arith.constant 0 : index
    %307 = vector.load %arg17[%c5_240, %c0_241, %c0_242] : memref<12x16x16xf32, #tpu.memory_space<vmem>>, vector<1x16x16xf32>
    %308 = vector.shape_cast %307 : vector<1x16x16xf32> to vector<16x16xf32>
    %c5_243 = arith.constant 5 : index
    %c0_244 = arith.constant 0 : index
    %c0_245 = arith.constant 0 : index
    %309 = vector.load %arg18[%c5_243, %c0_244, %c0_245] : memref<12x1x256xf32, #tpu.memory_space<vmem>>, vector<1x1x256xf32>
    %310 = vector.shape_cast %309 : vector<1x1x256xf32> to vector<1x256xf32>
    %cst_246 = arith.constant dense<0.000000e+00> : vector<16x256xf32>
    %311 = tpu.matmul %304, %306, %cst_246 {dimension_numbers = #tpu.dot_dimension_numbers<[1], [0], [0], [1], [0, 0, 1, 1], [], []>} : vector<16x256xf32>, vector<256x256xf32>, vector<16x256xf32> -> vector<16x256xf32>
    %cst_247 = arith.constant dense<0.000000e+00> : vector<16x256xf32>
    %312 = tpu.matmul %308, %311, %cst_247 {dimension_numbers = #tpu.dot_dimension_numbers<[1], [0], [0], [1], [0, 0, 1, 1], [], []>} : vector<16x16xf32>, vector<16x256xf32>, vector<16x256xf32> -> vector<16x256xf32>
    %313 = vector.broadcast %310 : vector<1x256xf32> to vector<16x256xf32>
    %314 = arith.addf %312, %313 : vector<16x256xf32>
    %c5_248 = arith.constant 5 : index
    %c0_249 = arith.constant 0 : index
    %c0_250 = arith.constant 0 : index
    %315 = vector.load %arg19[%c5_248, %c0_249, %c0_250] : memref<12x16x256xf32, #tpu.memory_space<vmem>>, vector<1x16x256xf32>
    %316 = vector.shape_cast %315 : vector<1x16x256xf32> to vector<16x256xf32>
    %317 = arith.mulf %314, %316 : vector<16x256xf32>
    %c5_251 = arith.constant 5 : index
    %c0_252 = arith.constant 0 : index
    %c0_253 = arith.constant 0 : index
    %318 = vector.load %arg20[%c5_251, %c0_252, %c0_253] : memref<12x16x256xf32, #tpu.memory_space<vmem>>, vector<1x16x256xf32>
    %319 = vector.shape_cast %318 : vector<1x16x256xf32> to vector<16x256xf32>
    %320 = arith.addf %317, %319 : vector<16x256xf32>
    %321 = math.tanh %320 : vector<16x256xf32>
    %c5_254 = arith.constant 5 : index
    %c0_255 = arith.constant 0 : index
    %c0_256 = arith.constant 0 : index
    %322 = vector.load %arg21[%c5_254, %c0_255, %c0_256] : memref<12x256x256xf32, #tpu.memory_space<vmem>>, vector<1x256x256xf32>
    %323 = vector.shape_cast %322 : vector<1x256x256xf32> to vector<256x256xf32>
    %c5_257 = arith.constant 5 : index
    %c0_258 = arith.constant 0 : index
    %c0_259 = arith.constant 0 : index
    %324 = vector.load %arg22[%c5_257, %c0_258, %c0_259] : memref<12x16x16xf32, #tpu.memory_space<vmem>>, vector<1x16x16xf32>
    %325 = vector.shape_cast %324 : vector<1x16x16xf32> to vector<16x16xf32>
    %c5_260 = arith.constant 5 : index
    %c0_261 = arith.constant 0 : index
    %c0_262 = arith.constant 0 : index
    %326 = vector.load %arg23[%c5_260, %c0_261, %c0_262] : memref<12x1x256xf32, #tpu.memory_space<vmem>>, vector<1x1x256xf32>
    %327 = vector.shape_cast %326 : vector<1x1x256xf32> to vector<1x256xf32>
    %cst_263 = arith.constant dense<0.000000e+00> : vector<16x256xf32>
    %328 = tpu.matmul %321, %323, %cst_263 {dimension_numbers = #tpu.dot_dimension_numbers<[1], [0], [0], [1], [0, 0, 1, 1], [], []>} : vector<16x256xf32>, vector<256x256xf32>, vector<16x256xf32> -> vector<16x256xf32>
    %cst_264 = arith.constant dense<0.000000e+00> : vector<16x256xf32>
    %329 = tpu.matmul %325, %328, %cst_264 {dimension_numbers = #tpu.dot_dimension_numbers<[1], [0], [0], [1], [0, 0, 1, 1], [], []>} : vector<16x16xf32>, vector<16x256xf32>, vector<16x256xf32> -> vector<16x256xf32>
    %330 = vector.broadcast %327 : vector<1x256xf32> to vector<16x256xf32>
    %331 = arith.addf %329, %330 : vector<16x256xf32>
    %c5_265 = arith.constant 5 : index
    %c0_266 = arith.constant 0 : index
    %c0_267 = arith.constant 0 : index
    %332 = vector.load %arg24[%c5_265, %c0_266, %c0_267] : memref<12x16x256xf32, #tpu.memory_space<vmem>>, vector<1x16x256xf32>
    %333 = vector.shape_cast %332 : vector<1x16x256xf32> to vector<16x256xf32>
    %334 = arith.mulf %331, %333 : vector<16x256xf32>
    %c5_268 = arith.constant 5 : index
    %c0_269 = arith.constant 0 : index
    %c0_270 = arith.constant 0 : index
    %335 = vector.load %arg25[%c5_268, %c0_269, %c0_270] : memref<12x16x256xf32, #tpu.memory_space<vmem>>, vector<1x16x256xf32>
    %336 = vector.shape_cast %335 : vector<1x16x256xf32> to vector<16x256xf32>
    %337 = arith.addf %334, %336 : vector<16x256xf32>
    %338 = math.tanh %337 : vector<16x256xf32>
    %339 = arith.addf %304, %338 : vector<16x256xf32>
    %c6 = arith.constant 6 : index
    %c0_271 = arith.constant 0 : index
    %c0_272 = arith.constant 0 : index
    %340 = vector.load %arg16[%c6, %c0_271, %c0_272] : memref<12x256x256xf32, #tpu.memory_space<vmem>>, vector<1x256x256xf32>
    %341 = vector.shape_cast %340 : vector<1x256x256xf32> to vector<256x256xf32>
    %c6_273 = arith.constant 6 : index
    %c0_274 = arith.constant 0 : index
    %c0_275 = arith.constant 0 : index
    %342 = vector.load %arg17[%c6_273, %c0_274, %c0_275] : memref<12x16x16xf32, #tpu.memory_space<vmem>>, vector<1x16x16xf32>
    %343 = vector.shape_cast %342 : vector<1x16x16xf32> to vector<16x16xf32>
    %c6_276 = arith.constant 6 : index
    %c0_277 = arith.constant 0 : index
    %c0_278 = arith.constant 0 : index
    %344 = vector.load %arg18[%c6_276, %c0_277, %c0_278] : memref<12x1x256xf32, #tpu.memory_space<vmem>>, vector<1x1x256xf32>
    %345 = vector.shape_cast %344 : vector<1x1x256xf32> to vector<1x256xf32>
    %cst_279 = arith.constant dense<0.000000e+00> : vector<16x256xf32>
    %346 = tpu.matmul %339, %341, %cst_279 {dimension_numbers = #tpu.dot_dimension_numbers<[1], [0], [0], [1], [0, 0, 1, 1], [], []>} : vector<16x256xf32>, vector<256x256xf32>, vector<16x256xf32> -> vector<16x256xf32>
    %cst_280 = arith.constant dense<0.000000e+00> : vector<16x256xf32>
    %347 = tpu.matmul %343, %346, %cst_280 {dimension_numbers = #tpu.dot_dimension_numbers<[1], [0], [0], [1], [0, 0, 1, 1], [], []>} : vector<16x16xf32>, vector<16x256xf32>, vector<16x256xf32> -> vector<16x256xf32>
    %348 = vector.broadcast %345 : vector<1x256xf32> to vector<16x256xf32>
    %349 = arith.addf %347, %348 : vector<16x256xf32>
    %c6_281 = arith.constant 6 : index
    %c0_282 = arith.constant 0 : index
    %c0_283 = arith.constant 0 : index
    %350 = vector.load %arg19[%c6_281, %c0_282, %c0_283] : memref<12x16x256xf32, #tpu.memory_space<vmem>>, vector<1x16x256xf32>
    %351 = vector.shape_cast %350 : vector<1x16x256xf32> to vector<16x256xf32>
    %352 = arith.mulf %349, %351 : vector<16x256xf32>
    %c6_284 = arith.constant 6 : index
    %c0_285 = arith.constant 0 : index
    %c0_286 = arith.constant 0 : index
    %353 = vector.load %arg20[%c6_284, %c0_285, %c0_286] : memref<12x16x256xf32, #tpu.memory_space<vmem>>, vector<1x16x256xf32>
    %354 = vector.shape_cast %353 : vector<1x16x256xf32> to vector<16x256xf32>
    %355 = arith.addf %352, %354 : vector<16x256xf32>
    %356 = math.tanh %355 : vector<16x256xf32>
    %c6_287 = arith.constant 6 : index
    %c0_288 = arith.constant 0 : index
    %c0_289 = arith.constant 0 : index
    %357 = vector.load %arg21[%c6_287, %c0_288, %c0_289] : memref<12x256x256xf32, #tpu.memory_space<vmem>>, vector<1x256x256xf32>
    %358 = vector.shape_cast %357 : vector<1x256x256xf32> to vector<256x256xf32>
    %c6_290 = arith.constant 6 : index
    %c0_291 = arith.constant 0 : index
    %c0_292 = arith.constant 0 : index
    %359 = vector.load %arg22[%c6_290, %c0_291, %c0_292] : memref<12x16x16xf32, #tpu.memory_space<vmem>>, vector<1x16x16xf32>
    %360 = vector.shape_cast %359 : vector<1x16x16xf32> to vector<16x16xf32>
    %c6_293 = arith.constant 6 : index
    %c0_294 = arith.constant 0 : index
    %c0_295 = arith.constant 0 : index
    %361 = vector.load %arg23[%c6_293, %c0_294, %c0_295] : memref<12x1x256xf32, #tpu.memory_space<vmem>>, vector<1x1x256xf32>
    %362 = vector.shape_cast %361 : vector<1x1x256xf32> to vector<1x256xf32>
    %cst_296 = arith.constant dense<0.000000e+00> : vector<16x256xf32>
    %363 = tpu.matmul %356, %358, %cst_296 {dimension_numbers = #tpu.dot_dimension_numbers<[1], [0], [0], [1], [0, 0, 1, 1], [], []>} : vector<16x256xf32>, vector<256x256xf32>, vector<16x256xf32> -> vector<16x256xf32>
    %cst_297 = arith.constant dense<0.000000e+00> : vector<16x256xf32>
    %364 = tpu.matmul %360, %363, %cst_297 {dimension_numbers = #tpu.dot_dimension_numbers<[1], [0], [0], [1], [0, 0, 1, 1], [], []>} : vector<16x16xf32>, vector<16x256xf32>, vector<16x256xf32> -> vector<16x256xf32>
    %365 = vector.broadcast %362 : vector<1x256xf32> to vector<16x256xf32>
    %366 = arith.addf %364, %365 : vector<16x256xf32>
    %c6_298 = arith.constant 6 : index
    %c0_299 = arith.constant 0 : index
    %c0_300 = arith.constant 0 : index
    %367 = vector.load %arg24[%c6_298, %c0_299, %c0_300] : memref<12x16x256xf32, #tpu.memory_space<vmem>>, vector<1x16x256xf32>
    %368 = vector.shape_cast %367 : vector<1x16x256xf32> to vector<16x256xf32>
    %369 = arith.mulf %366, %368 : vector<16x256xf32>
    %c6_301 = arith.constant 6 : index
    %c0_302 = arith.constant 0 : index
    %c0_303 = arith.constant 0 : index
    %370 = vector.load %arg25[%c6_301, %c0_302, %c0_303] : memref<12x16x256xf32, #tpu.memory_space<vmem>>, vector<1x16x256xf32>
    %371 = vector.shape_cast %370 : vector<1x16x256xf32> to vector<16x256xf32>
    %372 = arith.addf %369, %371 : vector<16x256xf32>
    %373 = math.tanh %372 : vector<16x256xf32>
    %374 = arith.addf %339, %373 : vector<16x256xf32>
    %c7 = arith.constant 7 : index
    %c0_304 = arith.constant 0 : index
    %c0_305 = arith.constant 0 : index
    %375 = vector.load %arg16[%c7, %c0_304, %c0_305] : memref<12x256x256xf32, #tpu.memory_space<vmem>>, vector<1x256x256xf32>
    %376 = vector.shape_cast %375 : vector<1x256x256xf32> to vector<256x256xf32>
    %c7_306 = arith.constant 7 : index
    %c0_307 = arith.constant 0 : index
    %c0_308 = arith.constant 0 : index
    %377 = vector.load %arg17[%c7_306, %c0_307, %c0_308] : memref<12x16x16xf32, #tpu.memory_space<vmem>>, vector<1x16x16xf32>
    %378 = vector.shape_cast %377 : vector<1x16x16xf32> to vector<16x16xf32>
    %c7_309 = arith.constant 7 : index
    %c0_310 = arith.constant 0 : index
    %c0_311 = arith.constant 0 : index
    %379 = vector.load %arg18[%c7_309, %c0_310, %c0_311] : memref<12x1x256xf32, #tpu.memory_space<vmem>>, vector<1x1x256xf32>
    %380 = vector.shape_cast %379 : vector<1x1x256xf32> to vector<1x256xf32>
    %cst_312 = arith.constant dense<0.000000e+00> : vector<16x256xf32>
    %381 = tpu.matmul %374, %376, %cst_312 {dimension_numbers = #tpu.dot_dimension_numbers<[1], [0], [0], [1], [0, 0, 1, 1], [], []>} : vector<16x256xf32>, vector<256x256xf32>, vector<16x256xf32> -> vector<16x256xf32>
    %cst_313 = arith.constant dense<0.000000e+00> : vector<16x256xf32>
    %382 = tpu.matmul %378, %381, %cst_313 {dimension_numbers = #tpu.dot_dimension_numbers<[1], [0], [0], [1], [0, 0, 1, 1], [], []>} : vector<16x16xf32>, vector<16x256xf32>, vector<16x256xf32> -> vector<16x256xf32>
    %383 = vector.broadcast %380 : vector<1x256xf32> to vector<16x256xf32>
    %384 = arith.addf %382, %383 : vector<16x256xf32>
    %c7_314 = arith.constant 7 : index
    %c0_315 = arith.constant 0 : index
    %c0_316 = arith.constant 0 : index
    %385 = vector.load %arg19[%c7_314, %c0_315, %c0_316] : memref<12x16x256xf32, #tpu.memory_space<vmem>>, vector<1x16x256xf32>
    %386 = vector.shape_cast %385 : vector<1x16x256xf32> to vector<16x256xf32>
    %387 = arith.mulf %384, %386 : vector<16x256xf32>
    %c7_317 = arith.constant 7 : index
    %c0_318 = arith.constant 0 : index
    %c0_319 = arith.constant 0 : index
    %388 = vector.load %arg20[%c7_317, %c0_318, %c0_319] : memref<12x16x256xf32, #tpu.memory_space<vmem>>, vector<1x16x256xf32>
    %389 = vector.shape_cast %388 : vector<1x16x256xf32> to vector<16x256xf32>
    %390 = arith.addf %387, %389 : vector<16x256xf32>
    %391 = math.tanh %390 : vector<16x256xf32>
    %c7_320 = arith.constant 7 : index
    %c0_321 = arith.constant 0 : index
    %c0_322 = arith.constant 0 : index
    %392 = vector.load %arg21[%c7_320, %c0_321, %c0_322] : memref<12x256x256xf32, #tpu.memory_space<vmem>>, vector<1x256x256xf32>
    %393 = vector.shape_cast %392 : vector<1x256x256xf32> to vector<256x256xf32>
    %c7_323 = arith.constant 7 : index
    %c0_324 = arith.constant 0 : index
    %c0_325 = arith.constant 0 : index
    %394 = vector.load %arg22[%c7_323, %c0_324, %c0_325] : memref<12x16x16xf32, #tpu.memory_space<vmem>>, vector<1x16x16xf32>
    %395 = vector.shape_cast %394 : vector<1x16x16xf32> to vector<16x16xf32>
    %c7_326 = arith.constant 7 : index
    %c0_327 = arith.constant 0 : index
    %c0_328 = arith.constant 0 : index
    %396 = vector.load %arg23[%c7_326, %c0_327, %c0_328] : memref<12x1x256xf32, #tpu.memory_space<vmem>>, vector<1x1x256xf32>
    %397 = vector.shape_cast %396 : vector<1x1x256xf32> to vector<1x256xf32>
    %cst_329 = arith.constant dense<0.000000e+00> : vector<16x256xf32>
    %398 = tpu.matmul %391, %393, %cst_329 {dimension_numbers = #tpu.dot_dimension_numbers<[1], [0], [0], [1], [0, 0, 1, 1], [], []>} : vector<16x256xf32>, vector<256x256xf32>, vector<16x256xf32> -> vector<16x256xf32>
    %cst_330 = arith.constant dense<0.000000e+00> : vector<16x256xf32>
    %399 = tpu.matmul %395, %398, %cst_330 {dimension_numbers = #tpu.dot_dimension_numbers<[1], [0], [0], [1], [0, 0, 1, 1], [], []>} : vector<16x16xf32>, vector<16x256xf32>, vector<16x256xf32> -> vector<16x256xf32>
    %400 = vector.broadcast %397 : vector<1x256xf32> to vector<16x256xf32>
    %401 = arith.addf %399, %400 : vector<16x256xf32>
    %c7_331 = arith.constant 7 : index
    %c0_332 = arith.constant 0 : index
    %c0_333 = arith.constant 0 : index
    %402 = vector.load %arg24[%c7_331, %c0_332, %c0_333] : memref<12x16x256xf32, #tpu.memory_space<vmem>>, vector<1x16x256xf32>
    %403 = vector.shape_cast %402 : vector<1x16x256xf32> to vector<16x256xf32>
    %404 = arith.mulf %401, %403 : vector<16x256xf32>
    %c7_334 = arith.constant 7 : index
    %c0_335 = arith.constant 0 : index
    %c0_336 = arith.constant 0 : index
    %405 = vector.load %arg25[%c7_334, %c0_335, %c0_336] : memref<12x16x256xf32, #tpu.memory_space<vmem>>, vector<1x16x256xf32>
    %406 = vector.shape_cast %405 : vector<1x16x256xf32> to vector<16x256xf32>
    %407 = arith.addf %404, %406 : vector<16x256xf32>
    %408 = math.tanh %407 : vector<16x256xf32>
    %409 = arith.addf %374, %408 : vector<16x256xf32>
    %c8 = arith.constant 8 : index
    %c0_337 = arith.constant 0 : index
    %c0_338 = arith.constant 0 : index
    %410 = vector.load %arg16[%c8, %c0_337, %c0_338] : memref<12x256x256xf32, #tpu.memory_space<vmem>>, vector<1x256x256xf32>
    %411 = vector.shape_cast %410 : vector<1x256x256xf32> to vector<256x256xf32>
    %c8_339 = arith.constant 8 : index
    %c0_340 = arith.constant 0 : index
    %c0_341 = arith.constant 0 : index
    %412 = vector.load %arg17[%c8_339, %c0_340, %c0_341] : memref<12x16x16xf32, #tpu.memory_space<vmem>>, vector<1x16x16xf32>
    %413 = vector.shape_cast %412 : vector<1x16x16xf32> to vector<16x16xf32>
    %c8_342 = arith.constant 8 : index
    %c0_343 = arith.constant 0 : index
    %c0_344 = arith.constant 0 : index
    %414 = vector.load %arg18[%c8_342, %c0_343, %c0_344] : memref<12x1x256xf32, #tpu.memory_space<vmem>>, vector<1x1x256xf32>
    %415 = vector.shape_cast %414 : vector<1x1x256xf32> to vector<1x256xf32>
    %cst_345 = arith.constant dense<0.000000e+00> : vector<16x256xf32>
    %416 = tpu.matmul %409, %411, %cst_345 {dimension_numbers = #tpu.dot_dimension_numbers<[1], [0], [0], [1], [0, 0, 1, 1], [], []>} : vector<16x256xf32>, vector<256x256xf32>, vector<16x256xf32> -> vector<16x256xf32>
    %cst_346 = arith.constant dense<0.000000e+00> : vector<16x256xf32>
    %417 = tpu.matmul %413, %416, %cst_346 {dimension_numbers = #tpu.dot_dimension_numbers<[1], [0], [0], [1], [0, 0, 1, 1], [], []>} : vector<16x16xf32>, vector<16x256xf32>, vector<16x256xf32> -> vector<16x256xf32>
    %418 = vector.broadcast %415 : vector<1x256xf32> to vector<16x256xf32>
    %419 = arith.addf %417, %418 : vector<16x256xf32>
    %c8_347 = arith.constant 8 : index
    %c0_348 = arith.constant 0 : index
    %c0_349 = arith.constant 0 : index
    %420 = vector.load %arg19[%c8_347, %c0_348, %c0_349] : memref<12x16x256xf32, #tpu.memory_space<vmem>>, vector<1x16x256xf32>
    %421 = vector.shape_cast %420 : vector<1x16x256xf32> to vector<16x256xf32>
    %422 = arith.mulf %419, %421 : vector<16x256xf32>
    %c8_350 = arith.constant 8 : index
    %c0_351 = arith.constant 0 : index
    %c0_352 = arith.constant 0 : index
    %423 = vector.load %arg20[%c8_350, %c0_351, %c0_352] : memref<12x16x256xf32, #tpu.memory_space<vmem>>, vector<1x16x256xf32>
    %424 = vector.shape_cast %423 : vector<1x16x256xf32> to vector<16x256xf32>
    %425 = arith.addf %422, %424 : vector<16x256xf32>
    %426 = math.tanh %425 : vector<16x256xf32>
    %c8_353 = arith.constant 8 : index
    %c0_354 = arith.constant 0 : index
    %c0_355 = arith.constant 0 : index
    %427 = vector.load %arg21[%c8_353, %c0_354, %c0_355] : memref<12x256x256xf32, #tpu.memory_space<vmem>>, vector<1x256x256xf32>
    %428 = vector.shape_cast %427 : vector<1x256x256xf32> to vector<256x256xf32>
    %c8_356 = arith.constant 8 : index
    %c0_357 = arith.constant 0 : index
    %c0_358 = arith.constant 0 : index
    %429 = vector.load %arg22[%c8_356, %c0_357, %c0_358] : memref<12x16x16xf32, #tpu.memory_space<vmem>>, vector<1x16x16xf32>
    %430 = vector.shape_cast %429 : vector<1x16x16xf32> to vector<16x16xf32>
    %c8_359 = arith.constant 8 : index
    %c0_360 = arith.constant 0 : index
    %c0_361 = arith.constant 0 : index
    %431 = vector.load %arg23[%c8_359, %c0_360, %c0_361] : memref<12x1x256xf32, #tpu.memory_space<vmem>>, vector<1x1x256xf32>
    %432 = vector.shape_cast %431 : vector<1x1x256xf32> to vector<1x256xf32>
    %cst_362 = arith.constant dense<0.000000e+00> : vector<16x256xf32>
    %433 = tpu.matmul %426, %428, %cst_362 {dimension_numbers = #tpu.dot_dimension_numbers<[1], [0], [0], [1], [0, 0, 1, 1], [], []>} : vector<16x256xf32>, vector<256x256xf32>, vector<16x256xf32> -> vector<16x256xf32>
    %cst_363 = arith.constant dense<0.000000e+00> : vector<16x256xf32>
    %434 = tpu.matmul %430, %433, %cst_363 {dimension_numbers = #tpu.dot_dimension_numbers<[1], [0], [0], [1], [0, 0, 1, 1], [], []>} : vector<16x16xf32>, vector<16x256xf32>, vector<16x256xf32> -> vector<16x256xf32>
    %435 = vector.broadcast %432 : vector<1x256xf32> to vector<16x256xf32>
    %436 = arith.addf %434, %435 : vector<16x256xf32>
    %c8_364 = arith.constant 8 : index
    %c0_365 = arith.constant 0 : index
    %c0_366 = arith.constant 0 : index
    %437 = vector.load %arg24[%c8_364, %c0_365, %c0_366] : memref<12x16x256xf32, #tpu.memory_space<vmem>>, vector<1x16x256xf32>
    %438 = vector.shape_cast %437 : vector<1x16x256xf32> to vector<16x256xf32>
    %439 = arith.mulf %436, %438 : vector<16x256xf32>
    %c8_367 = arith.constant 8 : index
    %c0_368 = arith.constant 0 : index
    %c0_369 = arith.constant 0 : index
    %440 = vector.load %arg25[%c8_367, %c0_368, %c0_369] : memref<12x16x256xf32, #tpu.memory_space<vmem>>, vector<1x16x256xf32>
    %441 = vector.shape_cast %440 : vector<1x16x256xf32> to vector<16x256xf32>
    %442 = arith.addf %439, %441 : vector<16x256xf32>
    %443 = math.tanh %442 : vector<16x256xf32>
    %444 = arith.addf %409, %443 : vector<16x256xf32>
    %c9 = arith.constant 9 : index
    %c0_370 = arith.constant 0 : index
    %c0_371 = arith.constant 0 : index
    %445 = vector.load %arg16[%c9, %c0_370, %c0_371] : memref<12x256x256xf32, #tpu.memory_space<vmem>>, vector<1x256x256xf32>
    %446 = vector.shape_cast %445 : vector<1x256x256xf32> to vector<256x256xf32>
    %c9_372 = arith.constant 9 : index
    %c0_373 = arith.constant 0 : index
    %c0_374 = arith.constant 0 : index
    %447 = vector.load %arg17[%c9_372, %c0_373, %c0_374] : memref<12x16x16xf32, #tpu.memory_space<vmem>>, vector<1x16x16xf32>
    %448 = vector.shape_cast %447 : vector<1x16x16xf32> to vector<16x16xf32>
    %c9_375 = arith.constant 9 : index
    %c0_376 = arith.constant 0 : index
    %c0_377 = arith.constant 0 : index
    %449 = vector.load %arg18[%c9_375, %c0_376, %c0_377] : memref<12x1x256xf32, #tpu.memory_space<vmem>>, vector<1x1x256xf32>
    %450 = vector.shape_cast %449 : vector<1x1x256xf32> to vector<1x256xf32>
    %cst_378 = arith.constant dense<0.000000e+00> : vector<16x256xf32>
    %451 = tpu.matmul %444, %446, %cst_378 {dimension_numbers = #tpu.dot_dimension_numbers<[1], [0], [0], [1], [0, 0, 1, 1], [], []>} : vector<16x256xf32>, vector<256x256xf32>, vector<16x256xf32> -> vector<16x256xf32>
    %cst_379 = arith.constant dense<0.000000e+00> : vector<16x256xf32>
    %452 = tpu.matmul %448, %451, %cst_379 {dimension_numbers = #tpu.dot_dimension_numbers<[1], [0], [0], [1], [0, 0, 1, 1], [], []>} : vector<16x16xf32>, vector<16x256xf32>, vector<16x256xf32> -> vector<16x256xf32>
    %453 = vector.broadcast %450 : vector<1x256xf32> to vector<16x256xf32>
    %454 = arith.addf %452, %453 : vector<16x256xf32>
    %c9_380 = arith.constant 9 : index
    %c0_381 = arith.constant 0 : index
    %c0_382 = arith.constant 0 : index
    %455 = vector.load %arg19[%c9_380, %c0_381, %c0_382] : memref<12x16x256xf32, #tpu.memory_space<vmem>>, vector<1x16x256xf32>
    %456 = vector.shape_cast %455 : vector<1x16x256xf32> to vector<16x256xf32>
    %457 = arith.mulf %454, %456 : vector<16x256xf32>
    %c9_383 = arith.constant 9 : index
    %c0_384 = arith.constant 0 : index
    %c0_385 = arith.constant 0 : index
    %458 = vector.load %arg20[%c9_383, %c0_384, %c0_385] : memref<12x16x256xf32, #tpu.memory_space<vmem>>, vector<1x16x256xf32>
    %459 = vector.shape_cast %458 : vector<1x16x256xf32> to vector<16x256xf32>
    %460 = arith.addf %457, %459 : vector<16x256xf32>
    %461 = math.tanh %460 : vector<16x256xf32>
    %c9_386 = arith.constant 9 : index
    %c0_387 = arith.constant 0 : index
    %c0_388 = arith.constant 0 : index
    %462 = vector.load %arg21[%c9_386, %c0_387, %c0_388] : memref<12x256x256xf32, #tpu.memory_space<vmem>>, vector<1x256x256xf32>
    %463 = vector.shape_cast %462 : vector<1x256x256xf32> to vector<256x256xf32>
    %c9_389 = arith.constant 9 : index
    %c0_390 = arith.constant 0 : index
    %c0_391 = arith.constant 0 : index
    %464 = vector.load %arg22[%c9_389, %c0_390, %c0_391] : memref<12x16x16xf32, #tpu.memory_space<vmem>>, vector<1x16x16xf32>
    %465 = vector.shape_cast %464 : vector<1x16x16xf32> to vector<16x16xf32>
    %c9_392 = arith.constant 9 : index
    %c0_393 = arith.constant 0 : index
    %c0_394 = arith.constant 0 : index
    %466 = vector.load %arg23[%c9_392, %c0_393, %c0_394] : memref<12x1x256xf32, #tpu.memory_space<vmem>>, vector<1x1x256xf32>
    %467 = vector.shape_cast %466 : vector<1x1x256xf32> to vector<1x256xf32>
    %cst_395 = arith.constant dense<0.000000e+00> : vector<16x256xf32>
    %468 = tpu.matmul %461, %463, %cst_395 {dimension_numbers = #tpu.dot_dimension_numbers<[1], [0], [0], [1], [0, 0, 1, 1], [], []>} : vector<16x256xf32>, vector<256x256xf32>, vector<16x256xf32> -> vector<16x256xf32>
    %cst_396 = arith.constant dense<0.000000e+00> : vector<16x256xf32>
    %469 = tpu.matmul %465, %468, %cst_396 {dimension_numbers = #tpu.dot_dimension_numbers<[1], [0], [0], [1], [0, 0, 1, 1], [], []>} : vector<16x16xf32>, vector<16x256xf32>, vector<16x256xf32> -> vector<16x256xf32>
    %470 = vector.broadcast %467 : vector<1x256xf32> to vector<16x256xf32>
    %471 = arith.addf %469, %470 : vector<16x256xf32>
    %c9_397 = arith.constant 9 : index
    %c0_398 = arith.constant 0 : index
    %c0_399 = arith.constant 0 : index
    %472 = vector.load %arg24[%c9_397, %c0_398, %c0_399] : memref<12x16x256xf32, #tpu.memory_space<vmem>>, vector<1x16x256xf32>
    %473 = vector.shape_cast %472 : vector<1x16x256xf32> to vector<16x256xf32>
    %474 = arith.mulf %471, %473 : vector<16x256xf32>
    %c9_400 = arith.constant 9 : index
    %c0_401 = arith.constant 0 : index
    %c0_402 = arith.constant 0 : index
    %475 = vector.load %arg25[%c9_400, %c0_401, %c0_402] : memref<12x16x256xf32, #tpu.memory_space<vmem>>, vector<1x16x256xf32>
    %476 = vector.shape_cast %475 : vector<1x16x256xf32> to vector<16x256xf32>
    %477 = arith.addf %474, %476 : vector<16x256xf32>
    %478 = math.tanh %477 : vector<16x256xf32>
    %479 = arith.addf %444, %478 : vector<16x256xf32>
    %c10 = arith.constant 10 : index
    %c0_403 = arith.constant 0 : index
    %c0_404 = arith.constant 0 : index
    %480 = vector.load %arg16[%c10, %c0_403, %c0_404] : memref<12x256x256xf32, #tpu.memory_space<vmem>>, vector<1x256x256xf32>
    %481 = vector.shape_cast %480 : vector<1x256x256xf32> to vector<256x256xf32>
    %c10_405 = arith.constant 10 : index
    %c0_406 = arith.constant 0 : index
    %c0_407 = arith.constant 0 : index
    %482 = vector.load %arg17[%c10_405, %c0_406, %c0_407] : memref<12x16x16xf32, #tpu.memory_space<vmem>>, vector<1x16x16xf32>
    %483 = vector.shape_cast %482 : vector<1x16x16xf32> to vector<16x16xf32>
    %c10_408 = arith.constant 10 : index
    %c0_409 = arith.constant 0 : index
    %c0_410 = arith.constant 0 : index
    %484 = vector.load %arg18[%c10_408, %c0_409, %c0_410] : memref<12x1x256xf32, #tpu.memory_space<vmem>>, vector<1x1x256xf32>
    %485 = vector.shape_cast %484 : vector<1x1x256xf32> to vector<1x256xf32>
    %cst_411 = arith.constant dense<0.000000e+00> : vector<16x256xf32>
    %486 = tpu.matmul %479, %481, %cst_411 {dimension_numbers = #tpu.dot_dimension_numbers<[1], [0], [0], [1], [0, 0, 1, 1], [], []>} : vector<16x256xf32>, vector<256x256xf32>, vector<16x256xf32> -> vector<16x256xf32>
    %cst_412 = arith.constant dense<0.000000e+00> : vector<16x256xf32>
    %487 = tpu.matmul %483, %486, %cst_412 {dimension_numbers = #tpu.dot_dimension_numbers<[1], [0], [0], [1], [0, 0, 1, 1], [], []>} : vector<16x16xf32>, vector<16x256xf32>, vector<16x256xf32> -> vector<16x256xf32>
    %488 = vector.broadcast %485 : vector<1x256xf32> to vector<16x256xf32>
    %489 = arith.addf %487, %488 : vector<16x256xf32>
    %c10_413 = arith.constant 10 : index
    %c0_414 = arith.constant 0 : index
    %c0_415 = arith.constant 0 : index
    %490 = vector.load %arg19[%c10_413, %c0_414, %c0_415] : memref<12x16x256xf32, #tpu.memory_space<vmem>>, vector<1x16x256xf32>
    %491 = vector.shape_cast %490 : vector<1x16x256xf32> to vector<16x256xf32>
    %492 = arith.mulf %489, %491 : vector<16x256xf32>
    %c10_416 = arith.constant 10 : index
    %c0_417 = arith.constant 0 : index
    %c0_418 = arith.constant 0 : index
    %493 = vector.load %arg20[%c10_416, %c0_417, %c0_418] : memref<12x16x256xf32, #tpu.memory_space<vmem>>, vector<1x16x256xf32>
    %494 = vector.shape_cast %493 : vector<1x16x256xf32> to vector<16x256xf32>
    %495 = arith.addf %492, %494 : vector<16x256xf32>
    %496 = math.tanh %495 : vector<16x256xf32>
    %c10_419 = arith.constant 10 : index
    %c0_420 = arith.constant 0 : index
    %c0_421 = arith.constant 0 : index
    %497 = vector.load %arg21[%c10_419, %c0_420, %c0_421] : memref<12x256x256xf32, #tpu.memory_space<vmem>>, vector<1x256x256xf32>
    %498 = vector.shape_cast %497 : vector<1x256x256xf32> to vector<256x256xf32>
    %c10_422 = arith.constant 10 : index
    %c0_423 = arith.constant 0 : index
    %c0_424 = arith.constant 0 : index
    %499 = vector.load %arg22[%c10_422, %c0_423, %c0_424] : memref<12x16x16xf32, #tpu.memory_space<vmem>>, vector<1x16x16xf32>
    %500 = vector.shape_cast %499 : vector<1x16x16xf32> to vector<16x16xf32>
    %c10_425 = arith.constant 10 : index
    %c0_426 = arith.constant 0 : index
    %c0_427 = arith.constant 0 : index
    %501 = vector.load %arg23[%c10_425, %c0_426, %c0_427] : memref<12x1x256xf32, #tpu.memory_space<vmem>>, vector<1x1x256xf32>
    %502 = vector.shape_cast %501 : vector<1x1x256xf32> to vector<1x256xf32>
    %cst_428 = arith.constant dense<0.000000e+00> : vector<16x256xf32>
    %503 = tpu.matmul %496, %498, %cst_428 {dimension_numbers = #tpu.dot_dimension_numbers<[1], [0], [0], [1], [0, 0, 1, 1], [], []>} : vector<16x256xf32>, vector<256x256xf32>, vector<16x256xf32> -> vector<16x256xf32>
    %cst_429 = arith.constant dense<0.000000e+00> : vector<16x256xf32>
    %504 = tpu.matmul %500, %503, %cst_429 {dimension_numbers = #tpu.dot_dimension_numbers<[1], [0], [0], [1], [0, 0, 1, 1], [], []>} : vector<16x16xf32>, vector<16x256xf32>, vector<16x256xf32> -> vector<16x256xf32>
    %505 = vector.broadcast %502 : vector<1x256xf32> to vector<16x256xf32>
    %506 = arith.addf %504, %505 : vector<16x256xf32>
    %c10_430 = arith.constant 10 : index
    %c0_431 = arith.constant 0 : index
    %c0_432 = arith.constant 0 : index
    %507 = vector.load %arg24[%c10_430, %c0_431, %c0_432] : memref<12x16x256xf32, #tpu.memory_space<vmem>>, vector<1x16x256xf32>
    %508 = vector.shape_cast %507 : vector<1x16x256xf32> to vector<16x256xf32>
    %509 = arith.mulf %506, %508 : vector<16x256xf32>
    %c10_433 = arith.constant 10 : index
    %c0_434 = arith.constant 0 : index
    %c0_435 = arith.constant 0 : index
    %510 = vector.load %arg25[%c10_433, %c0_434, %c0_435] : memref<12x16x256xf32, #tpu.memory_space<vmem>>, vector<1x16x256xf32>
    %511 = vector.shape_cast %510 : vector<1x16x256xf32> to vector<16x256xf32>
    %512 = arith.addf %509, %511 : vector<16x256xf32>
    %513 = math.tanh %512 : vector<16x256xf32>
    %514 = arith.addf %479, %513 : vector<16x256xf32>
    %c11 = arith.constant 11 : index
    %c0_436 = arith.constant 0 : index
    %c0_437 = arith.constant 0 : index
    %515 = vector.load %arg16[%c11, %c0_436, %c0_437] : memref<12x256x256xf32, #tpu.memory_space<vmem>>, vector<1x256x256xf32>
    %516 = vector.shape_cast %515 : vector<1x256x256xf32> to vector<256x256xf32>
    %c11_438 = arith.constant 11 : index
    %c0_439 = arith.constant 0 : index
    %c0_440 = arith.constant 0 : index
    %517 = vector.load %arg17[%c11_438, %c0_439, %c0_440] : memref<12x16x16xf32, #tpu.memory_space<vmem>>, vector<1x16x16xf32>
    %518 = vector.shape_cast %517 : vector<1x16x16xf32> to vector<16x16xf32>
    %c11_441 = arith.constant 11 : index
    %c0_442 = arith.constant 0 : index
    %c0_443 = arith.constant 0 : index
    %519 = vector.load %arg18[%c11_441, %c0_442, %c0_443] : memref<12x1x256xf32, #tpu.memory_space<vmem>>, vector<1x1x256xf32>
    %520 = vector.shape_cast %519 : vector<1x1x256xf32> to vector<1x256xf32>
    %cst_444 = arith.constant dense<0.000000e+00> : vector<16x256xf32>
    %521 = tpu.matmul %514, %516, %cst_444 {dimension_numbers = #tpu.dot_dimension_numbers<[1], [0], [0], [1], [0, 0, 1, 1], [], []>} : vector<16x256xf32>, vector<256x256xf32>, vector<16x256xf32> -> vector<16x256xf32>
    %cst_445 = arith.constant dense<0.000000e+00> : vector<16x256xf32>
    %522 = tpu.matmul %518, %521, %cst_445 {dimension_numbers = #tpu.dot_dimension_numbers<[1], [0], [0], [1], [0, 0, 1, 1], [], []>} : vector<16x16xf32>, vector<16x256xf32>, vector<16x256xf32> -> vector<16x256xf32>
    %523 = vector.broadcast %520 : vector<1x256xf32> to vector<16x256xf32>
    %524 = arith.addf %522, %523 : vector<16x256xf32>
    %c11_446 = arith.constant 11 : index
    %c0_447 = arith.constant 0 : index
    %c0_448 = arith.constant 0 : index
    %525 = vector.load %arg19[%c11_446, %c0_447, %c0_448] : memref<12x16x256xf32, #tpu.memory_space<vmem>>, vector<1x16x256xf32>
    %526 = vector.shape_cast %525 : vector<1x16x256xf32> to vector<16x256xf32>
    %527 = arith.mulf %524, %526 : vector<16x256xf32>
    %c11_449 = arith.constant 11 : index
    %c0_450 = arith.constant 0 : index
    %c0_451 = arith.constant 0 : index
    %528 = vector.load %arg20[%c11_449, %c0_450, %c0_451] : memref<12x16x256xf32, #tpu.memory_space<vmem>>, vector<1x16x256xf32>
    %529 = vector.shape_cast %528 : vector<1x16x256xf32> to vector<16x256xf32>
    %530 = arith.addf %527, %529 : vector<16x256xf32>
    %531 = math.tanh %530 : vector<16x256xf32>
    %c11_452 = arith.constant 11 : index
    %c0_453 = arith.constant 0 : index
    %c0_454 = arith.constant 0 : index
    %532 = vector.load %arg21[%c11_452, %c0_453, %c0_454] : memref<12x256x256xf32, #tpu.memory_space<vmem>>, vector<1x256x256xf32>
    %533 = vector.shape_cast %532 : vector<1x256x256xf32> to vector<256x256xf32>
    %c11_455 = arith.constant 11 : index
    %c0_456 = arith.constant 0 : index
    %c0_457 = arith.constant 0 : index
    %534 = vector.load %arg22[%c11_455, %c0_456, %c0_457] : memref<12x16x16xf32, #tpu.memory_space<vmem>>, vector<1x16x16xf32>
    %535 = vector.shape_cast %534 : vector<1x16x16xf32> to vector<16x16xf32>
    %c11_458 = arith.constant 11 : index
    %c0_459 = arith.constant 0 : index
    %c0_460 = arith.constant 0 : index
    %536 = vector.load %arg23[%c11_458, %c0_459, %c0_460] : memref<12x1x256xf32, #tpu.memory_space<vmem>>, vector<1x1x256xf32>
    %537 = vector.shape_cast %536 : vector<1x1x256xf32> to vector<1x256xf32>
    %cst_461 = arith.constant dense<0.000000e+00> : vector<16x256xf32>
    %538 = tpu.matmul %531, %533, %cst_461 {dimension_numbers = #tpu.dot_dimension_numbers<[1], [0], [0], [1], [0, 0, 1, 1], [], []>} : vector<16x256xf32>, vector<256x256xf32>, vector<16x256xf32> -> vector<16x256xf32>
    %cst_462 = arith.constant dense<0.000000e+00> : vector<16x256xf32>
    %539 = tpu.matmul %535, %538, %cst_462 {dimension_numbers = #tpu.dot_dimension_numbers<[1], [0], [0], [1], [0, 0, 1, 1], [], []>} : vector<16x16xf32>, vector<16x256xf32>, vector<16x256xf32> -> vector<16x256xf32>
    %540 = vector.broadcast %537 : vector<1x256xf32> to vector<16x256xf32>
    %541 = arith.addf %539, %540 : vector<16x256xf32>
    %c11_463 = arith.constant 11 : index
    %c0_464 = arith.constant 0 : index
    %c0_465 = arith.constant 0 : index
    %542 = vector.load %arg24[%c11_463, %c0_464, %c0_465] : memref<12x16x256xf32, #tpu.memory_space<vmem>>, vector<1x16x256xf32>
    %543 = vector.shape_cast %542 : vector<1x16x256xf32> to vector<16x256xf32>
    %544 = arith.mulf %541, %543 : vector<16x256xf32>
    %c11_466 = arith.constant 11 : index
    %c0_467 = arith.constant 0 : index
    %c0_468 = arith.constant 0 : index
    %545 = vector.load %arg25[%c11_466, %c0_467, %c0_468] : memref<12x16x256xf32, #tpu.memory_space<vmem>>, vector<1x16x256xf32>
    %546 = vector.shape_cast %545 : vector<1x16x256xf32> to vector<16x256xf32>
    %547 = arith.addf %544, %546 : vector<16x256xf32>
    %548 = math.tanh %547 : vector<16x256xf32>
    %549 = arith.addf %514, %548 : vector<16x256xf32>
    %c0_469 = arith.constant 0 : index
    %c0_470 = arith.constant 0 : index
    %550 = vector.load %arg26[%c0_469, %c0_470] : memref<256x12xf32, #tpu.memory_space<vmem>>, vector<256x12xf32>
    %c0_471 = arith.constant 0 : index
    %c0_472 = arith.constant 0 : index
    %551 = vector.load %arg27[%c0_471, %c0_472] : memref<16x16xf32, #tpu.memory_space<vmem>>, vector<16x16xf32>
    %c0_473 = arith.constant 0 : index
    %c0_474 = arith.constant 0 : index
    %552 = vector.load %arg28[%c0_473, %c0_474] : memref<1x12xf32, #tpu.memory_space<vmem>>, vector<1x12xf32>
    %cst_475 = arith.constant dense<0.000000e+00> : vector<16x12xf32>
    %553 = tpu.matmul %549, %550, %cst_475 {dimension_numbers = #tpu.dot_dimension_numbers<[1], [0], [0], [1], [0, 0, 1, 1], [], []>} : vector<16x256xf32>, vector<256x12xf32>, vector<16x12xf32> -> vector<16x12xf32>
    %cst_476 = arith.constant dense<0.000000e+00> : vector<16x12xf32>
    %554 = tpu.matmul %551, %553, %cst_476 {dimension_numbers = #tpu.dot_dimension_numbers<[1], [0], [0], [1], [0, 0, 1, 1], [], []>} : vector<16x16xf32>, vector<16x12xf32>, vector<16x12xf32> -> vector<16x12xf32>
    %555 = vector.broadcast %552 : vector<1x12xf32> to vector<16x12xf32>
    %556 = arith.addf %554, %555 : vector<16x12xf32>
    %557 = arith.addf %556, %114 : vector<16x12xf32>
    %c0_477 = arith.constant 0 : index
    %c0_478 = arith.constant 0 : index
    %558 = vector.load %arg5[%c0_477, %c0_478] : memref<8x12xf32, #tpu.memory_space<vmem>>, vector<8x12xf32>
    %cst_479 = arith.constant dense<0.000000e+00> : vector<8x16xf32>
    %559 = tpu.matmul %558, %557, %cst_479 {dimension_numbers = #tpu.dot_dimension_numbers<[1], [1], [0], [0], [0, 0, 1, 0], [], []>} : vector<8x12xf32>, vector<16x12xf32>, vector<8x16xf32> -> vector<8x16xf32>
    %c0_480 = arith.constant 0 : index
    %c0_481 = arith.constant 0 : index
    %c0_482 = arith.constant 0 : index
    %560 = vector.load %arg29[%c0_480, %c0_481, %c0_482] : memref<1x8x16xf32, #tpu.memory_space<vmem>>, vector<1x8x16xf32>
    %561 = vector.shape_cast %560 : vector<1x8x16xf32> to vector<8x16xf32>
    %562 = vector.shape_cast %559 : vector<8x16xf32> to vector<1x8x16xf32>
    tpu.vector_store %arg29[%c0_480, %c0_481, %c0_482], %562 {strides = array<i32>} : memref<1x8x16xf32, #tpu.memory_space<vmem>>, vector<1x8x16xf32>,
    return
  }
  func.func @transform_0(%arg0: i32) -> (i32, i32, i32) {
    %c0_i32 = arith.constant 0 : i32
    %c0_i32_0 = arith.constant 0 : i32
    %c0_i32_1 = arith.constant 0 : i32
    return %arg0, %c0_i32, %c0_i32_0 : i32, i32, i32
  }
  func.func @transform_1(%arg0: i32) -> (i32, i32, i32) {
    %c0_i32 = arith.constant 0 : i32
    %c0_i32_0 = arith.constant 0 : i32
    %c0_i32_1 = arith.constant 0 : i32
    return %arg0, %c0_i32, %c0_i32_0 : i32, i32, i32
  }
  func.func @transform_2(%arg0: i32) -> (i32, i32) {
    %c0_i32 = arith.constant 0 : i32
    %c0_i32_0 = arith.constant 0 : i32
    %c0_i32_1 = arith.constant 0 : i32
    return %c0_i32, %c0_i32_0 : i32, i32
  }
  func.func @transform_3(%arg0: i32) -> (i32, i32) {
    %c0_i32 = arith.constant 0 : i32
    %c0_i32_0 = arith.constant 0 : i32
    %c0_i32_1 = arith.constant 0 : i32
    return %c0_i32, %c0_i32_0 : i32, i32
  }
  func.func @transform_4(%arg0: i32) -> (i32, i32) {
    %c0_i32 = arith.constant 0 : i32
    %c0_i32_0 = arith.constant 0 : i32
    %c0_i32_1 = arith.constant 0 : i32
    return %c0_i32, %c0_i32_0 : i32, i32
  }
  func.func @transform_5(%arg0: i32) -> (i32, i32, i32) {
    %c0_i32 = arith.constant 0 : i32
    %c0_i32_0 = arith.constant 0 : i32
    %c0_i32_1 = arith.constant 0 : i32
    %c0_i32_2 = arith.constant 0 : i32
    return %c0_i32, %c0_i32_0, %c0_i32_1 : i32, i32, i32
  }
  func.func @transform_6(%arg0: i32) -> (i32, i32, i32) {
    %c0_i32 = arith.constant 0 : i32
    %c0_i32_0 = arith.constant 0 : i32
    %c0_i32_1 = arith.constant 0 : i32
    %c0_i32_2 = arith.constant 0 : i32
    return %c0_i32, %c0_i32_0, %c0_i32_1 : i32, i32, i32
  }
  func.func @transform_7(%arg0: i32) -> (i32, i32, i32) {
    %c0_i32 = arith.constant 0 : i32
    %c0_i32_0 = arith.constant 0 : i32
    %c0_i32_1 = arith.constant 0 : i32
    %c0_i32_2 = arith.constant 0 : i32
    return %c0_i32, %c0_i32_0, %c0_i32_1 : i32, i32, i32
  }
  func.func @transform_8(%arg0: i32) -> (i32, i32, i32) {
    %c0_i32 = arith.constant 0 : i32
    %c0_i32_0 = arith.constant 0 : i32
    %c0_i32_1 = arith.constant 0 : i32
    %c0_i32_2 = arith.constant 0 : i32
    return %c0_i32, %c0_i32_0, %c0_i32_1 : i32, i32, i32
  }
  func.func @transform_9(%arg0: i32) -> (i32, i32) {
    %c0_i32 = arith.constant 0 : i32
    %c0_i32_0 = arith.constant 0 : i32
    %c0_i32_1 = arith.constant 0 : i32
    return %c0_i32, %c0_i32_0 : i32, i32
  }
  func.func @transform_10(%arg0: i32) -> (i32, i32) {
    %c0_i32 = arith.constant 0 : i32
    %c0_i32_0 = arith.constant 0 : i32
    %c0_i32_1 = arith.constant 0 : i32
    return %c0_i32, %c0_i32_0 : i32, i32
  }
  func.func @transform_11(%arg0: i32) -> (i32, i32) {
    %c0_i32 = arith.constant 0 : i32
    %c0_i32_0 = arith.constant 0 : i32
    %c0_i32_1 = arith.constant 0 : i32
    return %c0_i32, %c0_i32_0 : i32, i32
  }
  func.func @transform_12(%arg0: i32) -> (i32, i32) {
    %c0_i32 = arith.constant 0 : i32
    %c0_i32_0 = arith.constant 0 : i32
    %c0_i32_1 = arith.constant 0 : i32
    return %c0_i32, %c0_i32_0 : i32, i32
  }
  func.func @transform_13(%arg0: i32) -> (i32, i32) {
    %c0_i32 = arith.constant 0 : i32
    %c0_i32_0 = arith.constant 0 : i32
    %c0_i32_1 = arith.constant 0 : i32
    return %c0_i32, %c0_i32_0 : i32, i32
  }
  func.func @transform_14(%arg0: i32) -> (i32, i32) {
    %c0_i32 = arith.constant 0 : i32
    %c0_i32_0 = arith.constant 0 : i32
    %c0_i32_1 = arith.constant 0 : i32
    return %c0_i32, %c0_i32_0 : i32, i32
  }
  func.func @transform_15(%arg0: i32) -> (i32, i32, i32) {
    %c0_i32 = arith.constant 0 : i32
    %c0_i32_0 = arith.constant 0 : i32
    %c0_i32_1 = arith.constant 0 : i32
    %c0_i32_2 = arith.constant 0 : i32
    return %c0_i32, %c0_i32_0, %c0_i32_1 : i32, i32, i32
  }
  func.func @transform_16(%arg0: i32) -> (i32, i32, i32) {
    %c0_i32 = arith.constant 0 : i32
    %c0_i32_0 = arith.constant 0 : i32
    %c0_i32_1 = arith.constant 0 : i32
    %c0_i32_2 = arith.constant 0 : i32
    return %c0_i32, %c0_i32_0, %c0_i32_1 : i32, i32, i32
  }
  func.func @transform_17(%arg0: i32) -> (i32, i32, i32) {
    %c0_i32 = arith.constant 0 : i32
    %c0_i32_0 = arith.constant 0 : i32
    %c0_i32_1 = arith.constant 0 : i32
    %c0_i32_2 = arith.constant 0 : i32
    return %c0_i32, %c0_i32_0, %c0_i32_1 : i32, i32, i32
  }
  func.func @transform_18(%arg0: i32) -> (i32, i32, i32) {
    %c0_i32 = arith.constant 0 : i32
    %c0_i32_0 = arith.constant 0 : i32
    %c0_i32_1 = arith.constant 0 : i32
    %c0_i32_2 = arith.constant 0 : i32
    return %c0_i32, %c0_i32_0, %c0_i32_1 : i32, i32, i32
  }
  func.func @transform_19(%arg0: i32) -> (i32, i32, i32) {
    %c0_i32 = arith.constant 0 : i32
    %c0_i32_0 = arith.constant 0 : i32
    %c0_i32_1 = arith.constant 0 : i32
    %c0_i32_2 = arith.constant 0 : i32
    return %c0_i32, %c0_i32_0, %c0_i32_1 : i32, i32, i32
  }
  func.func @transform_20(%arg0: i32) -> (i32, i32, i32) {
    %c0_i32 = arith.constant 0 : i32
    %c0_i32_0 = arith.constant 0 : i32
    %c0_i32_1 = arith.constant 0 : i32
    %c0_i32_2 = arith.constant 0 : i32
    return %c0_i32, %c0_i32_0, %c0_i32_1 : i32, i32, i32
  }
  func.func @transform_21(%arg0: i32) -> (i32, i32, i32) {
    %c0_i32 = arith.constant 0 : i32
    %c0_i32_0 = arith.constant 0 : i32
    %c0_i32_1 = arith.constant 0 : i32
    %c0_i32_2 = arith.constant 0 : i32
    return %c0_i32, %c0_i32_0, %c0_i32_1 : i32, i32, i32
  }
  func.func @transform_22(%arg0: i32) -> (i32, i32, i32) {
    %c0_i32 = arith.constant 0 : i32
    %c0_i32_0 = arith.constant 0 : i32
    %c0_i32_1 = arith.constant 0 : i32
    %c0_i32_2 = arith.constant 0 : i32
    return %c0_i32, %c0_i32_0, %c0_i32_1 : i32, i32, i32
  }
  func.func @transform_23(%arg0: i32) -> (i32, i32, i32) {
    %c0_i32 = arith.constant 0 : i32
    %c0_i32_0 = arith.constant 0 : i32
    %c0_i32_1 = arith.constant 0 : i32
    %c0_i32_2 = arith.constant 0 : i32
    return %c0_i32, %c0_i32_0, %c0_i32_1 : i32, i32, i32
  }
  func.func @transform_24(%arg0: i32) -> (i32, i32, i32) {
    %c0_i32 = arith.constant 0 : i32
    %c0_i32_0 = arith.constant 0 : i32
    %c0_i32_1 = arith.constant 0 : i32
    %c0_i32_2 = arith.constant 0 : i32
    return %c0_i32, %c0_i32_0, %c0_i32_1 : i32, i32, i32
  }
  func.func @transform_25(%arg0: i32) -> (i32, i32) {
    %c0_i32 = arith.constant 0 : i32
    %c0_i32_0 = arith.constant 0 : i32
    %c0_i32_1 = arith.constant 0 : i32
    return %c0_i32, %c0_i32_0 : i32, i32
  }
  func.func @transform_26(%arg0: i32) -> (i32, i32) {
    %c0_i32 = arith.constant 0 : i32
    %c0_i32_0 = arith.constant 0 : i32
    %c0_i32_1 = arith.constant 0 : i32
    return %c0_i32, %c0_i32_0 : i32, i32
  }
  func.func @transform_27(%arg0: i32) -> (i32, i32) {
    %c0_i32 = arith.constant 0 : i32
    %c0_i32_0 = arith.constant 0 : i32
    %c0_i32_1 = arith.constant 0 : i32
    return %c0_i32, %c0_i32_0 : i32, i32
  }
  func.func @transform_28(%arg0: i32) -> (i32, i32, i32) {
    %c0_i32 = arith.constant 0 : i32
    %c0_i32_0 = arith.constant 0 : i32
    %c0_i32_1 = arith.constant 0 : i32
    return %arg0, %c0_i32, %c0_i32_0 : i32, i32, i32
  }
}

</mosaic_0001>

<bundles_post_ra>
// kernel: dct_att_gcn_forward.1
= control target key start
LH: loop header
LB: loop body
LE: loop exit
PB: predicated region body
PF: predicated region fallthrough
CT: control target
= control target key end

     0   :  { %s12208_s0 = inlined_call_operand.vmem [shape: f32[2,20,16], index: 0, kind: input, shape index: {}]   ;;  %s12209_s1 = inlined_call_operand.hbm [shape: f32[2,16,20], index: 1, kind: input, shape index: {}]   ;;  %s12210_s2 = inlined_call_operand.vmem [shape: f32[12,12], index: 2, kind: input, shape index: {}]   ;;  %s12211_s3 = inlined_call_operand.vmem [shape: f32[20,12], index: 3, kind: input, shape index: {}]   ;;  %s12212_s4 = inlined_call_operand.vmem [shape: f32[8,12], index: 4, kind: input, shape index: {}]   ;;  %s12213_s5 = inlined_call_operand.hbm [shape: f32[3,16,256], index: 5, kind: input, shape index: {}]   ;;  %s12214_s6 = inlined_call_operand.vmem [shape: f32[2,256,256], index: 6, kind: input, shape index: {}]   ;;  %s12215_s7 = inlined_call_operand.hbm [shape: f32[3,16,256], index: 7, kind: input, shape index: {}]   ;;  %s12216_s8 = inlined_call_operand.vmem [shape: f32[2,256,256], index: 8, kind: input, shape index: {}]   ;;  %s12217_s9 = inlined_call_operand.vmem [shape: f32[12,256], index: 9, kind: input, shape index: {}]   ;;  %s12218_s10 = inlined_call_operand.vmem [shape: f32[12,256], index: 10, kind: input, shape index: {}]   ;;  %s12219_s11 = inlined_call_operand.hbm [shape: f32[16,16], index: 11, kind: input, shape index: {}]   ;;  %s12220_s12 = inlined_call_operand.hbm [shape: f32[1,256], index: 12, kind: input, shape index: {}]   ;;  %s12221_s13 = inlined_call_operand.hbm [shape: f32[16,256], index: 13, kind: input, shape index: {}]   ;;  %s12222_s14 = inlined_call_operand.hbm [shape: f32[16,256], index: 14, kind: input, shape index: {}]   ;;  %s12223_s15 = inlined_call_operand.hbm [shape: f32[12,256,256], index: 15, kind: input, shape index: {}]   ;;  %s12224_s16 = inlined_call_operand.hbm [shape: f32[12,16,16], index: 16, kind: input, shape index: {}]   ;;  %s12225_s17 = inlined_call_operand.hbm [shape: f32[12,1,256], index: 17, kind: input, shape index: {}]   ;;  %s12226_s18 = inlined_call_operand.hbm [shape: f32[12,16,256], index: 18, kind: input, shape index: {}]   ;;  %s12227_s19 = inlined_call_operand.hbm [shape: f32[12,16,256], index: 19, kind: input, shape index: {}]   ;;  %s12228_s20 = inlined_call_operand.hbm [shape: f32[12,256,256], index: 20, kind: input, shape index: {}]   ;;  %s12229_s21 = inlined_call_operand.hbm [shape: f32[12,16,16], index: 21, kind: input, shape index: {}]   ;;  %s12230_s22 = inlined_call_operand.hbm [shape: f32[12,1,256], index: 22, kind: input, shape index: {}]   ;;  %s12231_s23 = inlined_call_operand.hbm [shape: f32[12,16,256], index: 23, kind: input, shape index: {}]   ;;  %s12232_s24 = inlined_call_operand.hbm [shape: f32[12,16,256], index: 24, kind: input, shape index: {}]   ;;  %s12233_s25 = inlined_call_operand.vmem [shape: f32[256,12], index: 25, kind: input, shape index: {}]   ;;  %s12234_s26 = inlined_call_operand.hbm [shape: f32[16,16], index: 26, kind: input, shape index: {}]   ;;  %s12235_s27 = inlined_call_operand.hbm [shape: f32[1,12], index: 27, kind: input, shape index: {}]   ;;  %s12236_s28 = inlined_call_operand.hbm [shape: f32[2,8,16], index: 28, kind: output, shape index: {}]  }
   0x1   :  { %12264 = sst [smem:[#allocation48_spill]] %s12208_s0 }
   0x2   :  { %12265 = sst [smem:[#allocation49_spill]] %s12209_s1 }
   0x3   :  { %12266 = sst [smem:[#allocation50_spill]] %s12210_s2 }
   0x4   :  { %12267 = sst [smem:[#allocation51_spill]] %s12211_s3 }
   0x5   :  { %12268 = sst [smem:[#allocation52_spill]] %s12212_s4 }
   0x6   :  { %12269 = sst [smem:[#allocation53_spill]] %s12213_s5 }
   0x7   :  { %12270 = sst [smem:[#allocation54_spill]] %s12214_s6 }
   0x8   :  { %12271 = sst [smem:[#allocation55_spill]] %s12215_s7 }
   0x9   :  { %12272 = sst [smem:[#allocation56_spill]] %s12216_s8 }
   0xa   :  { %12273 = sst [smem:[#allocation57_spill]] %s12217_s9 }
   0xb   :  { %12274 = sst [smem:[#allocation58_spill]] %s12218_s10 }
   0xc   :  { %12275 = sst [smem:[#allocation59_spill]] %s12219_s11 }
   0xd   :  { %12276 = sst [smem:[#allocation60_spill]] %s12220_s12 }
   0xe   :  { %12277 = sst [smem:[#allocation61_spill]] %s12221_s13 }
   0xf   :  { %12278 = sst [smem:[#allocation62_spill]] %s12222_s14 }
  0x10   :  { %12279 = sst [smem:[#allocation63_spill]] %s12223_s15 }
  0x11   :  { %12280 = sst [smem:[#allocation64_spill]] %s12224_s16 }
  0x12   :  { %12281 = sst [smem:[#allocation65_spill]] %s12225_s17 }
  0x13   :  { %12282 = sst [smem:[#allocation66_spill]] %s12226_s18 }
  0x14   :  { %12283 = sst [smem:[#allocation67_spill]] %s12233_s25 }
  0x15   :  { %12284 = sst [smem:[#allocation68_spill]] %s12235_s27 }
  0x16   :  { %12285 = sst [smem:[#allocation69_spill]] %s12236_s28 }
  0x17   :  { %33 = vsyncpa [#allocation3], 0 }
  0x18   :  { %35 = vsyncpa [#allocation3 + $0x1], 0 }
  0x19   :  { %36 = vsyncpa [#allocation6], 0 }
  0x1a   :  { %37 = vsyncpa [#allocation9], 0 }
  0x1b   :  { %38 = vsyncpa [#allocation12], 0 }
  0x1c   :  { %39 = vsyncpa [#allocation15], 0 }
  0x1d   :  { %40 = vsyncpa [#allocation18], 0 }
  0x1e   :  { %41 = vsyncpa [#allocation21], 0 }
  0x1f   :  { %42 = vsyncpa [#allocation24], 0 }
  0x20   :  { %43 = vsyncpa [#allocation27], 0 }
  0x21   :  { %44 = vsyncpa [#allocation30], 0 }
  0x22   :  { %45 = vsyncpa [#allocation4], 0 }
  0x23   :  { %47 = vsyncpa [#allocation4 + $0x1], 0  ;;  %s10492_s8 = smov 0   ;;  %s10494_s5 = smov 0  }
  0x24   :  { %s10496_s9 = smov 0   ;;  %s10498_s30 = smov 0  }
  0x25 LB: > { %12286 = sst [smem:[#allocation44_spill]] %s10301_s8  ;;  %s10516_s11 = sadd.s32 4294967295, %s10313_s30   ;;  %s10313_s30 = sphi %s10498_s30, %s12337_s30   ;;  %s10309_s9 = sphi %s10496_s9, %s12336_s9   ;;  %s10305_s5 = sphi %s10494_s5, %s12335_s5   ;;  %s10301_s8 = sphi %s10492_s8, %s12334_s8  }
  0x26   : > { %12287 = sst [smem:[#allocation45_spill]] %s10305_s5  ;;  %p8857_p0 = scmp.ge.s32.totalorder %s10313_s30, 1 }
  0x27   : > { %s12288_s10 = sld [smem:[#allocation53_spill]]  ;;  %p100_p1 = scmp.eq.s32.totalorder %s10516_s11, 0 }
  0x28   : > { %12289 = sst [smem:[#allocation46_spill]] %s10516_s11  ;;  %p682_p2 = scmp.lt.s32.totalorder %s10313_s30, 3 }
  0x29   : > { %s10315_s2 = smov [#allocation5]   ;;  %s12292_s4 = sld [smem:[#allocation59_spill]] }
  0x2a   : > { %p10521_p3 = pnand %p8857_p0, %p682_p2  ;;  %s704_s7 = sshll.u32 %s10315_s2, 4  ;;  %s705_s7 = int_to_ptr.vmem [resolvable:$true] %s704_s7 }
  0x2b   : > { %s10317_s2 = smov 256   ;;  %s10318_s25 = smov 16  }
  0x2c   : > { %s12290_s29 = scalar_select %p10521_p3, 1, 0 }
  0x2d   : > { %s702_s0 = sshll.u32 %s12288_s10, 4  ;;  %p9273_p4 = pneg %p10521_p3  ;;  %s703_s0 = int_to_ptr.hbm [resolvable:$true] %s702_s0 }
  0x2e   : > { %12291 = sst [smem:[#allocation47_spill]] %s12290_s29  ;;  %s10316_s10 = smov [#allocation8]  }
  0x2f   : > { %s742_s3 = sshll.u32 %s12292_s4, 4  ;;  %p10533_p6 = pnand %p9273_p4, %p100_p1  ;;  %s743_s3 = int_to_ptr.hbm [resolvable:$true] %s742_s3 }
  0x30   : > { %s744_s28 = sshll.u32 %s10316_s10, 4  ;;  %s12251_s12 = smov 128   ;;  %s745_s28 = int_to_ptr.vmem [resolvable:$true] %s744_s28 }
  0x31   : > { %9276 = dma.hbm_to_vmem [thread:$0]  (!%p10533_p6), %s703_s0, 1536, %s705_s7, [#allocation6], %s10317_s2, %s10317_s2, %s10318_s25  }
  0x32   : > { %s12253_s1 = smov 8   ;;  %s12294_s13 = sld [smem:[#allocation61_spill]] }
  0x33   : > { %9282 = dma.hbm_to_vmem [thread:$0]  (!%p10533_p6), %s743_s3, 256, %s745_s28, [#allocation9], %s12251_s12, %s12251_s12, %s12253_s1  }
  0x34   : > { %s10321_s11 = smov [#allocation11]   ;;  %s12295_s15 = sld [smem:[#allocation63_spill]] }
  0x35   : > { %s770_s8 = sshll.u32 %s10321_s11, 4  ;;  %s10322_s28 = smov [#allocation14]   ;;  %s771_s8 = int_to_ptr.vmem [resolvable:$true] %s770_s8 }
  0x36   : > { %s798_s7 = sshll.u32 %s10322_s28, 4  ;;  %s12296_s17 = sld [smem:[#allocation65_spill]]  ;;  %s799_s7 = int_to_ptr.vmem [resolvable:$true] %s798_s7 }
  0x37   : > { %s10323_s27 = smov [#allocation17]   ;;  %s12255_s28 = smov 32  }
  0x38   : > { %s768_s10 = sshll.u32 %s12294_s13, 4  ;;  %s826_s5 = sshll.u32 %s10323_s27, 4  ;;  %s769_s10 = int_to_ptr.hbm [resolvable:$true] %s768_s10  ;;  %s827_s5 = int_to_ptr.vmem [resolvable:$true] %s826_s5 }
  0x39   : > { %9288 = dma.hbm_to_vmem [thread:$0]  (!%p10533_p6), %s769_s10, 512, %s771_s8, [#allocation12], %s10317_s2, %s10317_s2, %s10318_s25  }
  0x3a   : > { %s796_s0 = sshll.u32 %s12295_s15, 4  ;;  %s852_s10 = sshll.u32 %s12227_s19, 4  ;;  %s797_s0 = int_to_ptr.hbm [resolvable:$true] %s796_s0  ;;  %s853_s10 = int_to_ptr.hbm [resolvable:$true] %s852_s10 }
  0x3b   : > { %9294 = dma.hbm_to_vmem [thread:$0]  (!%p10533_p6), %s797_s0, 98304, %s799_s7, [#allocation15], %s10317_s2, %s10317_s2, %s10318_s25  }
  0x3c   : > { %s824_s4 = sshll.u32 %s12296_s17, 4  ;;  %s12256_s12 = smov 2   ;;  %s825_s4 = int_to_ptr.hbm [resolvable:$true] %s824_s4 }
  0x3d   : > { %9300 = dma.hbm_to_vmem [thread:$0]  (!%p10533_p6), %s825_s4, 384, %s827_s5, [#allocation18], %s12255_s28, %s12255_s28, %s12256_s12  }
  0x3e   : > { %s10326_s3 = smov [#allocation20]   ;;  %s880_s7 = sshll.u32 %s12229_s21, 4  ;;  %s881_s7 = int_to_ptr.hbm [resolvable:$true] %s880_s7 }
  0x3f   : > { %s854_s29 = sshll.u32 %s10326_s3, 4  ;;  %s908_s8 = sshll.u32 %s12231_s23, 4  ;;  %s855_s29 = int_to_ptr.vmem [resolvable:$true] %s854_s29  ;;  %s909_s8 = int_to_ptr.hbm [resolvable:$true] %s908_s8 }
  0x40   : > { %9306 = dma.hbm_to_vmem [thread:$0]  (!%p10533_p6), %s853_s10, 6144, %s855_s29, [#allocation21], %s10317_s2, %s10317_s2, %s10318_s25  }
  0x41   : > { %s10327_s4 = smov [#allocation23]   ;;  %s12297_s1 = smov 8  }
  0x42   : > { %s882_s5 = sshll.u32 %s10327_s4, 4  ;;  %s12298_s3 = smov 128   ;;  %s883_s5 = int_to_ptr.vmem [resolvable:$true] %s882_s5 }
  0x43   : > { %9312 = dma.hbm_to_vmem [thread:$0]  (!%p10533_p6), %s881_s7, 3072, %s883_s5, [#allocation24], %s12298_s3, %s12298_s3, %s12297_s1  }
  0x44   : > { %s10328_s0 = smov [#allocation26]   ;;  %s939_s10 = sshll.u32 %s12234_s26, 4  ;;  %s940_s10 = int_to_ptr.hbm [resolvable:$true] %s939_s10 }
  0x45   : > { %s910_s28 = sshll.u32 %s10328_s0, 4  ;;  %s12299_s11 = sld [smem:[#allocation55_spill]]  ;;  %s911_s28 = int_to_ptr.vmem [resolvable:$true] %s910_s28 }
  0x46   : > { %9318 = dma.hbm_to_vmem [thread:$0]  (!%p10533_p6), %s909_s8, 6144, %s911_s28, [#allocation27], %s10317_s2, %s10317_s2, %s10318_s25  }
  0x47   : > { %s10329_s15 = smov [#allocation29]   ;;  %s10330_s13 = smov [#allocation7]  }
  0x48   : > { %s941_s7 = sshll.u32 %s10329_s15, 4  ;;  %s721_s12 = sshll.u32 %s10330_s13, 4  ;;  %s942_s7 = int_to_ptr.vmem [resolvable:$true] %s941_s7  ;;  %s722_s12 = int_to_ptr.vmem [resolvable:$true] %s721_s12 }
  0x49   : > { %9324 = dma.hbm_to_vmem [thread:$0]  (!%p10533_p6), %s940_s10, 256, %s942_s7, [#allocation30], %s12298_s3, %s12298_s3, %s12297_s1  }
  0x4a   : > { %s12300_s17 = sld [smem:[#allocation60_spill]]  ;;  %s10331_s27 = smov [#allocation10]  }
  0x4b   : > { %s719_s4 = sshll.u32 %s12299_s11, 4  ;;  %s12301_s14 = sld [smem:[#allocation62_spill]]  ;;  %s720_s4 = int_to_ptr.hbm [resolvable:$true] %s719_s4 }
  0x4c   : > { %9279 = dma.hbm_to_vmem [thread:$0]  (!%p10533_p6), %s720_s4, 1536, %s722_s12, [#allocation6], %s10317_s2, %s10317_s2, %s10318_s25  }
  0x4d   : > { %s759_s10 = sshll.u32 %s10331_s27, 4  ;;  %s10332_s11 = smov [#allocation13]   ;;  %s760_s10 = int_to_ptr.vmem [resolvable:$true] %s759_s10 }
  0x4e   : > { %s12302_s16 = sld [smem:[#allocation64_spill]]  ;;  %s10333_s15 = smov [#allocation16]  }
  0x4f   : > { %s12303_s18 = sld [smem:[#allocation66_spill]]  ;;  %s10334_s8 = smov [#allocation19]  }
  0x50   : > { %s757_s28 = sshll.u32 %s12300_s17, 4  ;;  %s784_s17 = sshll.u32 %s10332_s11, 4  ;;  %s758_s28 = int_to_ptr.hbm [resolvable:$true] %s757_s28  ;;  %s785_s17 = int_to_ptr.vmem [resolvable:$true] %s784_s17 }
  0x51   : > { %s782_s29 = sshll.u32 %s12301_s14, 4  ;;  %s840_s27 = sshll.u32 %s10334_s8, 4  ;;  %s783_s29 = int_to_ptr.hbm [resolvable:$true] %s782_s29  ;;  %s841_s27 = int_to_ptr.vmem [resolvable:$true] %s840_s27 }
  0x52   : > { %9285 = dma.hbm_to_vmem [thread:$0]  (!%p10533_p6), %s758_s28, 32, %s760_s10, [#allocation9]  }
  0x53   : > { %9291 = dma.hbm_to_vmem [thread:$0]  (!%p10533_p6), %s783_s29, 512, %s785_s17, [#allocation12], %s10317_s2, %s10317_s2, %s10318_s25  }
  0x54   : > { %s810_s5 = sshll.u32 %s12302_s16, 4  ;;  %s812_s28 = sshll.u32 %s10333_s15, 4  ;;  %s811_s5 = int_to_ptr.hbm [resolvable:$true] %s810_s5  ;;  %s813_s28 = int_to_ptr.vmem [resolvable:$true] %s812_s28 }
  0x55   : > { %s838_s0 = sshll.u32 %s12303_s18, 4  ;;  %s866_s29 = sshll.u32 %s12228_s20, 4  ;;  %s839_s0 = int_to_ptr.hbm [resolvable:$true] %s838_s0  ;;  %s867_s29 = int_to_ptr.hbm [resolvable:$true] %s866_s29 }
  0x56   : > { %9297 = dma.hbm_to_vmem [thread:$0]  (!%p10533_p6), %s811_s5, 3072, %s813_s28, [#allocation15], %s12298_s3, %s12298_s3, %s12297_s1  }
  0x57   : > { %9303 = dma.hbm_to_vmem [thread:$0]  (!%p10533_p6), %s839_s0, 6144, %s841_s27, [#allocation18], %s10317_s2, %s10317_s2, %s10318_s25  }
  0x58   : > { %s894_s13 = sshll.u32 %s12230_s22, 4  ;;  %s10335_s4 = smov [#allocation22]   ;;  %s895_s13 = int_to_ptr.hbm [resolvable:$true] %s894_s13 }
  0x59   : > { %s868_s5 = sshll.u32 %s10335_s4, 4  ;;  %s10336_s12 = smov [#allocation25]   ;;  %s869_s5 = int_to_ptr.vmem [resolvable:$true] %s868_s5 }
  0x5a   : > { %9309 = dma.hbm_to_vmem [thread:$0]  (!%p10533_p6), %s867_s29, 98304, %s869_s5, [#allocation21], %s10317_s2, %s10317_s2, %s10318_s25  }
  0x5b   : > { %s896_s15 = sshll.u32 %s10336_s12, 4  ;;  %s922_s8 = sshll.u32 %s12232_s24, 4  ;;  %s897_s15 = int_to_ptr.vmem [resolvable:$true] %s896_s15  ;;  %s923_s8 = int_to_ptr.hbm [resolvable:$true] %s922_s8 }
  0x5c   : > { %s12304_s27 = smov 2   ;;  %s12305_s10 = smov 32  }
  0x5d   : > { %9315 = dma.hbm_to_vmem [thread:$0]  (!%p10533_p6), %s895_s13, 384, %s897_s15, [#allocation24], %s12305_s10, %s12305_s10, %s12304_s27  }
  0x5e   : > { %s12306_s17 = sld [smem:[#allocation68_spill]]  ;;  %s10337_s5 = smov [#allocation28]  }
  0x5f   : > { %s12307_s7 = sld [smem:[#allocation45_spill]]  ;;  %s924_s28 = sshll.u32 %s10337_s5, 4  ;;  %s925_s28 = int_to_ptr.vmem [resolvable:$true] %s924_s28 }
  0x60   : > { %s12308_s12 = sld [smem:[#allocation44_spill]]  ;;  %s10338_s13 = smov [#allocation31]  }
  0x61   : > { %s12309_s0 = sld [smem:[#allocation46_spill]]  ;;  %s956_s15 = sshll.u32 %s10338_s13, 4  ;;  %s957_s15 = int_to_ptr.vmem [resolvable:$true] %s956_s15 }
  0x62   : > { %9321 = dma.hbm_to_vmem [thread:$0]  (!%p10533_p6), %s923_s8, 6144, %s925_s28, [#allocation27], %s10317_s2, %s10317_s2, %s10318_s25  }
  0x63   : > { %s8856_s27 = sadd.s32 4294967294, %s10313_s30   ;;  %s10671_s10 = sadd.s32 1, %s10313_s30  }
  0x64   : > { %s954_s4 = sshll.u32 %s12306_s17, 4  ;;  %s83_s11 = ssub.s32 %s10313_s30, %s10671_s10  ;;  %s955_s4 = int_to_ptr.hbm [resolvable:$true] %s954_s4 }
  0x65   : > { %9327 = dma.hbm_to_vmem [thread:$0]  (!%p10533_p6), %s955_s4, 16, %s957_s15, [#allocation30]  }
  0x66   : > { %s86_s29 = sadd.s32 1, %s10309_s9  ;;  %p84_p7 = scmp.eq.s32.totalorder %s83_s11, 0 }
  0x67   : > { %p93_p8 = scmp.ne.s32.totalorder %s10309_s9, %s12307_s7  ;;  %p94_p9 = scmp.eq.s32.totalorder %s10313_s30, 0 }
  0x68   : > { %p99_p10 = scmp.ne.s32.totalorder %s12307_s7, %s12308_s12  ;;  %p669_p13 = scmp.eq.s32.totalorder %s12309_s0, 1 }
  0x69   : > { %s10682_s25 = scalar_select %p84_p7, %s10309_s9, %s86_s29  }
  0x6a   : > { %p10684_p11 = por %p94_p9, %p93_p8  ;;  %p10690_p12 = por %p100_p1, %p99_p10 }
  0x6b   : > { %p675_p0 = scmp.eq.s32.totalorder %s8856_s27, 1  ;;  %p9354_p2 = scmp.lt.s32.totalorder %s10313_s30, 2 }
  0x6c   : > { %s975_s8 = sand.u32 1, %s10309_s9   ;;  %p10697_p4 = por %p669_p13, %p93_p8 }
  0x6d   : > { %p10701_p6 = por %p675_p0, %p99_p10  ;;  %s8877_s4 = sshll.u32 %s975_s8, 4 }
  0x6e   : > { %s9175_s5 = sshll.u32 %s10313_s30, 4  ;;  %s12314_s13 = sld [smem:[#allocation49_spill]] }
  0x6f   : > { %s979_s11 = scalar_lea.vmem [#allocation2], %s8877_s4  ;;  %p10711_p7 = pnand %p9354_p2, %p10684_p11 }
  0x70   : > { %s987_s29 = sshll.u32 %s979_s11, 4  ;;  %s976_s14 = scalar_lea.sflag [#allocation3], %s975_s8  ;;  %s988_s29 = int_to_ptr.vmem [resolvable:$true] %s987_s29 }
  0x71   : > { %p10185_p9 = pneg %p10711_p7 }
  0x74   : > { %s984_s15 = scalar_lea.hbm %s12314_s13, %s9175_s5  ;;  %s10188_s12 = scalar_lea.hbm %s12314_s13, 32 }
  0x75   : > { %s985_s0 = sshll.u32 %s984_s15, 4  ;;  %s986_s0 = int_to_ptr.hbm [resolvable:$true] %s985_s0 }
  0x76   : > { %s10181_s16 = sshra.s32 %s986_s0, 4  ;;  %s10182_s16 = int_to_ptr.hbm [resolvable:$true] %s10181_s16 }
  0x77   : > { %s10183_s18 = scalar_lea.hbm %s10182_s16, 16  ;;  %p10189_p11 = scmp.lt.s32.totalorder %s10182_s16, %s12314_s13 }
  0x78   : > { %p10184_p8 = scmp.ne.s32.totalorder %s10182_s16, %s10183_s18  ;;  %p10190_p0 = scmp.lt.s32.totalorder %s10188_s12, %s10183_s18 }
  0x7a   : > { %p10186_p10 = pnand %p10185_p9, %p10184_p8  ;;  %p10191_p2 = por %p10190_p0, %p10189_p11 }
  0x7c   : > { %p10187_p13 = pneg %p10186_p10 }
  0x7e   : > { %p10192_p5 = pnand %p10191_p2, %p10187_p13 }
  0x80   : > { %10195 = shalt.err (!%p10192_p5)
}
  0x81   : > { %9331 = dma.hbm_to_vmem [thread:$0]  (!%p10711_p7), %s986_s0, 256, %s988_s29, %s976_s14, %s12298_s3, %s12298_s3, %s12297_s1  }
  0x82   : > { %999 = sbr.rel (%p10521_p3) target bundleno = 9005 (0x232d), region = 132  ;;  %s12317_s15 = sld [smem:[#allocation45_spill]] (!%p10521_p3) }
  0x88   : > { %s10731_s11 = sand.u32 1, %s12317_s15  }
  0x89   : > { %s8881_s16 = sshll.u32 %s10731_s11, 4  ;;  %s1002_s18 = scalar_lea.sflag [#allocation3], %s10731_s11 }
  0x8a   : > { %s10735_s4 = scalar_lea.vmem [#allocation2], %s8881_s16 }
  0x8b   : > { %10256 = dma.done.wait (%p10690_p12), %s1002_s18, 256  }
  0x8c   : > { %10258 = vsyncadd (%p10690_p12), %s1002_s18, 4294967040  ;;  %s12318_s27 = sld [smem:[#allocation46_spill]] }
  0x8d   : > { %10260 = dma.done.wait (%p100_p1), [#allocation6], 3072  }
  0x8e   : > { %10262 = vsyncadd (%p100_p1), [#allocation6], 4294964224 }
  0x8f   : > { %10264 = dma.done.wait (%p100_p1), [#allocation9], 288  }
  0x90   : > { %10266 = vsyncadd (%p100_p1), [#allocation9], 4294967008 }
  0x91   : > { %10268 = dma.done.wait (%p100_p1), [#allocation12], 1024  }
  0x92   : > { %10270 = vsyncadd (%p100_p1), [#allocation12], 4294966272 }
  0x93   : > { %10272 = dma.done.wait (%p100_p1), [#allocation15], 101376  }
  0x94   : > { %10274 = vsyncadd (%p100_p1), [#allocation15], 4294865920 }
  0x95   : > { %10276 = dma.done.wait (%p100_p1), [#allocation18], 6528  }
  0x96   : > { %10278 = vsyncadd (%p100_p1), [#allocation18], 4294960768 }
  0x97   : > { %10280 = dma.done.wait (%p100_p1), [#allocation21], 104448  }
  0x98   : > { %10282 = vsyncadd (%p100_p1), [#allocation21], 4294862848 }
  0x99   : > { %10284 = dma.done.wait (%p100_p1), [#allocation24], 3456  }
  0x9a   : > { %10286 = vsyncadd (%p100_p1), [#allocation24], 4294963840 }
  0x9b   : > { %10288 = dma.done.wait (%p100_p1), [#allocation27], 12288  }
  0x9c   : > { %10290 = vsyncadd (%p100_p1), [#allocation27], 4294955008 }
  0x9d   : > { %10292 = dma.done.wait (%p100_p1), [#allocation30], 272  }
  0x9e   : > { %10294 = vsyncadd (%p100_p1), [#allocation30], 4294967024  ;;  %p1174_p3 = scmp.lt.s32.totalorder %s12318_s27, 1  ;;  %s12319_s29 = sld [smem:[#allocation48_spill]]  ;;  %v1191_v0 = vld [vmem:[#allocation5 + $0x30] sm:$0xff]  ;;  %v1192_v1 = vld [vmem:[#allocation5 + $0x38] sm:$0xff] }
  0x9f   : > { %v1186_v2 = vld [vmem:[#allocation5 + $0x10] sm:$0xff]  ;;  %1218 = vmatpush.msra.mxu0 %v1191_v0  ;;  %9176 = vmatpush.msra.mxu1 %v1192_v1  ;;  %v1187_v3 = vld [vmem:[#allocation5 + $0x18] sm:$0xff]  ;;  %v1189_v4 = vld [vmem:[#allocation5 + $0x20] sm:$0xff]  ;;  %vm1199_vm0 = vcmask 130048   ;;  %vm1195_vm1 = vcmask 1046528   ;;  %s12320_s28 = sld [smem:[#allocation54_spill]] }
  0xa0   : > { %s1175_s14 = scalar_select %p1174_p3, %s12318_s27, 1  ;;  %v1190_v5 = vld [vmem:[#allocation5 + $0x28] sm:$0xff]  ;;  %1268 = vmatpush.msra.mxu2 %v1186_v2  ;;  %1291 = vmatpush.msra.mxu3 %v1187_v3  ;;  %v1184_v6 = vld [vmem:[#allocation5] sm:$0xff]  ;;  %v1304_v12 = vld [vmem:[#allocation5 + $0x58] sm:$0xff]  ;;  %vm1305_vm2 = vcmask 1045504   ;;  %vm2182_vm3 = vcmask 65536  }
  0xa1   : > { %v1185_v7 = vld [vmem:[#allocation5 + $0x8] sm:$0xff]  ;;  %1219 = vmatpush.msra.mxu0 %v1189_v4  ;;  %9177 = vmatpush.msra.mxu1 %v1190_v5  ;;  %v1303_v15 = vld [vmem:[#allocation5 + $0x50] sm:$0xff]  ;;  %v1301_v21 = vld [vmem:[#allocation5 + $0x40] sm:$0xff]  ;;  %s12321_s16 = sld [smem:[#allocation56_spill]]  ;;  %s10340_s3 = smov 126   ;;  %vm2352_vm8 = vcmask 1043456  }
  0xa2   : > { %s9178_s1 = smul.u32 24, %s1175_s14  ;;  %1269 = vmatpush.msra.mxu2 %v1184_v6  ;;  %1292 = vmatpush.msra.mxu3 %v1185_v7  ;;  %v1302_v14 = vld [vmem:[#allocation5 + $0x48] sm:$0xff]  ;;  %s10341_s6 = smov 127   ;;  %vm2382_vm9 = vcmask 162816   ;;  %vm2345_vm10 = vcmask 97280  }
  0xa3   : > { %1241 = vmatpush.msrb.mxu0 %v1192_v1  ;;  %1350 = vmatpush.msrb.mxu1 %v1304_v12  ;;  %s10343_s5 = smov 125   ;;  %s10344_s12 = smov 121  }
  0xa4   : > { %s10782_s0 = scalar_lea.vmem %s12319_s29, %s9178_s1  ;;  %s10339_s1 = smov 124  }
  0xa5   : > { %v1179_v8 = vld [vmem:[%s10782_s0] sm:$0xff]  ;;  %v1180_v9 = vld [vmem:[%s10782_s0 + $0x8] sm:$0xff]  ;;  %v8976_v18 = vld [vmem:[%s12320_s28 + $0x3f0] sm:$0xff]  ;;  %1242 = vmatpush.msrb.mxu0 %v1190_v5  ;;  %1351 = vmatpush.msrb.mxu1 %v1302_v14  ;;  %s10342_s29 = smov 123   ;;  %s10345_s2 = smov 122  }
  0xa6   : > { %v1196_v10 = vrot.slane %v1179_v8, 1  ;;  %v1197_v11 = vrot.slane %v1180_v9, 1  ;;  %8906 = vmatmul.msk.f32.vlgmr.msra.gmra.mxu2 %vm1199_vm0, %v1179_v8  ;;  %8908 = vmatmul.msk.f32.vlgmr.msra.gmra.mxu3 %vm1199_vm0, %v1179_v8  ;;  %v1306_v16 = vrot.slane %v1179_v8, 2  ;;  %v10791_v17 = vrot.slane %v1180_v9, 2  ;;  %v8977_v19 = vld [vmem:[%s12320_s28 + $0x3f8] sm:$0xff]  ;;  %v8974_v20 = vld [vmem:[%s12320_s28 + $0x3e0] sm:$0xff] }
  0xa7   : > { %1533 = vmatpush.msrb.mxu3 %v8976_v18  ;;  %v8975_v22 = vld [vmem:[%s12320_s28 + $0x3e8] sm:$0xff]  ;;  %v8972_v23 = vld [vmem:[%s12320_s28 + $0x3d0] sm:$0xff]  ;;  %v8970_v25 = vld [vmem:[%s12320_s28 + $0x3c0] sm:$0xff]  ;;  %s12257_s8 = smov 120  }
  0xa8   : > { %v1198_v13 = vsel %vm1195_vm1, %v1196_v10, %v1197_v11  ;;  %8905 = vmatmul.msk.f32.vlgmr.msra.gmra.mxu1 %vm1199_vm0, %v1197_v11  ;;  %v1308_v24 = vsel %vm1305_vm2, %v1306_v16, %v10791_v17  ;;  %v8973_v26 = vld [vmem:[%s12320_s28 + $0x3d8] sm:$0xff]  ;;  %v8968_v27 = vld [vmem:[%s12320_s28 + $0x3b0] sm:$0xff]  ;;  %v8971_v29 = vld [vmem:[%s12320_s28 + $0x3c8] sm:$0xff] }
  0xa9   : > { %8902 = vmatmul.msk.f32.vlgmr.msra.gmra.mxu0 %vm1199_vm0, %v1198_v13  ;;  %1579 = vmatpush.msra.mxu1 %v8977_v19  ;;  %v8944_v28 = vld [vmem:[%s12320_s28 + $0x2f0] sm:$0xff]  ;;  %v8966_v30 = vld [vmem:[%s12320_s28 + $0x3a0] sm:$0xff]  ;;  %v8969_v32 = vld [vmem:[%s12320_s28 + $0x3b8] sm:$0xff] }
  0xaa   : > { %1327 = vmatpush.msra.mxu0 %v1303_v15  ;;  %1534 = vmatpush.msrb.mxu3 %v8974_v20  ;;  %v8942_v31 = vld [vmem:[%s12320_s28 + $0x2e0] sm:$0xff]  ;;  %v8964_v33 = vld [vmem:[%s12320_s28 + $0x390] sm:$0xff]  ;;  %v8967_v35 = vld [vmem:[%s12320_s28 + $0x3a8] sm:$0xff] }
  0xab   : > { %1580 = vmatpush.msra.mxu1 %v8975_v22  ;;  %1510 = vmatpush.msrb.mxu2 %v8944_v28  ;;  %v8940_v34 = vld [vmem:[%s12320_s28 + $0x2d0] sm:$0xff]  ;;  %v8962_v36 = vld [vmem:[%s12320_s28 + $0x380] sm:$0xff]  ;;  %v8965_v37 = vld [vmem:[%s12320_s28 + $0x398] sm:$0xff] }
  0xac   : > { %1328 = vmatpush.msra.mxu0 %v1301_v21  ;;  %1535 = vmatpush.msrb.mxu3 %v8972_v23  ;;  %v8945_v38 = vld [vmem:[%s12320_s28 + $0x2f8] sm:$0xff]  ;;  %v8960_v39 = vld [vmem:[%s12320_s28 + $0x370] sm:$0xff]  ;;  %v8963_v40 = vld [vmem:[%s12320_s28 + $0x388] sm:$0xff] }
  0xad   : > { %1581 = vmatpush.msra.mxu1 %v8973_v26  ;;  %1511 = vmatpush.msrb.mxu2 %v8942_v31  ;;  %v8943_v41 = vld [vmem:[%s12320_s28 + $0x2e8] sm:$0xff]  ;;  %v8958_v42 = vld [vmem:[%s12320_s28 + $0x360] sm:$0xff]  ;;  %v8961_v43 = vld [vmem:[%s12320_s28 + $0x378] sm:$0xff] }
  0xae   : > { %8907 = vmatmul.msk.f32.gmra.mxu2 %vm1199_vm0, %v1180_v9  ;;  %8909 = vmatmul.msk.f32.gmra.mxu3 %vm1199_vm0, %v1180_v9  ;;  %v8941_v44 = vld [vmem:[%s12320_s28 + $0x2d8] sm:$0xff]  ;;  %v8959_v45 = vld [vmem:[%s12320_s28 + $0x368] sm:$0xff]  ;;  %v8938_v46 = vld [vmem:[%s12320_s28 + $0x2c0] sm:$0xff] }
  0xaf   : > { %1536 = vmatpush.msrb.mxu3 %v8970_v25  ;;  %1582 = vmatpush.msra.mxu1 %v8971_v29  ;;  %v8956_v47 = vld [vmem:[%s12320_s28 + $0x350] sm:$0xff]  ;;  %v8939_v48 = vld [vmem:[%s12320_s28 + $0x2c8] sm:$0xff]  ;;  %v8957_v49 = vld [vmem:[%s12320_s28 + $0x358] sm:$0xff] }
  0xb0   : > { %8912 = vmatmul.msk.f32.vlgmr.msrb.gmra.mxu1 %vm1199_vm0, %v1308_v24  ;;  %1512 = vmatpush.msrb.mxu2 %v8940_v34  ;;  %v8936_v50 = vld [vmem:[%s12320_s28 + $0x2b0] sm:$0xff]  ;;  %v8954_v51 = vld [vmem:[%s12320_s28 + $0x340] sm:$0xff]  ;;  %v8937_v52 = vld [vmem:[%s12320_s28 + $0x2b8] sm:$0xff] }
  0xb1   : > { %8903 = vmatmul.msk.f32.gmra.mxu0 %vm1199_vm0, %v1197_v11  ;;  %1537 = vmatpush.msrb.mxu3 %v8968_v27  ;;  %v8955_v53 = vld [vmem:[%s12320_s28 + $0x348] sm:$0xff]  ;;  %v8934_v54 = vld [vmem:[%s12320_s28 + $0x2a0] sm:$0xff]  ;;  %v8952_v55 = vld [vmem:[%s12320_s28 + $0x330] sm:$0xff] }
  0xb2   : > { %1583 = vmatpush.msra.mxu1 %v8969_v32  ;;  %1513 = vmatpush.msrb.mxu2 %v8938_v46  ;;  %v8935_v56 = vld [vmem:[%s12320_s28 + $0x2a8] sm:$0xff]  ;;  %v8953_v57 = vld [vmem:[%s12320_s28 + $0x338] sm:$0xff]  ;;  %v8932_v58 = vld [vmem:[%s12320_s28 + $0x290] sm:$0xff] }
  0xb3   : > { %1538 = vmatpush.msrb.mxu3 %v8966_v30  ;;  %v8950_v59 = vld [vmem:[%s12320_s28 + $0x320] sm:$0xff]  ;;  %v8933_v60 = vld [vmem:[%s12320_s28 + $0x298] sm:$0xff]  ;;  %v8951_v61 = vld [vmem:[%s12320_s28 + $0x328] sm:$0xff] }
  0xb4   : > { %1584 = vmatpush.msra.mxu1 %v8967_v35  ;;  %1514 = vmatpush.msrb.mxu2 %v8936_v50  ;;  %v8930_v62 = vld [vmem:[%s12320_s28 + $0x280] sm:$0xff]  ;;  %v8948_v63 = vld [vmem:[%s12320_s28 + $0x310] sm:$0xff]  ;;  %v8931_v0 = vld [vmem:[%s12320_s28 + $0x288] sm:$0xff] }
  0xb5   : > { %1539 = vmatpush.msrb.mxu3 %v8964_v33  ;;  %v8949_v1 = vld [vmem:[%s12320_s28 + $0x318] sm:$0xff]  ;;  %v8928_v2 = vld [vmem:[%s12320_s28 + $0x270] sm:$0xff]  ;;  %v8946_v3 = vld [vmem:[%s12320_s28 + $0x300] sm:$0xff] }
  0xb6   : > { %1585 = vmatpush.msra.mxu1 %v8965_v37  ;;  %1515 = vmatpush.msrb.mxu2 %v8934_v54  ;;  %v8929_v4 = vld [vmem:[%s12320_s28 + $0x278] sm:$0xff]  ;;  %v8947_v5 = vld [vmem:[%s12320_s28 + $0x308] sm:$0xff]  ;;  %v1429_v6 = vld [vmem:[%s12320_s28 + $0x1f0] sm:$0xff] }
  0xb7   : > { %1540 = vmatpush.msrb.mxu3 %v8962_v36  ;;  %v1430_v7 = vld [vmem:[%s12320_s28 + $0x1f8] sm:$0xff]  ;;  %v8926_v8 = vld [vmem:[%s12320_s28 + $0x260] sm:$0xff]  ;;  %v8927_v9 = vld [vmem:[%s12320_s28 + $0x268] sm:$0xff] }
  0xb8   : > { %8913 = vmatmul.msk.f32.gmra.mxu1 %vm1199_vm0, %v10791_v17  ;;  %1516 = vmatpush.msrb.mxu2 %v8932_v58  ;;  %v1427_v10 = vld [vmem:[%s12320_s28 + $0x1e0] sm:$0xff]  ;;  %v1428_v11 = vld [vmem:[%s12320_s28 + $0x1e8] sm:$0xff]  ;;  %v8924_v12 = vld [vmem:[%s12320_s28 + $0x250] sm:$0xff] }
  0xb9   : > { %8904 = vmatmul.msk.f32.vlgmr.msrb.gmra.mxu0 %vm1199_vm0, %v1198_v13  ;;  %1541 = vmatpush.msrb.mxu3 %v8960_v39  ;;  %v8925_v13 = vld [vmem:[%s12320_s28 + $0x258] sm:$0xff]  ;;  %v1425_v14 = vld [vmem:[%s12320_s28 + $0x1d0] sm:$0xff]  ;;  %v8922_v16 = vld [vmem:[%s12320_s28 + $0x240] sm:$0xff] }
  0xba   : > { %1556 = vmatpush.msrb.mxu0 %v8945_v38  ;;  %1586 = vmatpush.msra.mxu1 %v8963_v40  ;;  %v1426_v15 = vld [vmem:[%s12320_s28 + $0x1d8] sm:$0xff]  ;;  %v1423_v18 = vld [vmem:[%s12320_s28 + $0x1c0] sm:$0xff]  ;;  %v1424_v19 = vld [vmem:[%s12320_s28 + $0x1c8] sm:$0xff] }
  0xbb   : > { %1542 = vmatpush.msrb.mxu3 %v8958_v42  ;;  %1517 = vmatpush.msrb.mxu2 %v8930_v62  ;;  %v8920_v20 = vld [vmem:[%s12320_s28 + $0x230] sm:$0xff]  ;;  %v8921_v21 = vld [vmem:[%s12320_s28 + $0x238] sm:$0xff]  ;;  %v8919_v25 = vld [vmem:[%s12320_s28 + $0x228] sm:$0xff] }
  0xbc   : > { %1557 = vmatpush.msrb.mxu0 %v8943_v41  ;;  %1587 = vmatpush.msra.mxu1 %v8961_v43  ;;  %v1421_v22 = vld [vmem:[%s12320_s28 + $0x1b0] sm:$0xff]  ;;  %v1422_v23 = vld [vmem:[%s12320_s28 + $0x1b8] sm:$0xff]  ;;  %v1419_v26 = vld [vmem:[%s12320_s28 + $0x1a0] sm:$0xff] }
  0xbd   : > { %1543 = vmatpush.msrb.mxu3 %v8956_v47  ;;  %1518 = vmatpush.msrb.mxu2 %v8928_v2  ;;  %v1420_v27 = vld [vmem:[%s12320_s28 + $0x1a8] sm:$0xff]  ;;  %v8916_v28 = vld [vmem:[%s12320_s28 + $0x210] sm:$0xff]  ;;  %v8917_v29 = vld [vmem:[%s12320_s28 + $0x218] sm:$0xff] }
  0xbe   : > { %1558 = vmatpush.msrb.mxu0 %v8941_v44  ;;  %1588 = vmatpush.msra.mxu1 %v8959_v45  ;;  %v1417_v30 = vld [vmem:[%s12320_s28 + $0x190] sm:$0xff]  ;;  %v1418_v31 = vld [vmem:[%s12320_s28 + $0x198] sm:$0xff]  ;;  %v8914_v32 = vld [vmem:[%s12320_s28 + $0x200] sm:$0xff] }
  0xbf   : > { %1544 = vmatpush.msrb.mxu3 %v8954_v51  ;;  %1519 = vmatpush.msrb.mxu2 %v8926_v8  ;;  %v8915_v33 = vld [vmem:[%s12320_s28 + $0x208] sm:$0xff]  ;;  %v1397_v34 = vld [vmem:[%s12320_s28 + $0xf0] sm:$0xff]  ;;  %v1415_v35 = vld [vmem:[%s12320_s28 + $0x180] sm:$0xff] }
  0xc0   : > { %1559 = vmatpush.msrb.mxu0 %v8939_v48  ;;  %1589 = vmatpush.msra.mxu1 %v8957_v49  ;;  %v1398_v36 = vld [vmem:[%s12320_s28 + $0xf8] sm:$0xff]  ;;  %v1416_v37 = vld [vmem:[%s12320_s28 + $0x188] sm:$0xff]  ;;  %v1395_v38 = vld [vmem:[%s12320_s28 + $0xe0] sm:$0xff] }
  0xc1   : > { %8910 = vmatmul.msk.f32.vlgmr.msra.gmra.mxu0 %vm1199_vm0, %v1308_v24  ;;  %1545 = vmatpush.msrb.mxu3 %v8952_v55  ;;  %v8918_v24 = vld [vmem:[%s12320_s28 + $0x220] sm:$0xff]  ;;  %v1413_v39 = vld [vmem:[%s12320_s28 + $0x170] sm:$0xff]  ;;  %v1396_v40 = vld [vmem:[%s12320_s28 + $0xe8] sm:$0xff] }
  0xc2   : > { %1560 = vmatpush.msrb.mxu0 %v8937_v52  ;;  %1590 = vmatpush.msra.mxu1 %v8955_v53  ;;  %v1414_v41 = vld [vmem:[%s12320_s28 + $0x178] sm:$0xff]  ;;  %v1393_v42 = vld [vmem:[%s12320_s28 + $0xd0] sm:$0xff]  ;;  %v1411_v43 = vld [vmem:[%s12320_s28 + $0x160] sm:$0xff] }
  0xc3   : > { %1546 = vmatpush.msrb.mxu3 %v8950_v59  ;;  %1520 = vmatpush.msrb.mxu2 %v8924_v12  ;;  %v1394_v44 = vld [vmem:[%s12320_s28 + $0xd8] sm:$0xff]  ;;  %v1412_v45 = vld [vmem:[%s12320_s28 + $0x168] sm:$0xff]  ;;  %v1391_v46 = vld [vmem:[%s12320_s28 + $0xc0] sm:$0xff] }
  0xc4   : > { %1561 = vmatpush.msrb.mxu0 %v8935_v56  ;;  %1591 = vmatpush.msra.mxu1 %v8953_v57  ;;  %v1409_v47 = vld [vmem:[%s12320_s28 + $0x150] sm:$0xff]  ;;  %v1392_v48 = vld [vmem:[%s12320_s28 + $0xc8] sm:$0xff]  ;;  %v1410_v49 = vld [vmem:[%s12320_s28 + $0x158] sm:$0xff] }
  0xc5   : > { %1547 = vmatpush.msrb.mxu3 %v8948_v63  ;;  %1521 = vmatpush.msrb.mxu2 %v8922_v16  ;;  %v1389_v52 = vld [vmem:[%s12320_s28 + $0xb0] sm:$0xff]  ;;  %v1407_v53 = vld [vmem:[%s12320_s28 + $0x140] sm:$0xff]  ;;  %v1390_v54 = vld [vmem:[%s12320_s28 + $0xb8] sm:$0xff] }
  0xc6   : > { %1562 = vmatpush.msrb.mxu0 %v8933_v60  ;;  %1592 = vmatpush.msra.mxu1 %v8951_v61  ;;  %v1408_v55 = vld [vmem:[%s12320_s28 + $0x148] sm:$0xff]  ;;  %v1387_v56 = vld [vmem:[%s12320_s28 + $0xa0] sm:$0xff]  ;;  %v1405_v57 = vld [vmem:[%s12320_s28 + $0x130] sm:$0xff] }
  0xc7   : > { %1548 = vmatpush.msrb.mxu3 %v8946_v3  ;;  %1522 = vmatpush.msrb.mxu2 %v8920_v20  ;;  %v1388_v58 = vld [vmem:[%s12320_s28 + $0xa8] sm:$0xff]  ;;  %v1406_v59 = vld [vmem:[%s12320_s28 + $0x138] sm:$0xff]  ;;  %v1385_v60 = vld [vmem:[%s12320_s28 + $0x90] sm:$0xff] }
  0xc8   : > { %1563 = vmatpush.msrb.mxu0 %v8931_v0  ;;  %1593 = vmatpush.msra.mxu1 %v8949_v1  ;;  %v1403_v61 = vld [vmem:[%s12320_s28 + $0x120] sm:$0xff]  ;;  %v1386_v63 = vld [vmem:[%s12320_s28 + $0x98] sm:$0xff]  ;;  %v1404_v0 = vld [vmem:[%s12320_s28 + $0x128] sm:$0xff] }
  0xc9   : > { %8911 = vmatmul.msk.f32.gmra.mxu0 %vm1199_vm0, %v10791_v17  ;;  %1625 = vmatpush.msra.mxu3 %v1429_v6  ;;  %v8923_v17 = vld [vmem:[%s12320_s28 + $0x248] sm:$0xff]  ;;  %v1383_v1 = vld [vmem:[%s12320_s28 + $0x80] sm:$0xff]  ;;  %v1401_v2 = vld [vmem:[%s12320_s28 + $0x110] sm:$0xff] }
  0xca   : > { %1564 = vmatpush.msrb.mxu0 %v8929_v4  ;;  %1594 = vmatpush.msra.mxu1 %v8947_v5  ;;  %v1384_v3 = vld [vmem:[%s12320_s28 + $0x88] sm:$0xff]  ;;  %v1402_v4 = vld [vmem:[%s12320_s28 + $0x118] sm:$0xff]  ;;  %v1399_v8 = vld [vmem:[%s12320_s28 + $0x100] sm:$0xff] }
  0xcb   : > { %1626 = vmatpush.msra.mxu3 %v1427_v10  ;;  %1523 = vmatpush.msrb.mxu2 %v8918_v24  ;;  %v1400_v10 = vld [vmem:[%s12320_s28 + $0x108] sm:$0xff] }
  0xcc   : > { %1671 = vmatpush.msrb.mxu1 %v1430_v7  ;;  %1565 = vmatpush.msrb.mxu0 %v8927_v9  ;;  %v1381_v7 = vld [vmem:[%s12320_s28 + $0x70] sm:$0xff]  ;;  %v1382_v9 = vld [vmem:[%s12320_s28 + $0x78] sm:$0xff]  ;;  %v1380_v12 = vld [vmem:[%s12320_s28 + $0x68] sm:$0xff] }
  0xcd   : > { %1627 = vmatpush.msra.mxu3 %v1425_v14  ;;  %1524 = vmatpush.msrb.mxu2 %v8916_v28 }
  0xce   : > { %1672 = vmatpush.msrb.mxu1 %v1428_v11  ;;  %1566 = vmatpush.msrb.mxu0 %v8925_v13  ;;  %v1379_v11 = vld [vmem:[%s12320_s28 + $0x60] sm:$0xff]  ;;  %v1377_v13 = vld [vmem:[%s12320_s28 + $0x50] sm:$0xff] }
  0xcf   : > { %1628 = vmatpush.msra.mxu3 %v1423_v18  ;;  %1525 = vmatpush.msrb.mxu2 %v8914_v32  ;;  %v1376_v18 = vld [vmem:[%s12320_s28 + $0x48] sm:$0xff] }
  0xd0   : > { %1673 = vmatpush.msrb.mxu1 %v1426_v15  ;;  %1567 = vmatpush.msrb.mxu0 %v8923_v17  ;;  %v1378_v15 = vld [vmem:[%s12320_s28 + $0x58] sm:$0xff]  ;;  %v1375_v17 = vld [vmem:[%s12320_s28 + $0x40] sm:$0xff] }
  0xd1   : > { %1629 = vmatpush.msra.mxu3 %v1421_v22  ;;  %1602 = vmatpush.msra.mxu2 %v1397_v34  ;;  %v1373_v22 = vld [vmem:[%s12320_s28 + $0x30] sm:$0xff]  ;;  %v1368_v34 = vld [vmem:[%s12320_s28 + $0x8] sm:$0xff] }
  0xd2   : > { %1674 = vmatpush.msrb.mxu1 %v1424_v19  ;;  %1568 = vmatpush.msrb.mxu0 %v8921_v21 }
  0xd3   : > { %1630 = vmatpush.msra.mxu3 %v1419_v26  ;;  %1603 = vmatpush.msra.mxu2 %v1395_v38  ;;  %v1371_v26 = vld [vmem:[%s12320_s28 + $0x20] sm:$0xff]  ;;  %v1706_v38 = vld [vmem:[#allocation7 + $0x38] sm:$0xff] }
  0xd4   : > { %1675 = vmatpush.msrb.mxu1 %v1422_v23  ;;  %1569 = vmatpush.msrb.mxu0 %v8919_v25  ;;  %v1374_v23 = vld [vmem:[%s12320_s28 + $0x38] sm:$0xff] }
  0xd5   : > { %1631 = vmatpush.msra.mxu3 %v1417_v30  ;;  %1604 = vmatpush.msra.mxu2 %v1393_v42  ;;  %v1369_v30 = vld [vmem:[%s12320_s28 + $0x10] sm:$0xff] }
  0xd6   : > { %1676 = vmatpush.msrb.mxu1 %v1420_v27  ;;  %1570 = vmatpush.msrb.mxu0 %v8917_v29  ;;  %v1372_v27 = vld [vmem:[%s12320_s28 + $0x28] sm:$0xff] }
  0xd7   : > { %1632 = vmatpush.msra.mxu3 %v1415_v35  ;;  %1605 = vmatpush.msra.mxu2 %v1391_v46 }
  0xd8   : > { %1677 = vmatpush.msrb.mxu1 %v1418_v31  ;;  %1571 = vmatpush.msrb.mxu0 %v8915_v33  ;;  %v1370_v31 = vld [vmem:[%s12320_s28 + $0x18] sm:$0xff]  ;;  %v1367_v33 = vld [vmem:[%s12320_s28] sm:$0xff] }
  0xd9   : > { %1633 = vmatpush.msra.mxu3 %v1413_v39  ;;  %1606 = vmatpush.msra.mxu2 %v1389_v52 }
  0xda   : > { %1648 = vmatpush.msra.mxu0 %v1398_v36  ;;  %1678 = vmatpush.msrb.mxu1 %v1416_v37 }
  0xdb   : > { %1634 = vmatpush.msra.mxu3 %v1411_v43  ;;  %1607 = vmatpush.msra.mxu2 %v1387_v56  ;;  %v1795_v56 = vld [vmem:[#allocation7 + $0x48] sm:$0xff] }
  0xdc   : > { %1649 = vmatpush.msra.mxu0 %v1396_v40  ;;  %1679 = vmatpush.msrb.mxu1 %v1414_v41  ;;  %v1704_v40 = vld [vmem:[#allocation7 + $0x28] sm:$0xff] }
  0xdd   : > { %1635 = vmatpush.msra.mxu3 %v1409_v47  ;;  %1608 = vmatpush.msra.mxu2 %v1385_v60 }
  0xde   : > { %1650 = vmatpush.msra.mxu0 %v1394_v44  ;;  %1680 = vmatpush.msrb.mxu1 %v1412_v45 }
  0xdf   : > { %1636 = vmatpush.msra.mxu3 %v1407_v53  ;;  %1609 = vmatpush.msra.mxu2 %v1383_v1  ;;  %v1705_v53 = vld [vmem:[#allocation7 + $0x30] sm:$0xff] }
  0xe0   : > { %1651 = vmatpush.msra.mxu0 %v1392_v48  ;;  %1681 = vmatpush.msrb.mxu1 %v1410_v49  ;;  %v1797_v48 = vld [vmem:[#allocation7 + $0x58] sm:$0xff]  ;;  %v9046_v1 = vld [vmem:[%s12321_s16 + $0x3f0] sm:$0xff] }
  0xe1   : > { %1637 = vmatpush.msra.mxu3 %v1405_v57  ;;  %1610 = vmatpush.msra.mxu2 %v1381_v7  ;;  %v1699_v57 = vld [vmem:[#allocation7 + $0x8] sm:$0xff]  ;;  %v9036_v7 = vld [vmem:[%s12321_s16 + $0x3a0] sm:$0xff] }
  0xe2   : > { %1652 = vmatpush.msra.mxu0 %v1390_v54  ;;  %1682 = vmatpush.msrb.mxu1 %v1408_v55  ;;  %v1703_v55 = vld [vmem:[#allocation7 + $0x20] sm:$0xff] }
  0xe3   : > { %1638 = vmatpush.msra.mxu3 %v1403_v61  ;;  %1611 = vmatpush.msra.mxu2 %v1379_v11  ;;  %v1700_v61 = vld [vmem:[#allocation7 + $0x10] sm:$0xff] }
  0xe4   : > { %1653 = vmatpush.msra.mxu0 %v1388_v58  ;;  %1683 = vmatpush.msrb.mxu1 %v1406_v59  ;;  %v1181_v58 = vld [vmem:[%s10782_s0 + $0x10] sm:$0xf] }
  0xe5   : > { %1639 = vmatpush.msra.mxu3 %v1401_v2  ;;  %1612 = vmatpush.msra.mxu2 %v1377_v13  ;;  %v1708_v59 = vrot.slane %v1181_v58, 1  ;;  %v1798_v60 = vrot.slane %v1181_v58, 2  ;;  %v9044_v2 = vld [vmem:[%s12321_s16 + $0x3e0] sm:$0xff]  ;;  %v9014_v11 = vld [vmem:[%s12321_s16 + $0x2f0] sm:$0xff]  ;;  %v9041_v13 = vld [vmem:[%s12321_s16 + $0x3c8] sm:$0xff] }
  0xe6   : > { %1654 = vmatpush.msra.mxu0 %v1386_v63  ;;  %1684 = vmatpush.msrb.mxu1 %v1404_v0  ;;  %v1796_v63 = vld [vmem:[#allocation7 + $0x50] sm:$0xff]  ;;  %v1794_v0 = vld [vmem:[#allocation7 + $0x40] sm:$0xff] }
  0xe7   : > { %1640 = vmatpush.msra.mxu3 %v1399_v8  ;;  %1613 = vmatpush.msra.mxu2 %v1375_v17  ;;  %v9045_v8 = vld [vmem:[%s12321_s16 + $0x3e8] sm:$0xff]  ;;  %v9010_v17 = vld [vmem:[%s12321_s16 + $0x2d0] sm:$0xff] }
  0xe8   : > { %1655 = vmatpush.msra.mxu0 %v1384_v3  ;;  %1685 = vmatpush.msrb.mxu1 %v1402_v4  ;;  %v9042_v3 = vld [vmem:[%s12321_s16 + $0x3d0] sm:$0xff]  ;;  %v9040_v4 = vld [vmem:[%s12321_s16 + $0x3c0] sm:$0xff] }
  0xe9   : > { %1614 = vmatpush.msra.mxu2 %v1373_v22  ;;  %v9035_v22 = vld [vmem:[%s12321_s16 + $0x398] sm:$0xff] }
  0xea   : > { %1656 = vmatpush.msra.mxu0 %v1382_v9  ;;  %1686 = vmatpush.msrb.mxu1 %v1400_v10  ;;  %v9034_v9 = vld [vmem:[%s12321_s16 + $0x390] sm:$0xff]  ;;  %v9043_v10 = vld [vmem:[%s12321_s16 + $0x3d8] sm:$0xff] }
  0xeb   : > { %1615 = vmatpush.msra.mxu2 %v1371_v26  ;;  %v9033_v26 = vld [vmem:[%s12321_s16 + $0x388] sm:$0xff] }
  0xec   : > { %1657 = vmatpush.msra.mxu0 %v1380_v12  ;;  %v9032_v12 = vld [vmem:[%s12321_s16 + $0x380] sm:$0xff] }
  0xed   : > { %1616 = vmatpush.msra.mxu2 %v1369_v30  ;;  %v9031_v30 = vld [vmem:[%s12321_s16 + $0x378] sm:$0xff] }
  0xee   : > { %1658 = vmatpush.msra.mxu0 %v1378_v15  ;;  %v9030_v15 = vld [vmem:[%s12321_s16 + $0x370] sm:$0xff] }
  0xef   : > { %1617 = vmatpush.msra.mxu2 %v1367_v33  ;;  %v9011_v33 = vld [vmem:[%s12321_s16 + $0x2d8] sm:$0xff] }
  0xf0   : > { %1659 = vmatpush.msra.mxu0 %v1376_v18  ;;  %v9028_v18 = vld [vmem:[%s12321_s16 + $0x360] sm:$0xff] }
  0xf2   : > { %1660 = vmatpush.msra.mxu0 %v1374_v23  ;;  %v9006_v23 = vld [vmem:[%s12321_s16 + $0x2b0] sm:$0xff] }
  0xf4   : > { %1661 = vmatpush.msra.mxu0 %v1372_v27  ;;  %v9004_v27 = vld [vmem:[%s12321_s16 + $0x2a0] sm:$0xff] }
  0xf6   : > { %1662 = vmatpush.msra.mxu0 %v1370_v31  ;;  %v9002_v31 = vld [vmem:[%s12321_s16 + $0x290] sm:$0xff] }
  0xf8   : > { %1663 = vmatpush.msra.mxu0 %v1368_v34  ;;  %v9029_v34 = vld [vmem:[%s12321_s16 + $0x368] sm:$0xff] }
 0x125   : > { %v1247_v50 = vpop.f32.mrf.mxu1 }
 0x126   : > { %v11086_v51 = vpop.f32.mrf.mxu0 }
 0x129   : > { %v1294_v62 = vpop.f32.mrf.mxu3  ;;  %v1271_v25 = vpop.f32.mrf.mxu2 }
 0x12a   : > { %v1272_v41 = vadd.f32 %v1271_v25, %v11086_v51  ;;  %v1701_v51 = vld [vmem:[#allocation7 + $0x18] sm:$0xff] }
 0x12b   : > { %v9015_v25 = vld [vmem:[%s12321_s16 + $0x2f8] sm:$0xff] }
 0x12d   : > { %v1353_v5 = vpop.f32.mrf.mxu1 }
 0x12e   : > { %v11136_v6 = vpop.f32.mrf.mxu0 }
 0x131   : > { %v1297_v14 = vpop.f32.mrf.mxu3  ;;  %v1274_v42 = vpop.f32.mrf.mxu2 }
 0x132   : > { %v1298_v16 = vadd.f32 %v1297_v14, %v1247_v50  ;;  %v1275_v44 = vadd.f32 %v1274_v42, %v11136_v6  ;;  %v9047_v6 = vld [vmem:[%s12321_s16 + $0x3f8] sm:$0xff]  ;;  %v9012_v14 = vld [vmem:[%s12321_s16 + $0x2e0] sm:$0xff]  ;;  %v9025_v42 = vld [vmem:[%s12321_s16 + $0x348] sm:$0xff] }
 0x135   : > { %v1356_v19 = vpop.f32.mrf.mxu1 }
 0x136   : > { %v1244_v20 = vpop.f32.mrf.mxu0  ;;  %v1362_v21 = vadd.f32 %v1356_v19, %v1298_v16  ;;  %v9039_v16 = vld [vmem:[%s12321_s16 + $0x3b8] sm:$0xff]  ;;  %v9037_v19 = vld [vmem:[%s12321_s16 + $0x3a8] sm:$0xff] }
 0x137   : > { %v1295_v24 = vadd.f32 %v1294_v62, %v1244_v20  ;;  %v1698_v62 = vld [vmem:[#allocation7] sm:$0xff] }
 0x138   : > { %v1366_v29 = vmax.f32 %v1362_v21, 0.0  ;;  %v9008_v20 = vld [vmem:[%s12321_s16 + $0x2c0] sm:$0xff]  ;;  %v9026_v21 = vld [vmem:[%s12321_s16 + $0x350] sm:$0xff] }
 0x139   : > { %v1360_v28 = vadd.f32 %v1353_v5, %v1295_v24  ;;  %v9038_v5 = vld [vmem:[%s12321_s16 + $0x3b0] sm:$0xff]  ;;  %v9024_v24 = vld [vmem:[%s12321_s16 + $0x340] sm:$0xff] }
 0x13a   : > { %v1504_v36 = vrot.slane %v1366_v29, 1 }
 0x13b   : > { %v1364_v32 = vmax.f32 %v1360_v28, 0.0  ;;  %v9022_v28 = vld [vmem:[%s12321_s16 + $0x330] sm:$0xff] }
 0x13d   : > { %v1503_v35 = vrot.slane %v1364_v32, 1 }
 0x13e   : > { %v1330_v37 = vpop.f32.mrf.mxu0 }
 0x13f   : > { %v1505_v39 = vsel %vm1195_vm1, %v1503_v35, %v1504_v36  ;;  %v1359_v43 = vadd.f32 %v1330_v37, %v1272_v41  ;;  %v9000_v35 = vld [vmem:[%s12321_s16 + $0x280] sm:$0xff]  ;;  %v9009_v37 = vld [vmem:[%s12321_s16 + $0x2c8] sm:$0xff]  ;;  %v9007_v41 = vld [vmem:[%s12321_s16 + $0x2b8] sm:$0xff] }
 0x140   : > { %1549 = vmatmul.f32.vlgmr.msrb.gmra.mxu3 %v1505_v39  ;;  %1595 = vmatmul.f32.vlgmr.msra.gmra.mxu1 %v1505_v39  ;;  %v8998_v39 = vld [vmem:[%s12321_s16 + $0x270] sm:$0xff] }
 0x141   : > { %1745 = vmatpush.msrb.mxu3 %v1706_v38  ;;  %v1363_v46 = vmax.f32 %v1359_v43, 0.0  ;;  %1835 = vmatpush.msra.mxu1 %v1797_v48  ;;  %v9027_v38 = vld [vmem:[%s12321_s16 + $0x358] sm:$0xff]  ;;  %v1907_v43 = vld [vmem:[%s12321_s16 + $0x1f0] sm:$0xff] }
 0x142   : > { %v8994_v48 = vld [vmem:[%s12321_s16 + $0x250] sm:$0xff] }
 0x143   : > { %1746 = vmatpush.msrb.mxu3 %v1704_v40  ;;  %v1500_v50 = vrot.slane %v1363_v46, 1  ;;  %1836 = vmatpush.msra.mxu1 %v1795_v56  ;;  %v9016_v40 = vld [vmem:[%s12321_s16 + $0x300] sm:$0xff]  ;;  %v8990_v56 = vld [vmem:[%s12321_s16 + $0x230] sm:$0xff] }
 0x146   : > { %v1333_v45 = vpop.f32.mrf.mxu0 }
 0x147   : > { %v1361_v47 = vadd.f32 %v1333_v45, %v1275_v44  ;;  %v8996_v44 = vld [vmem:[%s12321_s16 + $0x260] sm:$0xff]  ;;  %v9005_v45 = vld [vmem:[%s12321_s16 + $0x2a8] sm:$0xff] }
 0x148   : > { %1552 = vmatmul.f32.gmra.mxu3 %v1504_v36  ;;  %1598 = vmatmul.f32.gmra.mxu1 %v1504_v36  ;;  %v9018_v36 = vld [vmem:[%s12321_s16 + $0x310] sm:$0xff] }
 0x149   : > { %v1365_v49 = vmax.f32 %v1361_v47, 0.0  ;;  %v1905_v47 = vld [vmem:[%s12321_s16 + $0x1e0] sm:$0xff] }
 0x14b   : > { %v1501_v52 = vrot.slane %v1365_v49, 1 }
 0x14d   : > { %v1502_v54 = vsel %vm1195_vm1, %v1500_v50, %v1501_v52  ;;  %v9021_v50 = vld [vmem:[%s12321_s16 + $0x328] sm:$0xff] }
 0x14e   : > { %1526 = vmatmul.f32.vlgmr.msrb.gmra.mxu2 %v1502_v54  ;;  %1572 = vmatmul.f32.vlgmr.msrb.gmra.mxu0 %v1502_v54  ;;  %v9001_v54 = vld [vmem:[%s12321_s16 + $0x288] sm:$0xff] }
 0x14f   : > { %1725 = vmatpush.msrb.mxu2 %v1705_v53  ;;  %2020 = vmatpush.msrb.mxu0 %v9015_v25  ;;  %v8992_v53 = vld [vmem:[%s12321_s16 + $0x240] sm:$0xff]  ;;  %v1867_v25 = vld [vmem:[%s12321_s16 + $0xb0] sm:$0xff] }
 0x150   : > { %1641 = vmatmul.f32.vlgmr.msra.gmra.mxu3 %v1364_v32  ;;  %1687 = vmatmul.f32.vlgmr.msrb.gmra.mxu1 %v1364_v32  ;;  %v9020_v32 = vld [vmem:[%s12321_s16 + $0x320] sm:$0xff] }
 0x151   : > { %1787 = vmatpush.msra.mxu3 %v1701_v51  ;;  %1726 = vmatpush.msrb.mxu2 %v1703_v55  ;;  %v9019_v51 = vld [vmem:[%s12321_s16 + $0x318] sm:$0xff]  ;;  %v1901_v55 = vld [vmem:[%s12321_s16 + $0x1c0] sm:$0xff] }
 0x152   : > { %2040 = vmatpush.msrb.mxu1 %v9047_v6  ;;  %v8993_v6 = vld [vmem:[%s12321_s16 + $0x248] sm:$0xff] }
 0x153   : > { %1788 = vmatpush.msra.mxu3 %v1699_v57  ;;  %v8999_v57 = vld [vmem:[%s12321_s16 + $0x278] sm:$0xff] }
 0x154   : > { %2041 = vmatpush.msrb.mxu1 %v9045_v8  ;;  %v1893_v8 = vld [vmem:[%s12321_s16 + $0x180] sm:$0xff] }
 0x156   : > { %1529 = vmatmul.f32.gmra.mxu2 %v1501_v52  ;;  %1575 = vmatmul.f32.gmra.mxu0 %v1501_v52  ;;  %v1903_v52 = vld [vmem:[%s12321_s16 + $0x1d0] sm:$0xff] }
 0x157   : > { %2042 = vmatpush.msrb.mxu1 %v9043_v10 }
 0x158   : > { %1644 = vmatmul.f32.gmra.mxu3 %v1366_v29  ;;  %1690 = vmatmul.f32.gmra.mxu1 %v1366_v29  ;;  %v9013_v29 = vld [vmem:[%s12321_s16 + $0x2e8] sm:$0xff] }
 0x159   : > { %2043 = vmatpush.msrb.mxu1 %v9041_v13  ;;  %2021 = vmatpush.msrb.mxu0 %v9013_v29  ;;  %v1891_v13 = vld [vmem:[%s12321_s16 + $0x170] sm:$0xff] }
 0x15b   : > { %2044 = vmatpush.msrb.mxu1 %v9039_v16  ;;  %2022 = vmatpush.msrb.mxu0 %v9011_v33  ;;  %v8989_v16 = vld [vmem:[%s12321_s16 + $0x228] sm:$0xff] }
 0x15c   : > { %v1874_v33 = vld [vmem:[%s12321_s16 + $0xe8] sm:$0xff] }
 0x15d   : > { %2045 = vmatpush.msrb.mxu1 %v9037_v19  ;;  %2023 = vmatpush.msrb.mxu0 %v9009_v37  ;;  %v1898_v19 = vld [vmem:[%s12321_s16 + $0x1a8] sm:$0xff]  ;;  %v1872_v37 = vld [vmem:[%s12321_s16 + $0xd8] sm:$0xff] }
 0x15e   : > { %1618 = vmatmul.f32.vlgmr.msra.gmra.mxu2 %v1363_v46  ;;  %1664 = vmatmul.f32.vlgmr.msra.gmra.mxu0 %v1363_v46  ;;  %v9023_v46 = vld [vmem:[%s12321_s16 + $0x338] sm:$0xff] }
 0x15f   : > { %1767 = vmatpush.msra.mxu2 %v1700_v61  ;;  %2046 = vmatpush.msrb.mxu1 %v9035_v22  ;;  %v8988_v61 = vld [vmem:[%s12321_s16 + $0x220] sm:$0xff]  ;;  %v1887_v22 = vld [vmem:[%s12321_s16 + $0x150] sm:$0xff] }
 0x160   : > { %8979 = vmatmul.msk.f32.vlgmr.msrb.gmra.mxu3 %vm1199_vm0, %v1708_v59  ;;  %8983 = vmatmul.msk.f32.vlgmr.msra.gmra.mxu1 %vm1199_vm0, %v1798_v60 }
 0x161   : > { %1768 = vmatpush.msra.mxu2 %v1698_v62  ;;  %1815 = vmatpush.msrb.mxu3 %v1796_v63  ;;  %v8997_v62 = vld [vmem:[%s12321_s16 + $0x268] sm:$0xff]  ;;  %v1897_v63 = vld [vmem:[%s12321_s16 + $0x1a0] sm:$0xff] }
 0x162   : > { %2047 = vmatpush.msrb.mxu1 %v9033_v26  ;;  %2024 = vmatpush.msrb.mxu0 %v9007_v41  ;;  %v1885_v26 = vld [vmem:[%s12321_s16 + $0x140] sm:$0xff]  ;;  %v1879_v41 = vld [vmem:[%s12321_s16 + $0x110] sm:$0xff] }
 0x163   : > { %1816 = vmatpush.msrb.mxu3 %v1794_v0  ;;  %v1906_v0 = vld [vmem:[%s12321_s16 + $0x1e8] sm:$0xff] }
 0x164   : > { %2048 = vmatpush.msrb.mxu1 %v9031_v30  ;;  %2025 = vmatpush.msrb.mxu0 %v9005_v45  ;;  %v1894_v30 = vld [vmem:[%s12321_s16 + $0x188] sm:$0xff]  ;;  %v1859_v45 = vld [vmem:[%s12321_s16 + $0x70] sm:$0xff] }
 0x166   : > { %1621 = vmatmul.f32.gmra.mxu2 %v1365_v49  ;;  %1667 = vmatmul.f32.gmra.mxu0 %v1365_v49  ;;  %v9003_v49 = vld [vmem:[%s12321_s16 + $0x298] sm:$0xff] }
 0x167   : > { %2049 = vmatpush.msrb.mxu1 %v9029_v34  ;;  %2026 = vmatpush.msrb.mxu0 %v9003_v49  ;;  %v1892_v34 = vld [vmem:[%s12321_s16 + $0x178] sm:$0xff]  ;;  %v1886_v49 = vld [vmem:[%s12321_s16 + $0x148] sm:$0xff] }
 0x168   : > { %8981 = vmatmul.msk.f32.vlgmr.msra.gmra.mxu3 %vm1199_vm0, %v1181_v58 }
 0x169   : > { %2000 = vmatpush.msra.mxu3 %v9046_v1  ;;  %2050 = vmatpush.msrb.mxu1 %v9027_v38  ;;  %v8986_v1 = vld [vmem:[%s12321_s16 + $0x210] sm:$0xff] }
 0x16a   : > { %2027 = vmatpush.msrb.mxu0 %v9001_v54  ;;  %v1884_v54 = vld [vmem:[%s12321_s16 + $0x138] sm:$0xff] }
 0x16b   : > { %2001 = vmatpush.msra.mxu3 %v9044_v2  ;;  %2051 = vmatpush.msrb.mxu1 %v9025_v42  ;;  %v8995_v2 = vld [vmem:[%s12321_s16 + $0x258] sm:$0xff]  ;;  %v1870_v42 = vld [vmem:[%s12321_s16 + $0xc8] sm:$0xff] }
 0x16c   : > { %2028 = vmatpush.msrb.mxu0 %v8999_v57 }
 0x16d   : > { %2002 = vmatpush.msra.mxu3 %v9042_v3  ;;  %2052 = vmatpush.msrb.mxu1 %v9023_v46  ;;  %v1895_v3 = vld [vmem:[%s12321_s16 + $0x190] sm:$0xff]  ;;  %v1877_v46 = vld [vmem:[%s12321_s16 + $0x100] sm:$0xff] }
 0x16e   : > { %8978 = vmatmul.msk.f32.vlgmr.msrb.gmra.mxu2 %vm1199_vm0, %v1708_v59  ;;  %v1899_v59 = vld [vmem:[%s12321_s16 + $0x1b0] sm:$0xff]  ;;  %2029 = vmatpush.msrb.mxu0 %v8997_v62 }
 0x16f   : > { %2003 = vmatpush.msra.mxu3 %v9040_v4  ;;  %1980 = vmatpush.msrb.mxu2 %v9014_v11  ;;  %v1904_v4 = vld [vmem:[%s12321_s16 + $0x1d8] sm:$0xff] }
 0x170   : > { %8982 = vmatmul.msk.f32.vlgmr.msrb.gmra.mxu3 %vm1199_vm0, %v1798_v60  ;;  %2053 = vmatpush.msrb.mxu1 %v9021_v50  ;;  %v1908_v60 = vld [vmem:[%s12321_s16 + $0x1f8] sm:$0xff] }
 0x171   : > { %2004 = vmatpush.msra.mxu3 %v9038_v5  ;;  %1981 = vmatpush.msrb.mxu2 %v9012_v14  ;;  %v8984_v5 = vld [vmem:[%s12321_s16 + $0x200] sm:$0xff]  ;;  %v8991_v11 = vld [vmem:[%s12321_s16 + $0x238] sm:$0xff] }
 0x172   : > { %2054 = vmatpush.msrb.mxu1 %v9019_v51  ;;  %2030 = vmatpush.msrb.mxu0 %v8995_v2  ;;  %v1900_v14 = vld [vmem:[%s12321_s16 + $0x1b8] sm:$0xff]  ;;  %v1855_v51 = vld [vmem:[%s12321_s16 + $0x50] sm:$0xff]  ;;  %v1849_v2 = vld [vmem:[%s12321_s16 + $0x20] sm:$0xff] }
 0x173   : > { %2005 = vmatpush.msra.mxu3 %v9036_v7  ;;  %1982 = vmatpush.msrb.mxu2 %v9010_v17  ;;  %v1875_v7 = vld [vmem:[%s12321_s16 + $0xf0] sm:$0xff] }
 0x174   : > { %2031 = vmatpush.msrb.mxu0 %v8993_v6  ;;  %v1871_v17 = vld [vmem:[%s12321_s16 + $0xd0] sm:$0xff]  ;;  %v1856_v6 = vld [vmem:[%s12321_s16 + $0x58] sm:$0xff] }
 0x175   : > { %2006 = vmatpush.msra.mxu3 %v9034_v9  ;;  %1983 = vmatpush.msrb.mxu2 %v9008_v20  ;;  %v1902_v9 = vld [vmem:[%s12321_s16 + $0x1c8] sm:$0xff]  ;;  %v8987_v20 = vld [vmem:[%s12321_s16 + $0x218] sm:$0xff] }
 0x176   : > { %8980 = vmatmul.msk.f32.vlgmr.msra.gmra.mxu2 %vm1199_vm0, %v1181_v58  ;;  %v9017_v58 = vld [vmem:[%s12321_s16 + $0x308] sm:$0xff]  ;;  %2032 = vmatpush.msrb.mxu0 %v8991_v11 }
 0x177   : > { %2007 = vmatpush.msra.mxu3 %v9032_v12  ;;  %1984 = vmatpush.msrb.mxu2 %v9006_v23  ;;  %v1873_v12 = vld [vmem:[%s12321_s16 + $0xe0] sm:$0xff]  ;;  %v1896_v23 = vld [vmem:[%s12321_s16 + $0x198] sm:$0xff] }
 0x178   : > { %2055 = vmatpush.msrb.mxu1 %v9017_v58  ;;  %2033 = vmatpush.msrb.mxu0 %v8989_v16  ;;  %v1848_v16 = vld [vmem:[%s12321_s16 + $0x18] sm:$0xff] }
 0x179   : > { %2008 = vmatpush.msra.mxu3 %v9030_v15  ;;  %1985 = vmatpush.msrb.mxu2 %v9004_v27  ;;  %v1876_v27 = vld [vmem:[%s12321_s16 + $0xf8] sm:$0xff] }
 0x17a   : > { %2120 = vmatpush.msra.mxu1 %v1908_v60  ;;  %2034 = vmatpush.msrb.mxu0 %v8987_v20  ;;  %v1862_v60 = vld [vmem:[%s12321_s16 + $0x88] sm:$0xff] }
 0x17b   : > { %2009 = vmatpush.msra.mxu3 %v9028_v18  ;;  %1986 = vmatpush.msrb.mxu2 %v9002_v31  ;;  %v1889_v18 = vld [vmem:[%s12321_s16 + $0x160] sm:$0xff] }
 0x17c   : > { %2121 = vmatpush.msra.mxu1 %v1906_v0  ;;  %v1865_v31 = vld [vmem:[%s12321_s16 + $0xa0] sm:$0xff]  ;;  %v1860_v0 = vld [vmem:[%s12321_s16 + $0x78] sm:$0xff] }
 0x17d   : > { %2010 = vmatpush.msra.mxu3 %v9026_v21  ;;  %1987 = vmatpush.msrb.mxu2 %v9000_v35  ;;  %v1869_v21 = vld [vmem:[%s12321_s16 + $0xc0] sm:$0xff]  ;;  %v1863_v35 = vld [vmem:[%s12321_s16 + $0x90] sm:$0xff] }
 0x17e   : > { %2122 = vmatpush.msra.mxu1 %v1904_v4 }
 0x17f   : > { %2011 = vmatpush.msra.mxu3 %v9024_v24  ;;  %1988 = vmatpush.msrb.mxu2 %v8998_v39  ;;  %v8985_v24 = vld [vmem:[%s12321_s16 + $0x208] sm:$0xff] }
 0x180   : > { %2123 = vmatpush.msra.mxu1 %v1902_v9  ;;  %2035 = vmatpush.msrb.mxu0 %v8985_v24  ;;  %v1890_v39 = vld [vmem:[%s12321_s16 + $0x168] sm:$0xff] }
 0x181   : > { %2012 = vmatpush.msra.mxu3 %v9022_v28  ;;  %1989 = vmatpush.msrb.mxu2 %v8996_v44  ;;  %v1888_v44 = vld [vmem:[%s12321_s16 + $0x158] sm:$0xff] }
 0x182   : > { %2124 = vmatpush.msra.mxu1 %v1900_v14  ;;  %2100 = vmatpush.msra.mxu0 %v1876_v27  ;;  %v1850_v14 = vld [vmem:[%s12321_s16 + $0x28] sm:$0xff] }
 0x183   : > { %2013 = vmatpush.msra.mxu3 %v9020_v32  ;;  %1990 = vmatpush.msrb.mxu2 %v8994_v48  ;;  %v1883_v32 = vld [vmem:[%s12321_s16 + $0x130] sm:$0xff] }
 0x184   : > { %2125 = vmatpush.msra.mxu1 %v1898_v19  ;;  %2101 = vmatpush.msra.mxu0 %v1874_v33 }
 0x185   : > { %2014 = vmatpush.msra.mxu3 %v9018_v36  ;;  %1991 = vmatpush.msrb.mxu2 %v8992_v53  ;;  %v1881_v36 = vld [vmem:[%s12321_s16 + $0x120] sm:$0xff]  ;;  %v1866_v53 = vld [vmem:[%s12321_s16 + $0xa8] sm:$0xff] }
 0x186   : > { %2126 = vmatpush.msra.mxu1 %v1896_v23  ;;  %2102 = vmatpush.msra.mxu0 %v1872_v37 }
 0x187   : > { %2015 = vmatpush.msra.mxu3 %v9016_v40  ;;  %1992 = vmatpush.msrb.mxu2 %v8990_v56  ;;  %v1861_v40 = vld [vmem:[%s12321_s16 + $0x80] sm:$0xff]  ;;  %v1882_v56 = vld [vmem:[%s12321_s16 + $0x128] sm:$0xff] }
 0x188   : > { %2127 = vmatpush.msra.mxu1 %v1894_v30  ;;  %2103 = vmatpush.msra.mxu0 %v1870_v42 }
 0x189   : > { %2080 = vmatpush.msrb.mxu3 %v1907_v43  ;;  %1993 = vmatpush.msrb.mxu2 %v8988_v61  ;;  %v1880_v61 = vld [vmem:[%s12321_s16 + $0x118] sm:$0xff] }
 0x18a   : > { %2128 = vmatpush.msra.mxu1 %v1892_v34 }
 0x18b   : > { %2081 = vmatpush.msrb.mxu3 %v1905_v47  ;;  %1994 = vmatpush.msrb.mxu2 %v8986_v1  ;;  %v1868_v47 = vld [vmem:[%s12321_s16 + $0xb8] sm:$0xff]  ;;  %v1878_v1 = vld [vmem:[%s12321_s16 + $0x108] sm:$0xff] }
 0x18c   : > { %2129 = vmatpush.msra.mxu1 %v1890_v39  ;;  %2104 = vmatpush.msra.mxu0 %v1868_v47 }
 0x18d   : > { %2082 = vmatpush.msrb.mxu3 %v1903_v52  ;;  %1995 = vmatpush.msrb.mxu2 %v8984_v5  ;;  %v1857_v52 = vld [vmem:[%s12321_s16 + $0x60] sm:$0xff]  ;;  %v1847_v5 = vld [vmem:[%s12321_s16 + $0x10] sm:$0xff] }
 0x18e   : > { %2130 = vmatpush.msra.mxu1 %v1888_v44  ;;  %2105 = vmatpush.msra.mxu0 %v1866_v53 }
 0x18f   : > { %2083 = vmatpush.msrb.mxu3 %v1901_v55  ;;  %2060 = vmatpush.msra.mxu2 %v1875_v7  ;;  %v1864_v55 = vld [vmem:[%s12321_s16 + $0x98] sm:$0xff]  ;;  %v1845_v7 = vld [vmem:[%s12321_s16] sm:$0xff] }
 0x190   : > { %2131 = vmatpush.msra.mxu1 %v1886_v49  ;;  %2106 = vmatpush.msra.mxu0 %v1864_v55 }
 0x191   : > { %2084 = vmatpush.msrb.mxu3 %v1899_v59  ;;  %2061 = vmatpush.msra.mxu2 %v1873_v12  ;;  %v1853_v59 = vld [vmem:[%s12321_s16 + $0x40] sm:$0xff] }
 0x192   : > { %2132 = vmatpush.msra.mxu1 %v1884_v54  ;;  %2107 = vmatpush.msra.mxu0 %v1862_v60 }
 0x193   : > { %2085 = vmatpush.msrb.mxu3 %v1897_v63  ;;  %2062 = vmatpush.msra.mxu2 %v1871_v17  ;;  %v1851_v63 = vld [vmem:[%s12321_s16 + $0x30] sm:$0xff] }
 0x194   : > { %2133 = vmatpush.msra.mxu1 %v1882_v56  ;;  %2108 = vmatpush.msra.mxu0 %v1860_v0 }
 0x195   : > { %2086 = vmatpush.msrb.mxu3 %v1895_v3  ;;  %2063 = vmatpush.msra.mxu2 %v1869_v21  ;;  %v1858_v3 = vld [vmem:[%s12321_s16 + $0x68] sm:$0xff] }
 0x196   : > { %2134 = vmatpush.msra.mxu1 %v1880_v61  ;;  %2109 = vmatpush.msra.mxu0 %v1858_v3 }
 0x197   : > { %2087 = vmatpush.msrb.mxu3 %v1893_v8  ;;  %2064 = vmatpush.msra.mxu2 %v1867_v25  ;;  %v1854_v8 = vld [vmem:[%s12321_s16 + $0x48] sm:$0xff] }
 0x198   : > { %2135 = vmatpush.msra.mxu1 %v1878_v1  ;;  %2110 = vmatpush.msra.mxu0 %v1856_v6 }
 0x199   : > { %2088 = vmatpush.msrb.mxu3 %v1891_v13  ;;  %2065 = vmatpush.msra.mxu2 %v1865_v31  ;;  %v1852_v13 = vld [vmem:[%s12321_s16 + $0x38] sm:$0xff] }
 0x19a   : > { %2111 = vmatpush.msra.mxu0 %v1854_v8 }
 0x19b   : > { %2089 = vmatpush.msrb.mxu3 %v1889_v18  ;;  %2066 = vmatpush.msra.mxu2 %v1863_v35  ;;  %v1846_v18 = vld [vmem:[%s12321_s16 + $0x8] sm:$0xff] }
 0x19c   : > { %2112 = vmatpush.msra.mxu0 %v1852_v13 }
 0x19d   : > { %2090 = vmatpush.msrb.mxu3 %v1887_v22  ;;  %2067 = vmatpush.msra.mxu2 %v1861_v40 }
 0x19e   : > { %2113 = vmatpush.msra.mxu0 %v1850_v14 }
 0x19f   : > { %2091 = vmatpush.msrb.mxu3 %v1885_v26  ;;  %2068 = vmatpush.msra.mxu2 %v1859_v45 }
 0x1a0   : > { %2114 = vmatpush.msra.mxu0 %v1848_v16 }
 0x1a1   : > { %2092 = vmatpush.msrb.mxu3 %v1883_v32  ;;  %2069 = vmatpush.msra.mxu2 %v1857_v52 }
 0x1a2   : > { %2115 = vmatpush.msra.mxu0 %v1846_v18 }
 0x1a3   : > { %2093 = vmatpush.msrb.mxu3 %v1881_v36  ;;  %2070 = vmatpush.msra.mxu2 %v1855_v51 }
 0x1a5   : > { %2094 = vmatpush.msrb.mxu3 %v1879_v41  ;;  %2071 = vmatpush.msra.mxu2 %v1853_v59 }
 0x1a7   : > { %2095 = vmatpush.msrb.mxu3 %v1877_v46  ;;  %2072 = vmatpush.msra.mxu2 %v1851_v63 }
 0x1a9   : > { %2073 = vmatpush.msra.mxu2 %v1849_v2 }
 0x1ab   : > { %2074 = vmatpush.msra.mxu2 %v1847_v5 }
 0x1ad   : > { %2075 = vmatpush.msra.mxu2 %v1845_v7 }
 0x1bd   : > { %v11436_v15 = vpop.f32.mrf.mxu1 }
 0x1c3   : > { %v11422_v10 = vpop.f32.mrf.mxu3 }
 0x1c5   : > { %v11502_v38 = vpop.f32.mrf.mxu1 }
 0x1cb   : > { %v11474_v28 = vpop.f32.mrf.mxu3  ;;  %v11476_v29 = vpop.f32.mrf.mxu0 }
 0x1cc   : > { %v1597_v25 = vadd.f32 %v11436_v15, %v11476_v29 }
 0x1cd   : > { %v1688_v57 = vpop.f32.mrf.mxu1 }
 0x1d1   : > { %v11516_v43 = vpop.f32.mrf.mxu2 }
 0x1d2   : > { %v1551_v15 = vadd.f32 %v11422_v10, %v11516_v43 }
 0x1d3   : > { %v11530_v48 = vpop.f32.mrf.mxu3  ;;  %v1576_v50 = vpop.f32.mrf.mxu0 }
 0x1d4   : > { %v1600_v19 = vadd.f32 %v11502_v38, %v1576_v50 }
 0x1d5   : > { %v1691_v11 = vpop.f32.mrf.mxu1 }
 0x1d9   : > { %v1530_v58 = vpop.f32.mrf.mxu2 }
 0x1da   : > { %v1554_v36 = vadd.f32 %v11474_v28, %v1530_v58 }
 0x1db   : > { %v11562_v62 = vpop.f32.mrf.mxu3  ;;  %v1665_v4 = vpop.f32.mrf.mxu0 }
 0x1dc   : > { %v1666_v27 = vadd.f32 %v1665_v4, %v1597_v25 }
 0x1dd   : > { %v1838_v23 = vpop.f32.mrf.mxu1 }
 0x1de   : > { %v1689_v34 = vadd.f32 %v1688_v57, %v1666_v27 }
 0x1e0   : > { %v1695_v37 = vmax.f32 %v1689_v34, 0.0 }
 0x1e1   : > { %v1619_v9 = vpop.f32.mrf.mxu2 }
 0x1e2   : > { %v1620_v42 = vadd.f32 %v1619_v9, %v1551_v15 }
 0x1e3   : > { %v1748_v12 = vpop.f32.mrf.mxu3  ;;  %v1668_v17 = vpop.f32.mrf.mxu0 }
 0x1e4   : > { %v1669_v21 = vadd.f32 %v1668_v17, %v1600_v19  ;;  %v1643_v47 = vadd.f32 %v11530_v48, %v1620_v42 }
 0x1e6   : > { %v1692_v30 = vadd.f32 %v1691_v11, %v1669_v21  ;;  %v1694_v49 = vmax.f32 %v1643_v47, 0.0 }
 0x1e8   : > { %v1697_v35 = vmax.f32 %v1692_v30, 0.0 }
 0x1e9   : > { %v1622_v20 = vpop.f32.mrf.mxu2 }
 0x1ea   : > { %v1623_v38 = vadd.f32 %v1622_v20, %v1554_v36  ;;  %v11630_v36 = vld [vmem:[%s10735_s4 + $0x8] sm:$0xff] }
 0x1eb   : > { %v1790_v22 = vpop.f32.mrf.mxu3 }
 0x1ec   : > { %v1791_v24 = vadd.f32 %v1790_v22, %v1748_v12  ;;  %v1646_v44 = vadd.f32 %v11562_v62, %v1623_v38 }
 0x1ee   : > { %v1842_v26 = vadd.f32 %v1838_v23, %v1791_v24  ;;  %v1696_v28 = vmax.f32 %v1646_v44, 0.0 }
 0x1f0   : > { %v1844_v31 = vmax.f32 %v1842_v26, 0.0  ;;  %v11622_v26 = vld [vmem:[%s10735_s4] sm:$0xff] }
 0x1f1   : > { %v1728_v32 = vpop.f32.mrf.mxu2 }
 0x1f2   : > { %v1977_v33 = vrot.slane %v1844_v31, 1 }
 0x1f3   : > { %v1818_v40 = vpop.f32.mrf.mxu3 }
 0x1f4   : > { %2016 = vmatmul.f32.vlgmr.msra.gmra.mxu3 %v1977_v33  ;;  %2056 = vmatmul.f32.vlgmr.msrb.gmra.mxu1 %v1977_v33 }
 0x1f5   : > { %2176 = vmatpush.xpose.msra.mxu3 %v1697_v35 }
 0x1f9   : > { %2177 = vmatpush.xpose.msra.mxu3 %v1695_v37  ;;  %v1770_v39 = vpop.f32.mrf.mxu2 }
 0x1fa   : > { %v1771_v41 = vadd.f32 %v1770_v39, %v1728_v32 }
 0x1fc   : > { %v1841_v29 = vadd.f32 %v1818_v40, %v1771_v41  ;;  %2096 = vmatmul.f32.vlgmr.msrb.gmra.mxu3 %v1844_v31  ;;  %2136 = vmatmul.f32.vlgmr.msra.gmra.mxu1 %v1844_v31 }
 0x1fe   : > { %v1843_v45 = vmax.f32 %v1841_v29, 0.0 }
 0x200   : > { %v1976_v46 = vrot.slane %v1843_v45, 1 }
 0x202   : > { %1996 = vmatmul.f32.vlgmr.msrb.gmra.mxu2 %v1976_v46  ;;  %2036 = vmatmul.f32.vlgmr.msrb.gmra.mxu0 %v1976_v46 }
 0x203   : > { %2156 = vmatpush.xpose.msrb.mxu2 %v1696_v28 }
 0x207   : > { %2157 = vmatpush.xpose.msrb.mxu2 %v1694_v49 }
 0x20a   : > { %2076 = vmatmul.f32.vlgmr.msra.gmra.mxu2 %v1843_v45  ;;  %2116 = vmatmul.f32.vlgmr.msra.gmra.mxu0 %v1843_v45 }
 0x271   : > { %v2057_v50 = vpop.f32.mrf.mxu1 }
 0x277   : > { %v2017_v43 = vpop.f32.mrf.mxu3 }
 0x279   : > { %v2137_v55 = vpop.f32.mrf.mxu1 }
 0x27f   : > { %v2037_v10 = vpop.f32.mrf.mxu0  ;;  %v2097_v60 = vpop.f32.mrf.mxu3 }
 0x280   : > { %v2058_v53 = vadd.f32 %v2057_v50, %v2037_v10 }
 0x285   : > { %v1997_v52 = vpop.f32.mrf.mxu2 }
 0x286   : > { %v2018_v57 = vadd.f32 %v2017_v43, %v1997_v52 }
 0x287   : > { %v2117_v54 = vpop.f32.mrf.mxu0 }
 0x288   : > { %v2118_v51 = vadd.f32 %v2117_v54, %v2058_v53 }
 0x28a   : > { %v2138_v56 = vadd.f32 %v2137_v55, %v2118_v51 }
 0x28c   : > { %v2141_v58 = vmax.f32 %v2138_v56, 0.0 }
 0x28d   : > { %v2077_v48 = vpop.f32.mrf.mxu2 }
 0x28e   : > { %v2078_v59 = vadd.f32 %v2077_v48, %v2018_v57  ;;  %2178 = vmatmul.f32.vlgmr.msra.gmra.mxu3 %v2141_v58 }
 0x290   : > { %v2098_v61 = vadd.f32 %v2097_v60, %v2078_v59 }
 0x292   : > { %v2140_v62 = vmax.f32 %v2098_v61, 0.0 }
 0x294   : > { %2158 = vmatmul.f32.vlgmr.msrb.gmra.mxu2 %v2140_v62 }
 0x311   : > { %v2179_v1 = vpop.f32.mrf.mxu3 }
 0x317   : > { %v2159_v63 = vpop.f32.mrf.mxu2 }
 0x318   : > { %v2160_v0 = vadd.f32 1e-15, %v2159_v63 }
 0x31a   : > { %v2180_v2 = vadd.f32 %v2179_v1, %v2160_v0 }
 0x31c   : > { %v2183_v3 = vsel %vm2182_vm3, %v2180_v2, 0.0 }
 0x31d   : > { %2184 = vadd.xlane.f32.xlu0 %v2183_v3 }
 0x390   : > { %v2185_v4 = vpop.xlane.xlu0 %2184 }
 0x391   : > { %9439 = vrcp.f32 %v2185_v4  ;;  %v2197_v8 = vand.u32 2147483648, %v2185_v4  ;;  %v2195_v11 = vand.u32 2147483647, %v2185_v4  ;;  %vm2191_vm5 = vweird.f32 %v2185_v4 }
 0x393   : > { %v2198_v13 = vor.u32 1.1754944e-38, %v2197_v8  ;;  %vm2196_vm7 = vcmp.eq.f32.partialorder %v2195_v11, 8.507059e+37 }
 0x397   : > { %v9440_v5 = vpop.eup %9439 }
 0x398   : > { %v2187_v6 = vmul.f32 %v9440_v5, %v2185_v4  ;;  %vm2192_vm4 = vweird.f32 %v9440_v5 }
 0x399   : > { %vm2193_vm6 = vmor %vm2191_vm5, %vm2192_vm4 }
 0x39a   : > { %v2188_v7 = vsub.f32 1.0, %v2187_v6 }
 0x39c   : > { %v2189_v9 = vmul.f32 %v9440_v5, %v2188_v7 }
 0x39e   : > { %v2190_v12 = vadd.f32 %v9440_v5, %v2189_v9 }
 0x3a0   : > { %v2194_v14 = vsel %vm2193_vm6, %v9440_v5, %v2190_v12 }
 0x3a1   : > { %v2199_v16 = vsel %vm2196_vm7, %v2198_v13, %v2194_v14 }
 0x3a2   : > { %v2200_v17 = vmul.f32 %v2199_v16, %v2180_v2 }
 0x3a4   : > { %2258 = vrot.lane.b32.xlu2 %v2200_v17, %s10339_s1  ;;  %2224 = vrot.lane.b32.xlu1 %v2200_v17, %s10340_s3  ;;  %9179 = vpush %v2200_v17 }
 0x3a5   : > { %2207 = vrot.lane.b32.xlu0 %v2200_v17, %s10341_s6 }
 0x3ac   : > { %2275 = vrot.lane.b32.xlu2 %v2200_v17, %s10342_s29  ;;  %2241 = vrot.lane.b32.xlu1 %v2200_v17, %s10343_s5 }
 0x3b4   : > { %2309 = vrot.lane.b32.xlu2 %v2200_v17, %s10344_s12  ;;  %2292 = vrot.lane.b32.xlu1 %v2200_v17, %s10345_s2 }
 0x3bc   : > { %2326 = vrot.lane.b32.xlu1 %v2200_v17, %s12257_s8 }
 0x3d5   : > { %s11619_s15 = spop %9179 }
 0x3d6   : > { %v2203_v48 = vstv %s11619_s15  ;;  %s9172_s15 = sshll.u32 %s12318_s27, 3 }
 0x3d7   : > { %v2205_v61 = vmul.f32 %v2203_v48, %v11622_v26  ;;  %v2206_v6 = vmul.f32 %v2203_v48, %v11630_v36  ;;  %v2633_v48 = vld [vmem:[#allocation14 + $0x70] sm:$0xff] }
 0x3fe   : > { %v2259_v18 = vpop.permute.xlu2 %2258 }
 0x406   : > { %v2276_v21 = vpop.permute.xlu2 %2275 }
 0x40e   : > { %v2310_v24 = vpop.permute.xlu2 %2309 }
 0x416   : > { %v2225_v19 = vpop.permute.xlu1 %2224 }
 0x417   : > { %v2208_v20 = vpop.permute.xlu0 %2207 }
 0x418   : > { %9181 = vpush %v2208_v20 }
 0x419   : > { %9183 = vpush %v2225_v19 }
 0x41e   : > { %v2242_v22 = vpop.permute.xlu1 %2241 }
 0x41f   : > { %9185 = vpush %v2242_v22 }
 0x420   : > { %9187 = vpush %v2259_v18 }
 0x421   : > { %9189 = vpush %v2276_v21 }
 0x426   : > { %v2293_v23 = vpop.permute.xlu1 %2292 }
 0x427   : > { %9191 = vpush %v2293_v23 }
 0x428   : > { %9193 = vpush %v2310_v24 }
 0x42e   : > { %v2327_v25 = vpop.permute.xlu1 %2326 }
 0x42f   : > { %9195 = vpush %v2327_v25 }
 0x449   : > { %s9182_s0 = spop %9181 }
 0x44a   : > { %v2210_v27 = vstv %s9182_s0  ;;  %s9184_s18 = spop %9183 }
 0x44b   : > { %v2212_v30 = vmul.f32 %v2210_v27, %v11622_v26  ;;  %v2227_v31 = vstv %s9184_s18  ;;  %v2213_v38 = vmul.f32 %v2210_v27, %v11630_v36 }
 0x44c   : > { %v2229_v32 = vmul.f32 %v2227_v31, %v11622_v26  ;;  %v2230_v29 = vmul.f32 %v2227_v31, %v11630_v36 }
 0x44d   : > { %2216 = vrot.lane.b32.xlu2 %v2212_v30, %s10341_s6 }
 0x44e   : > { %2233 = vrot.lane.b32.xlu0 %v2229_v32, %s10340_s3 }
 0x450   : > { %s9186_s14 = spop %9185 }
 0x451   : > { %v2244_v33 = vstv %s9186_s14  ;;  %s9188_s8 = spop %9187 }
 0x452   : > { %v2246_v34 = vmul.f32 %v2244_v33, %v11622_v26  ;;  %v2261_v35 = vstv %s9188_s8  ;;  %s9190_s0 = spop %9189  ;;  %v2247_v44 = vmul.f32 %v2244_v33, %v11630_v36  ;;  %s12323_s8 = sld [smem:[#allocation50_spill]] }
 0x453   : > { %v2263_v37 = vmul.f32 %v2261_v35, %v11622_v26  ;;  %v2278_v39 = vstv %s9190_s0  ;;  %v2264_v46 = vmul.f32 %v2261_v35, %v11630_v36  ;;  %s8900_s0 = sshll.u32 %s10731_s11, 3 }
 0x454   : > { %2250 = vrot.lane.b32.xlu1 %v2246_v34, %s10343_s5  ;;  %v2280_v41 = vmul.f32 %v2278_v39, %v11622_v26  ;;  %v2281_v49 = vmul.f32 %v2278_v39, %v11630_v36 }
 0x455   : > { %2267 = vrot.lane.b32.xlu2 %v2263_v37, %s10339_s1 }
 0x456   : > { %2218 = vrot.lane.b32.xlu0 %v2213_v38, %s10341_s6 }
 0x458   : > { %s9192_s18 = spop %9191  ;;  %s12324_s14 = smov %s12323_s8  ;;  %v2344_v53 = vld [vmem:[%s12323_s8 + $0x8] sm:$0xf] }
 0x459   : > { %v2295_v40 = vstv %s9192_s18  ;;  %s9194_s4 = spop %9193  ;;  %9048 = vmatpush.msk.msrb.mxu0 %vm2352_vm8, %v2344_v53  ;;  %v2343_v55 = vld [vmem:[%s12324_s14] sm:$0xff]  ;;  %v2671_v53 = vld [vmem:[#allocation14 + $0x1a0] sm:$0xff]  ;;  %s12330_s8 = sld [smem:[#allocation52_spill]] }
 0x45a   : > { %v2297_v15 = vmul.f32 %v2295_v40, %v11622_v26  ;;  %v2312_v42 = vstv %s9194_s4  ;;  %v2298_v50 = vmul.f32 %v2295_v40, %v11630_v36  ;;  %s12325_s4 = sld [smem:[#allocation51_spill]]  ;;  %s8588_s14 = scalar_lea.sflag [#allocation4], %s10731_s11 }
 0x45b   : > { %v2314_v45 = vmul.f32 %v2312_v42, %v11622_v26  ;;  %v2315_v10 = vmul.f32 %v2312_v42, %v11630_v36  ;;  %2371 = vmatpush.msrb.mxu0 %v2343_v55  ;;  %v2647_v42 = vld [vmem:[#allocation14 + $0xe0] sm:$0xff]  ;;  %v2637_v55 = vld [vmem:[#allocation14 + $0x90] sm:$0xff] }
 0x45c   : > { %2284 = vrot.lane.b32.xlu1 %v2280_v41, %s10342_s29 }
 0x45d   : > { %2235 = vrot.lane.b32.xlu2 %v2230_v29, %s10340_s3  ;;  %s12322_s3 = smov 120   ;;  %v2681_v29 = vld [vmem:[#allocation14 + $0x1f0] sm:$0xff] }
 0x45e   : > { %2301 = vrot.lane.b32.xlu0 %v2297_v15, %s10345_s2  ;;  %v2649_v15 = vld [vmem:[#allocation14 + $0xf0] sm:$0xff] }
 0x460   : > { %s9196_s6 = spop %9195  ;;  %v2381_v56 = vld [vmem:[%s12325_s4 + $0x10] sm:$0xf]  ;;  %v2380_v57 = vld [vmem:[%s12325_s4 + $0x8] sm:$0xff]  ;;  %v2379_v58 = vld [vmem:[%s12325_s4] sm:$0xff]  ;;  %s12331_s4 = sld [smem:[#allocation69_spill]] }
 0x461   : > { %v2329_v47 = vstv %s9196_s6  ;;  %9051 = vmatpush.msk.msrb.mxu1 %vm2352_vm8, %v2381_v56  ;;  %v2669_v56 = vld [vmem:[#allocation14 + $0x190] sm:$0xff] }
 0x462   : > { %v2331_v28 = vmul.f32 %v2329_v47, %v11622_v26  ;;  %v2332_v43 = vmul.f32 %v2329_v47, %v11630_v36  ;;  %v2643_v47 = vld [vmem:[#allocation14 + $0xc0] sm:$0xff] }
 0x463   : > { %2406 = vmatpush.msrb.mxu1 %v2380_v57  ;;  %v2635_v57 = vld [vmem:[#allocation14 + $0x80] sm:$0xff] }
 0x464   : > { %2252 = vrot.lane.b32.xlu1 %v2247_v44, %s10343_s5  ;;  %s12327_s5 = sld [smem:[#allocation57_spill]]  ;;  %v2679_v44 = vld [vmem:[#allocation14 + $0x1e0] sm:$0xff] }
 0x465   : > { %2318 = vrot.lane.b32.xlu2 %v2314_v45, %s10344_s12  ;;  %2407 = vmatpush.msrb.mxu1 %v2379_v58  ;;  %v2645_v45 = vld [vmem:[#allocation14 + $0xd0] sm:$0xff]  ;;  %v2667_v58 = vld [vmem:[#allocation14 + $0x180] sm:$0xff] }
 0x466   : > { %2269 = vrot.lane.b32.xlu0 %v2264_v46, %s10339_s1  ;;  %9052 = vmatmul.msk.f32.vlgmr.msrb.gmra.mxu1 %vm2382_vm9, %v11622_v26  ;;  %v2677_v46 = vld [vmem:[#allocation14 + $0x1d0] sm:$0xff]  ;;  %s8598_s6 = scalar_lea.hbm %s12331_s4, %s9172_s15  ;;  %s10231_s15 = scalar_lea.hbm %s12331_s4, 16 }
 0x46a   : > { %v2417_v34 = vld [vmem:[%s12327_s5 + $0x10] sm:$0xf] }
 0x46b   : > { %9060 = vmatpush.msk.msra.mxu0 %vm2352_vm8, %v2417_v34  ;;  %v2630_v34 = vld [vmem:[#allocation14 + $0x58] sm:$0xff] }
 0x46c   : > { %2335 = vrot.lane.b32.xlu1 %v2331_v28, %s12322_s3  ;;  %v2675_v28 = vld [vmem:[#allocation14 + $0x1c0] sm:$0xff] }
 0x46d   : > { %2286 = vrot.lane.b32.xlu2 %v2281_v49, %s10342_s29  ;;  %s12326_s29 = sld [smem:[#allocation58_spill]]  ;;  %v2641_v49 = vld [vmem:[#allocation14 + $0xb0] sm:$0xff] }
 0x46e   : > { %2303 = vrot.lane.b32.xlu0 %v2298_v50, %s10345_s2  ;;  %9053 = vmatmul.msk.f32.gmra.mxu1 %vm2382_vm9, %v11630_v36  ;;  %s12328_s2 = smov %s12327_s5  ;;  %v2673_v50 = vld [vmem:[#allocation14 + $0x1b0] sm:$0xff] }
 0x46f   : > { %v2418_v35 = vld [vmem:[%s12328_s2 + $0x18] sm:$0xf]  ;;  %v2415_v36 = vld [vmem:[%s12328_s2] sm:$0xff]  ;;  %v2416_v37 = vld [vmem:[%s12328_s2 + $0x8] sm:$0xff] }
 0x470   : > { %9063 = vmatpush.msk.msra.mxu1 %vm2352_vm8, %v2418_v35  ;;  %2508 = vmatpush.msra.mxu0 %v2415_v36  ;;  %v2662_v35 = vld [vmem:[#allocation14 + $0x158] sm:$0xff]  ;;  %v2627_v36 = vld [vmem:[#allocation14 + $0x40] sm:$0xff] }
 0x472   : > { %2531 = vmatpush.msra.mxu1 %v2416_v37  ;;  %v2659_v37 = vld [vmem:[#allocation14 + $0x140] sm:$0xff] }
 0x473   : > { %v2421_v0 = vld [vmem:[%s12326_s29 + $0x10] sm:$0xf]  ;;  %v2422_v1 = vld [vmem:[%s12326_s29 + $0x18] sm:$0xf]  ;;  %v2419_v32 = vld [vmem:[%s12326_s29] sm:$0xff] }
 0x474   : > { %2320 = vrot.lane.b32.xlu1 %v2315_v10, %s10344_s12  ;;  %9054 = vmatpush.msk.msra.mxu2 %vm2352_vm8, %v2421_v0  ;;  %v2420_v33 = vld [vmem:[%s12326_s29 + $0x8] sm:$0xff]  ;;  %s12329_s12 = sld [smem:[#allocation67_spill]] }
 0x475   : > { %2337 = vrot.lane.b32.xlu2 %v2332_v43, %s12322_s3  ;;  %9057 = vmatpush.msk.msrb.mxu3 %vm2352_vm8, %v2422_v1  ;;  %s1173_s3 = scalar_lea.vmem [#allocation32], %s8900_s0 }
 0x476   : > { %2450 = vmatpush.msra.mxu2 %v2419_v32  ;;  %2709 = vmatpush.msrb.mxu1 %v2681_v29  ;;  %v2629_v32 = vld [vmem:[#allocation14 + $0x50] sm:$0xff]  ;;  %s8600_s2 = sshll.u32 %s1173_s3, 4  ;;  %s8601_s2 = int_to_ptr.vmem [resolvable:$true] %s8600_s2 }
 0x477   : > { %2473 = vmatpush.msrb.mxu3 %v2420_v33  ;;  %v2661_v33 = vld [vmem:[#allocation14 + $0x150] sm:$0xff] }
 0x478   : > { %2710 = vmatpush.msrb.mxu1 %v2679_v44  ;;  %v2657_v29 = vld [vmem:[#allocation14 + $0x130] sm:$0xff]  ;;  %v2658_v44 = vld [vmem:[#allocation14 + $0x138] sm:$0xff] }
 0x47a   : > { %2711 = vmatpush.msrb.mxu1 %v2677_v46  ;;  %v2655_v46 = vld [vmem:[#allocation14 + $0x120] sm:$0xff] }
 0x47c   : > { %2712 = vmatpush.msrb.mxu1 %v2675_v28  ;;  %v2656_v28 = vld [vmem:[#allocation14 + $0x128] sm:$0xff] }
 0x47e   : > { %2713 = vmatpush.msrb.mxu1 %v2673_v50  ;;  %v2653_v50 = vld [vmem:[#allocation14 + $0x110] sm:$0xff] }
 0x480   : > { %2714 = vmatpush.msrb.mxu1 %v2671_v53  ;;  %v2651_v53 = vld [vmem:[#allocation14 + $0x100] sm:$0xff] }
 0x482   : > { %2715 = vmatpush.msrb.mxu1 %v2669_v56 }
 0x484   : > { %2716 = vmatpush.msrb.mxu1 %v2667_v58 }
 0x4a7   : > { %v2217_v52 = vpop.permute.xlu2 %2216 }
 0x4a8   : > { %v2222_v63 = vadd.f32 %v2217_v52, %v2205_v61  ;;  %v2639_v52 = vld [vmem:[#allocation14 + $0xa0] sm:$0xff] }
 0x4af   : > { %v2268_v54 = vpop.permute.xlu2 %2267 }
 0x4b7   : > { %v2236_v62 = vpop.permute.xlu2 %2235 }
 0x4bf   : > { %v2319_v8 = vpop.permute.xlu2 %2318 }
 0x4c0   : > { %v2234_v51 = vpop.permute.xlu0 %2233 }
 0x4c1   : > { %v2239_v2 = vadd.f32 %v2234_v51, %v2222_v63 }
 0x4c6   : > { %v2251_v59 = vpop.permute.xlu1 %2250 }
 0x4c7   : > { %v2256_v4 = vadd.f32 %v2251_v59, %v2239_v2  ;;  %v2287_v19 = vpop.permute.xlu2 %2286  ;;  %v2665_v59 = vld [vmem:[#allocation14 + $0x170] sm:$0xff] }
 0x4c8   : > { %v2219_v60 = vpop.permute.xlu0 %2218  ;;  %2717 = vmatpush.msrb.mxu1 %v2665_v59 }
 0x4c9   : > { %v2273_v7 = vadd.f32 %v2268_v54, %v2256_v4  ;;  %v2223_v9 = vadd.f32 %v2219_v60, %v2206_v6  ;;  %v2539_v4 = vld [vmem:[#allocation8] sm:$0xff]  ;;  %v2682_v6 = vld [vmem:[#allocation14 + $0x1f8] sm:$0xff] }
 0x4cb   : > { %v2240_v16 = vadd.f32 %v2236_v62, %v2223_v9  ;;  %v2646_v9 = vld [vmem:[#allocation14 + $0xd8] sm:$0xff] }
 0x4ce   : > { %v2285_v3 = vpop.permute.xlu1 %2284 }
 0x4cf   : > { %v2290_v11 = vadd.f32 %v2285_v3, %v2273_v7  ;;  %v2338_v30 = vpop.permute.xlu2 %2337  ;;  %v2648_v7 = vld [vmem:[#allocation14 + $0xe8] sm:$0xff] }
 0x4d0   : > { %v2302_v5 = vpop.permute.xlu0 %2301 }
 0x4d1   : > { %v2307_v14 = vadd.f32 %v2302_v5, %v2290_v11  ;;  %v2650_v5 = vld [vmem:[#allocation14 + $0xf8] sm:$0xff] }
 0x4d2   : > { %v2678_v11 = vld [vmem:[#allocation14 + $0x1d8] sm:$0xff] }
 0x4d3   : > { %v2324_v18 = vadd.f32 %v2319_v8, %v2307_v14  ;;  %v2680_v8 = vld [vmem:[#allocation14 + $0x1e8] sm:$0xff]  ;;  %v2540_v14 = vld [vmem:[#allocation8 + $0x8] sm:$0xff] }
 0x4d6   : > { %v2253_v12 = vpop.permute.xlu1 %2252 }
 0x4d7   : > { %v2257_v17 = vadd.f32 %v2253_v12, %v2240_v16  ;;  %v2644_v12 = vld [vmem:[#allocation14 + $0xc8] sm:$0xff]  ;;  %v2642_v16 = vld [vmem:[#allocation14 + $0xb8] sm:$0xff] }
 0x4d8   : > { %v2270_v13 = vpop.permute.xlu0 %2269 }
 0x4d9   : > { %v2274_v21 = vadd.f32 %v2270_v13, %v2257_v17  ;;  %v2676_v13 = vld [vmem:[#allocation14 + $0x1c8] sm:$0xff]  ;;  %v2674_v17 = vld [vmem:[#allocation14 + $0x1b8] sm:$0xff] }
 0x4db   : > { %v2291_v24 = vadd.f32 %v2287_v19, %v2274_v21  ;;  %v2672_v19 = vld [vmem:[#allocation14 + $0x1a8] sm:$0xff]  ;;  %v2670_v21 = vld [vmem:[#allocation14 + $0x198] sm:$0xff] }
 0x4de   : > { %v2336_v20 = vpop.permute.xlu1 %2335 }
 0x4df   : > { %v2341_v22 = vadd.f32 %v2336_v20, %v2324_v18  ;;  %v2640_v18 = vld [vmem:[#allocation14 + $0xa8] sm:$0xff]  ;;  %v2638_v20 = vld [vmem:[#allocation14 + $0x98] sm:$0xff] }
 0x4e0   : > { %v2304_v23 = vpop.permute.xlu0 %2303 }
 0x4e1   : > { %9049 = vmatmul.msk.f32.vlgmr.msrb.gmra.mxu0 %vm2345_vm10, %v2341_v22  ;;  %v2308_v25 = vadd.f32 %v2304_v23, %v2291_v24  ;;  %v2636_v22 = vld [vmem:[#allocation14 + $0x88] sm:$0xff]  ;;  %v2634_v24 = vld [vmem:[#allocation14 + $0x78] sm:$0xff] }
 0x4e2   : > { %2686 = vmatpush.msrb.mxu0 %v2649_v15  ;;  %v2668_v23 = vld [vmem:[#allocation14 + $0x188] sm:$0xff]  ;;  %v2625_v15 = vld [vmem:[#allocation14 + $0x30] sm:$0xff] }
 0x4e3   : > { %v11711_v38 = vpop.f32.mrf.mxu1 }
 0x4e4   : > { %9064 = vmatmul.msk.f32.vlgmr.msra.gmra.mxu1 %vm2345_vm10, %v11711_v38  ;;  %2687 = vmatpush.msrb.mxu0 %v2647_v42  ;;  %v2626_v42 = vld [vmem:[#allocation14 + $0x38] sm:$0xff] }
 0x4e6   : > { %v2321_v26 = vpop.permute.xlu1 %2320  ;;  %2688 = vmatpush.msrb.mxu0 %v2645_v45  ;;  %v2623_v45 = vld [vmem:[#allocation14 + $0x20] sm:$0xff] }
 0x4e7   : > { %v2325_v27 = vadd.f32 %v2321_v26, %v2308_v25  ;;  %v2666_v25 = vld [vmem:[#allocation14 + $0x178] sm:$0xff]  ;;  %v2631_v26 = vld [vmem:[#allocation14 + $0x60] sm:$0xff] }
 0x4e8   : > { %2689 = vmatpush.msrb.mxu0 %v2643_v47  ;;  %v2624_v47 = vld [vmem:[#allocation14 + $0x28] sm:$0xff] }
 0x4e9   : > { %v2342_v31 = vadd.f32 %v2338_v30, %v2325_v27  ;;  %v2663_v27 = vld [vmem:[#allocation14 + $0x160] sm:$0xff]  ;;  %v2632_v30 = vld [vmem:[#allocation14 + $0x68] sm:$0xff] }
 0x4ea   : > { %2690 = vmatpush.msrb.mxu0 %v2641_v49  ;;  %2718 = vmatpush.msrb.mxu1 %v2663_v27  ;;  %v2621_v49 = vld [vmem:[#allocation14 + $0x10] sm:$0xff]  ;;  %v2881_v27 = vld [vmem:[#allocation22 + $0xd0] sm:$0xff] }
 0x4eb   : > { %9050 = vmatmul.msk.f32.gmra.mxu0 %vm2345_vm10, %v2342_v31  ;;  %v11717_v39 = vpop.f32.mrf.mxu1  ;;  %v2664_v31 = vld [vmem:[#allocation14 + $0x168] sm:$0xff] }
 0x4ec   : > { %9065 = vmatmul.msk.f32.gmra.mxu1 %vm2345_vm10, %v11717_v39  ;;  %2691 = vmatpush.msrb.mxu0 %v2639_v52  ;;  %v2619_v52 = vld [vmem:[#allocation14] sm:$0xff] }
 0x4ed   : > { %2719 = vmatpush.msrb.mxu1 %v2661_v33  ;;  %v2879_v33 = vld [vmem:[#allocation22 + $0xc0] sm:$0xff] }
 0x4ee   : > { %2692 = vmatpush.msrb.mxu0 %v2637_v55  ;;  %v2541_v55 = vld [vmem:[#allocation10] sm:$0x3] }
 0x4ef   : > { %2720 = vmatpush.msrb.mxu1 %v2659_v37  ;;  %v2543_v56 = vperm.slane %v2541_v55, 0  ;;  %v2875_v37 = vld [vmem:[#allocation22 + $0xa0] sm:$0xff] }
 0x4f0   : > { %2693 = vmatpush.msrb.mxu0 %v2635_v57  ;;  %v2544_v57 = vperm.slane %v2541_v55, 1 }
 0x4f1   : > { %2721 = vmatpush.msrb.mxu1 %v2657_v29  ;;  %v2873_v29 = vld [vmem:[#allocation22 + $0x90] sm:$0xff] }
 0x4f2   : > { %2694 = vmatpush.msrb.mxu0 %v2633_v48  ;;  %v2599_v48 = vld [vmem:[#allocation11] sm:$0xff] }
 0x4f3   : > { %9061 = vmatmul.msk.f32.vlgmr.msra.gmra.mxu0 %vm2345_vm10, %v11711_v38  ;;  %2722 = vmatpush.msrb.mxu1 %v2655_v46  ;;  %v2871_v46 = vld [vmem:[#allocation22 + $0x80] sm:$0xff] }
 0x4f4   : > { %2695 = vmatpush.msrb.mxu0 %v2631_v26  ;;  %v2915_v26 = vld [vmem:[#allocation22 + $0x1e0] sm:$0xff] }
 0x4f5   : > { %2723 = vmatpush.msrb.mxu1 %v2653_v50 }
 0x4f6   : > { %2696 = vmatpush.msrb.mxu0 %v2629_v32 }
 0x4f7   : > { %2724 = vmatpush.msrb.mxu1 %v2651_v53 }
 0x4f8   : > { %2697 = vmatpush.msrb.mxu0 %v2627_v36  ;;  %v2909_v36 = vld [vmem:[#allocation22 + $0x1b0] sm:$0xff] }
 0x4fa   : > { %2698 = vmatpush.msrb.mxu0 %v2625_v15 }
 0x4fb   : > { %9062 = vmatmul.msk.f32.gmra.mxu0 %vm2345_vm10, %v11717_v39 }
 0x4fc   : > { %2699 = vmatpush.msrb.mxu0 %v2623_v45 }
 0x4fe   : > { %2700 = vmatpush.msrb.mxu0 %v2621_v49  ;;  %v2869_v49 = vld [vmem:[#allocation22 + $0x70] sm:$0xff] }
 0x500   : > { %2701 = vmatpush.msrb.mxu0 %v2619_v52  ;;  %v2886_v52 = vld [vmem:[#allocation22 + $0xf8] sm:$0xff] }
 0x55e   : > { %v2373_v40 = vpop.f32.mrf.mxu0 }
 0x55f   : > { %9055 = vmatmul.msk.f32.vlgmr.msra.gmra.mxu2 %vm2345_vm10, %v2373_v40  ;;  %9058 = vmatmul.msk.f32.vlgmr.msrb.gmra.mxu3 %vm2345_vm10, %v2373_v40  ;;  %v2628_v40 = vld [vmem:[#allocation14 + $0x48] sm:$0xff] }
 0x561   : > { %v2533_v43 = vpop.f32.mrf.mxu1 }
 0x568   : > { %v2376_v41 = vpop.f32.mrf.mxu0 }
 0x569   : > { %9056 = vmatmul.msk.f32.gmra.mxu2 %vm2345_vm10, %v2376_v41  ;;  %9059 = vmatmul.msk.f32.gmra.mxu3 %vm2345_vm10, %v2376_v41  ;;  %v2536_v61 = vpop.f32.mrf.mxu1  ;;  %v2660_v41 = vld [vmem:[#allocation14 + $0x148] sm:$0xff] }
 0x570   : > { %v2510_v10 = vpop.f32.mrf.mxu0 }
 0x578   : > { %v2513_v60 = vpop.f32.mrf.mxu0 }
 0x5e2   : > { %v2452_v54 = vpop.f32.mrf.mxu2  ;;  %v2475_v51 = vpop.f32.mrf.mxu3 }
 0x5e3   : > { %v2511_v2 = vadd.f32 %v2510_v10, %v2452_v54  ;;  %v2534_v3 = vadd.f32 %v2533_v43, %v2475_v51  ;;  %v2622_v10 = vld [vmem:[#allocation14 + $0x18] sm:$0xff]  ;;  %v2620_v54 = vld [vmem:[#allocation14 + $0x8] sm:$0xff] }
 0x5e4   : > { %v2654_v43 = vld [vmem:[#allocation14 + $0x118] sm:$0xff]  ;;  %v2652_v51 = vld [vmem:[#allocation14 + $0x108] sm:$0xff] }
 0x5ec   : > { %v2455_v62 = vpop.f32.mrf.mxu2  ;;  %v2478_v63 = vpop.f32.mrf.mxu3 }
 0x5ed   : > { %v2514_v0 = vadd.f32 %v2513_v60, %v2455_v62  ;;  %v2537_v1 = vadd.f32 %v2536_v61, %v2478_v63  ;;  %v2600_v60 = vld [vmem:[#allocation11 + $0x8] sm:$0xff]  ;;  %v2607_v63 = vld [vmem:[#allocation13] sm:$0xff] }
 0x5ef   : > { %2567 = vmatpush.msrb.mxu2 %v2514_v0  ;;  %2590 = vmatpush.msra.mxu3 %v2537_v1  ;;  %v2608_v0 = vld [vmem:[#allocation13 + $0x8] sm:$0xff] }
 0x5f1   : > { %2568 = vmatpush.msrb.mxu2 %v2511_v2  ;;  %2591 = vmatpush.msra.mxu3 %v2534_v3 }
 0x5f2   : > { %9066 = vmatmul.msk.f32.vlgmr.msrb.gmra.mxu2 %vm1199_vm0, %v2539_v4  ;;  %9068 = vmatmul.msk.f32.vlgmr.msra.gmra.mxu3 %vm1199_vm0, %v2539_v4 }
 0x5f3   : > { %2732 = vmatpush.msra.mxu2 %v2650_v5  ;;  %2755 = vmatpush.msrb.mxu3 %v2682_v6  ;;  %v2601_v6 = vld [vmem:[#allocation11 + $0x10] sm:$0xff] }
 0x5f5   : > { %2733 = vmatpush.msra.mxu2 %v2648_v7  ;;  %2756 = vmatpush.msrb.mxu3 %v2680_v8  ;;  %v2602_v8 = vld [vmem:[#allocation11 + $0x18] sm:$0xff] }
 0x5f7   : > { %2734 = vmatpush.msra.mxu2 %v2646_v9  ;;  %2757 = vmatpush.msrb.mxu3 %v2678_v11 }
 0x5f9   : > { %2735 = vmatpush.msra.mxu2 %v2644_v12  ;;  %2758 = vmatpush.msrb.mxu3 %v2676_v13  ;;  %v2609_v12 = vld [vmem:[#allocation13 + $0x10] sm:$0xff]  ;;  %v2610_v13 = vld [vmem:[#allocation13 + $0x18] sm:$0xff] }
 0x5fa   : > { %9067 = vmatmul.msk.f32.gmra.mxu2 %vm1199_vm0, %v2540_v14  ;;  %9069 = vmatmul.msk.f32.gmra.mxu3 %vm1199_vm0, %v2540_v14 }
 0x5fb   : > { %2736 = vmatpush.msra.mxu2 %v2642_v16  ;;  %2759 = vmatpush.msrb.mxu3 %v2674_v17 }
 0x5fd   : > { %2737 = vmatpush.msra.mxu2 %v2640_v18  ;;  %2760 = vmatpush.msrb.mxu3 %v2672_v19 }
 0x5ff   : > { %2738 = vmatpush.msra.mxu2 %v2638_v20  ;;  %2761 = vmatpush.msrb.mxu3 %v2670_v21 }
 0x601   : > { %2739 = vmatpush.msra.mxu2 %v2636_v22  ;;  %2762 = vmatpush.msrb.mxu3 %v2668_v23  ;;  %v2885_v23 = vld [vmem:[#allocation22 + $0xf0] sm:$0xff] }
 0x603   : > { %2740 = vmatpush.msra.mxu2 %v2634_v24  ;;  %2763 = vmatpush.msrb.mxu3 %v2666_v25  ;;  %v2917_v24 = vld [vmem:[#allocation22 + $0x1f0] sm:$0xff]  ;;  %v2883_v25 = vld [vmem:[#allocation22 + $0xe0] sm:$0xff] }
 0x605   : > { %2741 = vmatpush.msra.mxu2 %v2632_v30  ;;  %2764 = vmatpush.msrb.mxu3 %v2664_v31  ;;  %v2913_v31 = vld [vmem:[#allocation22 + $0x1d0] sm:$0xff] }
 0x607   : > { %2742 = vmatpush.msra.mxu2 %v2630_v34  ;;  %2765 = vmatpush.msrb.mxu3 %v2662_v35  ;;  %v2911_v34 = vld [vmem:[#allocation22 + $0x1c0] sm:$0xff]  ;;  %v2877_v35 = vld [vmem:[#allocation22 + $0xb0] sm:$0xff] }
 0x609   : > { %2743 = vmatpush.msra.mxu2 %v2628_v40  ;;  %2766 = vmatpush.msrb.mxu3 %v2660_v41  ;;  %v2907_v40 = vld [vmem:[#allocation22 + $0x1a0] sm:$0xff] }
 0x60b   : > { %2744 = vmatpush.msra.mxu2 %v2626_v42  ;;  %2767 = vmatpush.msrb.mxu3 %v2658_v44  ;;  %v2905_v42 = vld [vmem:[#allocation22 + $0x190] sm:$0xff] }
 0x60d   : > { %2745 = vmatpush.msra.mxu2 %v2624_v47  ;;  %2768 = vmatpush.msrb.mxu3 %v2656_v28  ;;  %v2903_v28 = vld [vmem:[#allocation22 + $0x180] sm:$0xff] }
 0x60f   : > { %2746 = vmatpush.msra.mxu2 %v2622_v10  ;;  %2769 = vmatpush.msrb.mxu3 %v2654_v43  ;;  %v2683_v10 = vld [vmem:[#allocation16] sm:$0xff]  ;;  %v2901_v43 = vld [vmem:[#allocation22 + $0x170] sm:$0xff] }
 0x611   : > { %2747 = vmatpush.msra.mxu2 %v2620_v54  ;;  %2770 = vmatpush.msrb.mxu3 %v2652_v51  ;;  %v2884_v51 = vld [vmem:[#allocation22 + $0xe8] sm:$0xff] }
 0x613   : > { %2922 = vmatpush.msrb.mxu2 %v2885_v23  ;;  %2945 = vmatpush.msra.mxu3 %v2917_v24  ;;  %v2863_v23 = vld [vmem:[#allocation22 + $0x40] sm:$0xff] }
 0x614   : > { %v2895_v24 = vld [vmem:[#allocation22 + $0x140] sm:$0xff] }
 0x615   : > { %2923 = vmatpush.msrb.mxu2 %v2883_v25  ;;  %2946 = vmatpush.msra.mxu3 %v2915_v26  ;;  %v2864_v25 = vld [vmem:[#allocation22 + $0x48] sm:$0xff] }
 0x616   : > { %v2896_v26 = vld [vmem:[#allocation22 + $0x148] sm:$0xff] }
 0x617   : > { %2924 = vmatpush.msrb.mxu2 %v2881_v27  ;;  %2947 = vmatpush.msra.mxu3 %v2913_v31  ;;  %v2861_v27 = vld [vmem:[#allocation22 + $0x30] sm:$0xff]  ;;  %v2862_v31 = vld [vmem:[#allocation22 + $0x38] sm:$0xff] }
 0x619   : > { %2925 = vmatpush.msrb.mxu2 %v2879_v33  ;;  %2948 = vmatpush.msra.mxu3 %v2911_v34  ;;  %v2859_v33 = vld [vmem:[#allocation22 + $0x20] sm:$0xff] }
 0x61a   : > { %v2891_v34 = vld [vmem:[#allocation22 + $0x120] sm:$0xff] }
 0x61b   : > { %2926 = vmatpush.msrb.mxu2 %v2877_v35  ;;  %2949 = vmatpush.msra.mxu3 %v2909_v36  ;;  %v2860_v35 = vld [vmem:[#allocation22 + $0x28] sm:$0xff] }
 0x61c   : > { %v2892_v36 = vld [vmem:[#allocation22 + $0x128] sm:$0xff] }
 0x61d   : > { %2927 = vmatpush.msrb.mxu2 %v2875_v37  ;;  %2950 = vmatpush.msra.mxu3 %v2907_v40  ;;  %v2857_v37 = vld [vmem:[#allocation22 + $0x10] sm:$0xff] }
 0x61e   : > { %v2889_v40 = vld [vmem:[#allocation22 + $0x110] sm:$0xff] }
 0x61f   : > { %2928 = vmatpush.msrb.mxu2 %v2873_v29  ;;  %2951 = vmatpush.msra.mxu3 %v2905_v42  ;;  %v2855_v29 = vld [vmem:[#allocation22] sm:$0xff] }
 0x620   : > { %v2887_v42 = vld [vmem:[#allocation22 + $0x100] sm:$0xff] }
 0x621   : > { %2929 = vmatpush.msrb.mxu2 %v2871_v46  ;;  %2952 = vmatpush.msra.mxu3 %v2903_v28  ;;  %v2685_v46 = vld [vmem:[#allocation17] sm:$0x3] }
 0x623   : > { %2930 = vmatpush.msrb.mxu2 %v2869_v49  ;;  %2953 = vmatpush.msra.mxu3 %v2901_v43  ;;  %v2835_v49 = vld [vmem:[#allocation19] sm:$0xff] }
 0x675   : > { %v2570_v58 = vpop.f32.mrf.mxu2  ;;  %v2593_v59 = vpop.f32.mrf.mxu3 }
 0x676   : > { %v2571_v61 = vadd.f32 %v2570_v58, %v2543_v56  ;;  %v2594_v62 = vadd.f32 %v2593_v59, %v2544_v57  ;;  %v2918_v58 = vld [vmem:[#allocation22 + $0x1f8] sm:$0xff]  ;;  %v2684_v59 = vld [vmem:[#allocation16 + $0x8] sm:$0xff] }
 0x678   : > { %v2603_v1 = vmul.f32 %v2599_v48, %v2571_v61  ;;  %v2604_v2 = vmul.f32 %v2600_v60, %v2594_v62  ;;  %v2880_v48 = vld [vmem:[#allocation22 + $0xc8] sm:$0xff]  ;;  %v2878_v61 = vld [vmem:[#allocation22 + $0xb8] sm:$0xff] }
 0x679   : > { %v2916_v60 = vld [vmem:[#allocation22 + $0x1e8] sm:$0xff]  ;;  %v2914_v62 = vld [vmem:[#allocation22 + $0x1d8] sm:$0xff] }
 0x67a   : > { %v2611_v3 = vadd.f32 %v2607_v63, %v2603_v1  ;;  %v2612_v4 = vadd.f32 %v2608_v0, %v2604_v2  ;;  %v2876_v63 = vld [vmem:[#allocation22 + $0xa8] sm:$0xff]  ;;  %v2874_v1 = vld [vmem:[#allocation22 + $0x98] sm:$0xff] }
 0x67b   : > { %v2912_v0 = vld [vmem:[#allocation22 + $0x1c8] sm:$0xff]  ;;  %v2910_v2 = vld [vmem:[#allocation22 + $0x1b8] sm:$0xff] }
 0x67c   : > { %9441 = vtanh.f32 %v2611_v3  ;;  %v2872_v3 = vld [vmem:[#allocation22 + $0x88] sm:$0xff] }
 0x67d   : > { %9443 = vtanh.f32 %v2612_v4  ;;  %v2573_v5 = vpop.f32.mrf.mxu2  ;;  %v2596_v7 = vpop.f32.mrf.mxu3  ;;  %v2908_v4 = vld [vmem:[#allocation22 + $0x1a8] sm:$0xff] }
 0x67e   : > { %v2574_v9 = vadd.f32 %v2573_v5, %v2543_v56  ;;  %v2597_v11 = vadd.f32 %v2596_v7, %v2544_v57  ;;  %v2882_v56 = vld [vmem:[#allocation22 + $0xd8] sm:$0xff]  ;;  %v2904_v7 = vld [vmem:[#allocation22 + $0x188] sm:$0xff] }
 0x67f   : > { %v2870_v5 = vld [vmem:[#allocation22 + $0x78] sm:$0xff] }
 0x680   : > { %v2605_v14 = vmul.f32 %v2601_v6, %v2574_v9  ;;  %v2606_v16 = vmul.f32 %v2602_v8, %v2597_v11  ;;  %v2906_v6 = vld [vmem:[#allocation22 + $0x198] sm:$0xff]  ;;  %v2867_v9 = vld [vmem:[#allocation22 + $0x60] sm:$0xff] }
 0x681   : > { %v2902_v8 = vld [vmem:[#allocation22 + $0x178] sm:$0xff]  ;;  %v2899_v11 = vld [vmem:[#allocation22 + $0x160] sm:$0xff]  ;;  %2931 = vmatpush.msrb.mxu2 %v2867_v9 }
 0x682   : > { %v11731_v17 = vpop.eup %9441  ;;  %v2613_v18 = vadd.f32 %v2609_v12, %v2605_v14  ;;  %v2614_v19 = vadd.f32 %v2610_v13, %v2606_v16  ;;  %2954 = vmatpush.msra.mxu3 %v2899_v11  ;;  %v2868_v12 = vld [vmem:[#allocation22 + $0x68] sm:$0xff]  ;;  %v2865_v14 = vld [vmem:[#allocation22 + $0x50] sm:$0xff] }
 0x683   : > { %v11733_v20 = vpop.eup %9443  ;;  %2702 = vmatmul.f32.vlgmr.msrb.gmra.mxu0 %v11731_v17  ;;  %2748 = vmatmul.f32.vlgmr.msra.gmra.mxu2 %v11731_v17  ;;  %v2900_v13 = vld [vmem:[#allocation22 + $0x168] sm:$0xff]  ;;  %v2897_v16 = vld [vmem:[#allocation22 + $0x150] sm:$0xff] }
 0x684   : > { %9445 = vtanh.f32 %v2613_v18  ;;  %2725 = vmatmul.f32.vlgmr.msrb.gmra.mxu1 %v11733_v20  ;;  %2771 = vmatmul.f32.vlgmr.msrb.gmra.mxu3 %v11733_v20  ;;  %v2866_v18 = vld [vmem:[#allocation22 + $0x58] sm:$0xff] }
 0x685   : > { %9447 = vtanh.f32 %v2614_v19  ;;  %2932 = vmatpush.msrb.mxu2 %v2865_v14  ;;  %2955 = vmatpush.msra.mxu3 %v2897_v16  ;;  %v2898_v19 = vld [vmem:[#allocation22 + $0x158] sm:$0xff] }
 0x686   : > { %v3154_v14 = vld [vmem:[#allocation14 + $0x3d0] sm:$0xff] }
 0x687   : > { %2933 = vmatpush.msrb.mxu2 %v2863_v23  ;;  %2956 = vmatpush.msra.mxu3 %v2895_v24  ;;  %v3126_v16 = vld [vmem:[#allocation14 + $0x2f0] sm:$0xff]  ;;  %v3152_v23 = vld [vmem:[#allocation14 + $0x3c0] sm:$0xff] }
 0x688   : > { %v3122_v24 = vld [vmem:[#allocation14 + $0x2d0] sm:$0xff] }
 0x689   : > { %2934 = vmatpush.msrb.mxu2 %v2861_v27  ;;  %v3120_v27 = vld [vmem:[#allocation14 + $0x2c0] sm:$0xff] }
 0x68a   : > { %v11739_v21 = vpop.eup %9445 }
 0x68b   : > { %v11741_v22 = vpop.eup %9447  ;;  %2705 = vmatmul.f32.gmra.mxu0 %v11739_v21  ;;  %2751 = vmatmul.f32.gmra.mxu2 %v11739_v21 }
 0x68c   : > { %2728 = vmatmul.f32.gmra.mxu1 %v11741_v22  ;;  %2774 = vmatmul.f32.gmra.mxu3 %v11741_v22 }
 0x68d   : > { %2935 = vmatpush.msrb.mxu2 %v2859_v33 }
 0x68f   : > { %2936 = vmatpush.msrb.mxu2 %v2857_v37 }
 0x691   : > { %2937 = vmatpush.msrb.mxu2 %v2855_v29  ;;  %v3159_v29 = vld [vmem:[#allocation14 + $0x3f8] sm:$0xff] }
 0x700   : > { %v2703_v30 = vpop.f32.mrf.mxu0 }
 0x701   : > { %v2726_v32 = vpop.f32.mrf.mxu1 }
 0x702   : > { %v2727_v50 = vadd.f32 %v2726_v32, %v2703_v30  ;;  %v2893_v30 = vld [vmem:[#allocation22 + $0x130] sm:$0xff]  ;;  %v2894_v32 = vld [vmem:[#allocation22 + $0x138] sm:$0xff] }
 0x703   : > { %2957 = vmatpush.msra.mxu3 %v2893_v30  ;;  %v3148_v30 = vld [vmem:[#allocation14 + $0x3a0] sm:$0xff] }
 0x705   : > { %2958 = vmatpush.msra.mxu3 %v2891_v34  ;;  %v3146_v34 = vld [vmem:[#allocation14 + $0x390] sm:$0xff] }
 0x706   : > { %v2749_v41 = vpop.f32.mrf.mxu2 }
 0x707   : > { %v2772_v15 = vpop.f32.mrf.mxu3  ;;  %2959 = vmatpush.msra.mxu3 %v2889_v40 }
 0x708   : > { %v2706_v44 = vpop.f32.mrf.mxu0  ;;  %v2773_v57 = vadd.f32 %v2772_v15, %v2749_v41  ;;  %v2858_v41 = vld [vmem:[#allocation22 + $0x18] sm:$0xff] }
 0x709   : > { %v2729_v45 = vpop.f32.mrf.mxu1  ;;  %v2890_v15 = vld [vmem:[#allocation22 + $0x118] sm:$0xff]  ;;  %2960 = vmatpush.msra.mxu3 %v2887_v42 }
 0x70a   : > { %v2730_v47 = vadd.f32 %v2729_v45, %v2706_v44  ;;  %v2856_v44 = vld [vmem:[#allocation22 + $0x8] sm:$0xff] }
 0x70b   : > { %v2888_v45 = vld [vmem:[#allocation22 + $0x108] sm:$0xff] }
 0x70c   : > { %2803 = vmatpush.msra.mxu0 %v2730_v47  ;;  %v2779_v47 = vperm.slane %v2685_v46, 0 }
 0x70e   : > { %2804 = vmatpush.msra.mxu0 %v2727_v50  ;;  %v2752_v53 = vpop.f32.mrf.mxu2 }
 0x70f   : > { %v2775_v54 = vpop.f32.mrf.mxu3  ;;  %9070 = vmatmul.msk.f32.vlgmr.msra.gmra.mxu0 %vm1199_vm0, %v2683_v10 }
 0x710   : > { %v2776_v55 = vadd.f32 %v2775_v54, %v2752_v53  ;;  %2968 = vmatpush.msrb.mxu0 %v2886_v52  ;;  %v2780_v52 = vperm.slane %v2685_v46, 1  ;;  %v3155_v46 = vld [vmem:[#allocation14 + $0x3d8] sm:$0xff] }
 0x712   : > { %2826 = vmatpush.msra.mxu1 %v2776_v55  ;;  %2969 = vmatpush.msrb.mxu0 %v2884_v51  ;;  %v2836_v51 = vld [vmem:[#allocation19 + $0x8] sm:$0xff] }
 0x714   : > { %2827 = vmatpush.msra.mxu1 %v2773_v57  ;;  %2970 = vmatpush.msrb.mxu0 %v2882_v56  ;;  %v2844_v56 = vld [vmem:[#allocation20 + $0x8] sm:$0xff] }
 0x715   : > { %9072 = vmatmul.msk.f32.vlgmr.msra.gmra.mxu1 %vm1199_vm0, %v2683_v10  ;;  %v2843_v10 = vld [vmem:[#allocation20] sm:$0xff] }
 0x716   : > { %2991 = vmatpush.msrb.mxu1 %v2918_v58  ;;  %2971 = vmatpush.msrb.mxu0 %v2880_v48  ;;  %v2837_v58 = vld [vmem:[#allocation19 + $0x10] sm:$0xff] }
 0x717   : > { %9071 = vmatmul.msk.f32.gmra.mxu0 %vm1199_vm0, %v2684_v59 }
 0x718   : > { %2992 = vmatpush.msrb.mxu1 %v2916_v60  ;;  %2972 = vmatpush.msrb.mxu0 %v2878_v61  ;;  %v2845_v60 = vld [vmem:[#allocation20 + $0x10] sm:$0xff] }
 0x71a   : > { %2993 = vmatpush.msrb.mxu1 %v2914_v62  ;;  %2973 = vmatpush.msrb.mxu0 %v2876_v63 }
 0x71c   : > { %2994 = vmatpush.msrb.mxu1 %v2912_v0  ;;  %2974 = vmatpush.msrb.mxu0 %v2874_v1 }
 0x71d   : > { %9073 = vmatmul.msk.f32.gmra.mxu1 %vm1199_vm0, %v2684_v59 }
 0x71e   : > { %2995 = vmatpush.msrb.mxu1 %v2910_v2  ;;  %2975 = vmatpush.msrb.mxu0 %v2872_v3  ;;  %v2838_v2 = vld [vmem:[#allocation19 + $0x18] sm:$0xff] }
 0x720   : > { %2996 = vmatpush.msrb.mxu1 %v2908_v4  ;;  %2976 = vmatpush.msrb.mxu0 %v2870_v5  ;;  %v2846_v4 = vld [vmem:[#allocation20 + $0x18] sm:$0xff] }
 0x722   : > { %2997 = vmatpush.msrb.mxu1 %v2906_v6  ;;  %2977 = vmatpush.msrb.mxu0 %v2868_v12  ;;  %v3158_v12 = vld [vmem:[#allocation14 + $0x3f0] sm:$0xff] }
 0x724   : > { %2998 = vmatpush.msrb.mxu1 %v2904_v7  ;;  %2978 = vmatpush.msrb.mxu0 %v2866_v18  ;;  %v3124_v18 = vld [vmem:[#allocation14 + $0x2e0] sm:$0xff] }
 0x726   : > { %2999 = vmatpush.msrb.mxu1 %v2902_v8  ;;  %2979 = vmatpush.msrb.mxu0 %v2864_v25 }
 0x728   : > { %3000 = vmatpush.msrb.mxu1 %v2900_v13  ;;  %2980 = vmatpush.msrb.mxu0 %v2862_v31  ;;  %v3156_v13 = vld [vmem:[#allocation14 + $0x3e0] sm:$0xff]  ;;  %v3118_v31 = vld [vmem:[#allocation14 + $0x2b0] sm:$0xff] }
 0x72a   : > { %3001 = vmatpush.msrb.mxu1 %v2898_v19  ;;  %2981 = vmatpush.msrb.mxu0 %v2860_v35 }
 0x72c   : > { %3002 = vmatpush.msrb.mxu1 %v2896_v26  ;;  %2982 = vmatpush.msrb.mxu0 %v2858_v41  ;;  %v3150_v26 = vld [vmem:[#allocation14 + $0x3b0] sm:$0xff]  ;;  %v2919_v41 = vld [vmem:[#allocation23] sm:$0xff] }
 0x72e   : > { %3003 = vmatpush.msrb.mxu1 %v2894_v32  ;;  %2983 = vmatpush.msrb.mxu0 %v2856_v44  ;;  %v3157_v44 = vld [vmem:[#allocation14 + $0x3e8] sm:$0xff] }
 0x730   : > { %3004 = vmatpush.msrb.mxu1 %v2892_v36  ;;  %3165 = vmatpush.msra.mxu0 %v3126_v16  ;;  %v3144_v36 = vld [vmem:[#allocation14 + $0x380] sm:$0xff]  ;;  %v3107_v16 = vld [vmem:[#allocation14 + $0x258] sm:$0xff] }
 0x732   : > { %3005 = vmatpush.msrb.mxu1 %v2890_v15  ;;  %3166 = vmatpush.msra.mxu0 %v3124_v18  ;;  %v3133_v18 = vld [vmem:[#allocation14 + $0x328] sm:$0xff] }
 0x734   : > { %3006 = vmatpush.msrb.mxu1 %v2888_v45  ;;  %3167 = vmatpush.msra.mxu0 %v3122_v24  ;;  %v3105_v24 = vld [vmem:[#allocation14 + $0x248] sm:$0xff] }
 0x736   : > { %3188 = vmatpush.msra.mxu1 %v3158_v12  ;;  %3168 = vmatpush.msra.mxu0 %v3120_v27  ;;  %v3135_v12 = vld [vmem:[#allocation14 + $0x338] sm:$0xff]  ;;  %v3128_v27 = vld [vmem:[#allocation14 + $0x300] sm:$0xff] }
 0x738   : > { %3189 = vmatpush.msra.mxu1 %v3156_v13  ;;  %3169 = vmatpush.msra.mxu0 %v3118_v31  ;;  %v3106_v13 = vld [vmem:[#allocation14 + $0x250] sm:$0xff]  ;;  %v3129_v31 = vld [vmem:[#allocation14 + $0x308] sm:$0xff] }
 0x73a   : > { %3190 = vmatpush.msra.mxu1 %v3154_v14  ;;  %v3132_v14 = vld [vmem:[#allocation14 + $0x320] sm:$0xff] }
 0x73c   : > { %3191 = vmatpush.msra.mxu1 %v3152_v23  ;;  %v3130_v23 = vld [vmem:[#allocation14 + $0x310] sm:$0xff] }
 0x73e   : > { %3192 = vmatpush.msra.mxu1 %v3150_v26  ;;  %v3102_v26 = vld [vmem:[#allocation14 + $0x230] sm:$0xff] }
 0x740   : > { %3193 = vmatpush.msra.mxu1 %v3148_v30  ;;  %v3103_v30 = vld [vmem:[#allocation14 + $0x238] sm:$0xff] }
 0x742   : > { %3194 = vmatpush.msra.mxu1 %v3146_v34  ;;  %v3098_v34 = vld [vmem:[#allocation14 + $0x210] sm:$0xff] }
 0x744   : > { %3195 = vmatpush.msra.mxu1 %v3144_v36  ;;  %v3096_v36 = vld [vmem:[#allocation14 + $0x200] sm:$0xff] }
 0x78c   : > { %v2806_v28 = vpop.f32.mrf.mxu0 }
 0x78d   : > { %v2807_v50 = vadd.f32 %v2806_v28, %v2779_v47  ;;  %v3127_v28 = vld [vmem:[#allocation14 + $0x2f8] sm:$0xff] }
 0x78f   : > { %v2839_v43 = vmul.f32 %v2835_v49, %v2807_v50  ;;  %v3153_v49 = vld [vmem:[#allocation14 + $0x3c8] sm:$0xff]  ;;  %v2920_v50 = vld [vmem:[#allocation23 + $0x8] sm:$0xff] }
 0x791   : > { %v2847_v53 = vadd.f32 %v2843_v10, %v2839_v43  ;;  %v3125_v10 = vld [vmem:[#allocation14 + $0x2e8] sm:$0xff]  ;;  %v3151_v43 = vld [vmem:[#allocation14 + $0x3b8] sm:$0xff] }
 0x792   : > { %v2829_v54 = vpop.f32.mrf.mxu1 }
 0x793   : > { %9449 = vtanh.f32 %v2847_v53  ;;  %v2830_v55 = vadd.f32 %v2829_v54, %v2780_v52  ;;  %v3149_v53 = vld [vmem:[#allocation14 + $0x3a8] sm:$0xff] }
 0x794   : > { %v2809_v57 = vpop.f32.mrf.mxu0  ;;  %v3121_v54 = vld [vmem:[#allocation14 + $0x2c8] sm:$0xff] }
 0x795   : > { %v2840_v48 = vmul.f32 %v2836_v51, %v2830_v55  ;;  %v2810_v59 = vadd.f32 %v2809_v57, %v2779_v47  ;;  %v3147_v51 = vld [vmem:[#allocation14 + $0x398] sm:$0xff]  ;;  %v3116_v57 = vld [vmem:[#allocation14 + $0x2a0] sm:$0xff] }
 0x796   : > { %v3119_v55 = vld [vmem:[#allocation14 + $0x2b8] sm:$0xff]  ;;  %3170 = vmatpush.msra.mxu0 %v3116_v57 }
 0x797   : > { %v2848_v61 = vadd.f32 %v2844_v56, %v2840_v48  ;;  %v2841_v62 = vmul.f32 %v2837_v58, %v2810_v59  ;;  %v3145_v56 = vld [vmem:[#allocation14 + $0x388] sm:$0xff]  ;;  %v3142_v58 = vld [vmem:[#allocation14 + $0x370] sm:$0xff]  ;;  %v3143_v59 = vld [vmem:[#allocation14 + $0x378] sm:$0xff] }
 0x798   : > { %3196 = vmatpush.msra.mxu1 %v3142_v58  ;;  %v3117_v48 = vld [vmem:[#allocation14 + $0x2a8] sm:$0xff] }
 0x799   : > { %v9450_v63 = vpop.eup %9449  ;;  %9451 = vtanh.f32 %v2848_v61  ;;  %v2849_v0 = vadd.f32 %v2845_v60, %v2841_v62  ;;  %v3114_v60 = vld [vmem:[#allocation14 + $0x290] sm:$0xff]  ;;  %v3140_v61 = vld [vmem:[#allocation14 + $0x360] sm:$0xff]  ;;  %v3115_v62 = vld [vmem:[#allocation14 + $0x298] sm:$0xff] }
 0x79a   : > { %v2832_v1 = vpop.f32.mrf.mxu1  ;;  %2938 = vmatmul.f32.vlgmr.msrb.gmra.mxu2 %v9450_v63  ;;  %2984 = vmatmul.f32.vlgmr.msrb.gmra.mxu0 %v9450_v63  ;;  %v3141_v63 = vld [vmem:[#allocation14 + $0x368] sm:$0xff] }
 0x79b   : > { %9453 = vtanh.f32 %v2849_v0  ;;  %v2833_v3 = vadd.f32 %v2832_v1, %v2780_v52  ;;  %v3123_v52 = vld [vmem:[#allocation14 + $0x2d8] sm:$0xff]  ;;  %3171 = vmatpush.msra.mxu0 %v3114_v60  ;;  %3197 = vmatpush.msra.mxu1 %v3140_v61  ;;  %v3112_v0 = vld [vmem:[#allocation14 + $0x280] sm:$0xff]  ;;  %v3138_v1 = vld [vmem:[#allocation14 + $0x350] sm:$0xff] }
 0x79d   : > { %v2842_v5 = vmul.f32 %v2838_v2, %v2833_v3  ;;  %v3113_v2 = vld [vmem:[#allocation14 + $0x288] sm:$0xff]  ;;  %3172 = vmatpush.msra.mxu0 %v3112_v0  ;;  %3198 = vmatpush.msra.mxu1 %v3138_v1  ;;  %v3139_v3 = vld [vmem:[#allocation14 + $0x358] sm:$0xff] }
 0x79f   : > { %v9452_v6 = vpop.eup %9451  ;;  %v2850_v7 = vadd.f32 %v2846_v4, %v2842_v5  ;;  %v3110_v4 = vld [vmem:[#allocation14 + $0x270] sm:$0xff]  ;;  %v3136_v5 = vld [vmem:[#allocation14 + $0x340] sm:$0xff] }
 0x7a0   : > { %2961 = vmatmul.f32.vlgmr.msra.gmra.mxu3 %v9452_v6  ;;  %3007 = vmatmul.f32.vlgmr.msrb.gmra.mxu1 %v9452_v6  ;;  %v3111_v6 = vld [vmem:[#allocation14 + $0x278] sm:$0xff] }
 0x7a1   : > { %v9454_v8 = vpop.eup %9453  ;;  %9455 = vtanh.f32 %v2850_v7  ;;  %3173 = vmatpush.msra.mxu0 %v3110_v4  ;;  %3199 = vmatpush.msra.mxu1 %v3136_v5  ;;  %v3137_v7 = vld [vmem:[#allocation14 + $0x348] sm:$0xff] }
 0x7a2   : > { %2941 = vmatmul.f32.gmra.mxu2 %v9454_v8  ;;  %2987 = vmatmul.f32.gmra.mxu0 %v9454_v8  ;;  %v3108_v8 = vld [vmem:[#allocation14 + $0x260] sm:$0xff] }
 0x7a3   : > { %3174 = vmatpush.msra.mxu0 %v3108_v8  ;;  %v3397_v8 = vld [vmem:[#allocation22 + $0x3e0] sm:$0xff] }
 0x7a5   : > { %3175 = vmatpush.msra.mxu0 %v3106_v13  ;;  %v3361_v13 = vld [vmem:[#allocation22 + $0x2c0] sm:$0xff] }
 0x7a7   : > { %v9456_v9 = vpop.eup %9455 }
 0x7a8   : > { %2964 = vmatmul.f32.gmra.mxu3 %v9456_v9  ;;  %3010 = vmatmul.f32.gmra.mxu1 %v9456_v9  ;;  %v3134_v9 = vld [vmem:[#allocation14 + $0x330] sm:$0xff] }
 0x7a9   : > { %3200 = vmatpush.msra.mxu1 %v3134_v9  ;;  %v3363_v9 = vld [vmem:[#allocation22 + $0x2d0] sm:$0xff] }
 0x7ab   : > { %3201 = vmatpush.msra.mxu1 %v3132_v14  ;;  %v3393_v14 = vld [vmem:[#allocation22 + $0x3c0] sm:$0xff] }
 0x7ad   : > { %3202 = vmatpush.msra.mxu1 %v3130_v23  ;;  %v3389_v23 = vld [vmem:[#allocation22 + $0x3a0] sm:$0xff] }
 0x7af   : > { %3203 = vmatpush.msra.mxu1 %v3128_v27 }
 0x817   : > { %v2985_v11 = vpop.f32.mrf.mxu0 }
 0x81d   : > { %v3008_v19 = vpop.f32.mrf.mxu1  ;;  %v2939_v25 = vpop.f32.mrf.mxu2 }
 0x81e   : > { %v3009_v40 = vadd.f32 %v3008_v19, %v2985_v11  ;;  %v3109_v11 = vld [vmem:[#allocation14 + $0x268] sm:$0xff]  ;;  %v3104_v19 = vld [vmem:[#allocation14 + $0x240] sm:$0xff] }
 0x81f   : > { %v2988_v33 = vpop.f32.mrf.mxu0  ;;  %3176 = vmatpush.msra.mxu0 %v3104_v19  ;;  %v3357_v19 = vld [vmem:[#allocation22 + $0x2a0] sm:$0xff] }
 0x821   : > { %3177 = vmatpush.msra.mxu0 %v3102_v26  ;;  %v3387_v26 = vld [vmem:[#allocation22 + $0x390] sm:$0xff] }
 0x823   : > { %v2962_v32 = vpop.f32.mrf.mxu3 }
 0x824   : > { %v2963_v47 = vadd.f32 %v2962_v32, %v2939_v25  ;;  %v3131_v25 = vld [vmem:[#allocation14 + $0x318] sm:$0xff]  ;;  %v3100_v32 = vld [vmem:[#allocation14 + $0x220] sm:$0xff] }
 0x825   : > { %v3011_v35 = vpop.f32.mrf.mxu1  ;;  %v2942_v15 = vpop.f32.mrf.mxu2  ;;  %3178 = vmatpush.msra.mxu0 %v3100_v32 }
 0x826   : > { %v3012_v37 = vadd.f32 %v3011_v35, %v2988_v33  ;;  %v3101_v33 = vld [vmem:[#allocation14 + $0x228] sm:$0xff]  ;;  %v3099_v35 = vld [vmem:[#allocation14 + $0x218] sm:$0xff] }
 0x827   : > { %3179 = vmatpush.msra.mxu0 %v3098_v34  ;;  %v3351_v34 = vld [vmem:[#allocation22 + $0x270] sm:$0xff] }
 0x828   : > { %3062 = vmatpush.msrb.mxu3 %v3012_v37  ;;  %v3097_v37 = vld [vmem:[#allocation14 + $0x208] sm:$0xff] }
 0x829   : > { %3180 = vmatpush.msra.mxu0 %v3096_v36  ;;  %v3161_v36 = vld [vmem:[#allocation16 + $0x10] sm:$0xff] }
 0x82a   : > { %3063 = vmatpush.msrb.mxu3 %v3009_v40  ;;  %v2921_v40 = vld [vmem:[#allocation25] sm:$0x3] }
 0x82b   : > { %v2965_v42 = vpop.f32.mrf.mxu3  ;;  %9076 = vmatmul.msk.f32.vlgmr.msrb.gmra.mxu3 %vm1199_vm0, %v2919_v41 }
 0x82c   : > { %v2966_v45 = vadd.f32 %v2965_v42, %v2942_v15  ;;  %3234 = vmatpush.msra.mxu3 %v3159_v29  ;;  %v3072_v29 = vld [vmem:[#allocation26 + $0x8] sm:$0xff] }
 0x82e   : > { %3039 = vmatpush.msra.mxu2 %v2966_v45  ;;  %3235 = vmatpush.msra.mxu3 %v3157_v44  ;;  %v3080_v44 = vld [vmem:[#allocation28 + $0x8] sm:$0xff] }
 0x830   : > { %3040 = vmatpush.msra.mxu2 %v2963_v47  ;;  %3236 = vmatpush.msra.mxu3 %v3155_v46  ;;  %v3015_v46 = vperm.slane %v2921_v40, 0 }
 0x831   : > { %9074 = vmatmul.msk.f32.vlgmr.msra.gmra.mxu2 %vm1199_vm0, %v2919_v41  ;;  %v3016_v41 = vperm.slane %v2921_v40, 1  ;;  %v3368_v40 = vld [vmem:[#allocation22 + $0x2f8] sm:$0xff] }
 0x832   : > { %3211 = vmatpush.msrb.mxu2 %v3127_v28  ;;  %3237 = vmatpush.msra.mxu3 %v3153_v49  ;;  %v3071_v49 = vld [vmem:[#allocation26] sm:$0xff] }
 0x833   : > { %9077 = vmatmul.msk.f32.gmra.mxu3 %vm1199_vm0, %v2920_v50 }
 0x834   : > { %3212 = vmatpush.msrb.mxu2 %v3125_v10  ;;  %3238 = vmatpush.msra.mxu3 %v3151_v43  ;;  %v3079_v10 = vld [vmem:[#allocation28] sm:$0xff] }
 0x836   : > { %3213 = vmatpush.msrb.mxu2 %v3123_v52  ;;  %3239 = vmatpush.msra.mxu3 %v3149_v53  ;;  %v3074_v52 = vld [vmem:[#allocation26 + $0x18] sm:$0xff] }
 0x838   : > { %3214 = vmatpush.msrb.mxu2 %v3121_v54  ;;  %3240 = vmatpush.msra.mxu3 %v3147_v51  ;;  %v3082_v51 = vld [vmem:[#allocation28 + $0x18] sm:$0xff] }
 0x839   : > { %9075 = vmatmul.msk.f32.gmra.mxu2 %vm1199_vm0, %v2920_v50 }
 0x83a   : > { %3215 = vmatpush.msrb.mxu2 %v3119_v55  ;;  %3241 = vmatpush.msra.mxu3 %v3145_v56 }
 0x83c   : > { %3216 = vmatpush.msrb.mxu2 %v3117_v48  ;;  %3242 = vmatpush.msra.mxu3 %v3143_v59  ;;  %v3073_v59 = vld [vmem:[#allocation26 + $0x10] sm:$0xff] }
 0x83e   : > { %3217 = vmatpush.msrb.mxu2 %v3115_v62  ;;  %3243 = vmatpush.msra.mxu3 %v3141_v63  ;;  %v3081_v62 = vld [vmem:[#allocation28 + $0x10] sm:$0xff] }
 0x840   : > { %3218 = vmatpush.msrb.mxu2 %v3113_v2  ;;  %3244 = vmatpush.msra.mxu3 %v3139_v3 }
 0x842   : > { %3219 = vmatpush.msrb.mxu2 %v3111_v6  ;;  %3245 = vmatpush.msra.mxu3 %v3137_v7  ;;  %v3399_v6 = vld [vmem:[#allocation22 + $0x3f0] sm:$0xff]  ;;  %v3365_v7 = vld [vmem:[#allocation22 + $0x2e0] sm:$0xff] }
 0x844   : > { %3220 = vmatpush.msrb.mxu2 %v3109_v11  ;;  %3246 = vmatpush.msra.mxu3 %v3135_v12  ;;  %v3395_v11 = vld [vmem:[#allocation22 + $0x3d0] sm:$0xff] }
 0x846   : > { %3221 = vmatpush.msrb.mxu2 %v3107_v16  ;;  %3247 = vmatpush.msra.mxu3 %v3133_v18  ;;  %v3391_v16 = vld [vmem:[#allocation22 + $0x3b0] sm:$0xff] }
 0x848   : > { %3222 = vmatpush.msrb.mxu2 %v3105_v24  ;;  %3248 = vmatpush.msra.mxu3 %v3131_v25  ;;  %v3355_v25 = vld [vmem:[#allocation22 + $0x290] sm:$0xff] }
 0x84a   : > { %3223 = vmatpush.msrb.mxu2 %v3103_v30  ;;  %3249 = vmatpush.msra.mxu3 %v3129_v31  ;;  %v3353_v31 = vld [vmem:[#allocation22 + $0x280] sm:$0xff] }
 0x84c   : > { %3224 = vmatpush.msrb.mxu2 %v3101_v33  ;;  %3429 = vmatpush.msrb.mxu3 %v3399_v6  ;;  %v3385_v33 = vld [vmem:[#allocation22 + $0x380] sm:$0xff] }
 0x84d   : > { %v3377_v6 = vld [vmem:[#allocation22 + $0x340] sm:$0xff] }
 0x84e   : > { %3225 = vmatpush.msrb.mxu2 %v3099_v35  ;;  %3430 = vmatpush.msrb.mxu3 %v3397_v8  ;;  %v3378_v8 = vld [vmem:[#allocation22 + $0x348] sm:$0xff] }
 0x850   : > { %3226 = vmatpush.msrb.mxu2 %v3097_v37  ;;  %3431 = vmatpush.msrb.mxu3 %v3395_v11  ;;  %v3383_v37 = vld [vmem:[#allocation22 + $0x370] sm:$0xff]  ;;  %v3344_v11 = vld [vmem:[#allocation22 + $0x238] sm:$0xff] }
 0x852   : > { %3432 = vmatpush.msrb.mxu3 %v3393_v14  ;;  %v3373_v14 = vld [vmem:[#allocation22 + $0x320] sm:$0xff] }
 0x854   : > { %3433 = vmatpush.msrb.mxu3 %v3391_v16  ;;  %v3374_v16 = vld [vmem:[#allocation22 + $0x328] sm:$0xff] }
 0x856   : > { %3434 = vmatpush.msrb.mxu3 %v3389_v23  ;;  %v3340_v23 = vld [vmem:[#allocation22 + $0x218] sm:$0xff] }
 0x858   : > { %3435 = vmatpush.msrb.mxu3 %v3387_v26  ;;  %v3369_v26 = vld [vmem:[#allocation22 + $0x300] sm:$0xff] }
 0x85a   : > { %3436 = vmatpush.msrb.mxu3 %v3385_v33 }
 0x85c   : > { %3437 = vmatpush.msrb.mxu3 %v3383_v37 }
 0x8ae   : > { %v3065_v15 = vpop.f32.mrf.mxu3 }
 0x8af   : > { %v3066_v42 = vadd.f32 %v3065_v15, %v3016_v41 }
 0x8b1   : > { %v3076_v45 = vmul.f32 %v3072_v29, %v3066_v42  ;;  %v3366_v29 = vld [vmem:[#allocation22 + $0x2e8] sm:$0xff] }
 0x8b3   : > { %v3084_v47 = vadd.f32 %v3080_v44, %v3076_v45  ;;  %v3364_v44 = vld [vmem:[#allocation22 + $0x2d8] sm:$0xff] }
 0x8b4   : > { %v3042_v28 = vpop.f32.mrf.mxu2 }
 0x8b5   : > { %9457 = vtanh.f32 %v3084_v47  ;;  %v3043_v50 = vadd.f32 %v3042_v28, %v3015_v46  ;;  %v3362_v47 = vld [vmem:[#allocation22 + $0x2c8] sm:$0xff]  ;;  %v3162_v28 = vld [vmem:[#allocation16 + $0x18] sm:$0xff] }
 0x8b6   : > { %v3068_v43 = vpop.f32.mrf.mxu3 }
 0x8b7   : > { %v3075_v53 = vmul.f32 %v3071_v49, %v3043_v50  ;;  %v3069_v54 = vadd.f32 %v3068_v43, %v3016_v41  ;;  %v3398_v49 = vld [vmem:[#allocation22 + $0x3e8] sm:$0xff]  ;;  %v3360_v50 = vld [vmem:[#allocation22 + $0x2b8] sm:$0xff] }
 0x8b8   : > { %v3358_v43 = vld [vmem:[#allocation22 + $0x2a8] sm:$0xff] }
 0x8b9   : > { %v3083_v55 = vadd.f32 %v3079_v10, %v3075_v53  ;;  %v3078_v56 = vmul.f32 %v3074_v52, %v3069_v54  ;;  %v3396_v10 = vld [vmem:[#allocation22 + $0x3d8] sm:$0xff]  ;;  %v3394_v52 = vld [vmem:[#allocation22 + $0x3c8] sm:$0xff] }
 0x8ba   : > { %v3356_v53 = vld [vmem:[#allocation22 + $0x298] sm:$0xff] }
 0x8bb   : > { %v9458_v57 = vpop.eup %9457  ;;  %9459 = vtanh.f32 %v3083_v55  ;;  %v3086_v58 = vadd.f32 %v3082_v51, %v3078_v56  ;;  %v3392_v54 = vld [vmem:[#allocation22 + $0x3b8] sm:$0xff]  ;;  %v3354_v51 = vld [vmem:[#allocation22 + $0x288] sm:$0xff] }
 0x8bc   : > { %v3045_v48 = vpop.f32.mrf.mxu2  ;;  %v11756_v60 = vadd.f32 %v9458_v57, %v11733_v20  ;;  %v3390_v55 = vld [vmem:[#allocation22 + $0x3a8] sm:$0xff]  ;;  %v3352_v56 = vld [vmem:[#allocation22 + $0x278] sm:$0xff] }
 0x8bd   : > { %9461 = vtanh.f32 %v3086_v58  ;;  %v3046_v61 = vadd.f32 %v3045_v48, %v3015_v46  ;;  %v3400_v46 = vld [vmem:[#allocation22 + $0x3f8] sm:$0xff]  ;;  %v3386_v58 = vld [vmem:[#allocation22 + $0x388] sm:$0xff] }
 0x8be   : > { %3204 = vmatmul.f32.vlgmr.msra.gmra.mxu1 %v11756_v60  ;;  %3250 = vmatmul.f32.vlgmr.msra.gmra.mxu3 %v11756_v60  ;;  %v3388_v57 = vld [vmem:[#allocation22 + $0x398] sm:$0xff] }
 0x8bf   : > { %v3077_v63 = vmul.f32 %v3073_v59, %v3046_v61  ;;  %v3384_v48 = vld [vmem:[#allocation22 + $0x378] sm:$0xff]  ;;  %v3349_v59 = vld [vmem:[#allocation22 + $0x260] sm:$0xff] }
 0x8c0   : > { %v3381_v61 = vld [vmem:[#allocation22 + $0x360] sm:$0xff] }
 0x8c1   : > { %v9460_v0 = vpop.eup %9459  ;;  %v3085_v1 = vadd.f32 %v3081_v62, %v3077_v63  ;;  %3438 = vmatpush.msrb.mxu3 %v3381_v61  ;;  %v3350_v62 = vld [vmem:[#allocation22 + $0x268] sm:$0xff] }
 0x8c2   : > { %v11761_v2 = vadd.f32 %v9460_v0, %v11731_v17  ;;  %v3367_v17 = vld [vmem:[#allocation22 + $0x2f0] sm:$0xff]  ;;  %v3382_v63 = vld [vmem:[#allocation22 + $0x368] sm:$0xff] }
 0x8c3   : > { %v9462_v3 = vpop.eup %9461  ;;  %9463 = vtanh.f32 %v3085_v1  ;;  %3406 = vmatpush.msra.mxu2 %v3367_v17  ;;  %v3347_v0 = vld [vmem:[#allocation22 + $0x250] sm:$0xff]  ;;  %v3345_v17 = vld [vmem:[#allocation22 + $0x240] sm:$0xff] }
 0x8c4   : > { %3181 = vmatmul.f32.vlgmr.msra.gmra.mxu0 %v11761_v2  ;;  %3227 = vmatmul.f32.vlgmr.msrb.gmra.mxu2 %v11761_v2  ;;  %v11766_v20 = vadd.f32 %v9462_v3, %v11741_v22  ;;  %v3379_v1 = vld [vmem:[#allocation22 + $0x350] sm:$0xff]  ;;  %v3348_v3 = vld [vmem:[#allocation22 + $0x258] sm:$0xff] }
 0x8c5   : > { %3407 = vmatpush.msra.mxu2 %v3365_v7  ;;  %3439 = vmatpush.msrb.mxu3 %v3379_v1  ;;  %v3346_v7 = vld [vmem:[#allocation22 + $0x248] sm:$0xff]  ;;  %v3612_v1 = vld [vmem:[#allocation14 + $0x4f0] sm:$0xff] }
 0x8c6   : > { %3207 = vmatmul.f32.gmra.mxu1 %v11766_v20  ;;  %3253 = vmatmul.f32.gmra.mxu3 %v11766_v20 }
 0x8c7   : > { %3408 = vmatpush.msra.mxu2 %v3363_v9  ;;  %3440 = vmatpush.msrb.mxu3 %v3377_v6  ;;  %v3375_v9 = vld [vmem:[#allocation22 + $0x330] sm:$0xff]  ;;  %v3608_v6 = vld [vmem:[#allocation14 + $0x4d0] sm:$0xff] }
 0x8c9   : > { %v9464_v4 = vpop.eup %9463  ;;  %3409 = vmatpush.msra.mxu2 %v3361_v13  ;;  %3441 = vmatpush.msrb.mxu3 %v3375_v9  ;;  %v3341_v13 = vld [vmem:[#allocation22 + $0x220] sm:$0xff]  ;;  %v3634_v9 = vld [vmem:[#allocation14 + $0x5a0] sm:$0xff] }
 0x8ca   : > { %v11771_v5 = vadd.f32 %v9464_v4, %v11739_v21  ;;  %v3359_v21 = vld [vmem:[#allocation22 + $0x2b0] sm:$0xff]  ;;  %v3380_v4 = vld [vmem:[#allocation22 + $0x358] sm:$0xff] }
 0x8cb   : > { %3410 = vmatpush.msra.mxu2 %v3359_v21  ;;  %3442 = vmatpush.msrb.mxu3 %v3373_v14  ;;  %v3342_v21 = vld [vmem:[#allocation22 + $0x228] sm:$0xff]  ;;  %v3632_v14 = vld [vmem:[#allocation14 + $0x590] sm:$0xff] }
 0x8cc   : > { %3184 = vmatmul.f32.gmra.mxu0 %v11771_v5  ;;  %3230 = vmatmul.f32.gmra.mxu2 %v11771_v5 }
 0x8cd   : > { %3411 = vmatpush.msra.mxu2 %v3357_v19  ;;  %v3371_v19 = vld [vmem:[#allocation22 + $0x310] sm:$0xff] }
 0x8ce   : > { %3443 = vmatpush.msrb.mxu3 %v3371_v19 }
 0x8cf   : > { %3412 = vmatpush.msra.mxu2 %v3355_v25  ;;  %v3337_v25 = vld [vmem:[#allocation22 + $0x200] sm:$0xff] }
 0x8d0   : > { %3444 = vmatpush.msrb.mxu3 %v3369_v26 }
 0x8d1   : > { %3413 = vmatpush.msra.mxu2 %v3353_v31  ;;  %v3164_v31 = vld [vmem:[#allocation17 + $0x2] sm:$0x3] }
 0x8d3   : > { %3414 = vmatpush.msra.mxu2 %v3351_v34  ;;  %v3315_v34 = vld [vmem:[#allocation19 + $0x20] sm:$0xff] }
 0x8d5   : > { %3415 = vmatpush.msra.mxu2 %v3349_v59 }
 0x8d7   : > { %3416 = vmatpush.msra.mxu2 %v3347_v0  ;;  %v3640_v0 = vld [vmem:[#allocation14 + $0x5d0] sm:$0xff] }
 0x8d9   : > { %3417 = vmatpush.msra.mxu2 %v3345_v17  ;;  %v3638_v17 = vld [vmem:[#allocation14 + $0x5c0] sm:$0xff] }
 0x93b   : > { %v3205_v22 = vpop.f32.mrf.mxu1 }
 0x941   : > { %v3182_v12 = vpop.f32.mrf.mxu0  ;;  %v3251_v18 = vpop.f32.mrf.mxu3 }
 0x942   : > { %v3206_v35 = vadd.f32 %v3205_v22, %v3182_v12  ;;  %v3343_v22 = vld [vmem:[#allocation22 + $0x230] sm:$0xff]  ;;  %v3376_v12 = vld [vmem:[#allocation22 + $0x338] sm:$0xff] }
 0x943   : > { %v3208_v27 = vpop.f32.mrf.mxu1  ;;  %3418 = vmatpush.msra.mxu2 %v3343_v22  ;;  %v3606_v22 = vld [vmem:[#allocation14 + $0x4c0] sm:$0xff] }
 0x945   : > { %3419 = vmatpush.msra.mxu2 %v3341_v13 }
 0x947   : > { %v3228_v24 = vpop.f32.mrf.mxu2 }
 0x948   : > { %v3252_v45 = vadd.f32 %v3251_v18, %v3228_v24  ;;  %v3339_v18 = vld [vmem:[#allocation22 + $0x210] sm:$0xff]  ;;  %v3372_v24 = vld [vmem:[#allocation22 + $0x318] sm:$0xff] }
 0x949   : > { %v3185_v30 = vpop.f32.mrf.mxu0  ;;  %v3254_v41 = vpop.f32.mrf.mxu3  ;;  %3420 = vmatpush.msra.mxu2 %v3339_v18 }
 0x94a   : > { %v3209_v32 = vadd.f32 %v3208_v27, %v3185_v30  ;;  %v3338_v27 = vld [vmem:[#allocation22 + $0x208] sm:$0xff] }
 0x94b   : > { %3421 = vmatpush.msra.mxu2 %v3337_v25  ;;  %v3370_v30 = vld [vmem:[#allocation22 + $0x308] sm:$0xff]  ;;  %v3645_v25 = vld [vmem:[#allocation14 + $0x5f8] sm:$0xff] }
 0x94c   : > { %3282 = vmatpush.msrb.mxu0 %v3209_v32  ;;  %v3258_v32 = vperm.slane %v3164_v31, 0 }
 0x94e   : > { %3283 = vmatpush.msrb.mxu0 %v3206_v35 }
 0x94f   : > { %v3231_v15 = vpop.f32.mrf.mxu2  ;;  %9078 = vmatmul.msk.f32.vlgmr.msrb.gmra.mxu0 %vm1199_vm0, %v3161_v36 }
 0x950   : > { %v3255_v42 = vadd.f32 %v3254_v41, %v3231_v15  ;;  %3452 = vmatpush.msra.mxu0 %v3368_v40  ;;  %v3259_v40 = vperm.slane %v3164_v31, 1  ;;  %v3641_v31 = vld [vmem:[#allocation14 + $0x5d8] sm:$0xff] }
 0x952   : > { %3305 = vmatpush.msrb.mxu1 %v3255_v42  ;;  %3453 = vmatpush.msra.mxu0 %v3366_v29  ;;  %v3316_v29 = vld [vmem:[#allocation19 + $0x28] sm:$0xff] }
 0x954   : > { %3306 = vmatpush.msrb.mxu1 %v3252_v45  ;;  %3454 = vmatpush.msra.mxu0 %v3364_v44  ;;  %v3325_v44 = vld [vmem:[#allocation20 + $0x28] sm:$0xff] }
 0x955   : > { %9080 = vmatmul.msk.f32.vlgmr.msrb.gmra.mxu1 %vm1199_vm0, %v3161_v36  ;;  %v3324_v36 = vld [vmem:[#allocation20 + $0x20] sm:$0xff] }
 0x956   : > { %3475 = vmatpush.msra.mxu1 %v3400_v46  ;;  %3455 = vmatpush.msra.mxu0 %v3362_v47  ;;  %v3317_v46 = vld [vmem:[#allocation19 + $0x30] sm:$0xff] }
 0x957   : > { %9079 = vmatmul.msk.f32.gmra.mxu0 %vm1199_vm0, %v3162_v28 }
 0x958   : > { %3476 = vmatpush.msra.mxu1 %v3398_v49  ;;  %3456 = vmatpush.msra.mxu0 %v3360_v50  ;;  %v3326_v49 = vld [vmem:[#allocation20 + $0x30] sm:$0xff] }
 0x95a   : > { %3477 = vmatpush.msra.mxu1 %v3396_v10  ;;  %3457 = vmatpush.msra.mxu0 %v3358_v43 }
 0x95c   : > { %3478 = vmatpush.msra.mxu1 %v3394_v52  ;;  %3458 = vmatpush.msra.mxu0 %v3356_v53 }
 0x95d   : > { %9081 = vmatmul.msk.f32.gmra.mxu1 %vm1199_vm0, %v3162_v28 }
 0x95e   : > { %3479 = vmatpush.msra.mxu1 %v3392_v54  ;;  %3459 = vmatpush.msra.mxu0 %v3354_v51  ;;  %v3318_v54 = vld [vmem:[#allocation19 + $0x38] sm:$0xff] }
 0x960   : > { %3480 = vmatpush.msra.mxu1 %v3390_v55  ;;  %3460 = vmatpush.msra.mxu0 %v3352_v56  ;;  %v3327_v55 = vld [vmem:[#allocation20 + $0x38] sm:$0xff] }
 0x962   : > { %3481 = vmatpush.msra.mxu1 %v3388_v57  ;;  %3461 = vmatpush.msra.mxu0 %v3350_v62  ;;  %v3644_v62 = vld [vmem:[#allocation14 + $0x5f0] sm:$0xff] }
 0x964   : > { %3482 = vmatpush.msra.mxu1 %v3386_v58  ;;  %3462 = vmatpush.msra.mxu0 %v3348_v3  ;;  %v3610_v3 = vld [vmem:[#allocation14 + $0x4e0] sm:$0xff] }
 0x966   : > { %3483 = vmatpush.msra.mxu1 %v3384_v48  ;;  %3463 = vmatpush.msra.mxu0 %v3346_v7 }
 0x968   : > { %3484 = vmatpush.msra.mxu1 %v3382_v63  ;;  %3464 = vmatpush.msra.mxu0 %v3344_v11  ;;  %v3642_v63 = vld [vmem:[#allocation14 + $0x5e0] sm:$0xff]  ;;  %v3604_v11 = vld [vmem:[#allocation14 + $0x4b0] sm:$0xff] }
 0x96a   : > { %3485 = vmatpush.msra.mxu1 %v3380_v4  ;;  %3465 = vmatpush.msra.mxu0 %v3342_v21 }
 0x96c   : > { %3486 = vmatpush.msra.mxu1 %v3378_v8  ;;  %3466 = vmatpush.msra.mxu0 %v3340_v23  ;;  %v3636_v8 = vld [vmem:[#allocation14 + $0x5b0] sm:$0xff]  ;;  %v3402_v23 = vld [vmem:[#allocation23 + $0x10] sm:$0xff] }
 0x96e   : > { %3487 = vmatpush.msra.mxu1 %v3376_v12  ;;  %3467 = vmatpush.msra.mxu0 %v3338_v27  ;;  %v3643_v27 = vld [vmem:[#allocation14 + $0x5e8] sm:$0xff] }
 0x970   : > { %3488 = vmatpush.msra.mxu1 %v3374_v16  ;;  %3651 = vmatpush.msrb.mxu0 %v3612_v1  ;;  %v3630_v16 = vld [vmem:[#allocation14 + $0x580] sm:$0xff]  ;;  %v3593_v1 = vld [vmem:[#allocation14 + $0x458] sm:$0xff] }
 0x972   : > { %3489 = vmatpush.msra.mxu1 %v3372_v24  ;;  %3652 = vmatpush.msrb.mxu0 %v3610_v3  ;;  %v3619_v3 = vld [vmem:[#allocation14 + $0x528] sm:$0xff] }
 0x974   : > { %3490 = vmatpush.msra.mxu1 %v3370_v30  ;;  %3653 = vmatpush.msrb.mxu0 %v3608_v6  ;;  %v3591_v6 = vld [vmem:[#allocation14 + $0x448] sm:$0xff] }
 0x976   : > { %3674 = vmatpush.msrb.mxu1 %v3644_v62  ;;  %3654 = vmatpush.msrb.mxu0 %v3606_v22  ;;  %v3621_v62 = vld [vmem:[#allocation14 + $0x538] sm:$0xff]  ;;  %v3614_v22 = vld [vmem:[#allocation14 + $0x500] sm:$0xff] }
 0x978   : > { %3675 = vmatpush.msrb.mxu1 %v3642_v63  ;;  %3655 = vmatpush.msrb.mxu0 %v3604_v11  ;;  %v3592_v63 = vld [vmem:[#allocation14 + $0x450] sm:$0xff]  ;;  %v3615_v11 = vld [vmem:[#allocation14 + $0x508] sm:$0xff] }
 0x97a   : > { %3676 = vmatpush.msrb.mxu1 %v3640_v0  ;;  %v3618_v0 = vld [vmem:[#allocation14 + $0x520] sm:$0xff] }
 0x97c   : > { %3677 = vmatpush.msrb.mxu1 %v3638_v17  ;;  %v3616_v17 = vld [vmem:[#allocation14 + $0x510] sm:$0xff] }
 0x97e   : > { %3678 = vmatpush.msrb.mxu1 %v3636_v8  ;;  %v3588_v8 = vld [vmem:[#allocation14 + $0x430] sm:$0xff] }
 0x980   : > { %3679 = vmatpush.msrb.mxu1 %v3634_v9  ;;  %v3589_v9 = vld [vmem:[#allocation14 + $0x438] sm:$0xff] }
 0x982   : > { %3680 = vmatpush.msrb.mxu1 %v3632_v14  ;;  %v3584_v14 = vld [vmem:[#allocation14 + $0x410] sm:$0xff] }
 0x984   : > { %3681 = vmatpush.msrb.mxu1 %v3630_v16  ;;  %v3582_v16 = vld [vmem:[#allocation14 + $0x400] sm:$0xff] }
 0x9cc   : > { %v3285_v33 = vpop.f32.mrf.mxu0 }
 0x9cd   : > { %v3286_v35 = vadd.f32 %v3285_v33, %v3258_v32  ;;  %v3613_v33 = vld [vmem:[#allocation14 + $0x4f8] sm:$0xff] }
 0x9cf   : > { %v3319_v37 = vmul.f32 %v3315_v34, %v3286_v35  ;;  %v3639_v34 = vld [vmem:[#allocation14 + $0x5c8] sm:$0xff]  ;;  %v3403_v35 = vld [vmem:[#allocation23 + $0x18] sm:$0xff] }
 0x9d1   : > { %v3328_v41 = vadd.f32 %v3324_v36, %v3319_v37  ;;  %v3611_v36 = vld [vmem:[#allocation14 + $0x4e8] sm:$0xff]  ;;  %v3637_v37 = vld [vmem:[#allocation14 + $0x5b8] sm:$0xff] }
 0x9d2   : > { %v3308_v15 = vpop.f32.mrf.mxu1 }
 0x9d3   : > { %9465 = vtanh.f32 %v3328_v41  ;;  %v3309_v42 = vadd.f32 %v3308_v15, %v3259_v40  ;;  %v3635_v41 = vld [vmem:[#allocation14 + $0x5a8] sm:$0xff] }
 0x9d4   : > { %v3288_v45 = vpop.f32.mrf.mxu0  ;;  %v3607_v15 = vld [vmem:[#allocation14 + $0x4c8] sm:$0xff] }
 0x9d5   : > { %v3320_v47 = vmul.f32 %v3316_v29, %v3309_v42  ;;  %v3289_v28 = vadd.f32 %v3288_v45, %v3258_v32  ;;  %v3633_v29 = vld [vmem:[#allocation14 + $0x598] sm:$0xff]  ;;  %v3602_v45 = vld [vmem:[#allocation14 + $0x4a0] sm:$0xff] }
 0x9d6   : > { %v3605_v42 = vld [vmem:[#allocation14 + $0x4b8] sm:$0xff]  ;;  %3656 = vmatpush.msrb.mxu0 %v3602_v45 }
 0x9d7   : > { %v3329_v50 = vadd.f32 %v3325_v44, %v3320_v47  ;;  %v3321_v10 = vmul.f32 %v3317_v46, %v3289_v28  ;;  %v3631_v44 = vld [vmem:[#allocation14 + $0x588] sm:$0xff]  ;;  %v3628_v46 = vld [vmem:[#allocation14 + $0x570] sm:$0xff]  ;;  %v3629_v28 = vld [vmem:[#allocation14 + $0x578] sm:$0xff] }
 0x9d8   : > { %3682 = vmatpush.msrb.mxu1 %v3628_v46  ;;  %v3603_v47 = vld [vmem:[#allocation14 + $0x4a8] sm:$0xff] }
 0x9d9   : > { %v9466_v43 = vpop.eup %9465  ;;  %9467 = vtanh.f32 %v3329_v50  ;;  %v3330_v52 = vadd.f32 %v3326_v49, %v3321_v10  ;;  %v3600_v49 = vld [vmem:[#allocation14 + $0x490] sm:$0xff]  ;;  %v3626_v50 = vld [vmem:[#allocation14 + $0x560] sm:$0xff]  ;;  %v3601_v10 = vld [vmem:[#allocation14 + $0x498] sm:$0xff] }
 0x9da   : > { %v3311_v53 = vpop.f32.mrf.mxu1  ;;  %3422 = vmatmul.f32.vlgmr.msra.gmra.mxu2 %v9466_v43  ;;  %3468 = vmatmul.f32.vlgmr.msra.gmra.mxu0 %v9466_v43  ;;  %v3627_v43 = vld [vmem:[#allocation14 + $0x568] sm:$0xff] }
 0x9db   : > { %9469 = vtanh.f32 %v3330_v52  ;;  %v3312_v51 = vadd.f32 %v3311_v53, %v3259_v40  ;;  %v3609_v40 = vld [vmem:[#allocation14 + $0x4d8] sm:$0xff]  ;;  %3657 = vmatpush.msrb.mxu0 %v3600_v49  ;;  %3683 = vmatpush.msrb.mxu1 %v3626_v50  ;;  %v3598_v52 = vld [vmem:[#allocation14 + $0x480] sm:$0xff]  ;;  %v3624_v53 = vld [vmem:[#allocation14 + $0x550] sm:$0xff] }
 0x9dd   : > { %v3322_v56 = vmul.f32 %v3318_v54, %v3312_v51  ;;  %v3599_v54 = vld [vmem:[#allocation14 + $0x488] sm:$0xff]  ;;  %3658 = vmatpush.msrb.mxu0 %v3598_v52  ;;  %3684 = vmatpush.msrb.mxu1 %v3624_v53  ;;  %v3625_v51 = vld [vmem:[#allocation14 + $0x558] sm:$0xff] }
 0x9df   : > { %v9468_v57 = vpop.eup %9467  ;;  %v3331_v58 = vadd.f32 %v3327_v55, %v3322_v56  ;;  %v3596_v55 = vld [vmem:[#allocation14 + $0x470] sm:$0xff]  ;;  %v3622_v56 = vld [vmem:[#allocation14 + $0x540] sm:$0xff] }
 0x9e0   : > { %3445 = vmatmul.f32.vlgmr.msrb.gmra.mxu3 %v9468_v57  ;;  %3491 = vmatmul.f32.vlgmr.msra.gmra.mxu1 %v9468_v57  ;;  %v3597_v57 = vld [vmem:[#allocation14 + $0x478] sm:$0xff] }
 0x9e1   : > { %v9470_v48 = vpop.eup %9469  ;;  %9471 = vtanh.f32 %v3331_v58  ;;  %3659 = vmatpush.msrb.mxu0 %v3596_v55  ;;  %3685 = vmatpush.msrb.mxu1 %v3622_v56  ;;  %v3623_v58 = vld [vmem:[#allocation14 + $0x548] sm:$0xff] }
 0x9e2   : > { %3425 = vmatmul.f32.gmra.mxu2 %v9470_v48  ;;  %3471 = vmatmul.f32.gmra.mxu0 %v9470_v48  ;;  %v3594_v48 = vld [vmem:[#allocation14 + $0x460] sm:$0xff] }
 0x9e3   : > { %3660 = vmatpush.msrb.mxu0 %v3594_v48  ;;  %v3883_v48 = vld [vmem:[#allocation22 + $0x5e0] sm:$0xff] }
 0x9e5   : > { %3661 = vmatpush.msrb.mxu0 %v3592_v63  ;;  %v3847_v63 = vld [vmem:[#allocation22 + $0x4c0] sm:$0xff] }
 0x9e7   : > { %v9472_v59 = vpop.eup %9471 }
 0x9e8   : > { %3448 = vmatmul.f32.gmra.mxu3 %v9472_v59  ;;  %3494 = vmatmul.f32.gmra.mxu1 %v9472_v59  ;;  %v3620_v59 = vld [vmem:[#allocation14 + $0x530] sm:$0xff] }
 0x9e9   : > { %3686 = vmatpush.msrb.mxu1 %v3620_v59  ;;  %v3849_v59 = vld [vmem:[#allocation22 + $0x4d0] sm:$0xff] }
 0x9eb   : > { %3687 = vmatpush.msrb.mxu1 %v3618_v0  ;;  %v3879_v0 = vld [vmem:[#allocation22 + $0x5c0] sm:$0xff] }
 0x9ed   : > { %3688 = vmatpush.msrb.mxu1 %v3616_v17  ;;  %v3875_v17 = vld [vmem:[#allocation22 + $0x5a0] sm:$0xff] }
 0x9ef   : > { %3689 = vmatpush.msrb.mxu1 %v3614_v22 }
 0xa57   : > { %v3469_v61 = vpop.f32.mrf.mxu0 }
 0xa5d   : > { %v3492_v4 = vpop.f32.mrf.mxu1  ;;  %v3423_v7 = vpop.f32.mrf.mxu2 }
 0xa5e   : > { %v3493_v19 = vadd.f32 %v3492_v4, %v3469_v61  ;;  %v3595_v61 = vld [vmem:[#allocation14 + $0x468] sm:$0xff]  ;;  %v3590_v4 = vld [vmem:[#allocation14 + $0x440] sm:$0xff] }
 0xa5f   : > { %v3472_v13 = vpop.f32.mrf.mxu0  ;;  %3662 = vmatpush.msrb.mxu0 %v3590_v4  ;;  %v3843_v4 = vld [vmem:[#allocation22 + $0x4a0] sm:$0xff] }
 0xa61   : > { %3663 = vmatpush.msrb.mxu0 %v3588_v8  ;;  %v3873_v8 = vld [vmem:[#allocation22 + $0x590] sm:$0xff] }
 0xa63   : > { %v3446_v12 = vpop.f32.mrf.mxu3 }
 0xa64   : > { %v3447_v32 = vadd.f32 %v3446_v12, %v3423_v7  ;;  %v3617_v7 = vld [vmem:[#allocation14 + $0x518] sm:$0xff]  ;;  %v3586_v12 = vld [vmem:[#allocation14 + $0x420] sm:$0xff] }
 0xa65   : > { %v3495_v21 = vpop.f32.mrf.mxu1  ;;  %v3426_v24 = vpop.f32.mrf.mxu2  ;;  %3664 = vmatpush.msrb.mxu0 %v3586_v12 }
 0xa66   : > { %v3496_v18 = vadd.f32 %v3495_v21, %v3472_v13  ;;  %v3587_v13 = vld [vmem:[#allocation14 + $0x428] sm:$0xff]  ;;  %v3585_v21 = vld [vmem:[#allocation14 + $0x418] sm:$0xff] }
 0xa67   : > { %3665 = vmatpush.msrb.mxu0 %v3584_v14  ;;  %v3837_v14 = vld [vmem:[#allocation22 + $0x470] sm:$0xff] }
 0xa68   : > { %3546 = vmatpush.msra.mxu3 %v3496_v18  ;;  %v3583_v18 = vld [vmem:[#allocation14 + $0x408] sm:$0xff] }
 0xa69   : > { %3666 = vmatpush.msrb.mxu0 %v3582_v16  ;;  %v3647_v16 = vld [vmem:[#allocation16 + $0x20] sm:$0xff] }
 0xa6a   : > { %3547 = vmatpush.msra.mxu3 %v3493_v19  ;;  %v3405_v19 = vld [vmem:[#allocation25 + $0x2] sm:$0x3] }
 0xa6b   : > { %v3449_v26 = vpop.f32.mrf.mxu3  ;;  %9084 = vmatmul.msk.f32.vlgmr.msra.gmra.mxu3 %vm1199_vm0, %v3402_v23 }
 0xa6c   : > { %v3450_v30 = vadd.f32 %v3449_v26, %v3426_v24  ;;  %3720 = vmatpush.msrb.mxu3 %v3645_v25  ;;  %v3557_v25 = vld [vmem:[#allocation26 + $0x28] sm:$0xff] }
 0xa6e   : > { %3523 = vmatpush.msrb.mxu2 %v3450_v30  ;;  %3721 = vmatpush.msrb.mxu3 %v3643_v27  ;;  %v3566_v27 = vld [vmem:[#allocation28 + $0x28] sm:$0xff] }
 0xa70   : > { %3524 = vmatpush.msrb.mxu2 %v3447_v32  ;;  %3722 = vmatpush.msrb.mxu3 %v3641_v31  ;;  %v3499_v31 = vperm.slane %v3405_v19, 0 }
 0xa71   : > { %9082 = vmatmul.msk.f32.vlgmr.msrb.gmra.mxu2 %vm1199_vm0, %v3402_v23  ;;  %v3500_v23 = vperm.slane %v3405_v19, 1  ;;  %v3854_v19 = vld [vmem:[#allocation22 + $0x4f8] sm:$0xff] }
 0xa72   : > { %3697 = vmatpush.msra.mxu2 %v3613_v33  ;;  %3723 = vmatpush.msrb.mxu3 %v3639_v34  ;;  %v3556_v34 = vld [vmem:[#allocation26 + $0x20] sm:$0xff] }
 0xa73   : > { %9085 = vmatmul.msk.f32.gmra.mxu3 %vm1199_vm0, %v3403_v35 }
 0xa74   : > { %3698 = vmatpush.msra.mxu2 %v3611_v36  ;;  %3724 = vmatpush.msrb.mxu3 %v3637_v37  ;;  %v3565_v36 = vld [vmem:[#allocation28 + $0x20] sm:$0xff] }
 0xa76   : > { %3699 = vmatpush.msra.mxu2 %v3609_v40  ;;  %3725 = vmatpush.msrb.mxu3 %v3635_v41  ;;  %v3559_v40 = vld [vmem:[#allocation26 + $0x38] sm:$0xff] }
 0xa78   : > { %3700 = vmatpush.msra.mxu2 %v3607_v15  ;;  %3726 = vmatpush.msrb.mxu3 %v3633_v29  ;;  %v3568_v29 = vld [vmem:[#allocation28 + $0x38] sm:$0xff] }
 0xa79   : > { %9083 = vmatmul.msk.f32.gmra.mxu2 %vm1199_vm0, %v3403_v35 }
 0xa7a   : > { %3701 = vmatpush.msra.mxu2 %v3605_v42  ;;  %3727 = vmatpush.msrb.mxu3 %v3631_v44 }
 0xa7c   : > { %3702 = vmatpush.msra.mxu2 %v3603_v47  ;;  %3728 = vmatpush.msrb.mxu3 %v3629_v28  ;;  %v3558_v28 = vld [vmem:[#allocation26 + $0x30] sm:$0xff] }
 0xa7e   : > { %3703 = vmatpush.msra.mxu2 %v3601_v10  ;;  %3729 = vmatpush.msrb.mxu3 %v3627_v43  ;;  %v3567_v10 = vld [vmem:[#allocation28 + $0x30] sm:$0xff] }
 0xa80   : > { %3704 = vmatpush.msra.mxu2 %v3599_v54  ;;  %3730 = vmatpush.msrb.mxu3 %v3625_v51 }
 0xa82   : > { %3705 = vmatpush.msra.mxu2 %v3597_v57  ;;  %3731 = vmatpush.msrb.mxu3 %v3623_v58  ;;  %v3885_v57 = vld [vmem:[#allocation22 + $0x5f0] sm:$0xff]  ;;  %v3851_v58 = vld [vmem:[#allocation22 + $0x4e0] sm:$0xff] }
 0xa84   : > { %3706 = vmatpush.msra.mxu2 %v3595_v61  ;;  %3732 = vmatpush.msrb.mxu3 %v3621_v62  ;;  %v3881_v61 = vld [vmem:[#allocation22 + $0x5d0] sm:$0xff] }
 0xa86   : > { %3707 = vmatpush.msra.mxu2 %v3593_v1  ;;  %3733 = vmatpush.msrb.mxu3 %v3619_v3  ;;  %v3877_v1 = vld [vmem:[#allocation22 + $0x5b0] sm:$0xff] }
 0xa88   : > { %3708 = vmatpush.msra.mxu2 %v3591_v6  ;;  %3734 = vmatpush.msrb.mxu3 %v3617_v7  ;;  %v3841_v7 = vld [vmem:[#allocation22 + $0x490] sm:$0xff] }
 0xa8a   : > { %3709 = vmatpush.msra.mxu2 %v3589_v9  ;;  %3735 = vmatpush.msrb.mxu3 %v3615_v11  ;;  %v3839_v11 = vld [vmem:[#allocation22 + $0x480] sm:$0xff] }
 0xa8c   : > { %3710 = vmatpush.msra.mxu2 %v3587_v13  ;;  %3915 = vmatpush.msra.mxu3 %v3885_v57  ;;  %v3871_v13 = vld [vmem:[#allocation22 + $0x580] sm:$0xff] }
 0xa8d   : > { %v3863_v57 = vld [vmem:[#allocation22 + $0x540] sm:$0xff] }
 0xa8e   : > { %3711 = vmatpush.msra.mxu2 %v3585_v21  ;;  %3916 = vmatpush.msra.mxu3 %v3883_v48  ;;  %v3864_v48 = vld [vmem:[#allocation22 + $0x548] sm:$0xff] }
 0xa90   : > { %3712 = vmatpush.msra.mxu2 %v3583_v18  ;;  %3917 = vmatpush.msra.mxu3 %v3881_v61  ;;  %v3869_v18 = vld [vmem:[#allocation22 + $0x570] sm:$0xff]  ;;  %v3830_v61 = vld [vmem:[#allocation22 + $0x438] sm:$0xff] }
 0xa92   : > { %3918 = vmatpush.msra.mxu3 %v3879_v0  ;;  %v3859_v0 = vld [vmem:[#allocation22 + $0x520] sm:$0xff] }
 0xa94   : > { %3919 = vmatpush.msra.mxu3 %v3877_v1  ;;  %v3860_v1 = vld [vmem:[#allocation22 + $0x528] sm:$0xff] }
 0xa96   : > { %3920 = vmatpush.msra.mxu3 %v3875_v17  ;;  %v3826_v17 = vld [vmem:[#allocation22 + $0x418] sm:$0xff] }
 0xa98   : > { %3921 = vmatpush.msra.mxu3 %v3873_v8  ;;  %v3855_v8 = vld [vmem:[#allocation22 + $0x500] sm:$0xff] }
 0xa9a   : > { %3922 = vmatpush.msra.mxu3 %v3871_v13 }
 0xa9c   : > { %3923 = vmatpush.msra.mxu3 %v3869_v18 }
 0xaee   : > { %v3549_v24 = vpop.f32.mrf.mxu3 }
 0xaef   : > { %v3550_v26 = vadd.f32 %v3549_v24, %v3500_v23 }
 0xaf1   : > { %v3561_v30 = vmul.f32 %v3557_v25, %v3550_v26  ;;  %v3852_v25 = vld [vmem:[#allocation22 + $0x4e8] sm:$0xff] }
 0xaf3   : > { %v3570_v32 = vadd.f32 %v3566_v27, %v3561_v30  ;;  %v3850_v27 = vld [vmem:[#allocation22 + $0x4d8] sm:$0xff] }
 0xaf4   : > { %v3526_v33 = vpop.f32.mrf.mxu2 }
 0xaf5   : > { %9473 = vtanh.f32 %v3570_v32  ;;  %v3527_v35 = vadd.f32 %v3526_v33, %v3499_v31  ;;  %v3848_v32 = vld [vmem:[#allocation22 + $0x4c8] sm:$0xff]  ;;  %v3648_v33 = vld [vmem:[#allocation16 + $0x28] sm:$0xff] }
 0xaf6   : > { %v3552_v37 = vpop.f32.mrf.mxu3 }
 0xaf7   : > { %v3560_v41 = vmul.f32 %v3556_v34, %v3527_v35  ;;  %v3553_v15 = vadd.f32 %v3552_v37, %v3500_v23  ;;  %v3884_v34 = vld [vmem:[#allocation22 + $0x5e8] sm:$0xff]  ;;  %v3846_v35 = vld [vmem:[#allocation22 + $0x4b8] sm:$0xff] }
 0xaf8   : > { %v3844_v37 = vld [vmem:[#allocation22 + $0x4a8] sm:$0xff] }
 0xaf9   : > { %v3569_v42 = vadd.f32 %v3565_v36, %v3560_v41  ;;  %v3563_v44 = vmul.f32 %v3559_v40, %v3553_v15  ;;  %v3882_v36 = vld [vmem:[#allocation22 + $0x5d8] sm:$0xff]  ;;  %v3880_v40 = vld [vmem:[#allocation22 + $0x5c8] sm:$0xff] }
 0xafa   : > { %v3842_v41 = vld [vmem:[#allocation22 + $0x498] sm:$0xff] }
 0xafb   : > { %v9474_v45 = vpop.eup %9473  ;;  %9475 = vtanh.f32 %v3569_v42  ;;  %v3572_v46 = vadd.f32 %v3568_v29, %v3563_v44  ;;  %v3878_v15 = vld [vmem:[#allocation22 + $0x5b8] sm:$0xff]  ;;  %v3840_v29 = vld [vmem:[#allocation22 + $0x488] sm:$0xff] }
 0xafc   : > { %v3529_v47 = vpop.f32.mrf.mxu2  ;;  %v11784_v49 = vadd.f32 %v9474_v45, %v11756_v60  ;;  %v3876_v42 = vld [vmem:[#allocation22 + $0x5a8] sm:$0xff]  ;;  %v3838_v44 = vld [vmem:[#allocation22 + $0x478] sm:$0xff] }
 0xafd   : > { %9477 = vtanh.f32 %v3572_v46  ;;  %v3530_v50 = vadd.f32 %v3529_v47, %v3499_v31  ;;  %v3886_v31 = vld [vmem:[#allocation22 + $0x5f8] sm:$0xff]  ;;  %v3872_v46 = vld [vmem:[#allocation22 + $0x588] sm:$0xff] }
 0xafe   : > { %3690 = vmatmul.f32.vlgmr.msrb.gmra.mxu1 %v11784_v49  ;;  %3736 = vmatmul.f32.vlgmr.msrb.gmra.mxu3 %v11784_v49  ;;  %v3874_v45 = vld [vmem:[#allocation22 + $0x598] sm:$0xff] }
 0xaff   : > { %v3562_v43 = vmul.f32 %v3558_v28, %v3530_v50  ;;  %v3870_v47 = vld [vmem:[#allocation22 + $0x578] sm:$0xff]  ;;  %v3835_v28 = vld [vmem:[#allocation22 + $0x460] sm:$0xff] }
 0xb00   : > { %v3867_v50 = vld [vmem:[#allocation22 + $0x560] sm:$0xff] }
 0xb01   : > { %v9476_v52 = vpop.eup %9475  ;;  %v3571_v53 = vadd.f32 %v3567_v10, %v3562_v43  ;;  %3924 = vmatpush.msra.mxu3 %v3867_v50  ;;  %v3836_v10 = vld [vmem:[#allocation22 + $0x468] sm:$0xff] }
 0xb02   : > { %v11789_v54 = vadd.f32 %v9476_v52, %v11761_v2  ;;  %v3853_v2 = vld [vmem:[#allocation22 + $0x4f0] sm:$0xff]  ;;  %v3868_v43 = vld [vmem:[#allocation22 + $0x568] sm:$0xff] }
 0xb03   : > { %v9478_v51 = vpop.eup %9477  ;;  %9479 = vtanh.f32 %v3571_v53  ;;  %3892 = vmatpush.msrb.mxu2 %v3853_v2  ;;  %v3833_v52 = vld [vmem:[#allocation22 + $0x450] sm:$0xff]  ;;  %v3831_v2 = vld [vmem:[#allocation22 + $0x440] sm:$0xff] }
 0xb04   : > { %3667 = vmatmul.f32.vlgmr.msrb.gmra.mxu0 %v11789_v54  ;;  %3713 = vmatmul.f32.vlgmr.msra.gmra.mxu2 %v11789_v54  ;;  %v11794_v60 = vadd.f32 %v9478_v51, %v11766_v20  ;;  %v3865_v53 = vld [vmem:[#allocation22 + $0x550] sm:$0xff]  ;;  %v3834_v51 = vld [vmem:[#allocation22 + $0x458] sm:$0xff] }
 0xb05   : > { %3893 = vmatpush.msrb.mxu2 %v3851_v58  ;;  %3925 = vmatpush.msra.mxu3 %v3865_v53  ;;  %v3832_v58 = vld [vmem:[#allocation22 + $0x448] sm:$0xff]  ;;  %v4098_v53 = vld [vmem:[#allocation14 + $0x6f0] sm:$0xff] }
 0xb06   : > { %3693 = vmatmul.f32.gmra.mxu1 %v11794_v60  ;;  %3739 = vmatmul.f32.gmra.mxu3 %v11794_v60 }
 0xb07   : > { %3894 = vmatpush.msrb.mxu2 %v3849_v59  ;;  %3926 = vmatpush.msra.mxu3 %v3863_v57  ;;  %v3861_v59 = vld [vmem:[#allocation22 + $0x530] sm:$0xff]  ;;  %v4094_v57 = vld [vmem:[#allocation14 + $0x6d0] sm:$0xff] }
 0xb09   : > { %v9480_v55 = vpop.eup %9479  ;;  %3895 = vmatpush.msrb.mxu2 %v3847_v63  ;;  %3927 = vmatpush.msra.mxu3 %v3861_v59  ;;  %v3827_v63 = vld [vmem:[#allocation22 + $0x420] sm:$0xff]  ;;  %v4120_v59 = vld [vmem:[#allocation14 + $0x7a0] sm:$0xff] }
 0xb0a   : > { %v11799_v56 = vadd.f32 %v9480_v55, %v11771_v5  ;;  %v3845_v5 = vld [vmem:[#allocation22 + $0x4b0] sm:$0xff]  ;;  %v3866_v55 = vld [vmem:[#allocation22 + $0x558] sm:$0xff] }
 0xb0b   : > { %3896 = vmatpush.msrb.mxu2 %v3845_v5  ;;  %3928 = vmatpush.msra.mxu3 %v3859_v0  ;;  %v3828_v5 = vld [vmem:[#allocation22 + $0x428] sm:$0xff]  ;;  %v4118_v0 = vld [vmem:[#allocation14 + $0x790] sm:$0xff] }
 0xb0c   : > { %3670 = vmatmul.f32.gmra.mxu0 %v11799_v56  ;;  %3716 = vmatmul.f32.gmra.mxu2 %v11799_v56 }
 0xb0d   : > { %3897 = vmatpush.msrb.mxu2 %v3843_v4  ;;  %v3857_v4 = vld [vmem:[#allocation22 + $0x510] sm:$0xff] }
 0xb0e   : > { %3929 = vmatpush.msra.mxu3 %v3857_v4 }
 0xb0f   : > { %3898 = vmatpush.msrb.mxu2 %v3841_v7  ;;  %v3823_v7 = vld [vmem:[#allocation22 + $0x400] sm:$0xff] }
 0xb10   : > { %3930 = vmatpush.msra.mxu3 %v3855_v8 }
 0xb11   : > { %3899 = vmatpush.msrb.mxu2 %v3839_v11  ;;  %v3650_v11 = vld [vmem:[#allocation17 + $0x4] sm:$0x3] }
 0xb13   : > { %3900 = vmatpush.msrb.mxu2 %v3837_v14  ;;  %v3801_v14 = vld [vmem:[#allocation19 + $0x40] sm:$0xff] }
 0xb15   : > { %3901 = vmatpush.msrb.mxu2 %v3835_v28 }
 0xb17   : > { %3902 = vmatpush.msrb.mxu2 %v3833_v52  ;;  %v4126_v52 = vld [vmem:[#allocation14 + $0x7d0] sm:$0xff] }
 0xb19   : > { %3903 = vmatpush.msrb.mxu2 %v3831_v2  ;;  %v4124_v2 = vld [vmem:[#allocation14 + $0x7c0] sm:$0xff] }
 0xb7b   : > { %v3691_v20 = vpop.f32.mrf.mxu1 }
 0xb81   : > { %v3668_v62 = vpop.f32.mrf.mxu0  ;;  %v3737_v3 = vpop.f32.mrf.mxu3 }
 0xb82   : > { %v3692_v21 = vadd.f32 %v3691_v20, %v3668_v62  ;;  %v3829_v20 = vld [vmem:[#allocation22 + $0x430] sm:$0xff]  ;;  %v3862_v62 = vld [vmem:[#allocation22 + $0x538] sm:$0xff] }
 0xb83   : > { %v3694_v22 = vpop.f32.mrf.mxu1  ;;  %3904 = vmatpush.msrb.mxu2 %v3829_v20  ;;  %v4092_v20 = vld [vmem:[#allocation14 + $0x6c0] sm:$0xff] }
 0xb85   : > { %3905 = vmatpush.msrb.mxu2 %v3827_v63 }
 0xb87   : > { %v3714_v6 = vpop.f32.mrf.mxu2 }
 0xb88   : > { %v3738_v30 = vadd.f32 %v3737_v3, %v3714_v6  ;;  %v3825_v3 = vld [vmem:[#allocation22 + $0x410] sm:$0xff]  ;;  %v3858_v6 = vld [vmem:[#allocation22 + $0x518] sm:$0xff] }
 0xb89   : > { %v3671_v9 = vpop.f32.mrf.mxu0  ;;  %v3740_v23 = vpop.f32.mrf.mxu3  ;;  %3906 = vmatpush.msrb.mxu2 %v3825_v3 }
 0xb8a   : > { %v3695_v12 = vadd.f32 %v3694_v22, %v3671_v9  ;;  %v3824_v22 = vld [vmem:[#allocation22 + $0x408] sm:$0xff] }
 0xb8b   : > { %3907 = vmatpush.msrb.mxu2 %v3823_v7  ;;  %v3856_v9 = vld [vmem:[#allocation22 + $0x508] sm:$0xff]  ;;  %v4131_v7 = vld [vmem:[#allocation14 + $0x7f8] sm:$0xff] }
 0xb8c   : > { %3768 = vmatpush.msra.mxu0 %v3695_v12  ;;  %v3744_v12 = vperm.slane %v3650_v11, 0 }
 0xb8e   : > { %3769 = vmatpush.msra.mxu0 %v3692_v21 }
 0xb8f   : > { %v3717_v24 = vpop.f32.mrf.mxu2  ;;  %9086 = vmatmul.msk.f32.vlgmr.msra.gmra.mxu0 %vm1199_vm0, %v3647_v16 }
 0xb90   : > { %v3741_v26 = vadd.f32 %v3740_v23, %v3717_v24  ;;  %3938 = vmatpush.msrb.mxu0 %v3854_v19  ;;  %v3745_v19 = vperm.slane %v3650_v11, 1  ;;  %v4127_v11 = vld [vmem:[#allocation14 + $0x7d8] sm:$0xff] }
 0xb92   : > { %3791 = vmatpush.msra.mxu1 %v3741_v26  ;;  %3939 = vmatpush.msrb.mxu0 %v3852_v25  ;;  %v3802_v25 = vld [vmem:[#allocation19 + $0x48] sm:$0xff] }
 0xb94   : > { %3792 = vmatpush.msra.mxu1 %v3738_v30  ;;  %3940 = vmatpush.msrb.mxu0 %v3850_v27  ;;  %v3811_v27 = vld [vmem:[#allocation20 + $0x48] sm:$0xff] }
 0xb95   : > { %9088 = vmatmul.msk.f32.vlgmr.msra.gmra.mxu1 %vm1199_vm0, %v3647_v16  ;;  %v3810_v16 = vld [vmem:[#allocation20 + $0x40] sm:$0xff] }
 0xb96   : > { %3961 = vmatpush.msrb.mxu1 %v3886_v31  ;;  %3941 = vmatpush.msrb.mxu0 %v3848_v32  ;;  %v3803_v31 = vld [vmem:[#allocation19 + $0x50] sm:$0xff] }
 0xb97   : > { %9087 = vmatmul.msk.f32.gmra.mxu0 %vm1199_vm0, %v3648_v33 }
 0xb98   : > { %3962 = vmatpush.msrb.mxu1 %v3884_v34  ;;  %3942 = vmatpush.msrb.mxu0 %v3846_v35  ;;  %v3812_v34 = vld [vmem:[#allocation20 + $0x50] sm:$0xff] }
 0xb9a   : > { %3963 = vmatpush.msrb.mxu1 %v3882_v36  ;;  %3943 = vmatpush.msrb.mxu0 %v3844_v37 }
 0xb9c   : > { %3964 = vmatpush.msrb.mxu1 %v3880_v40  ;;  %3944 = vmatpush.msrb.mxu0 %v3842_v41 }
 0xb9d   : > { %9089 = vmatmul.msk.f32.gmra.mxu1 %vm1199_vm0, %v3648_v33 }
 0xb9e   : > { %3965 = vmatpush.msrb.mxu1 %v3878_v15  ;;  %3945 = vmatpush.msrb.mxu0 %v3840_v29  ;;  %v3804_v15 = vld [vmem:[#allocation19 + $0x58] sm:$0xff] }
 0xba0   : > { %3966 = vmatpush.msrb.mxu1 %v3876_v42  ;;  %3946 = vmatpush.msrb.mxu0 %v3838_v44  ;;  %v3813_v42 = vld [vmem:[#allocation20 + $0x58] sm:$0xff] }
 0xba2   : > { %3967 = vmatpush.msrb.mxu1 %v3874_v45  ;;  %3947 = vmatpush.msrb.mxu0 %v3836_v10  ;;  %v4130_v10 = vld [vmem:[#allocation14 + $0x7f0] sm:$0xff] }
 0xba4   : > { %3968 = vmatpush.msrb.mxu1 %v3872_v46  ;;  %3948 = vmatpush.msrb.mxu0 %v3834_v51  ;;  %v4096_v51 = vld [vmem:[#allocation14 + $0x6e0] sm:$0xff] }
 0xba6   : > { %3969 = vmatpush.msrb.mxu1 %v3870_v47  ;;  %3949 = vmatpush.msrb.mxu0 %v3832_v58 }
 0xba8   : > { %3970 = vmatpush.msrb.mxu1 %v3868_v43  ;;  %3950 = vmatpush.msrb.mxu0 %v3830_v61  ;;  %v4128_v43 = vld [vmem:[#allocation14 + $0x7e0] sm:$0xff]  ;;  %v4090_v61 = vld [vmem:[#allocation14 + $0x6b0] sm:$0xff] }
 0xbaa   : > { %3971 = vmatpush.msrb.mxu1 %v3866_v55  ;;  %3951 = vmatpush.msrb.mxu0 %v3828_v5 }
 0xbac   : > { %3972 = vmatpush.msrb.mxu1 %v3864_v48  ;;  %3952 = vmatpush.msrb.mxu0 %v3826_v17  ;;  %v4122_v48 = vld [vmem:[#allocation14 + $0x7b0] sm:$0xff]  ;;  %v3888_v17 = vld [vmem:[#allocation23 + $0x20] sm:$0xff] }
 0xbae   : > { %3973 = vmatpush.msrb.mxu1 %v3862_v62  ;;  %3953 = vmatpush.msrb.mxu0 %v3824_v22  ;;  %v4129_v22 = vld [vmem:[#allocation14 + $0x7e8] sm:$0xff] }
 0xbb0   : > { %3974 = vmatpush.msrb.mxu1 %v3860_v1  ;;  %4137 = vmatpush.msra.mxu0 %v4098_v53  ;;  %v4116_v1 = vld [vmem:[#allocation14 + $0x780] sm:$0xff]  ;;  %v4079_v53 = vld [vmem:[#allocation14 + $0x658] sm:$0xff] }
 0xbb2   : > { %3975 = vmatpush.msrb.mxu1 %v3858_v6  ;;  %4138 = vmatpush.msra.mxu0 %v4096_v51  ;;  %v4105_v51 = vld [vmem:[#allocation14 + $0x728] sm:$0xff] }
 0xbb4   : > { %3976 = vmatpush.msrb.mxu1 %v3856_v9  ;;  %4139 = vmatpush.msra.mxu0 %v4094_v57  ;;  %v4077_v57 = vld [vmem:[#allocation14 + $0x648] sm:$0xff] }
 0xbb6   : > { %4160 = vmatpush.msra.mxu1 %v4130_v10  ;;  %4140 = vmatpush.msra.mxu0 %v4092_v20  ;;  %v4107_v10 = vld [vmem:[#allocation14 + $0x738] sm:$0xff]  ;;  %v4100_v20 = vld [vmem:[#allocation14 + $0x700] sm:$0xff] }
 0xbb8   : > { %4161 = vmatpush.msra.mxu1 %v4128_v43  ;;  %4141 = vmatpush.msra.mxu0 %v4090_v61  ;;  %v4078_v43 = vld [vmem:[#allocation14 + $0x650] sm:$0xff]  ;;  %v4101_v61 = vld [vmem:[#allocation14 + $0x708] sm:$0xff] }
 0xbba   : > { %4162 = vmatpush.msra.mxu1 %v4126_v52  ;;  %v4104_v52 = vld [vmem:[#allocation14 + $0x720] sm:$0xff] }
 0xbbc   : > { %4163 = vmatpush.msra.mxu1 %v4124_v2  ;;  %v4102_v2 = vld [vmem:[#allocation14 + $0x710] sm:$0xff] }
 0xbbe   : > { %4164 = vmatpush.msra.mxu1 %v4122_v48  ;;  %v4074_v48 = vld [vmem:[#allocation14 + $0x630] sm:$0xff] }
 0xbc0   : > { %4165 = vmatpush.msra.mxu1 %v4120_v59  ;;  %v4075_v59 = vld [vmem:[#allocation14 + $0x638] sm:$0xff] }
 0xbc2   : > { %4166 = vmatpush.msra.mxu1 %v4118_v0  ;;  %v4070_v0 = vld [vmem:[#allocation14 + $0x610] sm:$0xff] }
 0xbc4   : > { %4167 = vmatpush.msra.mxu1 %v4116_v1  ;;  %v4068_v1 = vld [vmem:[#allocation14 + $0x600] sm:$0xff] }
 0xc0c   : > { %v3771_v13 = vpop.f32.mrf.mxu0 }
 0xc0d   : > { %v3772_v21 = vadd.f32 %v3771_v13, %v3744_v12  ;;  %v4099_v13 = vld [vmem:[#allocation14 + $0x6f8] sm:$0xff] }
 0xc0f   : > { %v3805_v18 = vmul.f32 %v3801_v14, %v3772_v21  ;;  %v4125_v14 = vld [vmem:[#allocation14 + $0x7c8] sm:$0xff]  ;;  %v3889_v21 = vld [vmem:[#allocation23 + $0x28] sm:$0xff] }
 0xc11   : > { %v3814_v23 = vadd.f32 %v3810_v16, %v3805_v18  ;;  %v4097_v16 = vld [vmem:[#allocation14 + $0x6e8] sm:$0xff]  ;;  %v4123_v18 = vld [vmem:[#allocation14 + $0x7b8] sm:$0xff] }
 0xc12   : > { %v3794_v24 = vpop.f32.mrf.mxu1 }
 0xc13   : > { %9481 = vtanh.f32 %v3814_v23  ;;  %v3795_v26 = vadd.f32 %v3794_v24, %v3745_v19  ;;  %v4121_v23 = vld [vmem:[#allocation14 + $0x7a8] sm:$0xff] }
 0xc14   : > { %v3774_v30 = vpop.f32.mrf.mxu0  ;;  %v4093_v24 = vld [vmem:[#allocation14 + $0x6c8] sm:$0xff] }
 0xc15   : > { %v3806_v32 = vmul.f32 %v3802_v25, %v3795_v26  ;;  %v3775_v33 = vadd.f32 %v3774_v30, %v3744_v12  ;;  %v4119_v25 = vld [vmem:[#allocation14 + $0x798] sm:$0xff]  ;;  %v4088_v30 = vld [vmem:[#allocation14 + $0x6a0] sm:$0xff] }
 0xc16   : > { %v4091_v26 = vld [vmem:[#allocation14 + $0x6b8] sm:$0xff]  ;;  %4142 = vmatpush.msra.mxu0 %v4088_v30 }
 0xc17   : > { %v3815_v35 = vadd.f32 %v3811_v27, %v3806_v32  ;;  %v3807_v36 = vmul.f32 %v3803_v31, %v3775_v33  ;;  %v4117_v27 = vld [vmem:[#allocation14 + $0x788] sm:$0xff]  ;;  %v4114_v31 = vld [vmem:[#allocation14 + $0x770] sm:$0xff]  ;;  %v4115_v33 = vld [vmem:[#allocation14 + $0x778] sm:$0xff] }
 0xc18   : > { %4168 = vmatpush.msra.mxu1 %v4114_v31  ;;  %v4089_v32 = vld [vmem:[#allocation14 + $0x6a8] sm:$0xff] }
 0xc19   : > { %v9482_v37 = vpop.eup %9481  ;;  %9483 = vtanh.f32 %v3815_v35  ;;  %v3816_v40 = vadd.f32 %v3812_v34, %v3807_v36  ;;  %v4086_v34 = vld [vmem:[#allocation14 + $0x690] sm:$0xff]  ;;  %v4112_v35 = vld [vmem:[#allocation14 + $0x760] sm:$0xff]  ;;  %v4087_v36 = vld [vmem:[#allocation14 + $0x698] sm:$0xff] }
 0xc1a   : > { %v3797_v41 = vpop.f32.mrf.mxu1  ;;  %3908 = vmatmul.f32.vlgmr.msrb.gmra.mxu2 %v9482_v37  ;;  %3954 = vmatmul.f32.vlgmr.msrb.gmra.mxu0 %v9482_v37  ;;  %v4113_v37 = vld [vmem:[#allocation14 + $0x768] sm:$0xff] }
 0xc1b   : > { %9485 = vtanh.f32 %v3816_v40  ;;  %v3798_v29 = vadd.f32 %v3797_v41, %v3745_v19  ;;  %v4095_v19 = vld [vmem:[#allocation14 + $0x6d8] sm:$0xff]  ;;  %4143 = vmatpush.msra.mxu0 %v4086_v34  ;;  %4169 = vmatpush.msra.mxu1 %v4112_v35  ;;  %v4084_v40 = vld [vmem:[#allocation14 + $0x680] sm:$0xff]  ;;  %v4110_v41 = vld [vmem:[#allocation14 + $0x750] sm:$0xff] }
 0xc1d   : > { %v3808_v44 = vmul.f32 %v3804_v15, %v3798_v29  ;;  %v4085_v15 = vld [vmem:[#allocation14 + $0x688] sm:$0xff]  ;;  %4144 = vmatpush.msra.mxu0 %v4084_v40  ;;  %4170 = vmatpush.msra.mxu1 %v4110_v41  ;;  %v4111_v29 = vld [vmem:[#allocation14 + $0x758] sm:$0xff] }
 0xc1f   : > { %v9484_v45 = vpop.eup %9483  ;;  %v3817_v46 = vadd.f32 %v3813_v42, %v3808_v44  ;;  %v4082_v42 = vld [vmem:[#allocation14 + $0x670] sm:$0xff]  ;;  %v4108_v44 = vld [vmem:[#allocation14 + $0x740] sm:$0xff] }
 0xc20   : > { %3931 = vmatmul.f32.vlgmr.msra.gmra.mxu3 %v9484_v45  ;;  %3977 = vmatmul.f32.vlgmr.msrb.gmra.mxu1 %v9484_v45  ;;  %v4083_v45 = vld [vmem:[#allocation14 + $0x678] sm:$0xff] }
 0xc21   : > { %v9486_v47 = vpop.eup %9485  ;;  %9487 = vtanh.f32 %v3817_v46  ;;  %4145 = vmatpush.msra.mxu0 %v4082_v42  ;;  %4171 = vmatpush.msra.mxu1 %v4108_v44  ;;  %v4109_v46 = vld [vmem:[#allocation14 + $0x748] sm:$0xff] }
 0xc22   : > { %3911 = vmatmul.f32.gmra.mxu2 %v9486_v47  ;;  %3957 = vmatmul.f32.gmra.mxu0 %v9486_v47  ;;  %v4080_v47 = vld [vmem:[#allocation14 + $0x660] sm:$0xff] }
 0xc23   : > { %4146 = vmatpush.msra.mxu0 %v4080_v47  ;;  %v4369_v47 = vld [vmem:[#allocation22 + $0x7e0] sm:$0xff] }
 0xc25   : > { %4147 = vmatpush.msra.mxu0 %v4078_v43  ;;  %v4333_v43 = vld [vmem:[#allocation22 + $0x6c0] sm:$0xff] }
 0xc27   : > { %v9488_v28 = vpop.eup %9487 }
 0xc28   : > { %3934 = vmatmul.f32.gmra.mxu3 %v9488_v28  ;;  %3980 = vmatmul.f32.gmra.mxu1 %v9488_v28  ;;  %v4106_v28 = vld [vmem:[#allocation14 + $0x730] sm:$0xff] }
 0xc29   : > { %4172 = vmatpush.msra.mxu1 %v4106_v28  ;;  %v4335_v28 = vld [vmem:[#allocation22 + $0x6d0] sm:$0xff] }
 0xc2b   : > { %4173 = vmatpush.msra.mxu1 %v4104_v52  ;;  %v4365_v52 = vld [vmem:[#allocation22 + $0x7c0] sm:$0xff] }
 0xc2d   : > { %4174 = vmatpush.msra.mxu1 %v4102_v2  ;;  %v4361_v2 = vld [vmem:[#allocation22 + $0x7a0] sm:$0xff] }
 0xc2f   : > { %4175 = vmatpush.msra.mxu1 %v4100_v20 }
 0xc97   : > { %v3955_v50 = vpop.f32.mrf.mxu0 }
 0xc9d   : > { %v3978_v55 = vpop.f32.mrf.mxu1  ;;  %v3909_v58 = vpop.f32.mrf.mxu2 }
 0xc9e   : > { %v3979_v4 = vadd.f32 %v3978_v55, %v3955_v50  ;;  %v4081_v50 = vld [vmem:[#allocation14 + $0x668] sm:$0xff]  ;;  %v4076_v55 = vld [vmem:[#allocation14 + $0x640] sm:$0xff] }
 0xc9f   : > { %v3958_v63 = vpop.f32.mrf.mxu0  ;;  %4148 = vmatpush.msra.mxu0 %v4076_v55  ;;  %v4329_v55 = vld [vmem:[#allocation22 + $0x6a0] sm:$0xff] }
 0xca1   : > { %4149 = vmatpush.msra.mxu0 %v4074_v48  ;;  %v4359_v48 = vld [vmem:[#allocation22 + $0x790] sm:$0xff] }
 0xca3   : > { %v3932_v62 = vpop.f32.mrf.mxu3 }
 0xca4   : > { %v3933_v12 = vadd.f32 %v3932_v62, %v3909_v58  ;;  %v4103_v58 = vld [vmem:[#allocation14 + $0x718] sm:$0xff]  ;;  %v4072_v62 = vld [vmem:[#allocation14 + $0x620] sm:$0xff] }
 0xca5   : > { %v3981_v5 = vpop.f32.mrf.mxu1  ;;  %v3912_v6 = vpop.f32.mrf.mxu2  ;;  %4150 = vmatpush.msra.mxu0 %v4072_v62 }
 0xca6   : > { %v3982_v3 = vadd.f32 %v3981_v5, %v3958_v63  ;;  %v4073_v63 = vld [vmem:[#allocation14 + $0x628] sm:$0xff]  ;;  %v4071_v5 = vld [vmem:[#allocation14 + $0x618] sm:$0xff] }
 0xca7   : > { %4151 = vmatpush.msra.mxu0 %v4070_v0  ;;  %v4323_v0 = vld [vmem:[#allocation22 + $0x670] sm:$0xff] }
 0xca8   : > { %4032 = vmatpush.msrb.mxu3 %v3982_v3  ;;  %v4069_v3 = vld [vmem:[#allocation14 + $0x608] sm:$0xff] }
 0xca9   : > { %4152 = vmatpush.msra.mxu0 %v4068_v1  ;;  %v4133_v1 = vld [vmem:[#allocation16 + $0x30] sm:$0xff] }
 0xcaa   : > { %4033 = vmatpush.msrb.mxu3 %v3979_v4  ;;  %v3891_v4 = vld [vmem:[#allocation25 + $0x4] sm:$0x3] }
 0xcab   : > { %v3935_v8 = vpop.f32.mrf.mxu3  ;;  %9092 = vmatmul.msk.f32.vlgmr.msrb.gmra.mxu3 %vm1199_vm0, %v3888_v17 }
 0xcac   : > { %v3936_v9 = vadd.f32 %v3935_v8, %v3912_v6  ;;  %4206 = vmatpush.msra.mxu3 %v4131_v7  ;;  %v4043_v7 = vld [vmem:[#allocation26 + $0x48] sm:$0xff] }
 0xcae   : > { %4009 = vmatpush.msra.mxu2 %v3936_v9  ;;  %4207 = vmatpush.msra.mxu3 %v4129_v22  ;;  %v4052_v22 = vld [vmem:[#allocation28 + $0x48] sm:$0xff] }
 0xcb0   : > { %4010 = vmatpush.msra.mxu2 %v3933_v12  ;;  %4208 = vmatpush.msra.mxu3 %v4127_v11  ;;  %v3985_v11 = vperm.slane %v3891_v4, 0 }
 0xcb1   : > { %9090 = vmatmul.msk.f32.vlgmr.msra.gmra.mxu2 %vm1199_vm0, %v3888_v17  ;;  %v3986_v17 = vperm.slane %v3891_v4, 1  ;;  %v4340_v4 = vld [vmem:[#allocation22 + $0x6f8] sm:$0xff] }
 0xcb2   : > { %4183 = vmatpush.msrb.mxu2 %v4099_v13  ;;  %4209 = vmatpush.msra.mxu3 %v4125_v14  ;;  %v4042_v14 = vld [vmem:[#allocation26 + $0x40] sm:$0xff] }
 0xcb3   : > { %9093 = vmatmul.msk.f32.gmra.mxu3 %vm1199_vm0, %v3889_v21 }
 0xcb4   : > { %4184 = vmatpush.msrb.mxu2 %v4097_v16  ;;  %4210 = vmatpush.msra.mxu3 %v4123_v18  ;;  %v4051_v16 = vld [vmem:[#allocation28 + $0x40] sm:$0xff] }
 0xcb6   : > { %4185 = vmatpush.msrb.mxu2 %v4095_v19  ;;  %4211 = vmatpush.msra.mxu3 %v4121_v23  ;;  %v4045_v19 = vld [vmem:[#allocation26 + $0x58] sm:$0xff] }
 0xcb8   : > { %4186 = vmatpush.msrb.mxu2 %v4093_v24  ;;  %4212 = vmatpush.msra.mxu3 %v4119_v25  ;;  %v4054_v25 = vld [vmem:[#allocation28 + $0x58] sm:$0xff] }
 0xcb9   : > { %9091 = vmatmul.msk.f32.gmra.mxu2 %vm1199_vm0, %v3889_v21 }
 0xcba   : > { %4187 = vmatpush.msrb.mxu2 %v4091_v26  ;;  %4213 = vmatpush.msra.mxu3 %v4117_v27 }
 0xcbc   : > { %4188 = vmatpush.msrb.mxu2 %v4089_v32  ;;  %4214 = vmatpush.msra.mxu3 %v4115_v33  ;;  %v4044_v33 = vld [vmem:[#allocation26 + $0x50] sm:$0xff] }
 0xcbe   : > { %4189 = vmatpush.msrb.mxu2 %v4087_v36  ;;  %4215 = vmatpush.msra.mxu3 %v4113_v37  ;;  %v4053_v36 = vld [vmem:[#allocation28 + $0x50] sm:$0xff] }
 0xcc0   : > { %4190 = vmatpush.msrb.mxu2 %v4085_v15  ;;  %4216 = vmatpush.msra.mxu3 %v4111_v29 }
 0xcc2   : > { %4191 = vmatpush.msrb.mxu2 %v4083_v45  ;;  %4217 = vmatpush.msra.mxu3 %v4109_v46  ;;  %v4371_v45 = vld [vmem:[#allocation22 + $0x7f0] sm:$0xff]  ;;  %v4337_v46 = vld [vmem:[#allocation22 + $0x6e0] sm:$0xff] }
 0xcc4   : > { %4192 = vmatpush.msrb.mxu2 %v4081_v50  ;;  %4218 = vmatpush.msra.mxu3 %v4107_v10  ;;  %v4367_v50 = vld [vmem:[#allocation22 + $0x7d0] sm:$0xff] }
 0xcc6   : > { %4193 = vmatpush.msrb.mxu2 %v4079_v53  ;;  %4219 = vmatpush.msra.mxu3 %v4105_v51  ;;  %v4363_v53 = vld [vmem:[#allocation22 + $0x7b0] sm:$0xff] }
 0xcc8   : > { %4194 = vmatpush.msrb.mxu2 %v4077_v57  ;;  %4220 = vmatpush.msra.mxu3 %v4103_v58  ;;  %v4327_v58 = vld [vmem:[#allocation22 + $0x690] sm:$0xff] }
 0xcca   : > { %4195 = vmatpush.msrb.mxu2 %v4075_v59  ;;  %4221 = vmatpush.msra.mxu3 %v4101_v61  ;;  %v4325_v61 = vld [vmem:[#allocation22 + $0x680] sm:$0xff] }
 0xccc   : > { %4196 = vmatpush.msrb.mxu2 %v4073_v63  ;;  %4401 = vmatpush.msrb.mxu3 %v4371_v45  ;;  %v4357_v63 = vld [vmem:[#allocation22 + $0x780] sm:$0xff] }
 0xccd   : > { %v4349_v45 = vld [vmem:[#allocation22 + $0x740] sm:$0xff] }
 0xcce   : > { %4197 = vmatpush.msrb.mxu2 %v4071_v5  ;;  %4402 = vmatpush.msrb.mxu3 %v4369_v47  ;;  %v4350_v47 = vld [vmem:[#allocation22 + $0x748] sm:$0xff] }
 0xcd0   : > { %4198 = vmatpush.msrb.mxu2 %v4069_v3  ;;  %4403 = vmatpush.msrb.mxu3 %v4367_v50  ;;  %v4355_v3 = vld [vmem:[#allocation22 + $0x770] sm:$0xff]  ;;  %v4316_v50 = vld [vmem:[#allocation22 + $0x638] sm:$0xff] }
 0xcd2   : > { %4404 = vmatpush.msrb.mxu3 %v4365_v52  ;;  %v4345_v52 = vld [vmem:[#allocation22 + $0x720] sm:$0xff] }
 0xcd4   : > { %4405 = vmatpush.msrb.mxu3 %v4363_v53  ;;  %v4346_v53 = vld [vmem:[#allocation22 + $0x728] sm:$0xff] }
 0xcd6   : > { %4406 = vmatpush.msrb.mxu3 %v4361_v2  ;;  %v4312_v2 = vld [vmem:[#allocation22 + $0x618] sm:$0xff] }
 0xcd8   : > { %4407 = vmatpush.msrb.mxu3 %v4359_v48  ;;  %v4341_v48 = vld [vmem:[#allocation22 + $0x700] sm:$0xff] }
 0xcda   : > { %4408 = vmatpush.msrb.mxu3 %v4357_v63 }
 0xcdc   : > { %4409 = vmatpush.msrb.mxu3 %v4355_v3 }
 0xd2e   : > { %v4035_v6 = vpop.f32.mrf.mxu3 }
 0xd2f   : > { %v4036_v8 = vadd.f32 %v4035_v6, %v3986_v17 }
 0xd31   : > { %v4047_v9 = vmul.f32 %v4043_v7, %v4036_v8  ;;  %v4338_v7 = vld [vmem:[#allocation22 + $0x6e8] sm:$0xff] }
 0xd33   : > { %v4056_v12 = vadd.f32 %v4052_v22, %v4047_v9  ;;  %v4336_v22 = vld [vmem:[#allocation22 + $0x6d8] sm:$0xff] }
 0xd34   : > { %v4012_v13 = vpop.f32.mrf.mxu2 }
 0xd35   : > { %9489 = vtanh.f32 %v4056_v12  ;;  %v4013_v21 = vadd.f32 %v4012_v13, %v3985_v11  ;;  %v4334_v12 = vld [vmem:[#allocation22 + $0x6c8] sm:$0xff]  ;;  %v4134_v13 = vld [vmem:[#allocation16 + $0x38] sm:$0xff] }
 0xd36   : > { %v4038_v18 = vpop.f32.mrf.mxu3 }
 0xd37   : > { %v4046_v23 = vmul.f32 %v4042_v14, %v4013_v21  ;;  %v4039_v24 = vadd.f32 %v4038_v18, %v3986_v17  ;;  %v4370_v14 = vld [vmem:[#allocation22 + $0x7e8] sm:$0xff]  ;;  %v4332_v21 = vld [vmem:[#allocation22 + $0x6b8] sm:$0xff] }
 0xd38   : > { %v4330_v18 = vld [vmem:[#allocation22 + $0x6a8] sm:$0xff] }
 0xd39   : > { %v4055_v26 = vadd.f32 %v4051_v16, %v4046_v23  ;;  %v4049_v27 = vmul.f32 %v4045_v19, %v4039_v24  ;;  %v4368_v16 = vld [vmem:[#allocation22 + $0x7d8] sm:$0xff]  ;;  %v4366_v19 = vld [vmem:[#allocation22 + $0x7c8] sm:$0xff] }
 0xd3a   : > { %v4328_v23 = vld [vmem:[#allocation22 + $0x698] sm:$0xff] }
 0xd3b   : > { %v9490_v30 = vpop.eup %9489  ;;  %9491 = vtanh.f32 %v4055_v26  ;;  %v4058_v31 = vadd.f32 %v4054_v25, %v4049_v27  ;;  %v4364_v24 = vld [vmem:[#allocation22 + $0x7b8] sm:$0xff]  ;;  %v4326_v25 = vld [vmem:[#allocation22 + $0x688] sm:$0xff] }
 0xd3c   : > { %v4015_v32 = vpop.f32.mrf.mxu2  ;;  %v11812_v34 = vadd.f32 %v9490_v30, %v11784_v49  ;;  %v4362_v26 = vld [vmem:[#allocation22 + $0x7a8] sm:$0xff]  ;;  %v4324_v27 = vld [vmem:[#allocation22 + $0x678] sm:$0xff] }
 0xd3d   : > { %9493 = vtanh.f32 %v4058_v31  ;;  %v4016_v35 = vadd.f32 %v4015_v32, %v3985_v11  ;;  %v4372_v11 = vld [vmem:[#allocation22 + $0x7f8] sm:$0xff]  ;;  %v4358_v31 = vld [vmem:[#allocation22 + $0x788] sm:$0xff] }
 0xd3e   : > { %4176 = vmatmul.f32.vlgmr.msra.gmra.mxu1 %v11812_v34  ;;  %4222 = vmatmul.f32.vlgmr.msra.gmra.mxu3 %v11812_v34  ;;  %v4360_v30 = vld [vmem:[#allocation22 + $0x798] sm:$0xff] }
 0xd3f   : > { %v4048_v37 = vmul.f32 %v4044_v33, %v4016_v35  ;;  %v4356_v32 = vld [vmem:[#allocation22 + $0x778] sm:$0xff]  ;;  %v4321_v33 = vld [vmem:[#allocation22 + $0x660] sm:$0xff] }
 0xd40   : > { %v4353_v35 = vld [vmem:[#allocation22 + $0x760] sm:$0xff] }
 0xd41   : > { %v9492_v40 = vpop.eup %9491  ;;  %v4057_v41 = vadd.f32 %v4053_v36, %v4048_v37  ;;  %4410 = vmatpush.msrb.mxu3 %v4353_v35  ;;  %v4322_v36 = vld [vmem:[#allocation22 + $0x668] sm:$0xff] }
 0xd42   : > { %v11817_v15 = vadd.f32 %v9492_v40, %v11789_v54  ;;  %v4339_v54 = vld [vmem:[#allocation22 + $0x6f0] sm:$0xff]  ;;  %v4354_v37 = vld [vmem:[#allocation22 + $0x768] sm:$0xff] }
 0xd43   : > { %v9494_v29 = vpop.eup %9493  ;;  %9495 = vtanh.f32 %v4057_v41  ;;  %4378 = vmatpush.msra.mxu2 %v4339_v54  ;;  %v4319_v40 = vld [vmem:[#allocation22 + $0x650] sm:$0xff]  ;;  %v4317_v54 = vld [vmem:[#allocation22 + $0x640] sm:$0xff] }
 0xd44   : > { %4153 = vmatmul.f32.vlgmr.msra.gmra.mxu0 %v11817_v15  ;;  %4199 = vmatmul.f32.vlgmr.msrb.gmra.mxu2 %v11817_v15  ;;  %v11822_v49 = vadd.f32 %v9494_v29, %v11794_v60  ;;  %v4351_v41 = vld [vmem:[#allocation22 + $0x750] sm:$0xff]  ;;  %v4320_v29 = vld [vmem:[#allocation22 + $0x658] sm:$0xff] }
 0xd45   : > { %4379 = vmatpush.msra.mxu2 %v4337_v46  ;;  %4411 = vmatpush.msrb.mxu3 %v4351_v41  ;;  %v4318_v46 = vld [vmem:[#allocation22 + $0x648] sm:$0xff]  ;;  %v4584_v41 = vld [vmem:[#allocation14 + $0x8f0] sm:$0xff] }
 0xd46   : > { %4179 = vmatmul.f32.gmra.mxu1 %v11822_v49  ;;  %4225 = vmatmul.f32.gmra.mxu3 %v11822_v49 }
 0xd47   : > { %4380 = vmatpush.msra.mxu2 %v4335_v28  ;;  %4412 = vmatpush.msrb.mxu3 %v4349_v45  ;;  %v4347_v28 = vld [vmem:[#allocation22 + $0x730] sm:$0xff]  ;;  %v4580_v45 = vld [vmem:[#allocation14 + $0x8d0] sm:$0xff] }
 0xd49   : > { %v9496_v42 = vpop.eup %9495  ;;  %4381 = vmatpush.msra.mxu2 %v4333_v43  ;;  %4413 = vmatpush.msrb.mxu3 %v4347_v28  ;;  %v4313_v43 = vld [vmem:[#allocation22 + $0x620] sm:$0xff]  ;;  %v4606_v28 = vld [vmem:[#allocation14 + $0x9a0] sm:$0xff] }
 0xd4a   : > { %v11827_v44 = vadd.f32 %v9496_v42, %v11799_v56  ;;  %v4331_v56 = vld [vmem:[#allocation22 + $0x6b0] sm:$0xff]  ;;  %v4352_v42 = vld [vmem:[#allocation22 + $0x758] sm:$0xff] }
 0xd4b   : > { %4382 = vmatpush.msra.mxu2 %v4331_v56  ;;  %4414 = vmatpush.msrb.mxu3 %v4345_v52  ;;  %v4314_v56 = vld [vmem:[#allocation22 + $0x628] sm:$0xff]  ;;  %v4604_v52 = vld [vmem:[#allocation14 + $0x990] sm:$0xff] }
 0xd4c   : > { %4156 = vmatmul.f32.gmra.mxu0 %v11827_v44  ;;  %4202 = vmatmul.f32.gmra.mxu2 %v11827_v44 }
 0xd4d   : > { %4383 = vmatpush.msra.mxu2 %v4329_v55  ;;  %v4343_v55 = vld [vmem:[#allocation22 + $0x710] sm:$0xff] }
 0xd4e   : > { %4415 = vmatpush.msrb.mxu3 %v4343_v55 }
 0xd4f   : > { %4384 = vmatpush.msra.mxu2 %v4327_v58  ;;  %v4309_v58 = vld [vmem:[#allocation22 + $0x600] sm:$0xff] }
 0xd50   : > { %4416 = vmatpush.msrb.mxu3 %v4341_v48 }
 0xd51   : > { %4385 = vmatpush.msra.mxu2 %v4325_v61  ;;  %v4136_v61 = vld [vmem:[#allocation17 + $0x6] sm:$0x3] }
 0xd53   : > { %4386 = vmatpush.msra.mxu2 %v4323_v0  ;;  %v4287_v0 = vld [vmem:[#allocation19 + $0x60] sm:$0xff] }
 0xd55   : > { %4387 = vmatpush.msra.mxu2 %v4321_v33 }
 0xd57   : > { %4388 = vmatpush.msra.mxu2 %v4319_v40  ;;  %v4612_v40 = vld [vmem:[#allocation14 + $0x9d0] sm:$0xff] }
 0xd59   : > { %4389 = vmatpush.msra.mxu2 %v4317_v54  ;;  %v4610_v54 = vld [vmem:[#allocation14 + $0x9c0] sm:$0xff] }
 0xdbb   : > { %v4177_v60 = vpop.f32.mrf.mxu1 }
 0xdc1   : > { %v4154_v10 = vpop.f32.mrf.mxu0  ;;  %v4223_v51 = vpop.f32.mrf.mxu3 }
 0xdc2   : > { %v4178_v5 = vadd.f32 %v4177_v60, %v4154_v10  ;;  %v4315_v60 = vld [vmem:[#allocation22 + $0x630] sm:$0xff]  ;;  %v4348_v10 = vld [vmem:[#allocation22 + $0x738] sm:$0xff] }
 0xdc3   : > { %v4180_v20 = vpop.f32.mrf.mxu1  ;;  %4390 = vmatpush.msra.mxu2 %v4315_v60  ;;  %v4578_v60 = vld [vmem:[#allocation14 + $0x8c0] sm:$0xff] }
 0xdc5   : > { %4391 = vmatpush.msra.mxu2 %v4313_v43 }
 0xdc7   : > { %v4200_v57 = vpop.f32.mrf.mxu2 }
 0xdc8   : > { %v4224_v9 = vadd.f32 %v4223_v51, %v4200_v57  ;;  %v4311_v51 = vld [vmem:[#allocation22 + $0x610] sm:$0xff]  ;;  %v4344_v57 = vld [vmem:[#allocation22 + $0x718] sm:$0xff] }
 0xdc9   : > { %v4157_v59 = vpop.f32.mrf.mxu0  ;;  %v4226_v17 = vpop.f32.mrf.mxu3  ;;  %4392 = vmatpush.msra.mxu2 %v4311_v51 }
 0xdca   : > { %v4181_v62 = vadd.f32 %v4180_v20, %v4157_v59  ;;  %v4310_v20 = vld [vmem:[#allocation22 + $0x608] sm:$0xff] }
 0xdcb   : > { %4393 = vmatpush.msra.mxu2 %v4309_v58  ;;  %v4342_v59 = vld [vmem:[#allocation22 + $0x708] sm:$0xff]  ;;  %v4617_v58 = vld [vmem:[#allocation14 + $0x9f8] sm:$0xff] }
 0xdcc   : > { %4254 = vmatpush.msrb.mxu0 %v4181_v62  ;;  %v4230_v62 = vperm.slane %v4136_v61, 0 }
 0xdce   : > { %4255 = vmatpush.msrb.mxu0 %v4178_v5 }
 0xdcf   : > { %v4203_v6 = vpop.f32.mrf.mxu2  ;;  %9094 = vmatmul.msk.f32.vlgmr.msrb.gmra.mxu0 %vm1199_vm0, %v4133_v1 }
 0xdd0   : > { %v4227_v8 = vadd.f32 %v4226_v17, %v4203_v6  ;;  %4424 = vmatpush.msra.mxu0 %v4340_v4  ;;  %v4231_v4 = vperm.slane %v4136_v61, 1  ;;  %v4613_v61 = vld [vmem:[#allocation14 + $0x9d8] sm:$0xff] }
 0xdd2   : > { %4277 = vmatpush.msrb.mxu1 %v4227_v8  ;;  %4425 = vmatpush.msra.mxu0 %v4338_v7  ;;  %v4288_v7 = vld [vmem:[#allocation19 + $0x68] sm:$0xff] }
 0xdd4   : > { %4278 = vmatpush.msrb.mxu1 %v4224_v9  ;;  %4426 = vmatpush.msra.mxu0 %v4336_v22  ;;  %v4297_v22 = vld [vmem:[#allocation20 + $0x68] sm:$0xff] }
 0xdd5   : > { %9096 = vmatmul.msk.f32.vlgmr.msrb.gmra.mxu1 %vm1199_vm0, %v4133_v1  ;;  %v4296_v1 = vld [vmem:[#allocation20 + $0x60] sm:$0xff] }
 0xdd6   : > { %4447 = vmatpush.msra.mxu1 %v4372_v11  ;;  %4427 = vmatpush.msra.mxu0 %v4334_v12  ;;  %v4289_v11 = vld [vmem:[#allocation19 + $0x70] sm:$0xff] }
 0xdd7   : > { %9095 = vmatmul.msk.f32.gmra.mxu0 %vm1199_vm0, %v4134_v13 }
 0xdd8   : > { %4448 = vmatpush.msra.mxu1 %v4370_v14  ;;  %4428 = vmatpush.msra.mxu0 %v4332_v21  ;;  %v4298_v14 = vld [vmem:[#allocation20 + $0x70] sm:$0xff] }
 0xdda   : > { %4449 = vmatpush.msra.mxu1 %v4368_v16  ;;  %4429 = vmatpush.msra.mxu0 %v4330_v18 }
 0xddc   : > { %4450 = vmatpush.msra.mxu1 %v4366_v19  ;;  %4430 = vmatpush.msra.mxu0 %v4328_v23 }
 0xddd   : > { %9097 = vmatmul.msk.f32.gmra.mxu1 %vm1199_vm0, %v4134_v13 }
 0xdde   : > { %4451 = vmatpush.msra.mxu1 %v4364_v24  ;;  %4431 = vmatpush.msra.mxu0 %v4326_v25  ;;  %v4290_v24 = vld [vmem:[#allocation19 + $0x78] sm:$0xff] }
 0xde0   : > { %4452 = vmatpush.msra.mxu1 %v4362_v26  ;;  %4432 = vmatpush.msra.mxu0 %v4324_v27  ;;  %v4299_v26 = vld [vmem:[#allocation20 + $0x78] sm:$0xff] }
 0xde2   : > { %4453 = vmatpush.msra.mxu1 %v4360_v30  ;;  %4433 = vmatpush.msra.mxu0 %v4322_v36  ;;  %v4616_v36 = vld [vmem:[#allocation14 + $0x9f0] sm:$0xff] }
 0xde4   : > { %4454 = vmatpush.msra.mxu1 %v4358_v31  ;;  %4434 = vmatpush.msra.mxu0 %v4320_v29  ;;  %v4582_v29 = vld [vmem:[#allocation14 + $0x8e0] sm:$0xff] }
 0xde6   : > { %4455 = vmatpush.msra.mxu1 %v4356_v32  ;;  %4435 = vmatpush.msra.mxu0 %v4318_v46 }
 0xde8   : > { %4456 = vmatpush.msra.mxu1 %v4354_v37  ;;  %4436 = vmatpush.msra.mxu0 %v4316_v50  ;;  %v4614_v37 = vld [vmem:[#allocation14 + $0x9e0] sm:$0xff]  ;;  %v4576_v50 = vld [vmem:[#allocation14 + $0x8b0] sm:$0xff] }
 0xdea   : > { %4457 = vmatpush.msra.mxu1 %v4352_v42  ;;  %4437 = vmatpush.msra.mxu0 %v4314_v56 }
 0xdec   : > { %4458 = vmatpush.msra.mxu1 %v4350_v47  ;;  %4438 = vmatpush.msra.mxu0 %v4312_v2  ;;  %v4608_v47 = vld [vmem:[#allocation14 + $0x9b0] sm:$0xff]  ;;  %v4374_v2 = vld [vmem:[#allocation23 + $0x30] sm:$0xff] }
 0xdee   : > { %4459 = vmatpush.msra.mxu1 %v4348_v10  ;;  %4439 = vmatpush.msra.mxu0 %v4310_v20  ;;  %v4615_v20 = vld [vmem:[#allocation14 + $0x9e8] sm:$0xff] }
 0xdf0   : > { %4460 = vmatpush.msra.mxu1 %v4346_v53  ;;  %4623 = vmatpush.msrb.mxu0 %v4584_v41  ;;  %v4602_v53 = vld [vmem:[#allocation14 + $0x980] sm:$0xff]  ;;  %v4565_v41 = vld [vmem:[#allocation14 + $0x858] sm:$0xff] }
 0xdf2   : > { %4461 = vmatpush.msra.mxu1 %v4344_v57  ;;  %4624 = vmatpush.msrb.mxu0 %v4582_v29  ;;  %v4591_v29 = vld [vmem:[#allocation14 + $0x928] sm:$0xff] }
 0xdf4   : > { %4462 = vmatpush.msra.mxu1 %v4342_v59  ;;  %4625 = vmatpush.msrb.mxu0 %v4580_v45  ;;  %v4563_v45 = vld [vmem:[#allocation14 + $0x848] sm:$0xff] }
 0xdf6   : > { %4646 = vmatpush.msrb.mxu1 %v4616_v36  ;;  %4626 = vmatpush.msrb.mxu0 %v4578_v60  ;;  %v4593_v36 = vld [vmem:[#allocation14 + $0x938] sm:$0xff]  ;;  %v4586_v60 = vld [vmem:[#allocation14 + $0x900] sm:$0xff] }
 0xdf8   : > { %4647 = vmatpush.msrb.mxu1 %v4614_v37  ;;  %4627 = vmatpush.msrb.mxu0 %v4576_v50  ;;  %v4564_v37 = vld [vmem:[#allocation14 + $0x850] sm:$0xff]  ;;  %v4587_v50 = vld [vmem:[#allocation14 + $0x908] sm:$0xff] }
 0xdfa   : > { %4648 = vmatpush.msrb.mxu1 %v4612_v40  ;;  %v4590_v40 = vld [vmem:[#allocation14 + $0x920] sm:$0xff] }
 0xdfc   : > { %4649 = vmatpush.msrb.mxu1 %v4610_v54  ;;  %v4588_v54 = vld [vmem:[#allocation14 + $0x910] sm:$0xff] }
 0xdfe   : > { %4650 = vmatpush.msrb.mxu1 %v4608_v47  ;;  %v4560_v47 = vld [vmem:[#allocation14 + $0x830] sm:$0xff] }
 0xe00   : > { %4651 = vmatpush.msrb.mxu1 %v4606_v28  ;;  %v4561_v28 = vld [vmem:[#allocation14 + $0x838] sm:$0xff] }
 0xe02   : > { %4652 = vmatpush.msrb.mxu1 %v4604_v52  ;;  %v4556_v52 = vld [vmem:[#allocation14 + $0x810] sm:$0xff] }
 0xe04   : > { %4653 = vmatpush.msrb.mxu1 %v4602_v53  ;;  %v4554_v53 = vld [vmem:[#allocation14 + $0x800] sm:$0xff] }
 0xe4c   : > { %v4257_v63 = vpop.f32.mrf.mxu0 }
 0xe4d   : > { %v4258_v5 = vadd.f32 %v4257_v63, %v4230_v62  ;;  %v4585_v63 = vld [vmem:[#allocation14 + $0x8f8] sm:$0xff] }
 0xe4f   : > { %v4291_v3 = vmul.f32 %v4287_v0, %v4258_v5  ;;  %v4611_v0 = vld [vmem:[#allocation14 + $0x9c8] sm:$0xff]  ;;  %v4375_v5 = vld [vmem:[#allocation23 + $0x38] sm:$0xff] }
 0xe51   : > { %v4300_v17 = vadd.f32 %v4296_v1, %v4291_v3  ;;  %v4583_v1 = vld [vmem:[#allocation14 + $0x8e8] sm:$0xff]  ;;  %v4609_v3 = vld [vmem:[#allocation14 + $0x9b8] sm:$0xff] }
 0xe52   : > { %v4280_v6 = vpop.f32.mrf.mxu1 }
 0xe53   : > { %9497 = vtanh.f32 %v4300_v17  ;;  %v4281_v8 = vadd.f32 %v4280_v6, %v4231_v4  ;;  %v4607_v17 = vld [vmem:[#allocation14 + $0x9a8] sm:$0xff] }
 0xe54   : > { %v4260_v9 = vpop.f32.mrf.mxu0  ;;  %v4579_v6 = vld [vmem:[#allocation14 + $0x8c8] sm:$0xff] }
 0xe55   : > { %v4292_v12 = vmul.f32 %v4288_v7, %v4281_v8  ;;  %v4261_v13 = vadd.f32 %v4260_v9, %v4230_v62  ;;  %v4605_v7 = vld [vmem:[#allocation14 + $0x998] sm:$0xff]  ;;  %v4574_v9 = vld [vmem:[#allocation14 + $0x8a0] sm:$0xff] }
 0xe56   : > { %v4577_v8 = vld [vmem:[#allocation14 + $0x8b8] sm:$0xff]  ;;  %4628 = vmatpush.msrb.mxu0 %v4574_v9 }
 0xe57   : > { %v4301_v21 = vadd.f32 %v4297_v22, %v4292_v12  ;;  %v4293_v16 = vmul.f32 %v4289_v11, %v4261_v13  ;;  %v4603_v22 = vld [vmem:[#allocation14 + $0x988] sm:$0xff]  ;;  %v4600_v11 = vld [vmem:[#allocation14 + $0x970] sm:$0xff]  ;;  %v4601_v13 = vld [vmem:[#allocation14 + $0x978] sm:$0xff] }
 0xe58   : > { %4654 = vmatpush.msrb.mxu1 %v4600_v11  ;;  %v4575_v12 = vld [vmem:[#allocation14 + $0x8a8] sm:$0xff] }
 0xe59   : > { %v9498_v18 = vpop.eup %9497  ;;  %9499 = vtanh.f32 %v4301_v21  ;;  %v4302_v19 = vadd.f32 %v4298_v14, %v4293_v16  ;;  %v4572_v14 = vld [vmem:[#allocation14 + $0x890] sm:$0xff]  ;;  %v4598_v21 = vld [vmem:[#allocation14 + $0x960] sm:$0xff]  ;;  %v4573_v16 = vld [vmem:[#allocation14 + $0x898] sm:$0xff] }
 0xe5a   : > { %v4283_v23 = vpop.f32.mrf.mxu1  ;;  %4394 = vmatmul.f32.vlgmr.msra.gmra.mxu2 %v9498_v18  ;;  %4440 = vmatmul.f32.vlgmr.msra.gmra.mxu0 %v9498_v18  ;;  %v4599_v18 = vld [vmem:[#allocation14 + $0x968] sm:$0xff] }
 0xe5b   : > { %9501 = vtanh.f32 %v4302_v19  ;;  %v4284_v25 = vadd.f32 %v4283_v23, %v4231_v4  ;;  %v4581_v4 = vld [vmem:[#allocation14 + $0x8d8] sm:$0xff]  ;;  %4629 = vmatpush.msrb.mxu0 %v4572_v14  ;;  %4655 = vmatpush.msrb.mxu1 %v4598_v21  ;;  %v4570_v19 = vld [vmem:[#allocation14 + $0x880] sm:$0xff]  ;;  %v4596_v23 = vld [vmem:[#allocation14 + $0x950] sm:$0xff] }
 0xe5d   : > { %v4294_v27 = vmul.f32 %v4290_v24, %v4284_v25  ;;  %v4571_v24 = vld [vmem:[#allocation14 + $0x888] sm:$0xff]  ;;  %4630 = vmatpush.msrb.mxu0 %v4570_v19  ;;  %4656 = vmatpush.msrb.mxu1 %v4596_v23  ;;  %v4597_v25 = vld [vmem:[#allocation14 + $0x958] sm:$0xff] }
 0xe5f   : > { %v9500_v30 = vpop.eup %9499  ;;  %v4303_v31 = vadd.f32 %v4299_v26, %v4294_v27  ;;  %v4568_v26 = vld [vmem:[#allocation14 + $0x870] sm:$0xff]  ;;  %v4594_v27 = vld [vmem:[#allocation14 + $0x940] sm:$0xff] }
 0xe60   : > { %4417 = vmatmul.f32.vlgmr.msrb.gmra.mxu3 %v9500_v30  ;;  %4463 = vmatmul.f32.vlgmr.msra.gmra.mxu1 %v9500_v30  ;;  %v4569_v30 = vld [vmem:[#allocation14 + $0x878] sm:$0xff] }
 0xe61   : > { %v9502_v32 = vpop.eup %9501  ;;  %9503 = vtanh.f32 %v4303_v31  ;;  %4631 = vmatpush.msrb.mxu0 %v4568_v26  ;;  %4657 = vmatpush.msrb.mxu1 %v4594_v27  ;;  %v4595_v31 = vld [vmem:[#allocation14 + $0x948] sm:$0xff] }
 0xe62   : > { %4397 = vmatmul.f32.gmra.mxu2 %v9502_v32  ;;  %4443 = vmatmul.f32.gmra.mxu0 %v9502_v32  ;;  %v4566_v32 = vld [vmem:[#allocation14 + $0x860] sm:$0xff] }
 0xe63   : > { %4632 = vmatpush.msrb.mxu0 %v4566_v32  ;;  %v4855_v32 = vld [vmem:[#allocation22 + $0x9e0] sm:$0xff] }
 0xe65   : > { %4633 = vmatpush.msrb.mxu0 %v4564_v37  ;;  %v4819_v37 = vld [vmem:[#allocation22 + $0x8c0] sm:$0xff] }
 0xe67   : > { %v9504_v33 = vpop.eup %9503 }
 0xe68   : > { %4420 = vmatmul.f32.gmra.mxu3 %v9504_v33  ;;  %4466 = vmatmul.f32.gmra.mxu1 %v9504_v33  ;;  %v4592_v33 = vld [vmem:[#allocation14 + $0x930] sm:$0xff] }
 0xe69   : > { %4658 = vmatpush.msrb.mxu1 %v4592_v33  ;;  %v4821_v33 = vld [vmem:[#allocation22 + $0x8d0] sm:$0xff] }
 0xe6b   : > { %4659 = vmatpush.msrb.mxu1 %v4590_v40  ;;  %v4851_v40 = vld [vmem:[#allocation22 + $0x9c0] sm:$0xff] }
 0xe6d   : > { %4660 = vmatpush.msrb.mxu1 %v4588_v54  ;;  %v4847_v54 = vld [vmem:[#allocation22 + $0x9a0] sm:$0xff] }
 0xe6f   : > { %4661 = vmatpush.msrb.mxu1 %v4586_v60 }
 0xed7   : > { %v4441_v35 = vpop.f32.mrf.mxu0 }
 0xedd   : > { %v4464_v42 = vpop.f32.mrf.mxu1  ;;  %v4395_v46 = vpop.f32.mrf.mxu2 }
 0xede   : > { %v4465_v55 = vadd.f32 %v4464_v42, %v4441_v35  ;;  %v4567_v35 = vld [vmem:[#allocation14 + $0x868] sm:$0xff]  ;;  %v4562_v42 = vld [vmem:[#allocation14 + $0x840] sm:$0xff] }
 0xedf   : > { %v4444_v43 = vpop.f32.mrf.mxu0  ;;  %4634 = vmatpush.msrb.mxu0 %v4562_v42  ;;  %v4815_v42 = vld [vmem:[#allocation22 + $0x8a0] sm:$0xff] }
 0xee1   : > { %4635 = vmatpush.msrb.mxu0 %v4560_v47  ;;  %v4845_v47 = vld [vmem:[#allocation22 + $0x990] sm:$0xff] }
 0xee3   : > { %v4418_v10 = vpop.f32.mrf.mxu3 }
 0xee4   : > { %v4419_v62 = vadd.f32 %v4418_v10, %v4395_v46  ;;  %v4589_v46 = vld [vmem:[#allocation14 + $0x918] sm:$0xff]  ;;  %v4558_v10 = vld [vmem:[#allocation14 + $0x820] sm:$0xff] }
 0xee5   : > { %v4467_v56 = vpop.f32.mrf.mxu1  ;;  %v4398_v57 = vpop.f32.mrf.mxu2  ;;  %4636 = vmatpush.msrb.mxu0 %v4558_v10 }
 0xee6   : > { %v4468_v51 = vadd.f32 %v4467_v56, %v4444_v43  ;;  %v4559_v43 = vld [vmem:[#allocation14 + $0x828] sm:$0xff]  ;;  %v4557_v56 = vld [vmem:[#allocation14 + $0x818] sm:$0xff] }
 0xee7   : > { %4637 = vmatpush.msrb.mxu0 %v4556_v52  ;;  %v4809_v52 = vld [vmem:[#allocation22 + $0x870] sm:$0xff] }
 0xee8   : > { %4518 = vmatpush.msra.mxu3 %v4468_v51  ;;  %v4555_v51 = vld [vmem:[#allocation14 + $0x808] sm:$0xff] }
 0xee9   : > { %4638 = vmatpush.msrb.mxu0 %v4554_v53  ;;  %v4619_v53 = vld [vmem:[#allocation16 + $0x40] sm:$0xff] }
 0xeea   : > { %4519 = vmatpush.msra.mxu3 %v4465_v55  ;;  %v4377_v55 = vld [vmem:[#allocation25 + $0x6] sm:$0x3] }
 0xeeb   : > { %v4421_v48 = vpop.f32.mrf.mxu3  ;;  %9100 = vmatmul.msk.f32.vlgmr.msra.gmra.mxu3 %vm1199_vm0, %v4374_v2 }
 0xeec   : > { %v4422_v59 = vadd.f32 %v4421_v48, %v4398_v57  ;;  %4692 = vmatpush.msrb.mxu3 %v4617_v58  ;;  %v4529_v58 = vld [vmem:[#allocation26 + $0x68] sm:$0xff] }
 0xeee   : > { %4495 = vmatpush.msrb.mxu2 %v4422_v59  ;;  %4693 = vmatpush.msrb.mxu3 %v4615_v20  ;;  %v4538_v20 = vld [vmem:[#allocation28 + $0x68] sm:$0xff] }
 0xef0   : > { %4496 = vmatpush.msrb.mxu2 %v4419_v62  ;;  %4694 = vmatpush.msrb.mxu3 %v4613_v61  ;;  %v4471_v61 = vperm.slane %v4377_v55, 0 }
 0xef1   : > { %9098 = vmatmul.msk.f32.vlgmr.msrb.gmra.mxu2 %vm1199_vm0, %v4374_v2  ;;  %v4472_v2 = vperm.slane %v4377_v55, 1  ;;  %v4826_v55 = vld [vmem:[#allocation22 + $0x8f8] sm:$0xff] }
 0xef2   : > { %4669 = vmatpush.msra.mxu2 %v4585_v63  ;;  %4695 = vmatpush.msrb.mxu3 %v4611_v0  ;;  %v4528_v0 = vld [vmem:[#allocation26 + $0x60] sm:$0xff] }
 0xef3   : > { %9101 = vmatmul.msk.f32.gmra.mxu3 %vm1199_vm0, %v4375_v5 }
 0xef4   : > { %4670 = vmatpush.msra.mxu2 %v4583_v1  ;;  %4696 = vmatpush.msrb.mxu3 %v4609_v3  ;;  %v4537_v1 = vld [vmem:[#allocation28 + $0x60] sm:$0xff] }
 0xef6   : > { %4671 = vmatpush.msra.mxu2 %v4581_v4  ;;  %4697 = vmatpush.msrb.mxu3 %v4607_v17  ;;  %v4531_v4 = vld [vmem:[#allocation26 + $0x78] sm:$0xff] }
 0xef8   : > { %4672 = vmatpush.msra.mxu2 %v4579_v6  ;;  %4698 = vmatpush.msrb.mxu3 %v4605_v7  ;;  %v4540_v7 = vld [vmem:[#allocation28 + $0x78] sm:$0xff] }
 0xef9   : > { %9099 = vmatmul.msk.f32.gmra.mxu2 %vm1199_vm0, %v4375_v5 }
 0xefa   : > { %4673 = vmatpush.msra.mxu2 %v4577_v8  ;;  %4699 = vmatpush.msrb.mxu3 %v4603_v22 }
 0xefc   : > { %4674 = vmatpush.msra.mxu2 %v4575_v12  ;;  %4700 = vmatpush.msrb.mxu3 %v4601_v13  ;;  %v4530_v13 = vld [vmem:[#allocation26 + $0x70] sm:$0xff] }
 0xefe   : > { %4675 = vmatpush.msra.mxu2 %v4573_v16  ;;  %4701 = vmatpush.msrb.mxu3 %v4599_v18  ;;  %v4539_v16 = vld [vmem:[#allocation28 + $0x70] sm:$0xff] }
 0xf00   : > { %4676 = vmatpush.msra.mxu2 %v4571_v24  ;;  %4702 = vmatpush.msrb.mxu3 %v4597_v25 }
 0xf02   : > { %4677 = vmatpush.msra.mxu2 %v4569_v30  ;;  %4703 = vmatpush.msrb.mxu3 %v4595_v31  ;;  %v4857_v30 = vld [vmem:[#allocation22 + $0x9f0] sm:$0xff]  ;;  %v4823_v31 = vld [vmem:[#allocation22 + $0x8e0] sm:$0xff] }
 0xf04   : > { %4678 = vmatpush.msra.mxu2 %v4567_v35  ;;  %4704 = vmatpush.msrb.mxu3 %v4593_v36  ;;  %v4853_v35 = vld [vmem:[#allocation22 + $0x9d0] sm:$0xff] }
 0xf06   : > { %4679 = vmatpush.msra.mxu2 %v4565_v41  ;;  %4705 = vmatpush.msrb.mxu3 %v4591_v29  ;;  %v4849_v41 = vld [vmem:[#allocation22 + $0x9b0] sm:$0xff] }
 0xf08   : > { %4680 = vmatpush.msra.mxu2 %v4563_v45  ;;  %4706 = vmatpush.msrb.mxu3 %v4589_v46  ;;  %v4813_v46 = vld [vmem:[#allocation22 + $0x890] sm:$0xff] }
 0xf0a   : > { %4681 = vmatpush.msra.mxu2 %v4561_v28  ;;  %4707 = vmatpush.msrb.mxu3 %v4587_v50  ;;  %v4811_v50 = vld [vmem:[#allocation22 + $0x880] sm:$0xff] }
 0xf0c   : > { %4682 = vmatpush.msra.mxu2 %v4559_v43  ;;  %4887 = vmatpush.msra.mxu3 %v4857_v30  ;;  %v4843_v43 = vld [vmem:[#allocation22 + $0x980] sm:$0xff] }
 0xf0d   : > { %v4835_v30 = vld [vmem:[#allocation22 + $0x940] sm:$0xff] }
 0xf0e   : > { %4683 = vmatpush.msra.mxu2 %v4557_v56  ;;  %4888 = vmatpush.msra.mxu3 %v4855_v32  ;;  %v4836_v32 = vld [vmem:[#allocation22 + $0x948] sm:$0xff] }
 0xf10   : > { %4684 = vmatpush.msra.mxu2 %v4555_v51  ;;  %4889 = vmatpush.msra.mxu3 %v4853_v35  ;;  %v4841_v51 = vld [vmem:[#allocation22 + $0x970] sm:$0xff]  ;;  %v4802_v35 = vld [vmem:[#allocation22 + $0x838] sm:$0xff] }
 0xf12   : > { %4890 = vmatpush.msra.mxu3 %v4851_v40  ;;  %v4831_v40 = vld [vmem:[#allocation22 + $0x920] sm:$0xff] }
 0xf14   : > { %4891 = vmatpush.msra.mxu3 %v4849_v41  ;;  %v4832_v41 = vld [vmem:[#allocation22 + $0x928] sm:$0xff] }
 0xf16   : > { %4892 = vmatpush.msra.mxu3 %v4847_v54  ;;  %v4798_v54 = vld [vmem:[#allocation22 + $0x818] sm:$0xff] }
 0xf18   : > { %4893 = vmatpush.msra.mxu3 %v4845_v47  ;;  %v4827_v47 = vld [vmem:[#allocation22 + $0x900] sm:$0xff] }
 0xf1a   : > { %4894 = vmatpush.msra.mxu3 %v4843_v43 }
 0xf1c   : > { %4895 = vmatpush.msra.mxu3 %v4841_v51 }
 0xf6e   : > { %v4521_v57 = vpop.f32.mrf.mxu3 }
 0xf6f   : > { %v4522_v48 = vadd.f32 %v4521_v57, %v4472_v2 }
 0xf71   : > { %v4533_v59 = vmul.f32 %v4529_v58, %v4522_v48  ;;  %v4824_v58 = vld [vmem:[#allocation22 + $0x8e8] sm:$0xff] }
 0xf73   : > { %v4542_v62 = vadd.f32 %v4538_v20, %v4533_v59  ;;  %v4822_v20 = vld [vmem:[#allocation22 + $0x8d8] sm:$0xff] }
 0xf74   : > { %v4498_v63 = vpop.f32.mrf.mxu2 }
 0xf75   : > { %9505 = vtanh.f32 %v4542_v62  ;;  %v4499_v5 = vadd.f32 %v4498_v63, %v4471_v61  ;;  %v4820_v62 = vld [vmem:[#allocation22 + $0x8c8] sm:$0xff]  ;;  %v4620_v63 = vld [vmem:[#allocation16 + $0x48] sm:$0xff] }
 0xf76   : > { %v4524_v3 = vpop.f32.mrf.mxu3 }
 0xf77   : > { %v4532_v17 = vmul.f32 %v4528_v0, %v4499_v5  ;;  %v4525_v6 = vadd.f32 %v4524_v3, %v4472_v2  ;;  %v4856_v0 = vld [vmem:[#allocation22 + $0x9e8] sm:$0xff]  ;;  %v4818_v5 = vld [vmem:[#allocation22 + $0x8b8] sm:$0xff] }
 0xf78   : > { %v4816_v3 = vld [vmem:[#allocation22 + $0x8a8] sm:$0xff] }
 0xf79   : > { %v4541_v8 = vadd.f32 %v4537_v1, %v4532_v17  ;;  %v4535_v22 = vmul.f32 %v4531_v4, %v4525_v6  ;;  %v4854_v1 = vld [vmem:[#allocation22 + $0x9d8] sm:$0xff]  ;;  %v4852_v4 = vld [vmem:[#allocation22 + $0x9c8] sm:$0xff] }
 0xf7a   : > { %v4814_v17 = vld [vmem:[#allocation22 + $0x898] sm:$0xff] }
 0xf7b   : > { %v9506_v9 = vpop.eup %9505  ;;  %9507 = vtanh.f32 %v4541_v8  ;;  %v4544_v11 = vadd.f32 %v4540_v7, %v4535_v22  ;;  %v4850_v6 = vld [vmem:[#allocation22 + $0x9b8] sm:$0xff]  ;;  %v4812_v7 = vld [vmem:[#allocation22 + $0x888] sm:$0xff] }
 0xf7c   : > { %v4501_v12 = vpop.f32.mrf.mxu2  ;;  %v11840_v14 = vadd.f32 %v9506_v9, %v11812_v34  ;;  %v4848_v8 = vld [vmem:[#allocation22 + $0x9a8] sm:$0xff]  ;;  %v4810_v22 = vld [vmem:[#allocation22 + $0x878] sm:$0xff] }
 0xf7d   : > { %9509 = vtanh.f32 %v4544_v11  ;;  %v4502_v21 = vadd.f32 %v4501_v12, %v4471_v61  ;;  %v4858_v61 = vld [vmem:[#allocation22 + $0x9f8] sm:$0xff]  ;;  %v4844_v11 = vld [vmem:[#allocation22 + $0x988] sm:$0xff] }
 0xf7e   : > { %4662 = vmatmul.f32.vlgmr.msrb.gmra.mxu1 %v11840_v14  ;;  %4708 = vmatmul.f32.vlgmr.msrb.gmra.mxu3 %v11840_v14  ;;  %v4846_v9 = vld [vmem:[#allocation22 + $0x998] sm:$0xff] }
 0xf7f   : > { %v4534_v18 = vmul.f32 %v4530_v13, %v4502_v21  ;;  %v4842_v12 = vld [vmem:[#allocation22 + $0x978] sm:$0xff]  ;;  %v4807_v13 = vld [vmem:[#allocation22 + $0x860] sm:$0xff] }
 0xf80   : > { %v4839_v21 = vld [vmem:[#allocation22 + $0x960] sm:$0xff] }
 0xf81   : > { %v9508_v19 = vpop.eup %9507  ;;  %v4543_v23 = vadd.f32 %v4539_v16, %v4534_v18  ;;  %4896 = vmatpush.msra.mxu3 %v4839_v21  ;;  %v4808_v16 = vld [vmem:[#allocation22 + $0x868] sm:$0xff] }
 0xf82   : > { %v11845_v24 = vadd.f32 %v9508_v19, %v11817_v15  ;;  %v4825_v15 = vld [vmem:[#allocation22 + $0x8f0] sm:$0xff]  ;;  %v4840_v18 = vld [vmem:[#allocation22 + $0x968] sm:$0xff] }
 0xf83   : > { %v9510_v25 = vpop.eup %9509  ;;  %9511 = vtanh.f32 %v4543_v23  ;;  %4864 = vmatpush.msrb.mxu2 %v4825_v15  ;;  %v4805_v19 = vld [vmem:[#allocation22 + $0x850] sm:$0xff]  ;;  %v4803_v15 = vld [vmem:[#allocation22 + $0x840] sm:$0xff] }
 0xf84   : > { %4639 = vmatmul.f32.vlgmr.msrb.gmra.mxu0 %v11845_v24  ;;  %4685 = vmatmul.f32.vlgmr.msra.gmra.mxu2 %v11845_v24  ;;  %v11850_v34 = vadd.f32 %v9510_v25, %v11822_v49  ;;  %v4837_v23 = vld [vmem:[#allocation22 + $0x950] sm:$0xff]  ;;  %v4806_v25 = vld [vmem:[#allocation22 + $0x858] sm:$0xff] }
 0xf85   : > { %4865 = vmatpush.msrb.mxu2 %v4823_v31  ;;  %4897 = vmatpush.msra.mxu3 %v4837_v23  ;;  %v4804_v31 = vld [vmem:[#allocation22 + $0x848] sm:$0xff]  ;;  %v5070_v23 = vld [vmem:[#allocation14 + $0xaf0] sm:$0xff] }
 0xf86   : > { %4665 = vmatmul.f32.gmra.mxu1 %v11850_v34  ;;  %4711 = vmatmul.f32.gmra.mxu3 %v11850_v34 }
 0xf87   : > { %4866 = vmatpush.msrb.mxu2 %v4821_v33  ;;  %4898 = vmatpush.msra.mxu3 %v4835_v30  ;;  %v4833_v33 = vld [vmem:[#allocation22 + $0x930] sm:$0xff]  ;;  %v5066_v30 = vld [vmem:[#allocation14 + $0xad0] sm:$0xff] }
 0xf89   : > { %v9512_v26 = vpop.eup %9511  ;;  %4867 = vmatpush.msrb.mxu2 %v4819_v37  ;;  %4899 = vmatpush.msra.mxu3 %v4833_v33  ;;  %v4799_v37 = vld [vmem:[#allocation22 + $0x820] sm:$0xff]  ;;  %v5092_v33 = vld [vmem:[#allocation14 + $0xba0] sm:$0xff] }
 0xf8a   : > { %v11855_v27 = vadd.f32 %v9512_v26, %v11827_v44  ;;  %v4817_v44 = vld [vmem:[#allocation22 + $0x8b0] sm:$0xff]  ;;  %v4838_v26 = vld [vmem:[#allocation22 + $0x958] sm:$0xff] }
 0xf8b   : > { %4868 = vmatpush.msrb.mxu2 %v4817_v44  ;;  %4900 = vmatpush.msra.mxu3 %v4831_v40  ;;  %v4800_v44 = vld [vmem:[#allocation22 + $0x828] sm:$0xff]  ;;  %v5090_v40 = vld [vmem:[#allocation14 + $0xb90] sm:$0xff] }
 0xf8c   : > { %4642 = vmatmul.f32.gmra.mxu0 %v11855_v27  ;;  %4688 = vmatmul.f32.gmra.mxu2 %v11855_v27 }
 0xf8d   : > { %4869 = vmatpush.msrb.mxu2 %v4815_v42  ;;  %v4829_v42 = vld [vmem:[#allocation22 + $0x910] sm:$0xff] }
 0xf8e   : > { %4901 = vmatpush.msra.mxu3 %v4829_v42 }
 0xf8f   : > { %4870 = vmatpush.msrb.mxu2 %v4813_v46  ;;  %v4795_v46 = vld [vmem:[#allocation22 + $0x800] sm:$0xff] }
 0xf90   : > { %4902 = vmatpush.msra.mxu3 %v4827_v47 }
 0xf91   : > { %4871 = vmatpush.msrb.mxu2 %v4811_v50  ;;  %v4622_v50 = vld [vmem:[#allocation17 + $0x8] sm:$0x3] }
 0xf93   : > { %4872 = vmatpush.msrb.mxu2 %v4809_v52  ;;  %v4773_v52 = vld [vmem:[#allocation19 + $0x80] sm:$0xff] }
 0xf95   : > { %4873 = vmatpush.msrb.mxu2 %v4807_v13 }
 0xf97   : > { %4874 = vmatpush.msrb.mxu2 %v4805_v19  ;;  %v5098_v19 = vld [vmem:[#allocation14 + $0xbd0] sm:$0xff] }
 0xf99   : > { %4875 = vmatpush.msrb.mxu2 %v4803_v15  ;;  %v5096_v15 = vld [vmem:[#allocation14 + $0xbc0] sm:$0xff] }
 0xffb   : > { %v4663_v49 = vpop.f32.mrf.mxu1 }
0x1001   : > { %v4640_v36 = vpop.f32.mrf.mxu0  ;;  %v4709_v29 = vpop.f32.mrf.mxu3 }
0x1002   : > { %v4664_v56 = vadd.f32 %v4663_v49, %v4640_v36  ;;  %v4801_v49 = vld [vmem:[#allocation22 + $0x830] sm:$0xff]  ;;  %v4834_v36 = vld [vmem:[#allocation22 + $0x938] sm:$0xff] }
0x1003   : > { %v4666_v60 = vpop.f32.mrf.mxu1  ;;  %4876 = vmatpush.msrb.mxu2 %v4801_v49  ;;  %v5064_v49 = vld [vmem:[#allocation14 + $0xac0] sm:$0xff] }
0x1005   : > { %4877 = vmatpush.msrb.mxu2 %v4799_v37 }
0x1007   : > { %v4686_v45 = vpop.f32.mrf.mxu2 }
0x1008   : > { %v4710_v59 = vadd.f32 %v4709_v29, %v4686_v45  ;;  %v4797_v29 = vld [vmem:[#allocation22 + $0x810] sm:$0xff]  ;;  %v4830_v45 = vld [vmem:[#allocation22 + $0x918] sm:$0xff] }
0x1009   : > { %v4643_v28 = vpop.f32.mrf.mxu0  ;;  %v4712_v2 = vpop.f32.mrf.mxu3  ;;  %4878 = vmatpush.msrb.mxu2 %v4797_v29 }
0x100a   : > { %v4667_v10 = vadd.f32 %v4666_v60, %v4643_v28  ;;  %v4796_v60 = vld [vmem:[#allocation22 + $0x808] sm:$0xff] }
0x100b   : > { %4879 = vmatpush.msrb.mxu2 %v4795_v46  ;;  %v4828_v28 = vld [vmem:[#allocation22 + $0x908] sm:$0xff]  ;;  %v5103_v46 = vld [vmem:[#allocation14 + $0xbf8] sm:$0xff] }
0x100c   : > { %4740 = vmatpush.msra.mxu0 %v4667_v10  ;;  %v4716_v10 = vperm.slane %v4622_v50, 0 }
0x100e   : > { %4741 = vmatpush.msra.mxu0 %v4664_v56 }
0x100f   : > { %v4689_v57 = vpop.f32.mrf.mxu2  ;;  %9102 = vmatmul.msk.f32.vlgmr.msra.gmra.mxu0 %vm1199_vm0, %v4619_v53 }
0x1010   : > { %v4713_v48 = vadd.f32 %v4712_v2, %v4689_v57  ;;  %4910 = vmatpush.msrb.mxu0 %v4826_v55  ;;  %v4717_v55 = vperm.slane %v4622_v50, 1  ;;  %v5099_v50 = vld [vmem:[#allocation14 + $0xbd8] sm:$0xff] }
0x1012   : > { %4763 = vmatpush.msra.mxu1 %v4713_v48  ;;  %4911 = vmatpush.msrb.mxu0 %v4824_v58  ;;  %v4774_v58 = vld [vmem:[#allocation19 + $0x88] sm:$0xff] }
0x1014   : > { %4764 = vmatpush.msra.mxu1 %v4710_v59  ;;  %4912 = vmatpush.msrb.mxu0 %v4822_v20  ;;  %v4783_v20 = vld [vmem:[#allocation20 + $0x88] sm:$0xff] }
0x1015   : > { %9104 = vmatmul.msk.f32.vlgmr.msra.gmra.mxu1 %vm1199_vm0, %v4619_v53  ;;  %v4782_v53 = vld [vmem:[#allocation20 + $0x80] sm:$0xff] }
0x1016   : > { %4933 = vmatpush.msrb.mxu1 %v4858_v61  ;;  %4913 = vmatpush.msrb.mxu0 %v4820_v62  ;;  %v4775_v61 = vld [vmem:[#allocation19 + $0x90] sm:$0xff] }
0x1017   : > { %9103 = vmatmul.msk.f32.gmra.mxu0 %vm1199_vm0, %v4620_v63 }
0x1018   : > { %4934 = vmatpush.msrb.mxu1 %v4856_v0  ;;  %4914 = vmatpush.msrb.mxu0 %v4818_v5  ;;  %v4784_v0 = vld [vmem:[#allocation20 + $0x90] sm:$0xff] }
0x101a   : > { %4935 = vmatpush.msrb.mxu1 %v4854_v1  ;;  %4915 = vmatpush.msrb.mxu0 %v4816_v3 }
0x101c   : > { %4936 = vmatpush.msrb.mxu1 %v4852_v4  ;;  %4916 = vmatpush.msrb.mxu0 %v4814_v17 }
0x101d   : > { %9105 = vmatmul.msk.f32.gmra.mxu1 %vm1199_vm0, %v4620_v63 }
0x101e   : > { %4937 = vmatpush.msrb.mxu1 %v4850_v6  ;;  %4917 = vmatpush.msrb.mxu0 %v4812_v7  ;;  %v4776_v6 = vld [vmem:[#allocation19 + $0x98] sm:$0xff] }
0x1020   : > { %4938 = vmatpush.msrb.mxu1 %v4848_v8  ;;  %4918 = vmatpush.msrb.mxu0 %v4810_v22  ;;  %v4785_v8 = vld [vmem:[#allocation20 + $0x98] sm:$0xff] }
0x1022   : > { %4939 = vmatpush.msrb.mxu1 %v4846_v9  ;;  %4919 = vmatpush.msrb.mxu0 %v4808_v16  ;;  %v5102_v16 = vld [vmem:[#allocation14 + $0xbf0] sm:$0xff] }
0x1024   : > { %4940 = vmatpush.msrb.mxu1 %v4844_v11  ;;  %4920 = vmatpush.msrb.mxu0 %v4806_v25  ;;  %v5068_v25 = vld [vmem:[#allocation14 + $0xae0] sm:$0xff] }
0x1026   : > { %4941 = vmatpush.msrb.mxu1 %v4842_v12  ;;  %4921 = vmatpush.msrb.mxu0 %v4804_v31 }
0x1028   : > { %4942 = vmatpush.msrb.mxu1 %v4840_v18  ;;  %4922 = vmatpush.msrb.mxu0 %v4802_v35  ;;  %v5100_v18 = vld [vmem:[#allocation14 + $0xbe0] sm:$0xff]  ;;  %v5062_v35 = vld [vmem:[#allocation14 + $0xab0] sm:$0xff] }
0x102a   : > { %4943 = vmatpush.msrb.mxu1 %v4838_v26  ;;  %4923 = vmatpush.msrb.mxu0 %v4800_v44 }
0x102c   : > { %4944 = vmatpush.msrb.mxu1 %v4836_v32  ;;  %4924 = vmatpush.msrb.mxu0 %v4798_v54  ;;  %v5094_v32 = vld [vmem:[#allocation14 + $0xbb0] sm:$0xff]  ;;  %v4860_v54 = vld [vmem:[#allocation23 + $0x40] sm:$0xff] }
0x102e   : > { %4945 = vmatpush.msrb.mxu1 %v4834_v36  ;;  %4925 = vmatpush.msrb.mxu0 %v4796_v60  ;;  %v5101_v60 = vld [vmem:[#allocation14 + $0xbe8] sm:$0xff] }
0x1030   : > { %4946 = vmatpush.msrb.mxu1 %v4832_v41  ;;  %5109 = vmatpush.msra.mxu0 %v5070_v23  ;;  %v5088_v41 = vld [vmem:[#allocation14 + $0xb80] sm:$0xff]  ;;  %v5051_v23 = vld [vmem:[#allocation14 + $0xa58] sm:$0xff] }
0x1032   : > { %4947 = vmatpush.msrb.mxu1 %v4830_v45  ;;  %5110 = vmatpush.msra.mxu0 %v5068_v25  ;;  %v5077_v25 = vld [vmem:[#allocation14 + $0xb28] sm:$0xff] }
0x1034   : > { %4948 = vmatpush.msrb.mxu1 %v4828_v28  ;;  %5111 = vmatpush.msra.mxu0 %v5066_v30  ;;  %v5049_v30 = vld [vmem:[#allocation14 + $0xa48] sm:$0xff] }
0x1036   : > { %5132 = vmatpush.msra.mxu1 %v5102_v16  ;;  %5112 = vmatpush.msra.mxu0 %v5064_v49  ;;  %v5079_v16 = vld [vmem:[#allocation14 + $0xb38] sm:$0xff]  ;;  %v5072_v49 = vld [vmem:[#allocation14 + $0xb00] sm:$0xff] }
0x1038   : > { %5133 = vmatpush.msra.mxu1 %v5100_v18  ;;  %5113 = vmatpush.msra.mxu0 %v5062_v35  ;;  %v5050_v18 = vld [vmem:[#allocation14 + $0xa50] sm:$0xff]  ;;  %v5073_v35 = vld [vmem:[#allocation14 + $0xb08] sm:$0xff] }
0x103a   : > { %5134 = vmatpush.msra.mxu1 %v5098_v19  ;;  %v5076_v19 = vld [vmem:[#allocation14 + $0xb20] sm:$0xff] }
0x103c   : > { %5135 = vmatpush.msra.mxu1 %v5096_v15  ;;  %v5074_v15 = vld [vmem:[#allocation14 + $0xb10] sm:$0xff] }
0x103e   : > { %5136 = vmatpush.msra.mxu1 %v5094_v32  ;;  %v5046_v32 = vld [vmem:[#allocation14 + $0xa30] sm:$0xff] }
0x1040   : > { %5137 = vmatpush.msra.mxu1 %v5092_v33  ;;  %v5047_v33 = vld [vmem:[#allocation14 + $0xa38] sm:$0xff] }
0x1042   : > { %5138 = vmatpush.msra.mxu1 %v5090_v40  ;;  %v5042_v40 = vld [vmem:[#allocation14 + $0xa10] sm:$0xff] }
0x1044   : > { %5139 = vmatpush.msra.mxu1 %v5088_v41  ;;  %v5040_v41 = vld [vmem:[#allocation14 + $0xa00] sm:$0xff] }
0x108c   : > { %v4743_v43 = vpop.f32.mrf.mxu0 }
0x108d   : > { %v4744_v56 = vadd.f32 %v4743_v43, %v4716_v10  ;;  %v5071_v43 = vld [vmem:[#allocation14 + $0xaf8] sm:$0xff] }
0x108f   : > { %v4777_v51 = vmul.f32 %v4773_v52, %v4744_v56  ;;  %v5097_v52 = vld [vmem:[#allocation14 + $0xbc8] sm:$0xff]  ;;  %v4861_v56 = vld [vmem:[#allocation23 + $0x48] sm:$0xff] }
0x1091   : > { %v4786_v2 = vadd.f32 %v4782_v53, %v4777_v51  ;;  %v5069_v53 = vld [vmem:[#allocation14 + $0xae8] sm:$0xff]  ;;  %v5095_v51 = vld [vmem:[#allocation14 + $0xbb8] sm:$0xff] }
0x1092   : > { %v4766_v57 = vpop.f32.mrf.mxu1 }
0x1093   : > { %9513 = vtanh.f32 %v4786_v2  ;;  %v4767_v48 = vadd.f32 %v4766_v57, %v4717_v55  ;;  %v5093_v2 = vld [vmem:[#allocation14 + $0xba8] sm:$0xff] }
0x1094   : > { %v4746_v59 = vpop.f32.mrf.mxu0  ;;  %v5065_v57 = vld [vmem:[#allocation14 + $0xac8] sm:$0xff] }
0x1095   : > { %v4778_v62 = vmul.f32 %v4774_v58, %v4767_v48  ;;  %v4747_v63 = vadd.f32 %v4746_v59, %v4716_v10  ;;  %v5091_v58 = vld [vmem:[#allocation14 + $0xb98] sm:$0xff]  ;;  %v5060_v59 = vld [vmem:[#allocation14 + $0xaa0] sm:$0xff] }
0x1096   : > { %v5063_v48 = vld [vmem:[#allocation14 + $0xab8] sm:$0xff]  ;;  %5114 = vmatpush.msra.mxu0 %v5060_v59 }
0x1097   : > { %v4787_v5 = vadd.f32 %v4783_v20, %v4778_v62  ;;  %v4779_v1 = vmul.f32 %v4775_v61, %v4747_v63  ;;  %v5089_v20 = vld [vmem:[#allocation14 + $0xb88] sm:$0xff]  ;;  %v5086_v61 = vld [vmem:[#allocation14 + $0xb70] sm:$0xff]  ;;  %v5087_v63 = vld [vmem:[#allocation14 + $0xb78] sm:$0xff] }
0x1098   : > { %5140 = vmatpush.msra.mxu1 %v5086_v61  ;;  %v5061_v62 = vld [vmem:[#allocation14 + $0xaa8] sm:$0xff] }
0x1099   : > { %v9514_v3 = vpop.eup %9513  ;;  %9515 = vtanh.f32 %v4787_v5  ;;  %v4788_v4 = vadd.f32 %v4784_v0, %v4779_v1  ;;  %v5058_v0 = vld [vmem:[#allocation14 + $0xa90] sm:$0xff]  ;;  %v5084_v5 = vld [vmem:[#allocation14 + $0xb60] sm:$0xff]  ;;  %v5059_v1 = vld [vmem:[#allocation14 + $0xa98] sm:$0xff] }
0x109a   : > { %v4769_v17 = vpop.f32.mrf.mxu1  ;;  %4880 = vmatmul.f32.vlgmr.msrb.gmra.mxu2 %v9514_v3  ;;  %4926 = vmatmul.f32.vlgmr.msrb.gmra.mxu0 %v9514_v3  ;;  %v5085_v3 = vld [vmem:[#allocation14 + $0xb68] sm:$0xff] }
0x109b   : > { %9517 = vtanh.f32 %v4788_v4  ;;  %v4770_v7 = vadd.f32 %v4769_v17, %v4717_v55  ;;  %v5067_v55 = vld [vmem:[#allocation14 + $0xad8] sm:$0xff]  ;;  %5115 = vmatpush.msra.mxu0 %v5058_v0  ;;  %5141 = vmatpush.msra.mxu1 %v5084_v5  ;;  %v5056_v4 = vld [vmem:[#allocation14 + $0xa80] sm:$0xff]  ;;  %v5082_v17 = vld [vmem:[#allocation14 + $0xb50] sm:$0xff] }
0x109d   : > { %v4780_v22 = vmul.f32 %v4776_v6, %v4770_v7  ;;  %v5057_v6 = vld [vmem:[#allocation14 + $0xa88] sm:$0xff]  ;;  %5116 = vmatpush.msra.mxu0 %v5056_v4  ;;  %5142 = vmatpush.msra.mxu1 %v5082_v17  ;;  %v5083_v7 = vld [vmem:[#allocation14 + $0xb58] sm:$0xff] }
0x109f   : > { %v9516_v9 = vpop.eup %9515  ;;  %v4789_v11 = vadd.f32 %v4785_v8, %v4780_v22  ;;  %v5054_v8 = vld [vmem:[#allocation14 + $0xa70] sm:$0xff]  ;;  %v5080_v22 = vld [vmem:[#allocation14 + $0xb40] sm:$0xff] }
0x10a0   : > { %4903 = vmatmul.f32.vlgmr.msra.gmra.mxu3 %v9516_v9  ;;  %4949 = vmatmul.f32.vlgmr.msrb.gmra.mxu1 %v9516_v9  ;;  %v5055_v9 = vld [vmem:[#allocation14 + $0xa78] sm:$0xff] }
0x10a1   : > { %v9518_v12 = vpop.eup %9517  ;;  %9519 = vtanh.f32 %v4789_v11  ;;  %5117 = vmatpush.msra.mxu0 %v5054_v8  ;;  %5143 = vmatpush.msra.mxu1 %v5080_v22  ;;  %v5081_v11 = vld [vmem:[#allocation14 + $0xb48] sm:$0xff] }
0x10a2   : > { %4883 = vmatmul.f32.gmra.mxu2 %v9518_v12  ;;  %4929 = vmatmul.f32.gmra.mxu0 %v9518_v12  ;;  %v5052_v12 = vld [vmem:[#allocation14 + $0xa60] sm:$0xff] }
0x10a3   : > { %5118 = vmatpush.msra.mxu0 %v5052_v12  ;;  %v5341_v12 = vld [vmem:[#allocation22 + $0xbe0] sm:$0xff] }
0x10a5   : > { %5119 = vmatpush.msra.mxu0 %v5050_v18  ;;  %v5305_v18 = vld [vmem:[#allocation22 + $0xac0] sm:$0xff] }
0x10a7   : > { %v9520_v13 = vpop.eup %9519 }
0x10a8   : > { %4906 = vmatmul.f32.gmra.mxu3 %v9520_v13  ;;  %4952 = vmatmul.f32.gmra.mxu1 %v9520_v13  ;;  %v5078_v13 = vld [vmem:[#allocation14 + $0xb30] sm:$0xff] }
0x10a9   : > { %5144 = vmatpush.msra.mxu1 %v5078_v13  ;;  %v5307_v13 = vld [vmem:[#allocation22 + $0xad0] sm:$0xff] }
0x10ab   : > { %5145 = vmatpush.msra.mxu1 %v5076_v19  ;;  %v5337_v19 = vld [vmem:[#allocation22 + $0xbc0] sm:$0xff] }
0x10ad   : > { %5146 = vmatpush.msra.mxu1 %v5074_v15  ;;  %v5333_v15 = vld [vmem:[#allocation22 + $0xba0] sm:$0xff] }
0x10af   : > { %5147 = vmatpush.msra.mxu1 %v5072_v49 }
0x1117   : > { %v4927_v21 = vpop.f32.mrf.mxu0 }
0x111d   : > { %v4950_v26 = vpop.f32.mrf.mxu1  ;;  %v4881_v31 = vpop.f32.mrf.mxu2 }
0x111e   : > { %v4951_v42 = vadd.f32 %v4950_v26, %v4927_v21  ;;  %v5053_v21 = vld [vmem:[#allocation14 + $0xa68] sm:$0xff]  ;;  %v5048_v26 = vld [vmem:[#allocation14 + $0xa40] sm:$0xff] }
0x111f   : > { %v4930_v37 = vpop.f32.mrf.mxu0  ;;  %5120 = vmatpush.msra.mxu0 %v5048_v26  ;;  %v5301_v26 = vld [vmem:[#allocation22 + $0xaa0] sm:$0xff] }
0x1121   : > { %5121 = vmatpush.msra.mxu0 %v5046_v32  ;;  %v5331_v32 = vld [vmem:[#allocation22 + $0xb90] sm:$0xff] }
0x1123   : > { %v4904_v36 = vpop.f32.mrf.mxu3 }
0x1124   : > { %v4905_v10 = vadd.f32 %v4904_v36, %v4881_v31  ;;  %v5075_v31 = vld [vmem:[#allocation14 + $0xb18] sm:$0xff]  ;;  %v5044_v36 = vld [vmem:[#allocation14 + $0xa20] sm:$0xff] }
0x1125   : > { %v4953_v44 = vpop.f32.mrf.mxu1  ;;  %v4884_v45 = vpop.f32.mrf.mxu2  ;;  %5122 = vmatpush.msra.mxu0 %v5044_v36 }
0x1126   : > { %v4954_v29 = vadd.f32 %v4953_v44, %v4930_v37  ;;  %v5045_v37 = vld [vmem:[#allocation14 + $0xa28] sm:$0xff]  ;;  %v5043_v44 = vld [vmem:[#allocation14 + $0xa18] sm:$0xff] }
0x1127   : > { %5123 = vmatpush.msra.mxu0 %v5042_v40  ;;  %v5295_v40 = vld [vmem:[#allocation22 + $0xa70] sm:$0xff] }
0x1128   : > { %5004 = vmatpush.msrb.mxu3 %v4954_v29  ;;  %v5041_v29 = vld [vmem:[#allocation14 + $0xa08] sm:$0xff] }
0x1129   : > { %5124 = vmatpush.msra.mxu0 %v5040_v41  ;;  %v5105_v41 = vld [vmem:[#allocation16 + $0x50] sm:$0xff] }
0x112a   : > { %5005 = vmatpush.msrb.mxu3 %v4951_v42  ;;  %v4863_v42 = vld [vmem:[#allocation25 + $0x8] sm:$0x3] }
0x112b   : > { %v4907_v47 = vpop.f32.mrf.mxu3  ;;  %9108 = vmatmul.msk.f32.vlgmr.msrb.gmra.mxu3 %vm1199_vm0, %v4860_v54 }
0x112c   : > { %v4908_v28 = vadd.f32 %v4907_v47, %v4884_v45  ;;  %5178 = vmatpush.msra.mxu3 %v5103_v46  ;;  %v5015_v46 = vld [vmem:[#allocation26 + $0x88] sm:$0xff] }
0x112e   : > { %4981 = vmatpush.msra.mxu2 %v4908_v28  ;;  %5179 = vmatpush.msra.mxu3 %v5101_v60  ;;  %v5024_v60 = vld [vmem:[#allocation28 + $0x88] sm:$0xff] }
0x1130   : > { %4982 = vmatpush.msra.mxu2 %v4905_v10  ;;  %5180 = vmatpush.msra.mxu3 %v5099_v50  ;;  %v4957_v50 = vperm.slane %v4863_v42, 0 }
0x1131   : > { %9106 = vmatmul.msk.f32.vlgmr.msra.gmra.mxu2 %vm1199_vm0, %v4860_v54  ;;  %v4958_v54 = vperm.slane %v4863_v42, 1  ;;  %v5312_v42 = vld [vmem:[#allocation22 + $0xaf8] sm:$0xff] }
0x1132   : > { %5155 = vmatpush.msrb.mxu2 %v5071_v43  ;;  %5181 = vmatpush.msra.mxu3 %v5097_v52  ;;  %v5014_v52 = vld [vmem:[#allocation26 + $0x80] sm:$0xff] }
0x1133   : > { %9109 = vmatmul.msk.f32.gmra.mxu3 %vm1199_vm0, %v4861_v56 }
0x1134   : > { %5156 = vmatpush.msrb.mxu2 %v5069_v53  ;;  %5182 = vmatpush.msra.mxu3 %v5095_v51  ;;  %v5023_v53 = vld [vmem:[#allocation28 + $0x80] sm:$0xff] }
0x1136   : > { %5157 = vmatpush.msrb.mxu2 %v5067_v55  ;;  %5183 = vmatpush.msra.mxu3 %v5093_v2  ;;  %v5017_v55 = vld [vmem:[#allocation26 + $0x98] sm:$0xff] }
0x1138   : > { %5158 = vmatpush.msrb.mxu2 %v5065_v57  ;;  %5184 = vmatpush.msra.mxu3 %v5091_v58  ;;  %v5026_v58 = vld [vmem:[#allocation28 + $0x98] sm:$0xff] }
0x1139   : > { %9107 = vmatmul.msk.f32.gmra.mxu2 %vm1199_vm0, %v4861_v56 }
0x113a   : > { %5159 = vmatpush.msrb.mxu2 %v5063_v48  ;;  %5185 = vmatpush.msra.mxu3 %v5089_v20 }
0x113c   : > { %5160 = vmatpush.msrb.mxu2 %v5061_v62  ;;  %5186 = vmatpush.msra.mxu3 %v5087_v63  ;;  %v5016_v63 = vld [vmem:[#allocation26 + $0x90] sm:$0xff] }
0x113e   : > { %5161 = vmatpush.msrb.mxu2 %v5059_v1  ;;  %5187 = vmatpush.msra.mxu3 %v5085_v3  ;;  %v5025_v1 = vld [vmem:[#allocation28 + $0x90] sm:$0xff] }
0x1140   : > { %5162 = vmatpush.msrb.mxu2 %v5057_v6  ;;  %5188 = vmatpush.msra.mxu3 %v5083_v7 }
0x1142   : > { %5163 = vmatpush.msrb.mxu2 %v5055_v9  ;;  %5189 = vmatpush.msra.mxu3 %v5081_v11  ;;  %v5343_v9 = vld [vmem:[#allocation22 + $0xbf0] sm:$0xff]  ;;  %v5309_v11 = vld [vmem:[#allocation22 + $0xae0] sm:$0xff] }
0x1144   : > { %5164 = vmatpush.msrb.mxu2 %v5053_v21  ;;  %5190 = vmatpush.msra.mxu3 %v5079_v16  ;;  %v5339_v21 = vld [vmem:[#allocation22 + $0xbd0] sm:$0xff] }
0x1146   : > { %5165 = vmatpush.msrb.mxu2 %v5051_v23  ;;  %5191 = vmatpush.msra.mxu3 %v5077_v25  ;;  %v5335_v23 = vld [vmem:[#allocation22 + $0xbb0] sm:$0xff] }
0x1148   : > { %5166 = vmatpush.msrb.mxu2 %v5049_v30  ;;  %5192 = vmatpush.msra.mxu3 %v5075_v31  ;;  %v5299_v31 = vld [vmem:[#allocation22 + $0xa90] sm:$0xff] }
0x114a   : > { %5167 = vmatpush.msrb.mxu2 %v5047_v33  ;;  %5193 = vmatpush.msra.mxu3 %v5073_v35  ;;  %v5297_v35 = vld [vmem:[#allocation22 + $0xa80] sm:$0xff] }
0x114c   : > { %5168 = vmatpush.msrb.mxu2 %v5045_v37  ;;  %5373 = vmatpush.msrb.mxu3 %v5343_v9  ;;  %v5329_v37 = vld [vmem:[#allocation22 + $0xb80] sm:$0xff] }
0x114d   : > { %v5321_v9 = vld [vmem:[#allocation22 + $0xb40] sm:$0xff] }
0x114e   : > { %5169 = vmatpush.msrb.mxu2 %v5043_v44  ;;  %5374 = vmatpush.msrb.mxu3 %v5341_v12  ;;  %v5322_v12 = vld [vmem:[#allocation22 + $0xb48] sm:$0xff] }
0x1150   : > { %5170 = vmatpush.msrb.mxu2 %v5041_v29  ;;  %5375 = vmatpush.msrb.mxu3 %v5339_v21  ;;  %v5327_v29 = vld [vmem:[#allocation22 + $0xb70] sm:$0xff]  ;;  %v5288_v21 = vld [vmem:[#allocation22 + $0xa38] sm:$0xff] }
0x1152   : > { %5376 = vmatpush.msrb.mxu3 %v5337_v19  ;;  %v5317_v19 = vld [vmem:[#allocation22 + $0xb20] sm:$0xff] }
0x1154   : > { %5377 = vmatpush.msrb.mxu3 %v5335_v23  ;;  %v5318_v23 = vld [vmem:[#allocation22 + $0xb28] sm:$0xff] }
0x1156   : > { %5378 = vmatpush.msrb.mxu3 %v5333_v15  ;;  %v5284_v15 = vld [vmem:[#allocation22 + $0xa18] sm:$0xff] }
0x1158   : > { %5379 = vmatpush.msrb.mxu3 %v5331_v32  ;;  %v5313_v32 = vld [vmem:[#allocation22 + $0xb00] sm:$0xff] }
0x115a   : > { %5380 = vmatpush.msrb.mxu3 %v5329_v37 }
0x115c   : > { %5381 = vmatpush.msrb.mxu3 %v5327_v29 }
0x11ae   : > { %v5007_v45 = vpop.f32.mrf.mxu3 }
0x11af   : > { %v5008_v47 = vadd.f32 %v5007_v45, %v4958_v54 }
0x11b1   : > { %v5019_v28 = vmul.f32 %v5015_v46, %v5008_v47  ;;  %v5310_v46 = vld [vmem:[#allocation22 + $0xae8] sm:$0xff] }
0x11b3   : > { %v5028_v10 = vadd.f32 %v5024_v60, %v5019_v28  ;;  %v5308_v60 = vld [vmem:[#allocation22 + $0xad8] sm:$0xff] }
0x11b4   : > { %v4984_v43 = vpop.f32.mrf.mxu2 }
0x11b5   : > { %9521 = vtanh.f32 %v5028_v10  ;;  %v4985_v56 = vadd.f32 %v4984_v43, %v4957_v50  ;;  %v5306_v10 = vld [vmem:[#allocation22 + $0xac8] sm:$0xff]  ;;  %v5106_v43 = vld [vmem:[#allocation16 + $0x58] sm:$0xff] }
0x11b6   : > { %v5010_v51 = vpop.f32.mrf.mxu3 }
0x11b7   : > { %v5018_v2 = vmul.f32 %v5014_v52, %v4985_v56  ;;  %v5011_v57 = vadd.f32 %v5010_v51, %v4958_v54  ;;  %v5342_v52 = vld [vmem:[#allocation22 + $0xbe8] sm:$0xff]  ;;  %v5304_v56 = vld [vmem:[#allocation22 + $0xab8] sm:$0xff] }
0x11b8   : > { %v5302_v51 = vld [vmem:[#allocation22 + $0xaa8] sm:$0xff] }
0x11b9   : > { %v5027_v48 = vadd.f32 %v5023_v53, %v5018_v2  ;;  %v5021_v20 = vmul.f32 %v5017_v55, %v5011_v57  ;;  %v5340_v53 = vld [vmem:[#allocation22 + $0xbd8] sm:$0xff]  ;;  %v5338_v55 = vld [vmem:[#allocation22 + $0xbc8] sm:$0xff] }
0x11ba   : > { %v5300_v2 = vld [vmem:[#allocation22 + $0xa98] sm:$0xff] }
0x11bb   : > { %v9522_v59 = vpop.eup %9521  ;;  %9523 = vtanh.f32 %v5027_v48  ;;  %v5030_v61 = vadd.f32 %v5026_v58, %v5021_v20  ;;  %v5336_v57 = vld [vmem:[#allocation22 + $0xbb8] sm:$0xff]  ;;  %v5298_v58 = vld [vmem:[#allocation22 + $0xa88] sm:$0xff] }
0x11bc   : > { %v4987_v62 = vpop.f32.mrf.mxu2  ;;  %v11868_v0 = vadd.f32 %v9522_v59, %v11840_v14  ;;  %v5334_v48 = vld [vmem:[#allocation22 + $0xba8] sm:$0xff]  ;;  %v5296_v20 = vld [vmem:[#allocation22 + $0xa78] sm:$0xff] }
0x11bd   : > { %9525 = vtanh.f32 %v5030_v61  ;;  %v4988_v5 = vadd.f32 %v4987_v62, %v4957_v50  ;;  %v5344_v50 = vld [vmem:[#allocation22 + $0xbf8] sm:$0xff]  ;;  %v5330_v61 = vld [vmem:[#allocation22 + $0xb88] sm:$0xff] }
0x11be   : > { %5148 = vmatmul.f32.vlgmr.msra.gmra.mxu1 %v11868_v0  ;;  %5194 = vmatmul.f32.vlgmr.msra.gmra.mxu3 %v11868_v0  ;;  %v5332_v59 = vld [vmem:[#allocation22 + $0xb98] sm:$0xff] }
0x11bf   : > { %v5020_v3 = vmul.f32 %v5016_v63, %v4988_v5  ;;  %v5328_v62 = vld [vmem:[#allocation22 + $0xb78] sm:$0xff]  ;;  %v5293_v63 = vld [vmem:[#allocation22 + $0xa60] sm:$0xff] }
0x11c0   : > { %v5325_v5 = vld [vmem:[#allocation22 + $0xb60] sm:$0xff] }
0x11c1   : > { %v9524_v4 = vpop.eup %9523  ;;  %v5029_v17 = vadd.f32 %v5025_v1, %v5020_v3  ;;  %5382 = vmatpush.msrb.mxu3 %v5325_v5  ;;  %v5294_v1 = vld [vmem:[#allocation22 + $0xa68] sm:$0xff] }
0x11c2   : > { %v11873_v6 = vadd.f32 %v9524_v4, %v11845_v24  ;;  %v5311_v24 = vld [vmem:[#allocation22 + $0xaf0] sm:$0xff]  ;;  %v5326_v3 = vld [vmem:[#allocation22 + $0xb68] sm:$0xff] }
0x11c3   : > { %v9526_v7 = vpop.eup %9525  ;;  %9527 = vtanh.f32 %v5029_v17  ;;  %5350 = vmatpush.msra.mxu2 %v5311_v24  ;;  %v5291_v4 = vld [vmem:[#allocation22 + $0xa50] sm:$0xff]  ;;  %v5289_v24 = vld [vmem:[#allocation22 + $0xa40] sm:$0xff] }
0x11c4   : > { %5125 = vmatmul.f32.vlgmr.msra.gmra.mxu0 %v11873_v6  ;;  %5171 = vmatmul.f32.vlgmr.msrb.gmra.mxu2 %v11873_v6  ;;  %v11878_v14 = vadd.f32 %v9526_v7, %v11850_v34  ;;  %v5323_v17 = vld [vmem:[#allocation22 + $0xb50] sm:$0xff]  ;;  %v5292_v7 = vld [vmem:[#allocation22 + $0xa58] sm:$0xff] }
0x11c5   : > { %5351 = vmatpush.msra.mxu2 %v5309_v11  ;;  %5383 = vmatpush.msrb.mxu3 %v5323_v17  ;;  %v5290_v11 = vld [vmem:[#allocation22 + $0xa48] sm:$0xff]  ;;  %v5556_v17 = vld [vmem:[#allocation14 + $0xcf0] sm:$0xff] }
0x11c6   : > { %5151 = vmatmul.f32.gmra.mxu1 %v11878_v14  ;;  %5197 = vmatmul.f32.gmra.mxu3 %v11878_v14 }
0x11c7   : > { %5352 = vmatpush.msra.mxu2 %v5307_v13  ;;  %5384 = vmatpush.msrb.mxu3 %v5321_v9  ;;  %v5319_v13 = vld [vmem:[#allocation22 + $0xb30] sm:$0xff]  ;;  %v5552_v9 = vld [vmem:[#allocation14 + $0xcd0] sm:$0xff] }
0x11c9   : > { %v9528_v8 = vpop.eup %9527  ;;  %5353 = vmatpush.msra.mxu2 %v5305_v18  ;;  %5385 = vmatpush.msrb.mxu3 %v5319_v13  ;;  %v5285_v18 = vld [vmem:[#allocation22 + $0xa20] sm:$0xff]  ;;  %v5578_v13 = vld [vmem:[#allocation14 + $0xda0] sm:$0xff] }
0x11ca   : > { %v11883_v22 = vadd.f32 %v9528_v8, %v11855_v27  ;;  %v5303_v27 = vld [vmem:[#allocation22 + $0xab0] sm:$0xff]  ;;  %v5324_v8 = vld [vmem:[#allocation22 + $0xb58] sm:$0xff] }
0x11cb   : > { %5354 = vmatpush.msra.mxu2 %v5303_v27  ;;  %5386 = vmatpush.msrb.mxu3 %v5317_v19  ;;  %v5286_v27 = vld [vmem:[#allocation22 + $0xa28] sm:$0xff]  ;;  %v5576_v19 = vld [vmem:[#allocation14 + $0xd90] sm:$0xff] }
0x11cc   : > { %5128 = vmatmul.f32.gmra.mxu0 %v11883_v22  ;;  %5174 = vmatmul.f32.gmra.mxu2 %v11883_v22 }
0x11cd   : > { %5355 = vmatpush.msra.mxu2 %v5301_v26  ;;  %v5315_v26 = vld [vmem:[#allocation22 + $0xb10] sm:$0xff] }
0x11ce   : > { %5387 = vmatpush.msrb.mxu3 %v5315_v26 }
0x11cf   : > { %5356 = vmatpush.msra.mxu2 %v5299_v31  ;;  %v5281_v31 = vld [vmem:[#allocation22 + $0xa00] sm:$0xff] }
0x11d0   : > { %5388 = vmatpush.msrb.mxu3 %v5313_v32 }
0x11d1   : > { %5357 = vmatpush.msra.mxu2 %v5297_v35  ;;  %v5108_v35 = vld [vmem:[#allocation17 + $0xa] sm:$0x3] }
0x11d3   : > { %5358 = vmatpush.msra.mxu2 %v5295_v40  ;;  %v5259_v40 = vld [vmem:[#allocation19 + $0xa0] sm:$0xff] }
0x11d5   : > { %5359 = vmatpush.msra.mxu2 %v5293_v63 }
0x11d7   : > { %5360 = vmatpush.msra.mxu2 %v5291_v4  ;;  %v5584_v4 = vld [vmem:[#allocation14 + $0xdd0] sm:$0xff] }
0x11d9   : > { %5361 = vmatpush.msra.mxu2 %v5289_v24  ;;  %v5582_v24 = vld [vmem:[#allocation14 + $0xdc0] sm:$0xff] }
0x123b   : > { %v5149_v34 = vpop.f32.mrf.mxu1 }
0x1241   : > { %v5126_v16 = vpop.f32.mrf.mxu0  ;;  %v5195_v25 = vpop.f32.mrf.mxu3 }
0x1242   : > { %v5150_v44 = vadd.f32 %v5149_v34, %v5126_v16  ;;  %v5287_v34 = vld [vmem:[#allocation22 + $0xa30] sm:$0xff]  ;;  %v5320_v16 = vld [vmem:[#allocation22 + $0xb38] sm:$0xff] }
0x1243   : > { %v5152_v49 = vpop.f32.mrf.mxu1  ;;  %5362 = vmatpush.msra.mxu2 %v5287_v34  ;;  %v5550_v34 = vld [vmem:[#allocation14 + $0xcc0] sm:$0xff] }
0x1245   : > { %5363 = vmatpush.msra.mxu2 %v5285_v18 }
0x1247   : > { %v5172_v30 = vpop.f32.mrf.mxu2 }
0x1248   : > { %v5196_v28 = vadd.f32 %v5195_v25, %v5172_v30  ;;  %v5283_v25 = vld [vmem:[#allocation22 + $0xa10] sm:$0xff]  ;;  %v5316_v30 = vld [vmem:[#allocation22 + $0xb18] sm:$0xff] }
0x1249   : > { %v5129_v33 = vpop.f32.mrf.mxu0  ;;  %v5198_v54 = vpop.f32.mrf.mxu3  ;;  %5364 = vmatpush.msra.mxu2 %v5283_v25 }
0x124a   : > { %v5153_v36 = vadd.f32 %v5152_v49, %v5129_v33  ;;  %v5282_v49 = vld [vmem:[#allocation22 + $0xa08] sm:$0xff] }
0x124b   : > { %5365 = vmatpush.msra.mxu2 %v5281_v31  ;;  %v5314_v33 = vld [vmem:[#allocation22 + $0xb08] sm:$0xff]  ;;  %v5589_v31 = vld [vmem:[#allocation14 + $0xdf8] sm:$0xff] }
0x124c   : > { %5226 = vmatpush.msrb.mxu0 %v5153_v36  ;;  %v5202_v36 = vperm.slane %v5108_v35, 0 }
0x124e   : > { %5227 = vmatpush.msrb.mxu0 %v5150_v44 }
0x124f   : > { %v5175_v45 = vpop.f32.mrf.mxu2  ;;  %9110 = vmatmul.msk.f32.vlgmr.msrb.gmra.mxu0 %vm1199_vm0, %v5105_v41 }
0x1250   : > { %v5199_v47 = vadd.f32 %v5198_v54, %v5175_v45  ;;  %5396 = vmatpush.msra.mxu0 %v5312_v42  ;;  %v5203_v42 = vperm.slane %v5108_v35, 1  ;;  %v5585_v35 = vld [vmem:[#allocation14 + $0xdd8] sm:$0xff] }
0x1252   : > { %5249 = vmatpush.msrb.mxu1 %v5199_v47  ;;  %5397 = vmatpush.msra.mxu0 %v5310_v46  ;;  %v5260_v46 = vld [vmem:[#allocation19 + $0xa8] sm:$0xff] }
0x1254   : > { %5250 = vmatpush.msrb.mxu1 %v5196_v28  ;;  %5398 = vmatpush.msra.mxu0 %v5308_v60  ;;  %v5269_v60 = vld [vmem:[#allocation20 + $0xa8] sm:$0xff] }
0x1255   : > { %9112 = vmatmul.msk.f32.vlgmr.msrb.gmra.mxu1 %vm1199_vm0, %v5105_v41  ;;  %v5268_v41 = vld [vmem:[#allocation20 + $0xa0] sm:$0xff] }
0x1256   : > { %5419 = vmatpush.msra.mxu1 %v5344_v50  ;;  %5399 = vmatpush.msra.mxu0 %v5306_v10  ;;  %v5261_v50 = vld [vmem:[#allocation19 + $0xb0] sm:$0xff] }
0x1257   : > { %9111 = vmatmul.msk.f32.gmra.mxu0 %vm1199_vm0, %v5106_v43 }
0x1258   : > { %5420 = vmatpush.msra.mxu1 %v5342_v52  ;;  %5400 = vmatpush.msra.mxu0 %v5304_v56  ;;  %v5270_v52 = vld [vmem:[#allocation20 + $0xb0] sm:$0xff] }
0x125a   : > { %5421 = vmatpush.msra.mxu1 %v5340_v53  ;;  %5401 = vmatpush.msra.mxu0 %v5302_v51 }
0x125c   : > { %5422 = vmatpush.msra.mxu1 %v5338_v55  ;;  %5402 = vmatpush.msra.mxu0 %v5300_v2 }
0x125d   : > { %9113 = vmatmul.msk.f32.gmra.mxu1 %vm1199_vm0, %v5106_v43 }
0x125e   : > { %5423 = vmatpush.msra.mxu1 %v5336_v57  ;;  %5403 = vmatpush.msra.mxu0 %v5298_v58  ;;  %v5262_v57 = vld [vmem:[#allocation19 + $0xb8] sm:$0xff] }
0x1260   : > { %5424 = vmatpush.msra.mxu1 %v5334_v48  ;;  %5404 = vmatpush.msra.mxu0 %v5296_v20  ;;  %v5271_v48 = vld [vmem:[#allocation20 + $0xb8] sm:$0xff] }
0x1262   : > { %5425 = vmatpush.msra.mxu1 %v5332_v59  ;;  %5405 = vmatpush.msra.mxu0 %v5294_v1  ;;  %v5588_v1 = vld [vmem:[#allocation14 + $0xdf0] sm:$0xff] }
0x1264   : > { %5426 = vmatpush.msra.mxu1 %v5330_v61  ;;  %5406 = vmatpush.msra.mxu0 %v5292_v7  ;;  %v5554_v7 = vld [vmem:[#allocation14 + $0xce0] sm:$0xff] }
0x1266   : > { %5427 = vmatpush.msra.mxu1 %v5328_v62  ;;  %5407 = vmatpush.msra.mxu0 %v5290_v11 }
0x1268   : > { %5428 = vmatpush.msra.mxu1 %v5326_v3  ;;  %5408 = vmatpush.msra.mxu0 %v5288_v21  ;;  %v5586_v3 = vld [vmem:[#allocation14 + $0xde0] sm:$0xff]  ;;  %v5548_v21 = vld [vmem:[#allocation14 + $0xcb0] sm:$0xff] }
0x126a   : > { %5429 = vmatpush.msra.mxu1 %v5324_v8  ;;  %5409 = vmatpush.msra.mxu0 %v5286_v27 }
0x126c   : > { %5430 = vmatpush.msra.mxu1 %v5322_v12  ;;  %5410 = vmatpush.msra.mxu0 %v5284_v15  ;;  %v5580_v12 = vld [vmem:[#allocation14 + $0xdb0] sm:$0xff]  ;;  %v5346_v15 = vld [vmem:[#allocation23 + $0x50] sm:$0xff] }
0x126e   : > { %5431 = vmatpush.msra.mxu1 %v5320_v16  ;;  %5411 = vmatpush.msra.mxu0 %v5282_v49  ;;  %v5587_v49 = vld [vmem:[#allocation14 + $0xde8] sm:$0xff] }
0x1270   : > { %5432 = vmatpush.msra.mxu1 %v5318_v23  ;;  %5595 = vmatpush.msrb.mxu0 %v5556_v17  ;;  %v5574_v23 = vld [vmem:[#allocation14 + $0xd80] sm:$0xff]  ;;  %v5537_v17 = vld [vmem:[#allocation14 + $0xc58] sm:$0xff] }
0x1272   : > { %5433 = vmatpush.msra.mxu1 %v5316_v30  ;;  %5596 = vmatpush.msrb.mxu0 %v5554_v7  ;;  %v5563_v7 = vld [vmem:[#allocation14 + $0xd28] sm:$0xff] }
0x1274   : > { %5434 = vmatpush.msra.mxu1 %v5314_v33  ;;  %5597 = vmatpush.msrb.mxu0 %v5552_v9  ;;  %v5535_v9 = vld [vmem:[#allocation14 + $0xc48] sm:$0xff] }
0x1276   : > { %5618 = vmatpush.msrb.mxu1 %v5588_v1  ;;  %5598 = vmatpush.msrb.mxu0 %v5550_v34  ;;  %v5565_v1 = vld [vmem:[#allocation14 + $0xd38] sm:$0xff]  ;;  %v5558_v34 = vld [vmem:[#allocation14 + $0xd00] sm:$0xff] }
0x1278   : > { %5619 = vmatpush.msrb.mxu1 %v5586_v3  ;;  %5599 = vmatpush.msrb.mxu0 %v5548_v21  ;;  %v5536_v3 = vld [vmem:[#allocation14 + $0xc50] sm:$0xff]  ;;  %v5559_v21 = vld [vmem:[#allocation14 + $0xd08] sm:$0xff] }
0x127a   : > { %5620 = vmatpush.msrb.mxu1 %v5584_v4  ;;  %v5562_v4 = vld [vmem:[#allocation14 + $0xd20] sm:$0xff] }
0x127c   : > { %5621 = vmatpush.msrb.mxu1 %v5582_v24  ;;  %v5560_v24 = vld [vmem:[#allocation14 + $0xd10] sm:$0xff] }
0x127e   : > { %5622 = vmatpush.msrb.mxu1 %v5580_v12  ;;  %v5532_v12 = vld [vmem:[#allocation14 + $0xc30] sm:$0xff] }
0x1280   : > { %5623 = vmatpush.msrb.mxu1 %v5578_v13  ;;  %v5533_v13 = vld [vmem:[#allocation14 + $0xc38] sm:$0xff] }
0x1282   : > { %5624 = vmatpush.msrb.mxu1 %v5576_v19  ;;  %v5528_v19 = vld [vmem:[#allocation14 + $0xc10] sm:$0xff] }
0x1284   : > { %5625 = vmatpush.msrb.mxu1 %v5574_v23  ;;  %v5526_v23 = vld [vmem:[#allocation14 + $0xc00] sm:$0xff] }
0x12cc   : > { %v5229_v37 = vpop.f32.mrf.mxu0 }
0x12cd   : > { %v5230_v44 = vadd.f32 %v5229_v37, %v5202_v36  ;;  %v5557_v37 = vld [vmem:[#allocation14 + $0xcf8] sm:$0xff] }
0x12cf   : > { %v5263_v29 = vmul.f32 %v5259_v40, %v5230_v44  ;;  %v5583_v40 = vld [vmem:[#allocation14 + $0xdc8] sm:$0xff]  ;;  %v5347_v44 = vld [vmem:[#allocation23 + $0x58] sm:$0xff] }
0x12d1   : > { %v5272_v54 = vadd.f32 %v5268_v41, %v5263_v29  ;;  %v5555_v41 = vld [vmem:[#allocation14 + $0xce8] sm:$0xff]  ;;  %v5581_v29 = vld [vmem:[#allocation14 + $0xdb8] sm:$0xff] }
0x12d2   : > { %v5252_v45 = vpop.f32.mrf.mxu1 }
0x12d3   : > { %9529 = vtanh.f32 %v5272_v54  ;;  %v5253_v47 = vadd.f32 %v5252_v45, %v5203_v42  ;;  %v5579_v54 = vld [vmem:[#allocation14 + $0xda8] sm:$0xff] }
0x12d4   : > { %v5232_v28 = vpop.f32.mrf.mxu0  ;;  %v5551_v45 = vld [vmem:[#allocation14 + $0xcc8] sm:$0xff] }
0x12d5   : > { %v5264_v10 = vmul.f32 %v5260_v46, %v5253_v47  ;;  %v5233_v43 = vadd.f32 %v5232_v28, %v5202_v36  ;;  %v5577_v46 = vld [vmem:[#allocation14 + $0xd98] sm:$0xff]  ;;  %v5546_v28 = vld [vmem:[#allocation14 + $0xca0] sm:$0xff] }
0x12d6   : > { %v5549_v47 = vld [vmem:[#allocation14 + $0xcb8] sm:$0xff]  ;;  %5600 = vmatpush.msrb.mxu0 %v5546_v28 }
0x12d7   : > { %v5273_v56 = vadd.f32 %v5269_v60, %v5264_v10  ;;  %v5265_v53 = vmul.f32 %v5261_v50, %v5233_v43  ;;  %v5575_v60 = vld [vmem:[#allocation14 + $0xd88] sm:$0xff]  ;;  %v5572_v50 = vld [vmem:[#allocation14 + $0xd70] sm:$0xff]  ;;  %v5573_v43 = vld [vmem:[#allocation14 + $0xd78] sm:$0xff] }
0x12d8   : > { %5626 = vmatpush.msrb.mxu1 %v5572_v50  ;;  %v5547_v10 = vld [vmem:[#allocation14 + $0xca8] sm:$0xff] }
0x12d9   : > { %v9530_v51 = vpop.eup %9529  ;;  %9531 = vtanh.f32 %v5273_v56  ;;  %v5274_v55 = vadd.f32 %v5270_v52, %v5265_v53  ;;  %v5544_v52 = vld [vmem:[#allocation14 + $0xc90] sm:$0xff]  ;;  %v5570_v56 = vld [vmem:[#allocation14 + $0xd60] sm:$0xff]  ;;  %v5545_v53 = vld [vmem:[#allocation14 + $0xc98] sm:$0xff] }
0x12da   : > { %v5255_v2 = vpop.f32.mrf.mxu1  ;;  %5366 = vmatmul.f32.vlgmr.msra.gmra.mxu2 %v9530_v51  ;;  %5412 = vmatmul.f32.vlgmr.msra.gmra.mxu0 %v9530_v51  ;;  %v5571_v51 = vld [vmem:[#allocation14 + $0xd68] sm:$0xff] }
0x12db   : > { %9533 = vtanh.f32 %v5274_v55  ;;  %v5256_v58 = vadd.f32 %v5255_v2, %v5203_v42  ;;  %v5553_v42 = vld [vmem:[#allocation14 + $0xcd8] sm:$0xff]  ;;  %5601 = vmatpush.msrb.mxu0 %v5544_v52  ;;  %5627 = vmatpush.msrb.mxu1 %v5570_v56  ;;  %v5542_v55 = vld [vmem:[#allocation14 + $0xc80] sm:$0xff]  ;;  %v5568_v2 = vld [vmem:[#allocation14 + $0xd50] sm:$0xff] }
0x12dd   : > { %v5266_v20 = vmul.f32 %v5262_v57, %v5256_v58  ;;  %v5543_v57 = vld [vmem:[#allocation14 + $0xc88] sm:$0xff]  ;;  %5602 = vmatpush.msrb.mxu0 %v5542_v55  ;;  %5628 = vmatpush.msrb.mxu1 %v5568_v2  ;;  %v5569_v58 = vld [vmem:[#allocation14 + $0xd58] sm:$0xff] }
0x12df   : > { %v9532_v59 = vpop.eup %9531  ;;  %v5275_v61 = vadd.f32 %v5271_v48, %v5266_v20  ;;  %v5540_v48 = vld [vmem:[#allocation14 + $0xc70] sm:$0xff]  ;;  %v5566_v20 = vld [vmem:[#allocation14 + $0xd40] sm:$0xff] }
0x12e0   : > { %5389 = vmatmul.f32.vlgmr.msrb.gmra.mxu3 %v9532_v59  ;;  %5435 = vmatmul.f32.vlgmr.msra.gmra.mxu1 %v9532_v59  ;;  %v5541_v59 = vld [vmem:[#allocation14 + $0xc78] sm:$0xff] }
0x12e1   : > { %v9534_v62 = vpop.eup %9533  ;;  %9535 = vtanh.f32 %v5275_v61  ;;  %5603 = vmatpush.msrb.mxu0 %v5540_v48  ;;  %5629 = vmatpush.msrb.mxu1 %v5566_v20  ;;  %v5567_v61 = vld [vmem:[#allocation14 + $0xd48] sm:$0xff] }
0x12e2   : > { %5369 = vmatmul.f32.gmra.mxu2 %v9534_v62  ;;  %5415 = vmatmul.f32.gmra.mxu0 %v9534_v62  ;;  %v5538_v62 = vld [vmem:[#allocation14 + $0xc60] sm:$0xff] }
0x12e3   : > { %5604 = vmatpush.msrb.mxu0 %v5538_v62  ;;  %v5827_v62 = vld [vmem:[#allocation22 + $0xde0] sm:$0xff] }
0x12e5   : > { %5605 = vmatpush.msrb.mxu0 %v5536_v3  ;;  %v5791_v3 = vld [vmem:[#allocation22 + $0xcc0] sm:$0xff] }
0x12e7   : > { %v9536_v63 = vpop.eup %9535 }
0x12e8   : > { %5392 = vmatmul.f32.gmra.mxu3 %v9536_v63  ;;  %5438 = vmatmul.f32.gmra.mxu1 %v9536_v63  ;;  %v5564_v63 = vld [vmem:[#allocation14 + $0xd30] sm:$0xff] }
0x12e9   : > { %5630 = vmatpush.msrb.mxu1 %v5564_v63  ;;  %v5793_v63 = vld [vmem:[#allocation22 + $0xcd0] sm:$0xff] }
0x12eb   : > { %5631 = vmatpush.msrb.mxu1 %v5562_v4  ;;  %v5823_v4 = vld [vmem:[#allocation22 + $0xdc0] sm:$0xff] }
0x12ed   : > { %5632 = vmatpush.msrb.mxu1 %v5560_v24  ;;  %v5819_v24 = vld [vmem:[#allocation22 + $0xda0] sm:$0xff] }
0x12ef   : > { %5633 = vmatpush.msrb.mxu1 %v5558_v34 }
0x1357   : > { %v5413_v5 = vpop.f32.mrf.mxu0 }
0x135d   : > { %v5436_v8 = vpop.f32.mrf.mxu1  ;;  %v5367_v11 = vpop.f32.mrf.mxu2 }
0x135e   : > { %v5437_v26 = vadd.f32 %v5436_v8, %v5413_v5  ;;  %v5539_v5 = vld [vmem:[#allocation14 + $0xc68] sm:$0xff]  ;;  %v5534_v8 = vld [vmem:[#allocation14 + $0xc40] sm:$0xff] }
0x135f   : > { %v5416_v18 = vpop.f32.mrf.mxu0  ;;  %5606 = vmatpush.msrb.mxu0 %v5534_v8  ;;  %v5787_v8 = vld [vmem:[#allocation22 + $0xca0] sm:$0xff] }
0x1361   : > { %5607 = vmatpush.msrb.mxu0 %v5532_v12  ;;  %v5817_v12 = vld [vmem:[#allocation22 + $0xd90] sm:$0xff] }
0x1363   : > { %v5390_v16 = vpop.f32.mrf.mxu3 }
0x1364   : > { %v5391_v36 = vadd.f32 %v5390_v16, %v5367_v11  ;;  %v5561_v11 = vld [vmem:[#allocation14 + $0xd18] sm:$0xff]  ;;  %v5530_v16 = vld [vmem:[#allocation14 + $0xc20] sm:$0xff] }
0x1365   : > { %v5439_v27 = vpop.f32.mrf.mxu1  ;;  %v5370_v30 = vpop.f32.mrf.mxu2  ;;  %5608 = vmatpush.msrb.mxu0 %v5530_v16 }
0x1366   : > { %v5440_v25 = vadd.f32 %v5439_v27, %v5416_v18  ;;  %v5531_v18 = vld [vmem:[#allocation14 + $0xc28] sm:$0xff]  ;;  %v5529_v27 = vld [vmem:[#allocation14 + $0xc18] sm:$0xff] }
0x1367   : > { %5609 = vmatpush.msrb.mxu0 %v5528_v19  ;;  %v5781_v19 = vld [vmem:[#allocation22 + $0xc70] sm:$0xff] }
0x1368   : > { %5490 = vmatpush.msra.mxu3 %v5440_v25  ;;  %v5527_v25 = vld [vmem:[#allocation14 + $0xc08] sm:$0xff] }
0x1369   : > { %5610 = vmatpush.msrb.mxu0 %v5526_v23  ;;  %v5591_v23 = vld [vmem:[#allocation16 + $0x60] sm:$0xff] }
0x136a   : > { %5491 = vmatpush.msra.mxu3 %v5437_v26  ;;  %v5349_v26 = vld [vmem:[#allocation25 + $0xa] sm:$0x3] }
0x136b   : > { %v5393_v32 = vpop.f32.mrf.mxu3  ;;  %9116 = vmatmul.msk.f32.vlgmr.msra.gmra.mxu3 %vm1199_vm0, %v5346_v15 }
0x136c   : > { %v5394_v33 = vadd.f32 %v5393_v32, %v5370_v30  ;;  %5664 = vmatpush.msrb.mxu3 %v5589_v31  ;;  %v5501_v31 = vld [vmem:[#allocation26 + $0xa8] sm:$0xff] }
0x136e   : > { %5467 = vmatpush.msrb.mxu2 %v5394_v33  ;;  %5665 = vmatpush.msrb.mxu3 %v5587_v49  ;;  %v5510_v49 = vld [vmem:[#allocation28 + $0xa8] sm:$0xff] }
0x1370   : > { %5468 = vmatpush.msrb.mxu2 %v5391_v36  ;;  %5666 = vmatpush.msrb.mxu3 %v5585_v35  ;;  %v5443_v35 = vperm.slane %v5349_v26, 0 }
0x1371   : > { %9114 = vmatmul.msk.f32.vlgmr.msrb.gmra.mxu2 %vm1199_vm0, %v5346_v15  ;;  %v5444_v15 = vperm.slane %v5349_v26, 1  ;;  %v5798_v26 = vld [vmem:[#allocation22 + $0xcf8] sm:$0xff] }
0x1372   : > { %5641 = vmatpush.msra.mxu2 %v5557_v37  ;;  %5667 = vmatpush.msrb.mxu3 %v5583_v40  ;;  %v5500_v40 = vld [vmem:[#allocation26 + $0xa0] sm:$0xff] }
0x1373   : > { %9117 = vmatmul.msk.f32.gmra.mxu3 %vm1199_vm0, %v5347_v44 }
0x1374   : > { %5642 = vmatpush.msra.mxu2 %v5555_v41  ;;  %5668 = vmatpush.msrb.mxu3 %v5581_v29  ;;  %v5509_v41 = vld [vmem:[#allocation28 + $0xa0] sm:$0xff] }
0x1376   : > { %5643 = vmatpush.msra.mxu2 %v5553_v42  ;;  %5669 = vmatpush.msrb.mxu3 %v5579_v54  ;;  %v5503_v42 = vld [vmem:[#allocation26 + $0xb8] sm:$0xff] }
0x1378   : > { %5644 = vmatpush.msra.mxu2 %v5551_v45  ;;  %5670 = vmatpush.msrb.mxu3 %v5577_v46  ;;  %v5512_v46 = vld [vmem:[#allocation28 + $0xb8] sm:$0xff] }
0x1379   : > { %9115 = vmatmul.msk.f32.gmra.mxu2 %vm1199_vm0, %v5347_v44 }
0x137a   : > { %5645 = vmatpush.msra.mxu2 %v5549_v47  ;;  %5671 = vmatpush.msrb.mxu3 %v5575_v60 }
0x137c   : > { %5646 = vmatpush.msra.mxu2 %v5547_v10  ;;  %5672 = vmatpush.msrb.mxu3 %v5573_v43  ;;  %v5502_v43 = vld [vmem:[#allocation26 + $0xb0] sm:$0xff] }
0x137e   : > { %5647 = vmatpush.msra.mxu2 %v5545_v53  ;;  %5673 = vmatpush.msrb.mxu3 %v5571_v51  ;;  %v5511_v53 = vld [vmem:[#allocation28 + $0xb0] sm:$0xff] }
0x1380   : > { %5648 = vmatpush.msra.mxu2 %v5543_v57  ;;  %5674 = vmatpush.msrb.mxu3 %v5569_v58 }
0x1382   : > { %5649 = vmatpush.msra.mxu2 %v5541_v59  ;;  %5675 = vmatpush.msrb.mxu3 %v5567_v61  ;;  %v5829_v59 = vld [vmem:[#allocation22 + $0xdf0] sm:$0xff]  ;;  %v5795_v61 = vld [vmem:[#allocation22 + $0xce0] sm:$0xff] }
0x1384   : > { %5650 = vmatpush.msra.mxu2 %v5539_v5  ;;  %5676 = vmatpush.msrb.mxu3 %v5565_v1  ;;  %v5825_v5 = vld [vmem:[#allocation22 + $0xdd0] sm:$0xff] }
0x1386   : > { %5651 = vmatpush.msra.mxu2 %v5537_v17  ;;  %5677 = vmatpush.msrb.mxu3 %v5563_v7  ;;  %v5821_v17 = vld [vmem:[#allocation22 + $0xdb0] sm:$0xff] }
0x1388   : > { %5652 = vmatpush.msra.mxu2 %v5535_v9  ;;  %5678 = vmatpush.msrb.mxu3 %v5561_v11  ;;  %v5785_v11 = vld [vmem:[#allocation22 + $0xc90] sm:$0xff] }
0x138a   : > { %5653 = vmatpush.msra.mxu2 %v5533_v13  ;;  %5679 = vmatpush.msrb.mxu3 %v5559_v21  ;;  %v5783_v21 = vld [vmem:[#allocation22 + $0xc80] sm:$0xff] }
0x138c   : > { %5654 = vmatpush.msra.mxu2 %v5531_v18  ;;  %5859 = vmatpush.msra.mxu3 %v5829_v59  ;;  %v5815_v18 = vld [vmem:[#allocation22 + $0xd80] sm:$0xff] }
0x138d   : > { %v5807_v59 = vld [vmem:[#allocation22 + $0xd40] sm:$0xff] }
0x138e   : > { %5655 = vmatpush.msra.mxu2 %v5529_v27  ;;  %5860 = vmatpush.msra.mxu3 %v5827_v62  ;;  %v5808_v62 = vld [vmem:[#allocation22 + $0xd48] sm:$0xff] }
0x1390   : > { %5656 = vmatpush.msra.mxu2 %v5527_v25  ;;  %5861 = vmatpush.msra.mxu3 %v5825_v5  ;;  %v5813_v25 = vld [vmem:[#allocation22 + $0xd70] sm:$0xff]  ;;  %v5774_v5 = vld [vmem:[#allocation22 + $0xc38] sm:$0xff] }
0x1392   : > { %5862 = vmatpush.msra.mxu3 %v5823_v4  ;;  %v5803_v4 = vld [vmem:[#allocation22 + $0xd20] sm:$0xff] }
0x1394   : > { %5863 = vmatpush.msra.mxu3 %v5821_v17  ;;  %v5804_v17 = vld [vmem:[#allocation22 + $0xd28] sm:$0xff] }
0x1396   : > { %5864 = vmatpush.msra.mxu3 %v5819_v24  ;;  %v5770_v24 = vld [vmem:[#allocation22 + $0xc18] sm:$0xff] }
0x1398   : > { %5865 = vmatpush.msra.mxu3 %v5817_v12  ;;  %v5799_v12 = vld [vmem:[#allocation22 + $0xd00] sm:$0xff] }
0x139a   : > { %5866 = vmatpush.msra.mxu3 %v5815_v18 }
0x139c   : > { %5867 = vmatpush.msra.mxu3 %v5813_v25 }
0x13ee   : > { %v5493_v30 = vpop.f32.mrf.mxu3 }
0x13ef   : > { %v5494_v32 = vadd.f32 %v5493_v30, %v5444_v15 }
0x13f1   : > { %v5505_v33 = vmul.f32 %v5501_v31, %v5494_v32  ;;  %v5796_v31 = vld [vmem:[#allocation22 + $0xce8] sm:$0xff] }
0x13f3   : > { %v5514_v36 = vadd.f32 %v5510_v49, %v5505_v33  ;;  %v5794_v49 = vld [vmem:[#allocation22 + $0xcd8] sm:$0xff] }
0x13f4   : > { %v5470_v37 = vpop.f32.mrf.mxu2 }
0x13f5   : > { %9537 = vtanh.f32 %v5514_v36  ;;  %v5471_v44 = vadd.f32 %v5470_v37, %v5443_v35  ;;  %v5792_v36 = vld [vmem:[#allocation22 + $0xcc8] sm:$0xff]  ;;  %v5592_v37 = vld [vmem:[#allocation16 + $0x68] sm:$0xff] }
0x13f6   : > { %v5496_v29 = vpop.f32.mrf.mxu3 }
0x13f7   : > { %v5504_v54 = vmul.f32 %v5500_v40, %v5471_v44  ;;  %v5497_v45 = vadd.f32 %v5496_v29, %v5444_v15  ;;  %v5828_v40 = vld [vmem:[#allocation22 + $0xde8] sm:$0xff]  ;;  %v5790_v44 = vld [vmem:[#allocation22 + $0xcb8] sm:$0xff] }
0x13f8   : > { %v5788_v29 = vld [vmem:[#allocation22 + $0xca8] sm:$0xff] }
0x13f9   : > { %v5513_v47 = vadd.f32 %v5509_v41, %v5504_v54  ;;  %v5507_v60 = vmul.f32 %v5503_v42, %v5497_v45  ;;  %v5826_v41 = vld [vmem:[#allocation22 + $0xdd8] sm:$0xff]  ;;  %v5824_v42 = vld [vmem:[#allocation22 + $0xdc8] sm:$0xff] }
0x13fa   : > { %v5786_v54 = vld [vmem:[#allocation22 + $0xc98] sm:$0xff] }
0x13fb   : > { %v9538_v28 = vpop.eup %9537  ;;  %9539 = vtanh.f32 %v5513_v47  ;;  %v5516_v50 = vadd.f32 %v5512_v46, %v5507_v60  ;;  %v5822_v45 = vld [vmem:[#allocation22 + $0xdb8] sm:$0xff]  ;;  %v5784_v46 = vld [vmem:[#allocation22 + $0xc88] sm:$0xff] }
0x13fc   : > { %v5473_v10 = vpop.f32.mrf.mxu2  ;;  %v11896_v52 = vadd.f32 %v9538_v28, %v11868_v0  ;;  %v5820_v47 = vld [vmem:[#allocation22 + $0xda8] sm:$0xff]  ;;  %v5782_v60 = vld [vmem:[#allocation22 + $0xc78] sm:$0xff] }
0x13fd   : > { %9541 = vtanh.f32 %v5516_v50  ;;  %v5474_v56 = vadd.f32 %v5473_v10, %v5443_v35  ;;  %v5830_v35 = vld [vmem:[#allocation22 + $0xdf8] sm:$0xff]  ;;  %v5816_v50 = vld [vmem:[#allocation22 + $0xd88] sm:$0xff] }
0x13fe   : > { %5634 = vmatmul.f32.vlgmr.msrb.gmra.mxu1 %v11896_v52  ;;  %5680 = vmatmul.f32.vlgmr.msrb.gmra.mxu3 %v11896_v52  ;;  %v5818_v28 = vld [vmem:[#allocation22 + $0xd98] sm:$0xff] }
0x13ff   : > { %v5506_v51 = vmul.f32 %v5502_v43, %v5474_v56  ;;  %v5814_v10 = vld [vmem:[#allocation22 + $0xd78] sm:$0xff]  ;;  %v5779_v43 = vld [vmem:[#allocation22 + $0xc60] sm:$0xff] }
0x1400   : > { %v5811_v56 = vld [vmem:[#allocation22 + $0xd60] sm:$0xff] }
0x1401   : > { %v9540_v55 = vpop.eup %9539  ;;  %v5515_v2 = vadd.f32 %v5511_v53, %v5506_v51  ;;  %5868 = vmatpush.msra.mxu3 %v5811_v56  ;;  %v5780_v53 = vld [vmem:[#allocation22 + $0xc68] sm:$0xff] }
0x1402   : > { %v11901_v57 = vadd.f32 %v9540_v55, %v11873_v6  ;;  %v5797_v6 = vld [vmem:[#allocation22 + $0xcf0] sm:$0xff]  ;;  %v5812_v51 = vld [vmem:[#allocation22 + $0xd68] sm:$0xff] }
0x1403   : > { %v9542_v58 = vpop.eup %9541  ;;  %9543 = vtanh.f32 %v5515_v2  ;;  %5836 = vmatpush.msrb.mxu2 %v5797_v6  ;;  %v5777_v55 = vld [vmem:[#allocation22 + $0xc50] sm:$0xff]  ;;  %v5775_v6 = vld [vmem:[#allocation22 + $0xc40] sm:$0xff] }
0x1404   : > { %5611 = vmatmul.f32.vlgmr.msrb.gmra.mxu0 %v11901_v57  ;;  %5657 = vmatmul.f32.vlgmr.msra.gmra.mxu2 %v11901_v57  ;;  %v11906_v0 = vadd.f32 %v9542_v58, %v11878_v14  ;;  %v5809_v2 = vld [vmem:[#allocation22 + $0xd50] sm:$0xff]  ;;  %v5778_v58 = vld [vmem:[#allocation22 + $0xc58] sm:$0xff] }
0x1405   : > { %5837 = vmatpush.msrb.mxu2 %v5795_v61  ;;  %5869 = vmatpush.msra.mxu3 %v5809_v2  ;;  %v5776_v61 = vld [vmem:[#allocation22 + $0xc48] sm:$0xff]  ;;  %v6042_v2 = vld [vmem:[#allocation14 + $0xef0] sm:$0xff] }
0x1406   : > { %5637 = vmatmul.f32.gmra.mxu1 %v11906_v0  ;;  %5683 = vmatmul.f32.gmra.mxu3 %v11906_v0 }
0x1407   : > { %5838 = vmatpush.msrb.mxu2 %v5793_v63  ;;  %5870 = vmatpush.msra.mxu3 %v5807_v59  ;;  %v5805_v63 = vld [vmem:[#allocation22 + $0xd30] sm:$0xff]  ;;  %v6038_v59 = vld [vmem:[#allocation14 + $0xed0] sm:$0xff] }
0x1409   : > { %v9544_v48 = vpop.eup %9543  ;;  %5839 = vmatpush.msrb.mxu2 %v5791_v3  ;;  %5871 = vmatpush.msra.mxu3 %v5805_v63  ;;  %v5771_v3 = vld [vmem:[#allocation22 + $0xc20] sm:$0xff]  ;;  %v6064_v63 = vld [vmem:[#allocation14 + $0xfa0] sm:$0xff] }
0x140a   : > { %v11911_v20 = vadd.f32 %v9544_v48, %v11883_v22  ;;  %v5789_v22 = vld [vmem:[#allocation22 + $0xcb0] sm:$0xff]  ;;  %v5810_v48 = vld [vmem:[#allocation22 + $0xd58] sm:$0xff] }
0x140b   : > { %5840 = vmatpush.msrb.mxu2 %v5789_v22  ;;  %5872 = vmatpush.msra.mxu3 %v5803_v4  ;;  %v5772_v22 = vld [vmem:[#allocation22 + $0xc28] sm:$0xff]  ;;  %v6062_v4 = vld [vmem:[#allocation14 + $0xf90] sm:$0xff] }
0x140c   : > { %5614 = vmatmul.f32.gmra.mxu0 %v11911_v20  ;;  %5660 = vmatmul.f32.gmra.mxu2 %v11911_v20 }
0x140d   : > { %5841 = vmatpush.msrb.mxu2 %v5787_v8  ;;  %v5801_v8 = vld [vmem:[#allocation22 + $0xd10] sm:$0xff] }
0x140e   : > { %5873 = vmatpush.msra.mxu3 %v5801_v8 }
0x140f   : > { %5842 = vmatpush.msrb.mxu2 %v5785_v11  ;;  %v5767_v11 = vld [vmem:[#allocation22 + $0xc00] sm:$0xff] }
0x1410   : > { %5874 = vmatpush.msra.mxu3 %v5799_v12 }
0x1411   : > { %5843 = vmatpush.msrb.mxu2 %v5783_v21  ;;  %v5594_v21 = vld [vmem:[#allocation17 + $0xc] sm:$0x3] }
0x1413   : > { %5844 = vmatpush.msrb.mxu2 %v5781_v19  ;;  %v5745_v19 = vld [vmem:[#allocation19 + $0xc0] sm:$0xff] }
0x1415   : > { %5845 = vmatpush.msrb.mxu2 %v5779_v43 }
0x1417   : > { %5846 = vmatpush.msrb.mxu2 %v5777_v55  ;;  %v6070_v55 = vld [vmem:[#allocation14 + $0xfd0] sm:$0xff] }
0x1419   : > { %5847 = vmatpush.msrb.mxu2 %v5775_v6  ;;  %v6068_v6 = vld [vmem:[#allocation14 + $0xfc0] sm:$0xff] }
0x147b   : > { %v5635_v14 = vpop.f32.mrf.mxu1 }
0x1481   : > { %v5612_v1 = vpop.f32.mrf.mxu0  ;;  %v5681_v7 = vpop.f32.mrf.mxu3 }
0x1482   : > { %v5636_v27 = vadd.f32 %v5635_v14, %v5612_v1  ;;  %v5773_v14 = vld [vmem:[#allocation22 + $0xc30] sm:$0xff]  ;;  %v5806_v1 = vld [vmem:[#allocation22 + $0xd38] sm:$0xff] }
0x1483   : > { %v5638_v34 = vpop.f32.mrf.mxu1  ;;  %5848 = vmatpush.msrb.mxu2 %v5773_v14  ;;  %v6036_v14 = vld [vmem:[#allocation14 + $0xec0] sm:$0xff] }
0x1485   : > { %5849 = vmatpush.msrb.mxu2 %v5771_v3 }
0x1487   : > { %v5658_v9 = vpop.f32.mrf.mxu2 }
0x1488   : > { %v5682_v33 = vadd.f32 %v5681_v7, %v5658_v9  ;;  %v5769_v7 = vld [vmem:[#allocation22 + $0xc10] sm:$0xff]  ;;  %v5802_v9 = vld [vmem:[#allocation22 + $0xd18] sm:$0xff] }
0x1489   : > { %v5615_v13 = vpop.f32.mrf.mxu0  ;;  %v5684_v15 = vpop.f32.mrf.mxu3  ;;  %5850 = vmatpush.msrb.mxu2 %v5769_v7 }
0x148a   : > { %v5639_v16 = vadd.f32 %v5638_v34, %v5615_v13  ;;  %v5768_v34 = vld [vmem:[#allocation22 + $0xc08] sm:$0xff] }
0x148b   : > { %5851 = vmatpush.msrb.mxu2 %v5767_v11  ;;  %v5800_v13 = vld [vmem:[#allocation22 + $0xd08] sm:$0xff]  ;;  %v6075_v11 = vld [vmem:[#allocation14 + $0xff8] sm:$0xff] }
0x148c   : > { %5712 = vmatpush.msra.mxu0 %v5639_v16  ;;  %v5688_v16 = vperm.slane %v5594_v21, 0 }
0x148e   : > { %5713 = vmatpush.msra.mxu0 %v5636_v27 }
0x148f   : > { %v5661_v30 = vpop.f32.mrf.mxu2  ;;  %9118 = vmatmul.msk.f32.vlgmr.msra.gmra.mxu0 %vm1199_vm0, %v5591_v23 }
0x1490   : > { %v5685_v32 = vadd.f32 %v5684_v15, %v5661_v30  ;;  %5882 = vmatpush.msrb.mxu0 %v5798_v26  ;;  %v5689_v26 = vperm.slane %v5594_v21, 1  ;;  %v6071_v21 = vld [vmem:[#allocation14 + $0xfd8] sm:$0xff] }
0x1492   : > { %5735 = vmatpush.msra.mxu1 %v5685_v32  ;;  %5883 = vmatpush.msrb.mxu0 %v5796_v31  ;;  %v5746_v31 = vld [vmem:[#allocation19 + $0xc8] sm:$0xff] }
0x1494   : > { %5736 = vmatpush.msra.mxu1 %v5682_v33  ;;  %5884 = vmatpush.msrb.mxu0 %v5794_v49  ;;  %v5755_v49 = vld [vmem:[#allocation20 + $0xc8] sm:$0xff] }
0x1495   : > { %9120 = vmatmul.msk.f32.vlgmr.msra.gmra.mxu1 %vm1199_vm0, %v5591_v23  ;;  %v5754_v23 = vld [vmem:[#allocation20 + $0xc0] sm:$0xff] }
0x1496   : > { %5905 = vmatpush.msrb.mxu1 %v5830_v35  ;;  %5885 = vmatpush.msrb.mxu0 %v5792_v36  ;;  %v5747_v35 = vld [vmem:[#allocation19 + $0xd0] sm:$0xff] }
0x1497   : > { %9119 = vmatmul.msk.f32.gmra.mxu0 %vm1199_vm0, %v5592_v37 }
0x1498   : > { %5906 = vmatpush.msrb.mxu1 %v5828_v40  ;;  %5886 = vmatpush.msrb.mxu0 %v5790_v44  ;;  %v5756_v40 = vld [vmem:[#allocation20 + $0xd0] sm:$0xff] }
0x149a   : > { %5907 = vmatpush.msrb.mxu1 %v5826_v41  ;;  %5887 = vmatpush.msrb.mxu0 %v5788_v29 }
0x149c   : > { %5908 = vmatpush.msrb.mxu1 %v5824_v42  ;;  %5888 = vmatpush.msrb.mxu0 %v5786_v54 }
0x149d   : > { %9121 = vmatmul.msk.f32.gmra.mxu1 %vm1199_vm0, %v5592_v37 }
0x149e   : > { %5909 = vmatpush.msrb.mxu1 %v5822_v45  ;;  %5889 = vmatpush.msrb.mxu0 %v5784_v46  ;;  %v5748_v45 = vld [vmem:[#allocation19 + $0xd8] sm:$0xff] }
0x14a0   : > { %5910 = vmatpush.msrb.mxu1 %v5820_v47  ;;  %5890 = vmatpush.msrb.mxu0 %v5782_v60  ;;  %v5757_v47 = vld [vmem:[#allocation20 + $0xd8] sm:$0xff] }
0x14a2   : > { %5911 = vmatpush.msrb.mxu1 %v5818_v28  ;;  %5891 = vmatpush.msrb.mxu0 %v5780_v53  ;;  %v6074_v53 = vld [vmem:[#allocation14 + $0xff0] sm:$0xff] }
0x14a4   : > { %5912 = vmatpush.msrb.mxu1 %v5816_v50  ;;  %5892 = vmatpush.msrb.mxu0 %v5778_v58  ;;  %v6040_v58 = vld [vmem:[#allocation14 + $0xee0] sm:$0xff] }
0x14a6   : > { %5913 = vmatpush.msrb.mxu1 %v5814_v10  ;;  %5893 = vmatpush.msrb.mxu0 %v5776_v61 }
0x14a8   : > { %5914 = vmatpush.msrb.mxu1 %v5812_v51  ;;  %5894 = vmatpush.msrb.mxu0 %v5774_v5  ;;  %v6072_v51 = vld [vmem:[#allocation14 + $0xfe0] sm:$0xff]  ;;  %v6034_v5 = vld [vmem:[#allocation14 + $0xeb0] sm:$0xff] }
0x14aa   : > { %5915 = vmatpush.msrb.mxu1 %v5810_v48  ;;  %5895 = vmatpush.msrb.mxu0 %v5772_v22 }
0x14ac   : > { %5916 = vmatpush.msrb.mxu1 %v5808_v62  ;;  %5896 = vmatpush.msrb.mxu0 %v5770_v24  ;;  %v6066_v62 = vld [vmem:[#allocation14 + $0xfb0] sm:$0xff]  ;;  %v5832_v24 = vld [vmem:[#allocation23 + $0x60] sm:$0xff] }
0x14ae   : > { %5917 = vmatpush.msrb.mxu1 %v5806_v1  ;;  %5897 = vmatpush.msrb.mxu0 %v5768_v34  ;;  %v6073_v34 = vld [vmem:[#allocation14 + $0xfe8] sm:$0xff] }
0x14b0   : > { %5918 = vmatpush.msrb.mxu1 %v5804_v17  ;;  %6081 = vmatpush.msra.mxu0 %v6042_v2  ;;  %v6060_v17 = vld [vmem:[#allocation14 + $0xf80] sm:$0xff]  ;;  %v6023_v2 = vld [vmem:[#allocation14 + $0xe58] sm:$0xff] }
0x14b2   : > { %5919 = vmatpush.msrb.mxu1 %v5802_v9  ;;  %6082 = vmatpush.msra.mxu0 %v6040_v58  ;;  %v6049_v58 = vld [vmem:[#allocation14 + $0xf28] sm:$0xff] }
0x14b4   : > { %5920 = vmatpush.msrb.mxu1 %v5800_v13  ;;  %6083 = vmatpush.msra.mxu0 %v6038_v59  ;;  %v6021_v59 = vld [vmem:[#allocation14 + $0xe48] sm:$0xff] }
0x14b6   : > { %6104 = vmatpush.msra.mxu1 %v6074_v53  ;;  %6084 = vmatpush.msra.mxu0 %v6036_v14  ;;  %v6051_v53 = vld [vmem:[#allocation14 + $0xf38] sm:$0xff]  ;;  %v6044_v14 = vld [vmem:[#allocation14 + $0xf00] sm:$0xff] }
0x14b8   : > { %6105 = vmatpush.msra.mxu1 %v6072_v51  ;;  %6085 = vmatpush.msra.mxu0 %v6034_v5  ;;  %v6022_v51 = vld [vmem:[#allocation14 + $0xe50] sm:$0xff]  ;;  %v6045_v5 = vld [vmem:[#allocation14 + $0xf08] sm:$0xff] }
0x14ba   : > { %6106 = vmatpush.msra.mxu1 %v6070_v55  ;;  %v6048_v55 = vld [vmem:[#allocation14 + $0xf20] sm:$0xff] }
0x14bc   : > { %6107 = vmatpush.msra.mxu1 %v6068_v6  ;;  %v6046_v6 = vld [vmem:[#allocation14 + $0xf10] sm:$0xff] }
0x14be   : > { %6108 = vmatpush.msra.mxu1 %v6066_v62  ;;  %v6018_v62 = vld [vmem:[#allocation14 + $0xe30] sm:$0xff] }
0x14c0   : > { %6109 = vmatpush.msra.mxu1 %v6064_v63  ;;  %v6019_v63 = vld [vmem:[#allocation14 + $0xe38] sm:$0xff] }
0x14c2   : > { %6110 = vmatpush.msra.mxu1 %v6062_v4  ;;  %v6014_v4 = vld [vmem:[#allocation14 + $0xe10] sm:$0xff] }
0x14c4   : > { %6111 = vmatpush.msra.mxu1 %v6060_v17  ;;  %v6012_v17 = vld [vmem:[#allocation14 + $0xe00] sm:$0xff] }
0x150c   : > { %v5715_v18 = vpop.f32.mrf.mxu0 }
0x150d   : > { %v5716_v27 = vadd.f32 %v5715_v18, %v5688_v16  ;;  %v6043_v18 = vld [vmem:[#allocation14 + $0xef8] sm:$0xff] }
0x150f   : > { %v5749_v25 = vmul.f32 %v5745_v19, %v5716_v27  ;;  %v6069_v19 = vld [vmem:[#allocation14 + $0xfc8] sm:$0xff]  ;;  %v5833_v27 = vld [vmem:[#allocation23 + $0x68] sm:$0xff] }
0x1511   : > { %v5758_v15 = vadd.f32 %v5754_v23, %v5749_v25  ;;  %v6041_v23 = vld [vmem:[#allocation14 + $0xee8] sm:$0xff]  ;;  %v6067_v25 = vld [vmem:[#allocation14 + $0xfb8] sm:$0xff] }
0x1512   : > { %v5738_v30 = vpop.f32.mrf.mxu1 }
0x1513   : > { %9545 = vtanh.f32 %v5758_v15  ;;  %v5739_v32 = vadd.f32 %v5738_v30, %v5689_v26  ;;  %v6065_v15 = vld [vmem:[#allocation14 + $0xfa8] sm:$0xff] }
0x1514   : > { %v5718_v33 = vpop.f32.mrf.mxu0  ;;  %v6037_v30 = vld [vmem:[#allocation14 + $0xec8] sm:$0xff] }
0x1515   : > { %v5750_v36 = vmul.f32 %v5746_v31, %v5739_v32  ;;  %v5719_v37 = vadd.f32 %v5718_v33, %v5688_v16  ;;  %v6063_v31 = vld [vmem:[#allocation14 + $0xf98] sm:$0xff]  ;;  %v6032_v33 = vld [vmem:[#allocation14 + $0xea0] sm:$0xff] }
0x1516   : > { %v6035_v32 = vld [vmem:[#allocation14 + $0xeb8] sm:$0xff]  ;;  %6086 = vmatpush.msra.mxu0 %v6032_v33 }
0x1517   : > { %v5759_v44 = vadd.f32 %v5755_v49, %v5750_v36  ;;  %v5751_v41 = vmul.f32 %v5747_v35, %v5719_v37  ;;  %v6061_v49 = vld [vmem:[#allocation14 + $0xf88] sm:$0xff]  ;;  %v6058_v35 = vld [vmem:[#allocation14 + $0xf70] sm:$0xff]  ;;  %v6059_v37 = vld [vmem:[#allocation14 + $0xf78] sm:$0xff] }
0x1518   : > { %6112 = vmatpush.msra.mxu1 %v6058_v35  ;;  %v6033_v36 = vld [vmem:[#allocation14 + $0xea8] sm:$0xff] }
0x1519   : > { %v9546_v29 = vpop.eup %9545  ;;  %9547 = vtanh.f32 %v5759_v44  ;;  %v5760_v42 = vadd.f32 %v5756_v40, %v5751_v41  ;;  %v6030_v40 = vld [vmem:[#allocation14 + $0xe90] sm:$0xff]  ;;  %v6056_v44 = vld [vmem:[#allocation14 + $0xf60] sm:$0xff]  ;;  %v6031_v41 = vld [vmem:[#allocation14 + $0xe98] sm:$0xff] }
0x151a   : > { %v5741_v54 = vpop.f32.mrf.mxu1  ;;  %5852 = vmatmul.f32.vlgmr.msrb.gmra.mxu2 %v9546_v29  ;;  %5898 = vmatmul.f32.vlgmr.msrb.gmra.mxu0 %v9546_v29  ;;  %v6057_v29 = vld [vmem:[#allocation14 + $0xf68] sm:$0xff] }
0x151b   : > { %9549 = vtanh.f32 %v5760_v42  ;;  %v5742_v46 = vadd.f32 %v5741_v54, %v5689_v26  ;;  %v6039_v26 = vld [vmem:[#allocation14 + $0xed8] sm:$0xff]  ;;  %6087 = vmatpush.msra.mxu0 %v6030_v40  ;;  %6113 = vmatpush.msra.mxu1 %v6056_v44  ;;  %v6028_v42 = vld [vmem:[#allocation14 + $0xe80] sm:$0xff]  ;;  %v6054_v54 = vld [vmem:[#allocation14 + $0xf50] sm:$0xff] }
0x151d   : > { %v5752_v60 = vmul.f32 %v5748_v45, %v5742_v46  ;;  %v6029_v45 = vld [vmem:[#allocation14 + $0xe88] sm:$0xff]  ;;  %6088 = vmatpush.msra.mxu0 %v6028_v42  ;;  %6114 = vmatpush.msra.mxu1 %v6054_v54  ;;  %v6055_v46 = vld [vmem:[#allocation14 + $0xf58] sm:$0xff] }
0x151f   : > { %v9548_v28 = vpop.eup %9547  ;;  %v5761_v50 = vadd.f32 %v5757_v47, %v5752_v60  ;;  %v6026_v47 = vld [vmem:[#allocation14 + $0xe70] sm:$0xff]  ;;  %v6052_v60 = vld [vmem:[#allocation14 + $0xf40] sm:$0xff] }
0x1520   : > { %5875 = vmatmul.f32.vlgmr.msra.gmra.mxu3 %v9548_v28  ;;  %5921 = vmatmul.f32.vlgmr.msrb.gmra.mxu1 %v9548_v28  ;;  %v6027_v28 = vld [vmem:[#allocation14 + $0xe78] sm:$0xff] }
0x1521   : > { %v9550_v10 = vpop.eup %9549  ;;  %9551 = vtanh.f32 %v5761_v50  ;;  %6089 = vmatpush.msra.mxu0 %v6026_v47  ;;  %6115 = vmatpush.msra.mxu1 %v6052_v60  ;;  %v6053_v50 = vld [vmem:[#allocation14 + $0xf48] sm:$0xff] }
0x1522   : > { %5855 = vmatmul.f32.gmra.mxu2 %v9550_v10  ;;  %5901 = vmatmul.f32.gmra.mxu0 %v9550_v10  ;;  %v6024_v10 = vld [vmem:[#allocation14 + $0xe60] sm:$0xff] }
0x1523   : > { %6090 = vmatpush.msra.mxu0 %v6024_v10  ;;  %v6313_v10 = vld [vmem:[#allocation22 + $0xfe0] sm:$0xff] }
0x1525   : > { %6091 = vmatpush.msra.mxu0 %v6022_v51  ;;  %v6277_v51 = vld [vmem:[#allocation22 + $0xec0] sm:$0xff] }
0x1527   : > { %v9552_v43 = vpop.eup %9551 }
0x1528   : > { %5878 = vmatmul.f32.gmra.mxu3 %v9552_v43  ;;  %5924 = vmatmul.f32.gmra.mxu1 %v9552_v43  ;;  %v6050_v43 = vld [vmem:[#allocation14 + $0xf30] sm:$0xff] }
0x1529   : > { %6116 = vmatpush.msra.mxu1 %v6050_v43  ;;  %v6279_v43 = vld [vmem:[#allocation22 + $0xed0] sm:$0xff] }
0x152b   : > { %6117 = vmatpush.msra.mxu1 %v6048_v55  ;;  %v6309_v55 = vld [vmem:[#allocation22 + $0xfc0] sm:$0xff] }
0x152d   : > { %6118 = vmatpush.msra.mxu1 %v6046_v6  ;;  %v6305_v6 = vld [vmem:[#allocation22 + $0xfa0] sm:$0xff] }
0x152f   : > { %6119 = vmatpush.msra.mxu1 %v6044_v14 }
0x1597   : > { %v5899_v56 = vpop.f32.mrf.mxu0 }
0x159d   : > { %v5922_v48 = vpop.f32.mrf.mxu1  ;;  %v5853_v61 = vpop.f32.mrf.mxu2 }
0x159e   : > { %v5923_v8 = vadd.f32 %v5922_v48, %v5899_v56  ;;  %v6025_v56 = vld [vmem:[#allocation14 + $0xe68] sm:$0xff]  ;;  %v6020_v48 = vld [vmem:[#allocation14 + $0xe40] sm:$0xff] }
0x159f   : > { %v5902_v3 = vpop.f32.mrf.mxu0  ;;  %6092 = vmatpush.msra.mxu0 %v6020_v48  ;;  %v6273_v48 = vld [vmem:[#allocation22 + $0xea0] sm:$0xff] }
0x15a1   : > { %6093 = vmatpush.msra.mxu0 %v6018_v62  ;;  %v6303_v62 = vld [vmem:[#allocation22 + $0xf90] sm:$0xff] }
0x15a3   : > { %v5876_v1 = vpop.f32.mrf.mxu3 }
0x15a4   : > { %v5877_v16 = vadd.f32 %v5876_v1, %v5853_v61  ;;  %v6047_v61 = vld [vmem:[#allocation14 + $0xf18] sm:$0xff]  ;;  %v6016_v1 = vld [vmem:[#allocation14 + $0xe20] sm:$0xff] }
0x15a5   : > { %v5925_v22 = vpop.f32.mrf.mxu1  ;;  %v5856_v9 = vpop.f32.mrf.mxu2  ;;  %6094 = vmatpush.msra.mxu0 %v6016_v1 }
0x15a6   : > { %v5926_v7 = vadd.f32 %v5925_v22, %v5902_v3  ;;  %v6017_v3 = vld [vmem:[#allocation14 + $0xe28] sm:$0xff]  ;;  %v6015_v22 = vld [vmem:[#allocation14 + $0xe18] sm:$0xff] }
0x15a7   : > { %6095 = vmatpush.msra.mxu0 %v6014_v4  ;;  %v6267_v4 = vld [vmem:[#allocation22 + $0xe70] sm:$0xff] }
0x15a8   : > { %5976 = vmatpush.msrb.mxu3 %v5926_v7  ;;  %v6013_v7 = vld [vmem:[#allocation14 + $0xe08] sm:$0xff] }
0x15a9   : > { %6096 = vmatpush.msra.mxu0 %v6012_v17  ;;  %v6077_v17 = vld [vmem:[#allocation16 + $0x70] sm:$0xff] }
0x15aa   : > { %5977 = vmatpush.msrb.mxu3 %v5923_v8  ;;  %v5835_v8 = vld [vmem:[#allocation25 + $0xc] sm:$0x3] }
0x15ab   : > { %v5879_v12 = vpop.f32.mrf.mxu3  ;;  %9124 = vmatmul.msk.f32.vlgmr.msrb.gmra.mxu3 %vm1199_vm0, %v5832_v24 }
0x15ac   : > { %v5880_v13 = vadd.f32 %v5879_v12, %v5856_v9  ;;  %6150 = vmatpush.msra.mxu3 %v6075_v11  ;;  %v5987_v11 = vld [vmem:[#allocation26 + $0xc8] sm:$0xff] }
0x15ae   : > { %5953 = vmatpush.msra.mxu2 %v5880_v13  ;;  %6151 = vmatpush.msra.mxu3 %v6073_v34  ;;  %v5996_v34 = vld [vmem:[#allocation28 + $0xc8] sm:$0xff] }
0x15b0   : > { %5954 = vmatpush.msra.mxu2 %v5877_v16  ;;  %6152 = vmatpush.msra.mxu3 %v6071_v21  ;;  %v5929_v21 = vperm.slane %v5835_v8, 0 }
0x15b1   : > { %9122 = vmatmul.msk.f32.vlgmr.msra.gmra.mxu2 %vm1199_vm0, %v5832_v24  ;;  %v5930_v24 = vperm.slane %v5835_v8, 1  ;;  %v6284_v8 = vld [vmem:[#allocation22 + $0xef8] sm:$0xff] }
0x15b2   : > { %6127 = vmatpush.msrb.mxu2 %v6043_v18  ;;  %6153 = vmatpush.msra.mxu3 %v6069_v19  ;;  %v5986_v19 = vld [vmem:[#allocation26 + $0xc0] sm:$0xff] }
0x15b3   : > { %9125 = vmatmul.msk.f32.gmra.mxu3 %vm1199_vm0, %v5833_v27 }
0x15b4   : > { %6128 = vmatpush.msrb.mxu2 %v6041_v23  ;;  %6154 = vmatpush.msra.mxu3 %v6067_v25  ;;  %v5995_v23 = vld [vmem:[#allocation28 + $0xc0] sm:$0xff] }
0x15b6   : > { %6129 = vmatpush.msrb.mxu2 %v6039_v26  ;;  %6155 = vmatpush.msra.mxu3 %v6065_v15  ;;  %v5989_v26 = vld [vmem:[#allocation26 + $0xd8] sm:$0xff] }
0x15b8   : > { %6130 = vmatpush.msrb.mxu2 %v6037_v30  ;;  %6156 = vmatpush.msra.mxu3 %v6063_v31  ;;  %v5998_v31 = vld [vmem:[#allocation28 + $0xd8] sm:$0xff] }
0x15b9   : > { %9123 = vmatmul.msk.f32.gmra.mxu2 %vm1199_vm0, %v5833_v27 }
0x15ba   : > { %6131 = vmatpush.msrb.mxu2 %v6035_v32  ;;  %6157 = vmatpush.msra.mxu3 %v6061_v49 }
0x15bc   : > { %6132 = vmatpush.msrb.mxu2 %v6033_v36  ;;  %6158 = vmatpush.msra.mxu3 %v6059_v37  ;;  %v5988_v37 = vld [vmem:[#allocation26 + $0xd0] sm:$0xff] }
0x15be   : > { %6133 = vmatpush.msrb.mxu2 %v6031_v41  ;;  %6159 = vmatpush.msra.mxu3 %v6057_v29  ;;  %v5997_v41 = vld [vmem:[#allocation28 + $0xd0] sm:$0xff] }
0x15c0   : > { %6134 = vmatpush.msrb.mxu2 %v6029_v45  ;;  %6160 = vmatpush.msra.mxu3 %v6055_v46 }
0x15c2   : > { %6135 = vmatpush.msrb.mxu2 %v6027_v28  ;;  %6161 = vmatpush.msra.mxu3 %v6053_v50  ;;  %v6315_v28 = vld [vmem:[#allocation22 + $0xff0] sm:$0xff]  ;;  %v6281_v50 = vld [vmem:[#allocation22 + $0xee0] sm:$0xff] }
0x15c4   : > { %6136 = vmatpush.msrb.mxu2 %v6025_v56  ;;  %6162 = vmatpush.msra.mxu3 %v6051_v53  ;;  %v6311_v56 = vld [vmem:[#allocation22 + $0xfd0] sm:$0xff] }
0x15c6   : > { %6137 = vmatpush.msrb.mxu2 %v6023_v2  ;;  %6163 = vmatpush.msra.mxu3 %v6049_v58  ;;  %v6307_v2 = vld [vmem:[#allocation22 + $0xfb0] sm:$0xff] }
0x15c8   : > { %6138 = vmatpush.msrb.mxu2 %v6021_v59  ;;  %6164 = vmatpush.msra.mxu3 %v6047_v61  ;;  %v6271_v61 = vld [vmem:[#allocation22 + $0xe90] sm:$0xff] }
0x15ca   : > { %6139 = vmatpush.msrb.mxu2 %v6019_v63  ;;  %6165 = vmatpush.msra.mxu3 %v6045_v5  ;;  %v6269_v5 = vld [vmem:[#allocation22 + $0xe80] sm:$0xff] }
0x15cc   : > { %6140 = vmatpush.msrb.mxu2 %v6017_v3  ;;  %6345 = vmatpush.msrb.mxu3 %v6315_v28  ;;  %v6301_v3 = vld [vmem:[#allocation22 + $0xf80] sm:$0xff] }
0x15cd   : > { %v6293_v28 = vld [vmem:[#allocation22 + $0xf40] sm:$0xff] }
0x15ce   : > { %6141 = vmatpush.msrb.mxu2 %v6015_v22  ;;  %6346 = vmatpush.msrb.mxu3 %v6313_v10  ;;  %v6294_v10 = vld [vmem:[#allocation22 + $0xf48] sm:$0xff] }
0x15d0   : > { %6142 = vmatpush.msrb.mxu2 %v6013_v7  ;;  %6347 = vmatpush.msrb.mxu3 %v6311_v56  ;;  %v6299_v7 = vld [vmem:[#allocation22 + $0xf70] sm:$0xff]  ;;  %v6260_v56 = vld [vmem:[#allocation22 + $0xe38] sm:$0xff] }
0x15d2   : > { %6348 = vmatpush.msrb.mxu3 %v6309_v55  ;;  %v6289_v55 = vld [vmem:[#allocation22 + $0xf20] sm:$0xff] }
0x15d4   : > { %6349 = vmatpush.msrb.mxu3 %v6307_v2  ;;  %v6290_v2 = vld [vmem:[#allocation22 + $0xf28] sm:$0xff] }
0x15d6   : > { %6350 = vmatpush.msrb.mxu3 %v6305_v6  ;;  %v6256_v6 = vld [vmem:[#allocation22 + $0xe18] sm:$0xff] }
0x15d8   : > { %6351 = vmatpush.msrb.mxu3 %v6303_v62  ;;  %v6285_v62 = vld [vmem:[#allocation22 + $0xf00] sm:$0xff] }
0x15da   : > { %6352 = vmatpush.msrb.mxu3 %v6301_v3 }
0x15dc   : > { %6353 = vmatpush.msrb.mxu3 %v6299_v7 }
0x162e   : > { %v5979_v9 = vpop.f32.mrf.mxu3 }
0x162f   : > { %v5980_v12 = vadd.f32 %v5979_v9, %v5930_v24 }
0x1631   : > { %v5991_v13 = vmul.f32 %v5987_v11, %v5980_v12  ;;  %v6282_v11 = vld [vmem:[#allocation22 + $0xee8] sm:$0xff] }
0x1633   : > { %v6000_v16 = vadd.f32 %v5996_v34, %v5991_v13  ;;  %v6280_v34 = vld [vmem:[#allocation22 + $0xed8] sm:$0xff] }
0x1634   : > { %v5956_v18 = vpop.f32.mrf.mxu2 }
0x1635   : > { %9553 = vtanh.f32 %v6000_v16  ;;  %v5957_v27 = vadd.f32 %v5956_v18, %v5929_v21  ;;  %v6278_v16 = vld [vmem:[#allocation22 + $0xec8] sm:$0xff]  ;;  %v6078_v18 = vld [vmem:[#allocation16 + $0x78] sm:$0xff] }
0x1636   : > { %v5982_v25 = vpop.f32.mrf.mxu3 }
0x1637   : > { %v5990_v15 = vmul.f32 %v5986_v19, %v5957_v27  ;;  %v5983_v30 = vadd.f32 %v5982_v25, %v5930_v24  ;;  %v6314_v19 = vld [vmem:[#allocation22 + $0xfe8] sm:$0xff]  ;;  %v6276_v27 = vld [vmem:[#allocation22 + $0xeb8] sm:$0xff] }
0x1638   : > { %v6274_v25 = vld [vmem:[#allocation22 + $0xea8] sm:$0xff] }
0x1639   : > { %v5999_v32 = vadd.f32 %v5995_v23, %v5990_v15  ;;  %v5993_v49 = vmul.f32 %v5989_v26, %v5983_v30  ;;  %v6312_v23 = vld [vmem:[#allocation22 + $0xfd8] sm:$0xff]  ;;  %v6310_v26 = vld [vmem:[#allocation22 + $0xfc8] sm:$0xff] }
0x163a   : > { %v6272_v15 = vld [vmem:[#allocation22 + $0xe98] sm:$0xff] }
0x163b   : > { %v9554_v33 = vpop.eup %9553  ;;  %9555 = vtanh.f32 %v5999_v32  ;;  %v6002_v35 = vadd.f32 %v5998_v31, %v5993_v49  ;;  %v6308_v30 = vld [vmem:[#allocation22 + $0xfb8] sm:$0xff]  ;;  %v6270_v31 = vld [vmem:[#allocation22 + $0xe88] sm:$0xff] }
0x163c   : > { %v5959_v36 = vpop.f32.mrf.mxu2  ;;  %v11924_v40 = vadd.f32 %v9554_v33, %v11896_v52  ;;  %v6306_v32 = vld [vmem:[#allocation22 + $0xfa8] sm:$0xff]  ;;  %v6268_v49 = vld [vmem:[#allocation22 + $0xe78] sm:$0xff] }
0x163d   : > { %9557 = vtanh.f32 %v6002_v35  ;;  %v5960_v44 = vadd.f32 %v5959_v36, %v5929_v21  ;;  %v6316_v21 = vld [vmem:[#allocation22 + $0xff8] sm:$0xff]  ;;  %v6302_v35 = vld [vmem:[#allocation22 + $0xf88] sm:$0xff] }
0x163e   : > { %6120 = vmatmul.f32.vlgmr.msra.gmra.mxu1 %v11924_v40  ;;  %6166 = vmatmul.f32.vlgmr.msra.gmra.mxu3 %v11924_v40  ;;  %v6304_v33 = vld [vmem:[#allocation22 + $0xf98] sm:$0xff] }
0x163f   : > { %v5992_v29 = vmul.f32 %v5988_v37, %v5960_v44  ;;  %v6300_v36 = vld [vmem:[#allocation22 + $0xf78] sm:$0xff]  ;;  %v6265_v37 = vld [vmem:[#allocation22 + $0xe60] sm:$0xff] }
0x1640   : > { %v6297_v44 = vld [vmem:[#allocation22 + $0xf60] sm:$0xff] }
0x1641   : > { %v9556_v42 = vpop.eup %9555  ;;  %v6001_v54 = vadd.f32 %v5997_v41, %v5992_v29  ;;  %6354 = vmatpush.msrb.mxu3 %v6297_v44  ;;  %v6266_v41 = vld [vmem:[#allocation22 + $0xe68] sm:$0xff] }
0x1642   : > { %v11929_v45 = vadd.f32 %v9556_v42, %v11901_v57  ;;  %v6283_v57 = vld [vmem:[#allocation22 + $0xef0] sm:$0xff]  ;;  %v6298_v29 = vld [vmem:[#allocation22 + $0xf68] sm:$0xff] }
0x1643   : > { %v9558_v46 = vpop.eup %9557  ;;  %9559 = vtanh.f32 %v6001_v54  ;;  %6322 = vmatpush.msra.mxu2 %v6283_v57  ;;  %v6263_v42 = vld [vmem:[#allocation22 + $0xe50] sm:$0xff]  ;;  %v6261_v57 = vld [vmem:[#allocation22 + $0xe40] sm:$0xff] }
0x1644   : > { %6097 = vmatmul.f32.vlgmr.msra.gmra.mxu0 %v11929_v45  ;;  %6143 = vmatmul.f32.vlgmr.msrb.gmra.mxu2 %v11929_v45  ;;  %v11934_v52 = vadd.f32 %v9558_v46, %v11906_v0  ;;  %v6295_v54 = vld [vmem:[#allocation22 + $0xf50] sm:$0xff]  ;;  %v6264_v46 = vld [vmem:[#allocation22 + $0xe58] sm:$0xff] }
0x1645   : > { %6323 = vmatpush.msra.mxu2 %v6281_v50  ;;  %6355 = vmatpush.msrb.mxu3 %v6295_v54  ;;  %v6262_v50 = vld [vmem:[#allocation22 + $0xe48] sm:$0xff]  ;;  %v6528_v54 = vld [vmem:[#allocation14 + $0x10f0] sm:$0xff] }
0x1646   : > { %6123 = vmatmul.f32.gmra.mxu1 %v11934_v52  ;;  %6169 = vmatmul.f32.gmra.mxu3 %v11934_v52 }
0x1647   : > { %6324 = vmatpush.msra.mxu2 %v6279_v43  ;;  %6356 = vmatpush.msrb.mxu3 %v6293_v28  ;;  %v6291_v43 = vld [vmem:[#allocation22 + $0xf30] sm:$0xff]  ;;  %v6524_v28 = vld [vmem:[#allocation14 + $0x10d0] sm:$0xff] }
0x1649   : > { %v9560_v47 = vpop.eup %9559  ;;  %6325 = vmatpush.msra.mxu2 %v6277_v51  ;;  %6357 = vmatpush.msrb.mxu3 %v6291_v43  ;;  %v6257_v51 = vld [vmem:[#allocation22 + $0xe20] sm:$0xff]  ;;  %v6550_v43 = vld [vmem:[#allocation14 + $0x11a0] sm:$0xff] }
0x164a   : > { %v11939_v60 = vadd.f32 %v9560_v47, %v11911_v20  ;;  %v6275_v20 = vld [vmem:[#allocation22 + $0xeb0] sm:$0xff]  ;;  %v6296_v47 = vld [vmem:[#allocation22 + $0xf58] sm:$0xff] }
0x164b   : > { %6326 = vmatpush.msra.mxu2 %v6275_v20  ;;  %6358 = vmatpush.msrb.mxu3 %v6289_v55  ;;  %v6258_v20 = vld [vmem:[#allocation22 + $0xe28] sm:$0xff]  ;;  %v6548_v55 = vld [vmem:[#allocation14 + $0x1190] sm:$0xff] }
0x164c   : > { %6100 = vmatmul.f32.gmra.mxu0 %v11939_v60  ;;  %6146 = vmatmul.f32.gmra.mxu2 %v11939_v60 }
0x164d   : > { %6327 = vmatpush.msra.mxu2 %v6273_v48  ;;  %v6287_v48 = vld [vmem:[#allocation22 + $0xf10] sm:$0xff] }
0x164e   : > { %6359 = vmatpush.msrb.mxu3 %v6287_v48 }
0x164f   : > { %6328 = vmatpush.msra.mxu2 %v6271_v61  ;;  %v6253_v61 = vld [vmem:[#allocation22 + $0xe00] sm:$0xff] }
0x1650   : > { %6360 = vmatpush.msrb.mxu3 %v6285_v62 }
0x1651   : > { %6329 = vmatpush.msra.mxu2 %v6269_v5  ;;  %v6080_v5 = vld [vmem:[#allocation17 + $0xe] sm:$0x3] }
0x1653   : > { %6330 = vmatpush.msra.mxu2 %v6267_v4  ;;  %v6231_v4 = vld [vmem:[#allocation19 + $0xe0] sm:$0xff] }
0x1655   : > { %6331 = vmatpush.msra.mxu2 %v6265_v37 }
0x1657   : > { %6332 = vmatpush.msra.mxu2 %v6263_v42  ;;  %v6556_v42 = vld [vmem:[#allocation14 + $0x11d0] sm:$0xff] }
0x1659   : > { %6333 = vmatpush.msra.mxu2 %v6261_v57  ;;  %v6554_v57 = vld [vmem:[#allocation14 + $0x11c0] sm:$0xff] }
0x16bb   : > { %v6121_v0 = vpop.f32.mrf.mxu1 }
0x16c1   : > { %v6098_v53 = vpop.f32.mrf.mxu0  ;;  %v6167_v58 = vpop.f32.mrf.mxu3 }
0x16c2   : > { %v6122_v22 = vadd.f32 %v6121_v0, %v6098_v53  ;;  %v6259_v0 = vld [vmem:[#allocation22 + $0xe30] sm:$0xff]  ;;  %v6292_v53 = vld [vmem:[#allocation22 + $0xf38] sm:$0xff] }
0x16c3   : > { %v6124_v14 = vpop.f32.mrf.mxu1  ;;  %6334 = vmatpush.msra.mxu2 %v6259_v0  ;;  %v6522_v0 = vld [vmem:[#allocation14 + $0x10c0] sm:$0xff] }
0x16c5   : > { %6335 = vmatpush.msra.mxu2 %v6257_v51 }
0x16c7   : > { %v6144_v59 = vpop.f32.mrf.mxu2 }
0x16c8   : > { %v6168_v13 = vadd.f32 %v6167_v58, %v6144_v59  ;;  %v6255_v58 = vld [vmem:[#allocation22 + $0xe10] sm:$0xff]  ;;  %v6288_v59 = vld [vmem:[#allocation22 + $0xf18] sm:$0xff] }
0x16c9   : > { %v6101_v63 = vpop.f32.mrf.mxu0  ;;  %v6170_v24 = vpop.f32.mrf.mxu3  ;;  %6336 = vmatpush.msra.mxu2 %v6255_v58 }
0x16ca   : > { %v6125_v1 = vadd.f32 %v6124_v14, %v6101_v63  ;;  %v6254_v14 = vld [vmem:[#allocation22 + $0xe08] sm:$0xff] }
0x16cb   : > { %6337 = vmatpush.msra.mxu2 %v6253_v61  ;;  %v6286_v63 = vld [vmem:[#allocation22 + $0xf08] sm:$0xff]  ;;  %v6561_v61 = vld [vmem:[#allocation14 + $0x11f8] sm:$0xff] }
0x16cc   : > { %6198 = vmatpush.msrb.mxu0 %v6125_v1  ;;  %v6174_v1 = vperm.slane %v6080_v5, 0 }
0x16ce   : > { %6199 = vmatpush.msrb.mxu0 %v6122_v22 }
0x16cf   : > { %v6147_v9 = vpop.f32.mrf.mxu2  ;;  %9126 = vmatmul.msk.f32.vlgmr.msrb.gmra.mxu0 %vm1199_vm0, %v6077_v17 }
0x16d0   : > { %v6171_v12 = vadd.f32 %v6170_v24, %v6147_v9  ;;  %6368 = vmatpush.msra.mxu0 %v6284_v8  ;;  %v6175_v8 = vperm.slane %v6080_v5, 1  ;;  %v6557_v5 = vld [vmem:[#allocation14 + $0x11d8] sm:$0xff] }
0x16d2   : > { %6221 = vmatpush.msrb.mxu1 %v6171_v12  ;;  %6369 = vmatpush.msra.mxu0 %v6282_v11  ;;  %v6232_v11 = vld [vmem:[#allocation19 + $0xe8] sm:$0xff] }
0x16d4   : > { %6222 = vmatpush.msrb.mxu1 %v6168_v13  ;;  %6370 = vmatpush.msra.mxu0 %v6280_v34  ;;  %v6241_v34 = vld [vmem:[#allocation20 + $0xe8] sm:$0xff] }
0x16d5   : > { %9128 = vmatmul.msk.f32.vlgmr.msrb.gmra.mxu1 %vm1199_vm0, %v6077_v17  ;;  %v6240_v17 = vld [vmem:[#allocation20 + $0xe0] sm:$0xff] }
0x16d6   : > { %6391 = vmatpush.msra.mxu1 %v6316_v21  ;;  %6371 = vmatpush.msra.mxu0 %v6278_v16  ;;  %v6233_v21 = vld [vmem:[#allocation19 + $0xf0] sm:$0xff] }
0x16d7   : > { %9127 = vmatmul.msk.f32.gmra.mxu0 %vm1199_vm0, %v6078_v18 }
0x16d8   : > { %6392 = vmatpush.msra.mxu1 %v6314_v19  ;;  %6372 = vmatpush.msra.mxu0 %v6276_v27  ;;  %v6242_v19 = vld [vmem:[#allocation20 + $0xf0] sm:$0xff] }
0x16da   : > { %6393 = vmatpush.msra.mxu1 %v6312_v23  ;;  %6373 = vmatpush.msra.mxu0 %v6274_v25 }
0x16dc   : > { %6394 = vmatpush.msra.mxu1 %v6310_v26  ;;  %6374 = vmatpush.msra.mxu0 %v6272_v15 }
0x16dd   : > { %9129 = vmatmul.msk.f32.gmra.mxu1 %vm1199_vm0, %v6078_v18 }
0x16de   : > { %6395 = vmatpush.msra.mxu1 %v6308_v30  ;;  %6375 = vmatpush.msra.mxu0 %v6270_v31  ;;  %v6234_v30 = vld [vmem:[#allocation19 + $0xf8] sm:$0xff] }
0x16e0   : > { %6396 = vmatpush.msra.mxu1 %v6306_v32  ;;  %6376 = vmatpush.msra.mxu0 %v6268_v49  ;;  %v6243_v32 = vld [vmem:[#allocation20 + $0xf8] sm:$0xff] }
0x16e2   : > { %6397 = vmatpush.msra.mxu1 %v6304_v33  ;;  %6377 = vmatpush.msra.mxu0 %v6266_v41  ;;  %v6560_v41 = vld [vmem:[#allocation14 + $0x11f0] sm:$0xff] }
0x16e4   : > { %6398 = vmatpush.msra.mxu1 %v6302_v35  ;;  %6378 = vmatpush.msra.mxu0 %v6264_v46  ;;  %v6526_v46 = vld [vmem:[#allocation14 + $0x10e0] sm:$0xff] }
0x16e6   : > { %6399 = vmatpush.msra.mxu1 %v6300_v36  ;;  %6379 = vmatpush.msra.mxu0 %v6262_v50 }
0x16e8   : > { %6400 = vmatpush.msra.mxu1 %v6298_v29  ;;  %6380 = vmatpush.msra.mxu0 %v6260_v56  ;;  %v6558_v29 = vld [vmem:[#allocation14 + $0x11e0] sm:$0xff]  ;;  %v6520_v56 = vld [vmem:[#allocation14 + $0x10b0] sm:$0xff] }
0x16ea   : > { %6401 = vmatpush.msra.mxu1 %v6296_v47  ;;  %6381 = vmatpush.msra.mxu0 %v6258_v20 }
0x16ec   : > { %6402 = vmatpush.msra.mxu1 %v6294_v10  ;;  %6382 = vmatpush.msra.mxu0 %v6256_v6  ;;  %v6552_v10 = vld [vmem:[#allocation14 + $0x11b0] sm:$0xff]  ;;  %v6318_v6 = vld [vmem:[#allocation23 + $0x70] sm:$0xff] }
0x16ee   : > { %6403 = vmatpush.msra.mxu1 %v6292_v53  ;;  %6383 = vmatpush.msra.mxu0 %v6254_v14  ;;  %v6559_v14 = vld [vmem:[#allocation14 + $0x11e8] sm:$0xff] }
0x16f0   : > { %6404 = vmatpush.msra.mxu1 %v6290_v2  ;;  %6567 = vmatpush.msrb.mxu0 %v6528_v54  ;;  %v6546_v2 = vld [vmem:[#allocation14 + $0x1180] sm:$0xff]  ;;  %v6509_v54 = vld [vmem:[#allocation14 + $0x1058] sm:$0xff] }
0x16f2   : > { %6405 = vmatpush.msra.mxu1 %v6288_v59  ;;  %6568 = vmatpush.msrb.mxu0 %v6526_v46  ;;  %v6535_v46 = vld [vmem:[#allocation14 + $0x1128] sm:$0xff] }
0x16f4   : > { %6406 = vmatpush.msra.mxu1 %v6286_v63  ;;  %6569 = vmatpush.msrb.mxu0 %v6524_v28  ;;  %v6507_v28 = vld [vmem:[#allocation14 + $0x1048] sm:$0xff] }
0x16f6   : > { %6590 = vmatpush.msrb.mxu1 %v6560_v41  ;;  %6570 = vmatpush.msrb.mxu0 %v6522_v0  ;;  %v6537_v41 = vld [vmem:[#allocation14 + $0x1138] sm:$0xff]  ;;  %v6530_v0 = vld [vmem:[#allocation14 + $0x1100] sm:$0xff] }
0x16f8   : > { %6591 = vmatpush.msrb.mxu1 %v6558_v29  ;;  %6571 = vmatpush.msrb.mxu0 %v6520_v56  ;;  %v6508_v29 = vld [vmem:[#allocation14 + $0x1050] sm:$0xff]  ;;  %v6531_v56 = vld [vmem:[#allocation14 + $0x1108] sm:$0xff] }
0x16fa   : > { %6592 = vmatpush.msrb.mxu1 %v6556_v42  ;;  %v6534_v42 = vld [vmem:[#allocation14 + $0x1120] sm:$0xff] }
0x16fc   : > { %6593 = vmatpush.msrb.mxu1 %v6554_v57  ;;  %v6532_v57 = vld [vmem:[#allocation14 + $0x1110] sm:$0xff] }
0x16fe   : > { %6594 = vmatpush.msrb.mxu1 %v6552_v10  ;;  %v6504_v10 = vld [vmem:[#allocation14 + $0x1030] sm:$0xff] }
0x1700   : > { %6595 = vmatpush.msrb.mxu1 %v6550_v43  ;;  %v6505_v43 = vld [vmem:[#allocation14 + $0x1038] sm:$0xff] }
0x1702   : > { %6596 = vmatpush.msrb.mxu1 %v6548_v55  ;;  %v6500_v55 = vld [vmem:[#allocation14 + $0x1010] sm:$0xff] }
0x1704   : > { %6597 = vmatpush.msrb.mxu1 %v6546_v2  ;;  %v6498_v2 = vld [vmem:[#allocation14 + $0x1000] sm:$0xff] }
0x174c   : > { %v6201_v3 = vpop.f32.mrf.mxu0 }
0x174d   : > { %v6202_v22 = vadd.f32 %v6201_v3, %v6174_v1  ;;  %v6529_v3 = vld [vmem:[#allocation14 + $0x10f8] sm:$0xff] }
0x174f   : > { %v6235_v7 = vmul.f32 %v6231_v4, %v6202_v22  ;;  %v6555_v4 = vld [vmem:[#allocation14 + $0x11c8] sm:$0xff]  ;;  %v6319_v22 = vld [vmem:[#allocation23 + $0x78] sm:$0xff] }
0x1751   : > { %v6244_v24 = vadd.f32 %v6240_v17, %v6235_v7  ;;  %v6527_v17 = vld [vmem:[#allocation14 + $0x10e8] sm:$0xff]  ;;  %v6553_v7 = vld [vmem:[#allocation14 + $0x11b8] sm:$0xff] }
0x1752   : > { %v6224_v9 = vpop.f32.mrf.mxu1 }
0x1753   : > { %9561 = vtanh.f32 %v6244_v24  ;;  %v6225_v12 = vadd.f32 %v6224_v9, %v6175_v8  ;;  %v6551_v24 = vld [vmem:[#allocation14 + $0x11a8] sm:$0xff] }
0x1754   : > { %v6204_v13 = vpop.f32.mrf.mxu0  ;;  %v6523_v9 = vld [vmem:[#allocation14 + $0x10c8] sm:$0xff] }
0x1755   : > { %v6236_v16 = vmul.f32 %v6232_v11, %v6225_v12  ;;  %v6205_v18 = vadd.f32 %v6204_v13, %v6174_v1  ;;  %v6549_v11 = vld [vmem:[#allocation14 + $0x1198] sm:$0xff]  ;;  %v6518_v13 = vld [vmem:[#allocation14 + $0x10a0] sm:$0xff] }
0x1756   : > { %v6521_v12 = vld [vmem:[#allocation14 + $0x10b8] sm:$0xff]  ;;  %6572 = vmatpush.msrb.mxu0 %v6518_v13 }
0x1757   : > { %v6245_v27 = vadd.f32 %v6241_v34, %v6236_v16  ;;  %v6237_v23 = vmul.f32 %v6233_v21, %v6205_v18  ;;  %v6547_v34 = vld [vmem:[#allocation14 + $0x1188] sm:$0xff]  ;;  %v6544_v21 = vld [vmem:[#allocation14 + $0x1170] sm:$0xff]  ;;  %v6545_v18 = vld [vmem:[#allocation14 + $0x1178] sm:$0xff] }
0x1758   : > { %6598 = vmatpush.msrb.mxu1 %v6544_v21  ;;  %v6519_v16 = vld [vmem:[#allocation14 + $0x10a8] sm:$0xff] }
0x1759   : > { %v9562_v25 = vpop.eup %9561  ;;  %9563 = vtanh.f32 %v6245_v27  ;;  %v6246_v26 = vadd.f32 %v6242_v19, %v6237_v23  ;;  %v6516_v19 = vld [vmem:[#allocation14 + $0x1090] sm:$0xff]  ;;  %v6542_v27 = vld [vmem:[#allocation14 + $0x1160] sm:$0xff]  ;;  %v6517_v23 = vld [vmem:[#allocation14 + $0x1098] sm:$0xff] }
0x175a   : > { %v6227_v15 = vpop.f32.mrf.mxu1  ;;  %6338 = vmatmul.f32.vlgmr.msra.gmra.mxu2 %v9562_v25  ;;  %6384 = vmatmul.f32.vlgmr.msra.gmra.mxu0 %v9562_v25  ;;  %v6543_v25 = vld [vmem:[#allocation14 + $0x1168] sm:$0xff] }
0x175b   : > { %9565 = vtanh.f32 %v6246_v26  ;;  %v6228_v31 = vadd.f32 %v6227_v15, %v6175_v8  ;;  %v6525_v8 = vld [vmem:[#allocation14 + $0x10d8] sm:$0xff]  ;;  %6573 = vmatpush.msrb.mxu0 %v6516_v19  ;;  %6599 = vmatpush.msrb.mxu1 %v6542_v27  ;;  %v6514_v26 = vld [vmem:[#allocation14 + $0x1080] sm:$0xff]  ;;  %v6540_v15 = vld [vmem:[#allocation14 + $0x1150] sm:$0xff] }
0x175d   : > { %v6238_v49 = vmul.f32 %v6234_v30, %v6228_v31  ;;  %v6515_v30 = vld [vmem:[#allocation14 + $0x1088] sm:$0xff]  ;;  %6574 = vmatpush.msrb.mxu0 %v6514_v26  ;;  %6600 = vmatpush.msrb.mxu1 %v6540_v15  ;;  %v6541_v31 = vld [vmem:[#allocation14 + $0x1158] sm:$0xff] }
0x175f   : > { %v9564_v33 = vpop.eup %9563  ;;  %v6247_v35 = vadd.f32 %v6243_v32, %v6238_v49  ;;  %v6512_v32 = vld [vmem:[#allocation14 + $0x1070] sm:$0xff]  ;;  %v6538_v49 = vld [vmem:[#allocation14 + $0x1140] sm:$0xff] }
0x1760   : > { %6361 = vmatmul.f32.vlgmr.msrb.gmra.mxu3 %v9564_v33  ;;  %6407 = vmatmul.f32.vlgmr.msra.gmra.mxu1 %v9564_v33  ;;  %v6513_v33 = vld [vmem:[#allocation14 + $0x1078] sm:$0xff] }
0x1761   : > { %v9566_v36 = vpop.eup %9565  ;;  %9567 = vtanh.f32 %v6247_v35  ;;  %6575 = vmatpush.msrb.mxu0 %v6512_v32  ;;  %6601 = vmatpush.msrb.mxu1 %v6538_v49  ;;  %v6539_v35 = vld [vmem:[#allocation14 + $0x1148] sm:$0xff] }
0x1762   : > { %6341 = vmatmul.f32.gmra.mxu2 %v9566_v36  ;;  %6387 = vmatmul.f32.gmra.mxu0 %v9566_v36  ;;  %v6510_v36 = vld [vmem:[#allocation14 + $0x1060] sm:$0xff] }
0x1763   : > { %6576 = vmatpush.msrb.mxu0 %v6510_v36  ;;  %v6799_v36 = vld [vmem:[#allocation22 + $0x11e0] sm:$0xff] }
0x1765   : > { %6577 = vmatpush.msrb.mxu0 %v6508_v29  ;;  %v6763_v29 = vld [vmem:[#allocation22 + $0x10c0] sm:$0xff] }
0x1767   : > { %v9568_v37 = vpop.eup %9567 }
0x1768   : > { %6364 = vmatmul.f32.gmra.mxu3 %v9568_v37  ;;  %6410 = vmatmul.f32.gmra.mxu1 %v9568_v37  ;;  %v6536_v37 = vld [vmem:[#allocation14 + $0x1130] sm:$0xff] }
0x1769   : > { %6602 = vmatpush.msrb.mxu1 %v6536_v37  ;;  %v6765_v37 = vld [vmem:[#allocation22 + $0x10d0] sm:$0xff] }
0x176b   : > { %6603 = vmatpush.msrb.mxu1 %v6534_v42  ;;  %v6795_v42 = vld [vmem:[#allocation22 + $0x11c0] sm:$0xff] }
0x176d   : > { %6604 = vmatpush.msrb.mxu1 %v6532_v57  ;;  %v6791_v57 = vld [vmem:[#allocation22 + $0x11a0] sm:$0xff] }
0x176f   : > { %6605 = vmatpush.msrb.mxu1 %v6530_v0 }
0x17d7   : > { %v6385_v44 = vpop.f32.mrf.mxu0 }
0x17dd   : > { %v6408_v47 = vpop.f32.mrf.mxu1  ;;  %v6339_v50 = vpop.f32.mrf.mxu2 }
0x17de   : > { %v6409_v48 = vadd.f32 %v6408_v47, %v6385_v44  ;;  %v6511_v44 = vld [vmem:[#allocation14 + $0x1068] sm:$0xff]  ;;  %v6506_v47 = vld [vmem:[#allocation14 + $0x1040] sm:$0xff] }
0x17df   : > { %v6388_v51 = vpop.f32.mrf.mxu0  ;;  %6578 = vmatpush.msrb.mxu0 %v6506_v47  ;;  %v6759_v47 = vld [vmem:[#allocation22 + $0x10a0] sm:$0xff] }
0x17e1   : > { %6579 = vmatpush.msrb.mxu0 %v6504_v10  ;;  %v6789_v10 = vld [vmem:[#allocation22 + $0x1190] sm:$0xff] }
0x17e3   : > { %v6362_v53 = vpop.f32.mrf.mxu3 }
0x17e4   : > { %v6363_v1 = vadd.f32 %v6362_v53, %v6339_v50  ;;  %v6533_v50 = vld [vmem:[#allocation14 + $0x1118] sm:$0xff]  ;;  %v6502_v53 = vld [vmem:[#allocation14 + $0x1020] sm:$0xff] }
0x17e5   : > { %v6411_v20 = vpop.f32.mrf.mxu1  ;;  %v6342_v59 = vpop.f32.mrf.mxu2  ;;  %6580 = vmatpush.msrb.mxu0 %v6502_v53 }
0x17e6   : > { %v6412_v58 = vadd.f32 %v6411_v20, %v6388_v51  ;;  %v6503_v51 = vld [vmem:[#allocation14 + $0x1028] sm:$0xff]  ;;  %v6501_v20 = vld [vmem:[#allocation14 + $0x1018] sm:$0xff] }
0x17e7   : > { %6581 = vmatpush.msrb.mxu0 %v6500_v55  ;;  %v6753_v55 = vld [vmem:[#allocation22 + $0x1070] sm:$0xff] }
0x17e8   : > { %6462 = vmatpush.msra.mxu3 %v6412_v58  ;;  %v6499_v58 = vld [vmem:[#allocation14 + $0x1008] sm:$0xff] }
0x17e9   : > { %6582 = vmatpush.msrb.mxu0 %v6498_v2  ;;  %v6563_v2 = vld [vmem:[#allocation16 + $0x80] sm:$0xff] }
0x17ea   : > { %6463 = vmatpush.msra.mxu3 %v6409_v48  ;;  %v6321_v48 = vld [vmem:[#allocation25 + $0xe] sm:$0x3] }
0x17eb   : > { %v6365_v62 = vpop.f32.mrf.mxu3  ;;  %9132 = vmatmul.msk.f32.vlgmr.msra.gmra.mxu3 %vm1199_vm0, %v6318_v6 }
0x17ec   : > { %v6366_v63 = vadd.f32 %v6365_v62, %v6342_v59  ;;  %6636 = vmatpush.msrb.mxu3 %v6561_v61  ;;  %v6473_v61 = vld [vmem:[#allocation26 + $0xe8] sm:$0xff] }
0x17ee   : > { %6439 = vmatpush.msrb.mxu2 %v6366_v63  ;;  %6637 = vmatpush.msrb.mxu3 %v6559_v14  ;;  %v6482_v14 = vld [vmem:[#allocation28 + $0xe8] sm:$0xff] }
0x17f0   : > { %6440 = vmatpush.msrb.mxu2 %v6363_v1  ;;  %6638 = vmatpush.msrb.mxu3 %v6557_v5  ;;  %v6415_v5 = vperm.slane %v6321_v48, 0 }
0x17f1   : > { %9130 = vmatmul.msk.f32.vlgmr.msrb.gmra.mxu2 %vm1199_vm0, %v6318_v6  ;;  %v6416_v6 = vperm.slane %v6321_v48, 1  ;;  %v6770_v48 = vld [vmem:[#allocation22 + $0x10f8] sm:$0xff] }
0x17f2   : > { %6613 = vmatpush.msra.mxu2 %v6529_v3  ;;  %6639 = vmatpush.msrb.mxu3 %v6555_v4  ;;  %v6472_v4 = vld [vmem:[#allocation26 + $0xe0] sm:$0xff] }
0x17f3   : > { %9133 = vmatmul.msk.f32.gmra.mxu3 %vm1199_vm0, %v6319_v22 }
0x17f4   : > { %6614 = vmatpush.msra.mxu2 %v6527_v17  ;;  %6640 = vmatpush.msrb.mxu3 %v6553_v7  ;;  %v6481_v17 = vld [vmem:[#allocation28 + $0xe0] sm:$0xff] }
0x17f6   : > { %6615 = vmatpush.msra.mxu2 %v6525_v8  ;;  %6641 = vmatpush.msrb.mxu3 %v6551_v24  ;;  %v6475_v8 = vld [vmem:[#allocation26 + $0xf8] sm:$0xff] }
0x17f8   : > { %6616 = vmatpush.msra.mxu2 %v6523_v9  ;;  %6642 = vmatpush.msrb.mxu3 %v6549_v11  ;;  %v6484_v11 = vld [vmem:[#allocation28 + $0xf8] sm:$0xff] }
0x17f9   : > { %9131 = vmatmul.msk.f32.gmra.mxu2 %vm1199_vm0, %v6319_v22 }
0x17fa   : > { %6617 = vmatpush.msra.mxu2 %v6521_v12  ;;  %6643 = vmatpush.msrb.mxu3 %v6547_v34 }
0x17fc   : > { %6618 = vmatpush.msra.mxu2 %v6519_v16  ;;  %6644 = vmatpush.msrb.mxu3 %v6545_v18  ;;  %v6474_v18 = vld [vmem:[#allocation26 + $0xf0] sm:$0xff] }
0x17fe   : > { %6619 = vmatpush.msra.mxu2 %v6517_v23  ;;  %6645 = vmatpush.msrb.mxu3 %v6543_v25  ;;  %v6483_v23 = vld [vmem:[#allocation28 + $0xf0] sm:$0xff] }
0x1800   : > { %6620 = vmatpush.msra.mxu2 %v6515_v30  ;;  %6646 = vmatpush.msrb.mxu3 %v6541_v31 }
0x1802   : > { %6621 = vmatpush.msra.mxu2 %v6513_v33  ;;  %6647 = vmatpush.msrb.mxu3 %v6539_v35  ;;  %v6801_v33 = vld [vmem:[#allocation22 + $0x11f0] sm:$0xff]  ;;  %v6767_v35 = vld [vmem:[#allocation22 + $0x10e0] sm:$0xff] }
0x1804   : > { %6622 = vmatpush.msra.mxu2 %v6511_v44  ;;  %6648 = vmatpush.msrb.mxu3 %v6537_v41  ;;  %v6797_v44 = vld [vmem:[#allocation22 + $0x11d0] sm:$0xff] }
0x1806   : > { %6623 = vmatpush.msra.mxu2 %v6509_v54  ;;  %6649 = vmatpush.msrb.mxu3 %v6535_v46  ;;  %v6793_v54 = vld [vmem:[#allocation22 + $0x11b0] sm:$0xff] }
0x1808   : > { %6624 = vmatpush.msra.mxu2 %v6507_v28  ;;  %6650 = vmatpush.msrb.mxu3 %v6533_v50  ;;  %v6757_v50 = vld [vmem:[#allocation22 + $0x1090] sm:$0xff] }
0x180a   : > { %6625 = vmatpush.msra.mxu2 %v6505_v43  ;;  %6651 = vmatpush.msrb.mxu3 %v6531_v56  ;;  %v6755_v56 = vld [vmem:[#allocation22 + $0x1080] sm:$0xff] }
0x180c   : > { %6626 = vmatpush.msra.mxu2 %v6503_v51  ;;  %6831 = vmatpush.msra.mxu3 %v6801_v33  ;;  %v6787_v51 = vld [vmem:[#allocation22 + $0x1180] sm:$0xff] }
0x180d   : > { %v6779_v33 = vld [vmem:[#allocation22 + $0x1140] sm:$0xff] }
0x180e   : > { %6627 = vmatpush.msra.mxu2 %v6501_v20  ;;  %6832 = vmatpush.msra.mxu3 %v6799_v36  ;;  %v6780_v36 = vld [vmem:[#allocation22 + $0x1148] sm:$0xff] }
0x1810   : > { %6628 = vmatpush.msra.mxu2 %v6499_v58  ;;  %6833 = vmatpush.msra.mxu3 %v6797_v44  ;;  %v6785_v58 = vld [vmem:[#allocation22 + $0x1170] sm:$0xff]  ;;  %v6746_v44 = vld [vmem:[#allocation22 + $0x1038] sm:$0xff] }
0x1812   : > { %6834 = vmatpush.msra.mxu3 %v6795_v42  ;;  %v6775_v42 = vld [vmem:[#allocation22 + $0x1120] sm:$0xff] }
0x1814   : > { %6835 = vmatpush.msra.mxu3 %v6793_v54  ;;  %v6776_v54 = vld [vmem:[#allocation22 + $0x1128] sm:$0xff] }
0x1816   : > { %6836 = vmatpush.msra.mxu3 %v6791_v57  ;;  %v6742_v57 = vld [vmem:[#allocation22 + $0x1018] sm:$0xff] }
0x1818   : > { %6837 = vmatpush.msra.mxu3 %v6789_v10  ;;  %v6771_v10 = vld [vmem:[#allocation22 + $0x1100] sm:$0xff] }
0x181a   : > { %6838 = vmatpush.msra.mxu3 %v6787_v51 }
0x181c   : > { %6839 = vmatpush.msra.mxu3 %v6785_v58 }
0x186e   : > { %v6465_v59 = vpop.f32.mrf.mxu3 }
0x186f   : > { %v6466_v62 = vadd.f32 %v6465_v59, %v6416_v6 }
0x1871   : > { %v6477_v63 = vmul.f32 %v6473_v61, %v6466_v62  ;;  %v6768_v61 = vld [vmem:[#allocation22 + $0x10e8] sm:$0xff] }
0x1873   : > { %v6486_v1 = vadd.f32 %v6482_v14, %v6477_v63  ;;  %v6766_v14 = vld [vmem:[#allocation22 + $0x10d8] sm:$0xff] }
0x1874   : > { %v6442_v3 = vpop.f32.mrf.mxu2 }
0x1875   : > { %9569 = vtanh.f32 %v6486_v1  ;;  %v6443_v22 = vadd.f32 %v6442_v3, %v6415_v5  ;;  %v6764_v1 = vld [vmem:[#allocation22 + $0x10c8] sm:$0xff]  ;;  %v6564_v3 = vld [vmem:[#allocation16 + $0x88] sm:$0xff] }
0x1876   : > { %v6468_v7 = vpop.f32.mrf.mxu3 }
0x1877   : > { %v6476_v24 = vmul.f32 %v6472_v4, %v6443_v22  ;;  %v6469_v9 = vadd.f32 %v6468_v7, %v6416_v6  ;;  %v6800_v4 = vld [vmem:[#allocation22 + $0x11e8] sm:$0xff]  ;;  %v6762_v22 = vld [vmem:[#allocation22 + $0x10b8] sm:$0xff] }
0x1878   : > { %v6760_v7 = vld [vmem:[#allocation22 + $0x10a8] sm:$0xff] }
0x1879   : > { %v6485_v12 = vadd.f32 %v6481_v17, %v6476_v24  ;;  %v6479_v34 = vmul.f32 %v6475_v8, %v6469_v9  ;;  %v6798_v17 = vld [vmem:[#allocation22 + $0x11d8] sm:$0xff]  ;;  %v6796_v8 = vld [vmem:[#allocation22 + $0x11c8] sm:$0xff] }
0x187a   : > { %v6758_v24 = vld [vmem:[#allocation22 + $0x1098] sm:$0xff] }
0x187b   : > { %v9570_v13 = vpop.eup %9569  ;;  %9571 = vtanh.f32 %v6485_v12  ;;  %v6488_v21 = vadd.f32 %v6484_v11, %v6479_v34  ;;  %v6794_v9 = vld [vmem:[#allocation22 + $0x11b8] sm:$0xff]  ;;  %v6756_v11 = vld [vmem:[#allocation22 + $0x1088] sm:$0xff] }
0x187c   : > { %v6445_v16 = vpop.f32.mrf.mxu2  ;;  %v11952_v19 = vadd.f32 %v9570_v13, %v11924_v40  ;;  %v6792_v12 = vld [vmem:[#allocation22 + $0x11a8] sm:$0xff]  ;;  %v6754_v34 = vld [vmem:[#allocation22 + $0x1078] sm:$0xff] }
0x187d   : > { %9573 = vtanh.f32 %v6488_v21  ;;  %v6446_v27 = vadd.f32 %v6445_v16, %v6415_v5  ;;  %v6802_v5 = vld [vmem:[#allocation22 + $0x11f8] sm:$0xff]  ;;  %v6788_v21 = vld [vmem:[#allocation22 + $0x1188] sm:$0xff] }
0x187e   : > { %6606 = vmatmul.f32.vlgmr.msrb.gmra.mxu1 %v11952_v19  ;;  %6652 = vmatmul.f32.vlgmr.msrb.gmra.mxu3 %v11952_v19  ;;  %v6790_v13 = vld [vmem:[#allocation22 + $0x1198] sm:$0xff] }
0x187f   : > { %v6478_v25 = vmul.f32 %v6474_v18, %v6446_v27  ;;  %v6786_v16 = vld [vmem:[#allocation22 + $0x1178] sm:$0xff]  ;;  %v6751_v18 = vld [vmem:[#allocation22 + $0x1060] sm:$0xff] }
0x1880   : > { %v6783_v27 = vld [vmem:[#allocation22 + $0x1160] sm:$0xff] }
0x1881   : > { %v9572_v26 = vpop.eup %9571  ;;  %v6487_v15 = vadd.f32 %v6483_v23, %v6478_v25  ;;  %6840 = vmatpush.msra.mxu3 %v6783_v27  ;;  %v6752_v23 = vld [vmem:[#allocation22 + $0x1068] sm:$0xff] }
0x1882   : > { %v11957_v30 = vadd.f32 %v9572_v26, %v11929_v45  ;;  %v6769_v45 = vld [vmem:[#allocation22 + $0x10f0] sm:$0xff]  ;;  %v6784_v25 = vld [vmem:[#allocation22 + $0x1168] sm:$0xff] }
0x1883   : > { %v9574_v31 = vpop.eup %9573  ;;  %9575 = vtanh.f32 %v6487_v15  ;;  %6808 = vmatpush.msrb.mxu2 %v6769_v45  ;;  %v6749_v26 = vld [vmem:[#allocation22 + $0x1050] sm:$0xff]  ;;  %v6747_v45 = vld [vmem:[#allocation22 + $0x1040] sm:$0xff] }
0x1884   : > { %6583 = vmatmul.f32.vlgmr.msrb.gmra.mxu0 %v11957_v30  ;;  %6629 = vmatmul.f32.vlgmr.msra.gmra.mxu2 %v11957_v30  ;;  %v11962_v40 = vadd.f32 %v9574_v31, %v11934_v52  ;;  %v6781_v15 = vld [vmem:[#allocation22 + $0x1150] sm:$0xff]  ;;  %v6750_v31 = vld [vmem:[#allocation22 + $0x1058] sm:$0xff] }
0x1885   : > { %6809 = vmatpush.msrb.mxu2 %v6767_v35  ;;  %6841 = vmatpush.msra.mxu3 %v6781_v15  ;;  %v6748_v35 = vld [vmem:[#allocation22 + $0x1048] sm:$0xff]  ;;  %v7014_v15 = vld [vmem:[#allocation14 + $0x12f0] sm:$0xff] }
0x1886   : > { %6609 = vmatmul.f32.gmra.mxu1 %v11962_v40  ;;  %6655 = vmatmul.f32.gmra.mxu3 %v11962_v40 }
0x1887   : > { %6810 = vmatpush.msrb.mxu2 %v6765_v37  ;;  %6842 = vmatpush.msra.mxu3 %v6779_v33  ;;  %v6777_v37 = vld [vmem:[#allocation22 + $0x1130] sm:$0xff]  ;;  %v7010_v33 = vld [vmem:[#allocation14 + $0x12d0] sm:$0xff] }
0x1889   : > { %v9576_v32 = vpop.eup %9575  ;;  %6811 = vmatpush.msrb.mxu2 %v6763_v29  ;;  %6843 = vmatpush.msra.mxu3 %v6777_v37  ;;  %v6743_v29 = vld [vmem:[#allocation22 + $0x1020] sm:$0xff]  ;;  %v7036_v37 = vld [vmem:[#allocation14 + $0x13a0] sm:$0xff] }
0x188a   : > { %v11967_v49 = vadd.f32 %v9576_v32, %v11939_v60  ;;  %v6761_v60 = vld [vmem:[#allocation22 + $0x10b0] sm:$0xff]  ;;  %v6782_v32 = vld [vmem:[#allocation22 + $0x1158] sm:$0xff] }
0x188b   : > { %6812 = vmatpush.msrb.mxu2 %v6761_v60  ;;  %6844 = vmatpush.msra.mxu3 %v6775_v42  ;;  %v6744_v60 = vld [vmem:[#allocation22 + $0x1028] sm:$0xff]  ;;  %v7034_v42 = vld [vmem:[#allocation14 + $0x1390] sm:$0xff] }
0x188c   : > { %6586 = vmatmul.f32.gmra.mxu0 %v11967_v49  ;;  %6632 = vmatmul.f32.gmra.mxu2 %v11967_v49 }
0x188d   : > { %6813 = vmatpush.msrb.mxu2 %v6759_v47  ;;  %v6773_v47 = vld [vmem:[#allocation22 + $0x1110] sm:$0xff] }
0x188e   : > { %6845 = vmatpush.msra.mxu3 %v6773_v47 }
0x188f   : > { %6814 = vmatpush.msrb.mxu2 %v6757_v50  ;;  %v6739_v50 = vld [vmem:[#allocation22 + $0x1000] sm:$0xff] }
0x1890   : > { %6846 = vmatpush.msra.mxu3 %v6771_v10 }
0x1891   : > { %6815 = vmatpush.msrb.mxu2 %v6755_v56  ;;  %v6566_v56 = vld [vmem:[#allocation17 + $0x10] sm:$0x3] }
0x1893   : > { %6816 = vmatpush.msrb.mxu2 %v6753_v55  ;;  %v6717_v55 = vld [vmem:[#allocation19 + $0x100] sm:$0xff] }
0x1895   : > { %6817 = vmatpush.msrb.mxu2 %v6751_v18 }
0x1897   : > { %6818 = vmatpush.msrb.mxu2 %v6749_v26  ;;  %v7042_v26 = vld [vmem:[#allocation14 + $0x13d0] sm:$0xff] }
0x1899   : > { %6819 = vmatpush.msrb.mxu2 %v6747_v45  ;;  %v7040_v45 = vld [vmem:[#allocation14 + $0x13c0] sm:$0xff] }
0x18fb   : > { %v6607_v52 = vpop.f32.mrf.mxu1 }
0x1901   : > { %v6584_v41 = vpop.f32.mrf.mxu0  ;;  %v6653_v46 = vpop.f32.mrf.mxu3 }
0x1902   : > { %v6608_v20 = vadd.f32 %v6607_v52, %v6584_v41  ;;  %v6745_v52 = vld [vmem:[#allocation22 + $0x1030] sm:$0xff]  ;;  %v6778_v41 = vld [vmem:[#allocation22 + $0x1138] sm:$0xff] }
0x1903   : > { %v6610_v0 = vpop.f32.mrf.mxu1  ;;  %6820 = vmatpush.msrb.mxu2 %v6745_v52  ;;  %v7008_v52 = vld [vmem:[#allocation14 + $0x12c0] sm:$0xff] }
0x1905   : > { %6821 = vmatpush.msrb.mxu2 %v6743_v29 }
0x1907   : > { %v6630_v28 = vpop.f32.mrf.mxu2 }
0x1908   : > { %v6654_v63 = vadd.f32 %v6653_v46, %v6630_v28  ;;  %v6741_v46 = vld [vmem:[#allocation22 + $0x1010] sm:$0xff]  ;;  %v6774_v28 = vld [vmem:[#allocation22 + $0x1118] sm:$0xff] }
0x1909   : > { %v6587_v43 = vpop.f32.mrf.mxu0  ;;  %v6656_v6 = vpop.f32.mrf.mxu3  ;;  %6822 = vmatpush.msrb.mxu2 %v6741_v46 }
0x190a   : > { %v6611_v53 = vadd.f32 %v6610_v0, %v6587_v43  ;;  %v6740_v0 = vld [vmem:[#allocation22 + $0x1008] sm:$0xff] }
0x190b   : > { %6823 = vmatpush.msrb.mxu2 %v6739_v50  ;;  %v6772_v43 = vld [vmem:[#allocation22 + $0x1108] sm:$0xff]  ;;  %v7047_v50 = vld [vmem:[#allocation14 + $0x13f8] sm:$0xff] }
0x190c   : > { %6684 = vmatpush.msra.mxu0 %v6611_v53  ;;  %v6660_v53 = vperm.slane %v6566_v56, 0 }
0x190e   : > { %6685 = vmatpush.msra.mxu0 %v6608_v20 }
0x190f   : > { %v6633_v59 = vpop.f32.mrf.mxu2  ;;  %9134 = vmatmul.msk.f32.vlgmr.msra.gmra.mxu0 %vm1199_vm0, %v6563_v2 }
0x1910   : > { %v6657_v62 = vadd.f32 %v6656_v6, %v6633_v59  ;;  %6854 = vmatpush.msrb.mxu0 %v6770_v48  ;;  %v6661_v48 = vperm.slane %v6566_v56, 1  ;;  %v7043_v56 = vld [vmem:[#allocation14 + $0x13d8] sm:$0xff] }
0x1912   : > { %6707 = vmatpush.msra.mxu1 %v6657_v62  ;;  %6855 = vmatpush.msrb.mxu0 %v6768_v61  ;;  %v6718_v61 = vld [vmem:[#allocation19 + $0x108] sm:$0xff] }
0x1914   : > { %6708 = vmatpush.msra.mxu1 %v6654_v63  ;;  %6856 = vmatpush.msrb.mxu0 %v6766_v14  ;;  %v6727_v14 = vld [vmem:[#allocation20 + $0x108] sm:$0xff] }
0x1915   : > { %9136 = vmatmul.msk.f32.vlgmr.msra.gmra.mxu1 %vm1199_vm0, %v6563_v2  ;;  %v6726_v2 = vld [vmem:[#allocation20 + $0x100] sm:$0xff] }
0x1916   : > { %6877 = vmatpush.msrb.mxu1 %v6802_v5  ;;  %6857 = vmatpush.msrb.mxu0 %v6764_v1  ;;  %v6719_v5 = vld [vmem:[#allocation19 + $0x110] sm:$0xff] }
0x1917   : > { %9135 = vmatmul.msk.f32.gmra.mxu0 %vm1199_vm0, %v6564_v3 }
0x1918   : > { %6878 = vmatpush.msrb.mxu1 %v6800_v4  ;;  %6858 = vmatpush.msrb.mxu0 %v6762_v22  ;;  %v6728_v4 = vld [vmem:[#allocation20 + $0x110] sm:$0xff] }
0x191a   : > { %6879 = vmatpush.msrb.mxu1 %v6798_v17  ;;  %6859 = vmatpush.msrb.mxu0 %v6760_v7 }
0x191c   : > { %6880 = vmatpush.msrb.mxu1 %v6796_v8  ;;  %6860 = vmatpush.msrb.mxu0 %v6758_v24 }
0x191d   : > { %9137 = vmatmul.msk.f32.gmra.mxu1 %vm1199_vm0, %v6564_v3 }
0x191e   : > { %6881 = vmatpush.msrb.mxu1 %v6794_v9  ;;  %6861 = vmatpush.msrb.mxu0 %v6756_v11  ;;  %v6720_v9 = vld [vmem:[#allocation19 + $0x118] sm:$0xff] }
0x1920   : > { %6882 = vmatpush.msrb.mxu1 %v6792_v12  ;;  %6862 = vmatpush.msrb.mxu0 %v6754_v34  ;;  %v6729_v12 = vld [vmem:[#allocation20 + $0x118] sm:$0xff] }
0x1922   : > { %6883 = vmatpush.msrb.mxu1 %v6790_v13  ;;  %6863 = vmatpush.msrb.mxu0 %v6752_v23  ;;  %v7046_v23 = vld [vmem:[#allocation14 + $0x13f0] sm:$0xff] }
0x1924   : > { %6884 = vmatpush.msrb.mxu1 %v6788_v21  ;;  %6864 = vmatpush.msrb.mxu0 %v6750_v31  ;;  %v7012_v31 = vld [vmem:[#allocation14 + $0x12e0] sm:$0xff] }
0x1926   : > { %6885 = vmatpush.msrb.mxu1 %v6786_v16  ;;  %6865 = vmatpush.msrb.mxu0 %v6748_v35 }
0x1928   : > { %6886 = vmatpush.msrb.mxu1 %v6784_v25  ;;  %6866 = vmatpush.msrb.mxu0 %v6746_v44  ;;  %v7044_v25 = vld [vmem:[#allocation14 + $0x13e0] sm:$0xff]  ;;  %v7006_v44 = vld [vmem:[#allocation14 + $0x12b0] sm:$0xff] }
0x192a   : > { %6887 = vmatpush.msrb.mxu1 %v6782_v32  ;;  %6867 = vmatpush.msrb.mxu0 %v6744_v60 }
0x192c   : > { %6888 = vmatpush.msrb.mxu1 %v6780_v36  ;;  %6868 = vmatpush.msrb.mxu0 %v6742_v57  ;;  %v7038_v36 = vld [vmem:[#allocation14 + $0x13b0] sm:$0xff]  ;;  %v6804_v57 = vld [vmem:[#allocation23 + $0x80] sm:$0xff] }
0x192e   : > { %6889 = vmatpush.msrb.mxu1 %v6778_v41  ;;  %6869 = vmatpush.msrb.mxu0 %v6740_v0  ;;  %v7045_v0 = vld [vmem:[#allocation14 + $0x13e8] sm:$0xff] }
0x1930   : > { %6890 = vmatpush.msrb.mxu1 %v6776_v54  ;;  %7053 = vmatpush.msra.mxu0 %v7014_v15  ;;  %v7032_v54 = vld [vmem:[#allocation14 + $0x1380] sm:$0xff]  ;;  %v6995_v15 = vld [vmem:[#allocation14 + $0x1258] sm:$0xff] }
0x1932   : > { %6891 = vmatpush.msrb.mxu1 %v6774_v28  ;;  %7054 = vmatpush.msra.mxu0 %v7012_v31  ;;  %v7021_v31 = vld [vmem:[#allocation14 + $0x1328] sm:$0xff] }
0x1934   : > { %6892 = vmatpush.msrb.mxu1 %v6772_v43  ;;  %7055 = vmatpush.msra.mxu0 %v7010_v33  ;;  %v6993_v33 = vld [vmem:[#allocation14 + $0x1248] sm:$0xff] }
0x1936   : > { %7076 = vmatpush.msra.mxu1 %v7046_v23  ;;  %7056 = vmatpush.msra.mxu0 %v7008_v52  ;;  %v7023_v23 = vld [vmem:[#allocation14 + $0x1338] sm:$0xff]  ;;  %v7016_v52 = vld [vmem:[#allocation14 + $0x1300] sm:$0xff] }
0x1938   : > { %7077 = vmatpush.msra.mxu1 %v7044_v25  ;;  %7057 = vmatpush.msra.mxu0 %v7006_v44  ;;  %v6994_v25 = vld [vmem:[#allocation14 + $0x1250] sm:$0xff]  ;;  %v7017_v44 = vld [vmem:[#allocation14 + $0x1308] sm:$0xff] }
0x193a   : > { %7078 = vmatpush.msra.mxu1 %v7042_v26  ;;  %v7020_v26 = vld [vmem:[#allocation14 + $0x1320] sm:$0xff] }
0x193c   : > { %7079 = vmatpush.msra.mxu1 %v7040_v45  ;;  %v7018_v45 = vld [vmem:[#allocation14 + $0x1310] sm:$0xff] }
0x193e   : > { %7080 = vmatpush.msra.mxu1 %v7038_v36  ;;  %v6990_v36 = vld [vmem:[#allocation14 + $0x1230] sm:$0xff] }
0x1940   : > { %7081 = vmatpush.msra.mxu1 %v7036_v37  ;;  %v6991_v37 = vld [vmem:[#allocation14 + $0x1238] sm:$0xff] }
0x1942   : > { %7082 = vmatpush.msra.mxu1 %v7034_v42  ;;  %v6986_v42 = vld [vmem:[#allocation14 + $0x1210] sm:$0xff] }
0x1944   : > { %7083 = vmatpush.msra.mxu1 %v7032_v54  ;;  %v6984_v54 = vld [vmem:[#allocation14 + $0x1200] sm:$0xff] }
0x198c   : > { %v6687_v51 = vpop.f32.mrf.mxu0 }
0x198d   : > { %v6688_v20 = vadd.f32 %v6687_v51, %v6660_v53  ;;  %v7015_v51 = vld [vmem:[#allocation14 + $0x12f8] sm:$0xff] }
0x198f   : > { %v6721_v58 = vmul.f32 %v6717_v55, %v6688_v20  ;;  %v7041_v55 = vld [vmem:[#allocation14 + $0x13c8] sm:$0xff]  ;;  %v6805_v20 = vld [vmem:[#allocation23 + $0x88] sm:$0xff] }
0x1991   : > { %v6730_v6 = vadd.f32 %v6726_v2, %v6721_v58  ;;  %v7013_v2 = vld [vmem:[#allocation14 + $0x12e8] sm:$0xff]  ;;  %v7039_v58 = vld [vmem:[#allocation14 + $0x13b8] sm:$0xff] }
0x1992   : > { %v6710_v59 = vpop.f32.mrf.mxu1 }
0x1993   : > { %9577 = vtanh.f32 %v6730_v6  ;;  %v6711_v62 = vadd.f32 %v6710_v59, %v6661_v48  ;;  %v7037_v6 = vld [vmem:[#allocation14 + $0x13a8] sm:$0xff] }
0x1994   : > { %v6690_v63 = vpop.f32.mrf.mxu0  ;;  %v7009_v59 = vld [vmem:[#allocation14 + $0x12c8] sm:$0xff] }
0x1995   : > { %v6722_v1 = vmul.f32 %v6718_v61, %v6711_v62  ;;  %v6691_v3 = vadd.f32 %v6690_v63, %v6660_v53  ;;  %v7035_v61 = vld [vmem:[#allocation14 + $0x1398] sm:$0xff]  ;;  %v7004_v63 = vld [vmem:[#allocation14 + $0x12a0] sm:$0xff] }
0x1996   : > { %v7007_v62 = vld [vmem:[#allocation14 + $0x12b8] sm:$0xff]  ;;  %7058 = vmatpush.msra.mxu0 %v7004_v63 }
0x1997   : > { %v6731_v22 = vadd.f32 %v6727_v14, %v6722_v1  ;;  %v6723_v17 = vmul.f32 %v6719_v5, %v6691_v3  ;;  %v7033_v14 = vld [vmem:[#allocation14 + $0x1388] sm:$0xff]  ;;  %v7030_v5 = vld [vmem:[#allocation14 + $0x1370] sm:$0xff]  ;;  %v7031_v3 = vld [vmem:[#allocation14 + $0x1378] sm:$0xff] }
0x1998   : > { %7084 = vmatpush.msra.mxu1 %v7030_v5  ;;  %v7005_v1 = vld [vmem:[#allocation14 + $0x12a8] sm:$0xff] }
0x1999   : > { %v9578_v7 = vpop.eup %9577  ;;  %9579 = vtanh.f32 %v6731_v22  ;;  %v6732_v8 = vadd.f32 %v6728_v4, %v6723_v17  ;;  %v7002_v4 = vld [vmem:[#allocation14 + $0x1290] sm:$0xff]  ;;  %v7028_v22 = vld [vmem:[#allocation14 + $0x1360] sm:$0xff]  ;;  %v7003_v17 = vld [vmem:[#allocation14 + $0x1298] sm:$0xff] }
0x199a   : > { %v6713_v24 = vpop.f32.mrf.mxu1  ;;  %6824 = vmatmul.f32.vlgmr.msrb.gmra.mxu2 %v9578_v7  ;;  %6870 = vmatmul.f32.vlgmr.msrb.gmra.mxu0 %v9578_v7  ;;  %v7029_v7 = vld [vmem:[#allocation14 + $0x1368] sm:$0xff] }
0x199b   : > { %9581 = vtanh.f32 %v6732_v8  ;;  %v6714_v11 = vadd.f32 %v6713_v24, %v6661_v48  ;;  %v7011_v48 = vld [vmem:[#allocation14 + $0x12d8] sm:$0xff]  ;;  %7059 = vmatpush.msra.mxu0 %v7002_v4  ;;  %7085 = vmatpush.msra.mxu1 %v7028_v22  ;;  %v7000_v8 = vld [vmem:[#allocation14 + $0x1280] sm:$0xff]  ;;  %v7026_v24 = vld [vmem:[#allocation14 + $0x1350] sm:$0xff] }
0x199d   : > { %v6724_v34 = vmul.f32 %v6720_v9, %v6714_v11  ;;  %v7001_v9 = vld [vmem:[#allocation14 + $0x1288] sm:$0xff]  ;;  %7060 = vmatpush.msra.mxu0 %v7000_v8  ;;  %7086 = vmatpush.msra.mxu1 %v7026_v24  ;;  %v7027_v11 = vld [vmem:[#allocation14 + $0x1358] sm:$0xff] }
0x199f   : > { %v9580_v13 = vpop.eup %9579  ;;  %v6733_v21 = vadd.f32 %v6729_v12, %v6724_v34  ;;  %v6998_v12 = vld [vmem:[#allocation14 + $0x1270] sm:$0xff]  ;;  %v7024_v34 = vld [vmem:[#allocation14 + $0x1340] sm:$0xff] }
0x19a0   : > { %6847 = vmatmul.f32.vlgmr.msra.gmra.mxu3 %v9580_v13  ;;  %6893 = vmatmul.f32.vlgmr.msrb.gmra.mxu1 %v9580_v13  ;;  %v6999_v13 = vld [vmem:[#allocation14 + $0x1278] sm:$0xff] }
0x19a1   : > { %v9582_v16 = vpop.eup %9581  ;;  %9583 = vtanh.f32 %v6733_v21  ;;  %7061 = vmatpush.msra.mxu0 %v6998_v12  ;;  %7087 = vmatpush.msra.mxu1 %v7024_v34  ;;  %v7025_v21 = vld [vmem:[#allocation14 + $0x1348] sm:$0xff] }
0x19a2   : > { %6827 = vmatmul.f32.gmra.mxu2 %v9582_v16  ;;  %6873 = vmatmul.f32.gmra.mxu0 %v9582_v16  ;;  %v6996_v16 = vld [vmem:[#allocation14 + $0x1260] sm:$0xff] }
0x19a3   : > { %7062 = vmatpush.msra.mxu0 %v6996_v16  ;;  %v7285_v16 = vld [vmem:[#allocation22 + $0x13e0] sm:$0xff] }
0x19a5   : > { %7063 = vmatpush.msra.mxu0 %v6994_v25  ;;  %v7249_v25 = vld [vmem:[#allocation22 + $0x12c0] sm:$0xff] }
0x19a7   : > { %v9584_v18 = vpop.eup %9583 }
0x19a8   : > { %6850 = vmatmul.f32.gmra.mxu3 %v9584_v18  ;;  %6896 = vmatmul.f32.gmra.mxu1 %v9584_v18  ;;  %v7022_v18 = vld [vmem:[#allocation14 + $0x1330] sm:$0xff] }
0x19a9   : > { %7088 = vmatpush.msra.mxu1 %v7022_v18  ;;  %v7251_v18 = vld [vmem:[#allocation22 + $0x12d0] sm:$0xff] }
0x19ab   : > { %7089 = vmatpush.msra.mxu1 %v7020_v26  ;;  %v7281_v26 = vld [vmem:[#allocation22 + $0x13c0] sm:$0xff] }
0x19ad   : > { %7090 = vmatpush.msra.mxu1 %v7018_v45  ;;  %v7277_v45 = vld [vmem:[#allocation22 + $0x13a0] sm:$0xff] }
0x19af   : > { %7091 = vmatpush.msra.mxu1 %v7016_v52 }
0x1a17   : > { %v6871_v27 = vpop.f32.mrf.mxu0 }
0x1a1d   : > { %v6894_v32 = vpop.f32.mrf.mxu1  ;;  %v6825_v35 = vpop.f32.mrf.mxu2 }
0x1a1e   : > { %v6895_v47 = vadd.f32 %v6894_v32, %v6871_v27  ;;  %v6997_v27 = vld [vmem:[#allocation14 + $0x1268] sm:$0xff]  ;;  %v6992_v32 = vld [vmem:[#allocation14 + $0x1240] sm:$0xff] }
0x1a1f   : > { %v6874_v29 = vpop.f32.mrf.mxu0  ;;  %7064 = vmatpush.msra.mxu0 %v6992_v32  ;;  %v7245_v32 = vld [vmem:[#allocation22 + $0x12a0] sm:$0xff] }
0x1a21   : > { %7065 = vmatpush.msra.mxu0 %v6990_v36  ;;  %v7275_v36 = vld [vmem:[#allocation22 + $0x1390] sm:$0xff] }
0x1a23   : > { %v6848_v41 = vpop.f32.mrf.mxu3 }
0x1a24   : > { %v6849_v53 = vadd.f32 %v6848_v41, %v6825_v35  ;;  %v7019_v35 = vld [vmem:[#allocation14 + $0x1318] sm:$0xff]  ;;  %v6988_v41 = vld [vmem:[#allocation14 + $0x1220] sm:$0xff] }
0x1a25   : > { %v6897_v60 = vpop.f32.mrf.mxu1  ;;  %v6828_v28 = vpop.f32.mrf.mxu2  ;;  %7066 = vmatpush.msra.mxu0 %v6988_v41 }
0x1a26   : > { %v6898_v46 = vadd.f32 %v6897_v60, %v6874_v29  ;;  %v6989_v29 = vld [vmem:[#allocation14 + $0x1228] sm:$0xff]  ;;  %v6987_v60 = vld [vmem:[#allocation14 + $0x1218] sm:$0xff] }
0x1a27   : > { %7067 = vmatpush.msra.mxu0 %v6986_v42  ;;  %v7239_v42 = vld [vmem:[#allocation22 + $0x1270] sm:$0xff] }
0x1a28   : > { %6948 = vmatpush.msrb.mxu3 %v6898_v46  ;;  %v6985_v46 = vld [vmem:[#allocation14 + $0x1208] sm:$0xff] }
0x1a29   : > { %7068 = vmatpush.msra.mxu0 %v6984_v54  ;;  %v7049_v54 = vld [vmem:[#allocation16 + $0x90] sm:$0xff] }
0x1a2a   : > { %6949 = vmatpush.msrb.mxu3 %v6895_v47  ;;  %v6807_v47 = vld [vmem:[#allocation25 + $0x10] sm:$0x3] }
0x1a2b   : > { %v6851_v10 = vpop.f32.mrf.mxu3  ;;  %9140 = vmatmul.msk.f32.vlgmr.msrb.gmra.mxu3 %vm1199_vm0, %v6804_v57 }
0x1a2c   : > { %v6852_v43 = vadd.f32 %v6851_v10, %v6828_v28  ;;  %7122 = vmatpush.msra.mxu3 %v7047_v50  ;;  %v6959_v50 = vld [vmem:[#allocation26 + $0x108] sm:$0xff] }
0x1a2e   : > { %6925 = vmatpush.msra.mxu2 %v6852_v43  ;;  %7123 = vmatpush.msra.mxu3 %v7045_v0  ;;  %v6968_v0 = vld [vmem:[#allocation28 + $0x108] sm:$0xff] }
0x1a30   : > { %6926 = vmatpush.msra.mxu2 %v6849_v53  ;;  %7124 = vmatpush.msra.mxu3 %v7043_v56  ;;  %v6901_v56 = vperm.slane %v6807_v47, 0 }
0x1a31   : > { %9138 = vmatmul.msk.f32.vlgmr.msra.gmra.mxu2 %vm1199_vm0, %v6804_v57  ;;  %v6902_v57 = vperm.slane %v6807_v47, 1  ;;  %v7256_v47 = vld [vmem:[#allocation22 + $0x12f8] sm:$0xff] }
0x1a32   : > { %7099 = vmatpush.msrb.mxu2 %v7015_v51  ;;  %7125 = vmatpush.msra.mxu3 %v7041_v55  ;;  %v6958_v55 = vld [vmem:[#allocation26 + $0x100] sm:$0xff] }
0x1a33   : > { %9141 = vmatmul.msk.f32.gmra.mxu3 %vm1199_vm0, %v6805_v20 }
0x1a34   : > { %7100 = vmatpush.msrb.mxu2 %v7013_v2  ;;  %7126 = vmatpush.msra.mxu3 %v7039_v58  ;;  %v6967_v2 = vld [vmem:[#allocation28 + $0x100] sm:$0xff] }
0x1a36   : > { %7101 = vmatpush.msrb.mxu2 %v7011_v48  ;;  %7127 = vmatpush.msra.mxu3 %v7037_v6  ;;  %v6961_v48 = vld [vmem:[#allocation26 + $0x118] sm:$0xff] }
0x1a38   : > { %7102 = vmatpush.msrb.mxu2 %v7009_v59  ;;  %7128 = vmatpush.msra.mxu3 %v7035_v61  ;;  %v6970_v61 = vld [vmem:[#allocation28 + $0x118] sm:$0xff] }
0x1a39   : > { %9139 = vmatmul.msk.f32.gmra.mxu2 %vm1199_vm0, %v6805_v20 }
0x1a3a   : > { %7103 = vmatpush.msrb.mxu2 %v7007_v62  ;;  %7129 = vmatpush.msra.mxu3 %v7033_v14 }
0x1a3c   : > { %7104 = vmatpush.msrb.mxu2 %v7005_v1  ;;  %7130 = vmatpush.msra.mxu3 %v7031_v3  ;;  %v6960_v3 = vld [vmem:[#allocation26 + $0x110] sm:$0xff] }
0x1a3e   : > { %7105 = vmatpush.msrb.mxu2 %v7003_v17  ;;  %7131 = vmatpush.msra.mxu3 %v7029_v7  ;;  %v6969_v17 = vld [vmem:[#allocation28 + $0x110] sm:$0xff] }
0x1a40   : > { %7106 = vmatpush.msrb.mxu2 %v7001_v9  ;;  %7132 = vmatpush.msra.mxu3 %v7027_v11 }
0x1a42   : > { %7107 = vmatpush.msrb.mxu2 %v6999_v13  ;;  %7133 = vmatpush.msra.mxu3 %v7025_v21  ;;  %v7287_v13 = vld [vmem:[#allocation22 + $0x13f0] sm:$0xff]  ;;  %v7253_v21 = vld [vmem:[#allocation22 + $0x12e0] sm:$0xff] }
0x1a44   : > { %7108 = vmatpush.msrb.mxu2 %v6997_v27  ;;  %7134 = vmatpush.msra.mxu3 %v7023_v23  ;;  %v7283_v27 = vld [vmem:[#allocation22 + $0x13d0] sm:$0xff] }
0x1a46   : > { %7109 = vmatpush.msrb.mxu2 %v6995_v15  ;;  %7135 = vmatpush.msra.mxu3 %v7021_v31  ;;  %v7279_v15 = vld [vmem:[#allocation22 + $0x13b0] sm:$0xff] }
0x1a48   : > { %7110 = vmatpush.msrb.mxu2 %v6993_v33  ;;  %7136 = vmatpush.msra.mxu3 %v7019_v35  ;;  %v7243_v35 = vld [vmem:[#allocation22 + $0x1290] sm:$0xff] }
0x1a4a   : > { %7111 = vmatpush.msrb.mxu2 %v6991_v37  ;;  %7137 = vmatpush.msra.mxu3 %v7017_v44  ;;  %v7241_v44 = vld [vmem:[#allocation22 + $0x1280] sm:$0xff] }
0x1a4c   : > { %7112 = vmatpush.msrb.mxu2 %v6989_v29  ;;  %7317 = vmatpush.msrb.mxu3 %v7287_v13  ;;  %v7273_v29 = vld [vmem:[#allocation22 + $0x1380] sm:$0xff] }
0x1a4d   : > { %v7265_v13 = vld [vmem:[#allocation22 + $0x1340] sm:$0xff] }
0x1a4e   : > { %7113 = vmatpush.msrb.mxu2 %v6987_v60  ;;  %7318 = vmatpush.msrb.mxu3 %v7285_v16  ;;  %v7266_v16 = vld [vmem:[#allocation22 + $0x1348] sm:$0xff] }
0x1a50   : > { %7114 = vmatpush.msrb.mxu2 %v6985_v46  ;;  %7319 = vmatpush.msrb.mxu3 %v7283_v27  ;;  %v7271_v46 = vld [vmem:[#allocation22 + $0x1370] sm:$0xff]  ;;  %v7232_v27 = vld [vmem:[#allocation22 + $0x1238] sm:$0xff] }
0x1a52   : > { %7320 = vmatpush.msrb.mxu3 %v7281_v26  ;;  %v7261_v26 = vld [vmem:[#allocation22 + $0x1320] sm:$0xff] }
0x1a54   : > { %7321 = vmatpush.msrb.mxu3 %v7279_v15  ;;  %v7262_v15 = vld [vmem:[#allocation22 + $0x1328] sm:$0xff] }
0x1a56   : > { %7322 = vmatpush.msrb.mxu3 %v7277_v45  ;;  %v7228_v45 = vld [vmem:[#allocation22 + $0x1218] sm:$0xff] }
0x1a58   : > { %7323 = vmatpush.msrb.mxu3 %v7275_v36  ;;  %v7257_v36 = vld [vmem:[#allocation22 + $0x1300] sm:$0xff] }
0x1a5a   : > { %7324 = vmatpush.msrb.mxu3 %v7273_v29 }
0x1a5c   : > { %7325 = vmatpush.msrb.mxu3 %v7271_v46 }
0x1aae   : > { %v6951_v28 = vpop.f32.mrf.mxu3 }
0x1aaf   : > { %v6952_v10 = vadd.f32 %v6951_v28, %v6902_v57 }
0x1ab1   : > { %v6963_v43 = vmul.f32 %v6959_v50, %v6952_v10  ;;  %v7254_v50 = vld [vmem:[#allocation22 + $0x12e8] sm:$0xff] }
0x1ab3   : > { %v6972_v53 = vadd.f32 %v6968_v0, %v6963_v43  ;;  %v7252_v0 = vld [vmem:[#allocation22 + $0x12d8] sm:$0xff] }
0x1ab4   : > { %v6928_v51 = vpop.f32.mrf.mxu2 }
0x1ab5   : > { %9585 = vtanh.f32 %v6972_v53  ;;  %v6929_v20 = vadd.f32 %v6928_v51, %v6901_v56  ;;  %v7250_v53 = vld [vmem:[#allocation22 + $0x12c8] sm:$0xff]  ;;  %v7050_v51 = vld [vmem:[#allocation16 + $0x98] sm:$0xff] }
0x1ab6   : > { %v6954_v58 = vpop.f32.mrf.mxu3 }
0x1ab7   : > { %v6962_v6 = vmul.f32 %v6958_v55, %v6929_v20  ;;  %v6955_v59 = vadd.f32 %v6954_v58, %v6902_v57  ;;  %v7286_v55 = vld [vmem:[#allocation22 + $0x13e8] sm:$0xff]  ;;  %v7248_v20 = vld [vmem:[#allocation22 + $0x12b8] sm:$0xff] }
0x1ab8   : > { %v7246_v58 = vld [vmem:[#allocation22 + $0x12a8] sm:$0xff] }
0x1ab9   : > { %v6971_v62 = vadd.f32 %v6967_v2, %v6962_v6  ;;  %v6965_v14 = vmul.f32 %v6961_v48, %v6955_v59  ;;  %v7284_v2 = vld [vmem:[#allocation22 + $0x13d8] sm:$0xff]  ;;  %v7282_v48 = vld [vmem:[#allocation22 + $0x13c8] sm:$0xff] }
0x1aba   : > { %v7244_v6 = vld [vmem:[#allocation22 + $0x1298] sm:$0xff] }
0x1abb   : > { %v9586_v63 = vpop.eup %9585  ;;  %9587 = vtanh.f32 %v6971_v62  ;;  %v6974_v5 = vadd.f32 %v6970_v61, %v6965_v14  ;;  %v7280_v59 = vld [vmem:[#allocation22 + $0x13b8] sm:$0xff]  ;;  %v7242_v61 = vld [vmem:[#allocation22 + $0x1288] sm:$0xff] }
0x1abc   : > { %v6931_v1 = vpop.f32.mrf.mxu2  ;;  %v11980_v4 = vadd.f32 %v9586_v63, %v11952_v19  ;;  %v7278_v62 = vld [vmem:[#allocation22 + $0x13a8] sm:$0xff]  ;;  %v7240_v14 = vld [vmem:[#allocation22 + $0x1278] sm:$0xff] }
0x1abd   : > { %9589 = vtanh.f32 %v6974_v5  ;;  %v6932_v22 = vadd.f32 %v6931_v1, %v6901_v56  ;;  %v7288_v56 = vld [vmem:[#allocation22 + $0x13f8] sm:$0xff]  ;;  %v7274_v5 = vld [vmem:[#allocation22 + $0x1388] sm:$0xff] }
0x1abe   : > { %7092 = vmatmul.f32.vlgmr.msra.gmra.mxu1 %v11980_v4  ;;  %7138 = vmatmul.f32.vlgmr.msra.gmra.mxu3 %v11980_v4  ;;  %v7276_v63 = vld [vmem:[#allocation22 + $0x1398] sm:$0xff] }
0x1abf   : > { %v6964_v7 = vmul.f32 %v6960_v3, %v6932_v22  ;;  %v7272_v1 = vld [vmem:[#allocation22 + $0x1378] sm:$0xff]  ;;  %v7237_v3 = vld [vmem:[#allocation22 + $0x1260] sm:$0xff] }
0x1ac0   : > { %v7269_v22 = vld [vmem:[#allocation22 + $0x1360] sm:$0xff] }
0x1ac1   : > { %v9588_v8 = vpop.eup %9587  ;;  %v6973_v24 = vadd.f32 %v6969_v17, %v6964_v7  ;;  %7326 = vmatpush.msrb.mxu3 %v7269_v22  ;;  %v7238_v17 = vld [vmem:[#allocation22 + $0x1268] sm:$0xff] }
0x1ac2   : > { %v11985_v9 = vadd.f32 %v9588_v8, %v11957_v30  ;;  %v7255_v30 = vld [vmem:[#allocation22 + $0x12f0] sm:$0xff]  ;;  %v7270_v7 = vld [vmem:[#allocation22 + $0x1368] sm:$0xff] }
0x1ac3   : > { %v9590_v11 = vpop.eup %9589  ;;  %9591 = vtanh.f32 %v6973_v24  ;;  %7294 = vmatpush.msra.mxu2 %v7255_v30  ;;  %v7235_v8 = vld [vmem:[#allocation22 + $0x1250] sm:$0xff]  ;;  %v7233_v30 = vld [vmem:[#allocation22 + $0x1240] sm:$0xff] }
0x1ac4   : > { %7069 = vmatmul.f32.vlgmr.msra.gmra.mxu0 %v11985_v9  ;;  %7115 = vmatmul.f32.vlgmr.msrb.gmra.mxu2 %v11985_v9  ;;  %v11990_v19 = vadd.f32 %v9590_v11, %v11962_v40  ;;  %v7267_v24 = vld [vmem:[#allocation22 + $0x1350] sm:$0xff]  ;;  %v7236_v11 = vld [vmem:[#allocation22 + $0x1258] sm:$0xff] }
0x1ac5   : > { %7295 = vmatpush.msra.mxu2 %v7253_v21  ;;  %7327 = vmatpush.msrb.mxu3 %v7267_v24  ;;  %v7234_v21 = vld [vmem:[#allocation22 + $0x1248] sm:$0xff]  ;;  %v7500_v24 = vld [vmem:[#allocation14 + $0x14f0] sm:$0xff] }
0x1ac6   : > { %7095 = vmatmul.f32.gmra.mxu1 %v11990_v19  ;;  %7141 = vmatmul.f32.gmra.mxu3 %v11990_v19 }
0x1ac7   : > { %7296 = vmatpush.msra.mxu2 %v7251_v18  ;;  %7328 = vmatpush.msrb.mxu3 %v7265_v13  ;;  %v7263_v18 = vld [vmem:[#allocation22 + $0x1330] sm:$0xff]  ;;  %v7496_v13 = vld [vmem:[#allocation14 + $0x14d0] sm:$0xff] }
0x1ac9   : > { %v9592_v12 = vpop.eup %9591  ;;  %7297 = vmatpush.msra.mxu2 %v7249_v25  ;;  %7329 = vmatpush.msrb.mxu3 %v7263_v18  ;;  %v7229_v25 = vld [vmem:[#allocation22 + $0x1220] sm:$0xff]  ;;  %v7522_v18 = vld [vmem:[#allocation14 + $0x15a0] sm:$0xff] }
0x1aca   : > { %v11995_v34 = vadd.f32 %v9592_v12, %v11967_v49  ;;  %v7247_v49 = vld [vmem:[#allocation22 + $0x12b0] sm:$0xff]  ;;  %v7268_v12 = vld [vmem:[#allocation22 + $0x1358] sm:$0xff] }
0x1acb   : > { %7298 = vmatpush.msra.mxu2 %v7247_v49  ;;  %7330 = vmatpush.msrb.mxu3 %v7261_v26  ;;  %v7230_v49 = vld [vmem:[#allocation22 + $0x1228] sm:$0xff]  ;;  %v7520_v26 = vld [vmem:[#allocation14 + $0x1590] sm:$0xff] }
0x1acc   : > { %7072 = vmatmul.f32.gmra.mxu0 %v11995_v34  ;;  %7118 = vmatmul.f32.gmra.mxu2 %v11995_v34 }
0x1acd   : > { %7299 = vmatpush.msra.mxu2 %v7245_v32  ;;  %v7259_v32 = vld [vmem:[#allocation22 + $0x1310] sm:$0xff] }
0x1ace   : > { %7331 = vmatpush.msrb.mxu3 %v7259_v32 }
0x1acf   : > { %7300 = vmatpush.msra.mxu2 %v7243_v35  ;;  %v7225_v35 = vld [vmem:[#allocation22 + $0x1200] sm:$0xff] }
0x1ad0   : > { %7332 = vmatpush.msrb.mxu3 %v7257_v36 }
0x1ad1   : > { %7301 = vmatpush.msra.mxu2 %v7241_v44  ;;  %v7052_v44 = vld [vmem:[#allocation17 + $0x12] sm:$0x3] }
0x1ad3   : > { %7302 = vmatpush.msra.mxu2 %v7239_v42  ;;  %v7203_v42 = vld [vmem:[#allocation19 + $0x120] sm:$0xff] }
0x1ad5   : > { %7303 = vmatpush.msra.mxu2 %v7237_v3 }
0x1ad7   : > { %7304 = vmatpush.msra.mxu2 %v7235_v8  ;;  %v7528_v8 = vld [vmem:[#allocation14 + $0x15d0] sm:$0xff] }
0x1ad9   : > { %7305 = vmatpush.msra.mxu2 %v7233_v30  ;;  %v7526_v30 = vld [vmem:[#allocation14 + $0x15c0] sm:$0xff] }
0x1b3b   : > { %v7093_v40 = vpop.f32.mrf.mxu1 }
0x1b41   : > { %v7070_v23 = vpop.f32.mrf.mxu0  ;;  %v7139_v31 = vpop.f32.mrf.mxu3 }
0x1b42   : > { %v7094_v60 = vadd.f32 %v7093_v40, %v7070_v23  ;;  %v7231_v40 = vld [vmem:[#allocation22 + $0x1230] sm:$0xff]  ;;  %v7264_v23 = vld [vmem:[#allocation22 + $0x1338] sm:$0xff] }
0x1b43   : > { %v7096_v52 = vpop.f32.mrf.mxu1  ;;  %7306 = vmatpush.msra.mxu2 %v7231_v40  ;;  %v7494_v40 = vld [vmem:[#allocation14 + $0x14c0] sm:$0xff] }
0x1b45   : > { %7307 = vmatpush.msra.mxu2 %v7229_v25 }
0x1b47   : > { %v7116_v33 = vpop.f32.mrf.mxu2 }
0x1b48   : > { %v7140_v43 = vadd.f32 %v7139_v31, %v7116_v33  ;;  %v7227_v31 = vld [vmem:[#allocation22 + $0x1210] sm:$0xff]  ;;  %v7260_v33 = vld [vmem:[#allocation22 + $0x1318] sm:$0xff] }
0x1b49   : > { %v7073_v37 = vpop.f32.mrf.mxu0  ;;  %v7142_v57 = vpop.f32.mrf.mxu3  ;;  %7308 = vmatpush.msra.mxu2 %v7227_v31 }
0x1b4a   : > { %v7097_v41 = vadd.f32 %v7096_v52, %v7073_v37  ;;  %v7226_v52 = vld [vmem:[#allocation22 + $0x1208] sm:$0xff] }
0x1b4b   : > { %7309 = vmatpush.msra.mxu2 %v7225_v35  ;;  %v7258_v37 = vld [vmem:[#allocation22 + $0x1308] sm:$0xff]  ;;  %v7533_v35 = vld [vmem:[#allocation14 + $0x15f8] sm:$0xff] }
0x1b4c   : > { %7170 = vmatpush.msrb.mxu0 %v7097_v41  ;;  %v7146_v41 = vperm.slane %v7052_v44, 0 }
0x1b4e   : > { %7171 = vmatpush.msrb.mxu0 %v7094_v60 }
0x1b4f   : > { %v7119_v28 = vpop.f32.mrf.mxu2  ;;  %9142 = vmatmul.msk.f32.vlgmr.msrb.gmra.mxu0 %vm1199_vm0, %v7049_v54 }
0x1b50   : > { %v7143_v10 = vadd.f32 %v7142_v57, %v7119_v28  ;;  %7340 = vmatpush.msra.mxu0 %v7256_v47  ;;  %v7147_v47 = vperm.slane %v7052_v44, 1  ;;  %v7529_v44 = vld [vmem:[#allocation14 + $0x15d8] sm:$0xff] }
0x1b52   : > { %7193 = vmatpush.msrb.mxu1 %v7143_v10  ;;  %7341 = vmatpush.msra.mxu0 %v7254_v50  ;;  %v7204_v50 = vld [vmem:[#allocation19 + $0x128] sm:$0xff] }
0x1b54   : > { %7194 = vmatpush.msrb.mxu1 %v7140_v43  ;;  %7342 = vmatpush.msra.mxu0 %v7252_v0  ;;  %v7213_v0 = vld [vmem:[#allocation20 + $0x128] sm:$0xff] }
0x1b55   : > { %9144 = vmatmul.msk.f32.vlgmr.msrb.gmra.mxu1 %vm1199_vm0, %v7049_v54  ;;  %v7212_v54 = vld [vmem:[#allocation20 + $0x120] sm:$0xff] }
0x1b56   : > { %7363 = vmatpush.msra.mxu1 %v7288_v56  ;;  %7343 = vmatpush.msra.mxu0 %v7250_v53  ;;  %v7205_v56 = vld [vmem:[#allocation19 + $0x130] sm:$0xff] }
0x1b57   : > { %9143 = vmatmul.msk.f32.gmra.mxu0 %vm1199_vm0, %v7050_v51 }
0x1b58   : > { %7364 = vmatpush.msra.mxu1 %v7286_v55  ;;  %7344 = vmatpush.msra.mxu0 %v7248_v20  ;;  %v7214_v55 = vld [vmem:[#allocation20 + $0x130] sm:$0xff] }
0x1b5a   : > { %7365 = vmatpush.msra.mxu1 %v7284_v2  ;;  %7345 = vmatpush.msra.mxu0 %v7246_v58 }
0x1b5c   : > { %7366 = vmatpush.msra.mxu1 %v7282_v48  ;;  %7346 = vmatpush.msra.mxu0 %v7244_v6 }
0x1b5d   : > { %9145 = vmatmul.msk.f32.gmra.mxu1 %vm1199_vm0, %v7050_v51 }
0x1b5e   : > { %7367 = vmatpush.msra.mxu1 %v7280_v59  ;;  %7347 = vmatpush.msra.mxu0 %v7242_v61  ;;  %v7206_v59 = vld [vmem:[#allocation19 + $0x138] sm:$0xff] }
0x1b60   : > { %7368 = vmatpush.msra.mxu1 %v7278_v62  ;;  %7348 = vmatpush.msra.mxu0 %v7240_v14  ;;  %v7215_v62 = vld [vmem:[#allocation20 + $0x138] sm:$0xff] }
0x1b62   : > { %7369 = vmatpush.msra.mxu1 %v7276_v63  ;;  %7349 = vmatpush.msra.mxu0 %v7238_v17  ;;  %v7532_v17 = vld [vmem:[#allocation14 + $0x15f0] sm:$0xff] }
0x1b64   : > { %7370 = vmatpush.msra.mxu1 %v7274_v5  ;;  %7350 = vmatpush.msra.mxu0 %v7236_v11  ;;  %v7498_v11 = vld [vmem:[#allocation14 + $0x14e0] sm:$0xff] }
0x1b66   : > { %7371 = vmatpush.msra.mxu1 %v7272_v1  ;;  %7351 = vmatpush.msra.mxu0 %v7234_v21 }
0x1b68   : > { %7372 = vmatpush.msra.mxu1 %v7270_v7  ;;  %7352 = vmatpush.msra.mxu0 %v7232_v27  ;;  %v7530_v7 = vld [vmem:[#allocation14 + $0x15e0] sm:$0xff]  ;;  %v7492_v27 = vld [vmem:[#allocation14 + $0x14b0] sm:$0xff] }
0x1b6a   : > { %7373 = vmatpush.msra.mxu1 %v7268_v12  ;;  %7353 = vmatpush.msra.mxu0 %v7230_v49 }
0x1b6c   : > { %7374 = vmatpush.msra.mxu1 %v7266_v16  ;;  %7354 = vmatpush.msra.mxu0 %v7228_v45  ;;  %v7524_v16 = vld [vmem:[#allocation14 + $0x15b0] sm:$0xff]  ;;  %v7290_v45 = vld [vmem:[#allocation23 + $0x90] sm:$0xff] }
0x1b6e   : > { %7375 = vmatpush.msra.mxu1 %v7264_v23  ;;  %7355 = vmatpush.msra.mxu0 %v7226_v52  ;;  %v7531_v52 = vld [vmem:[#allocation14 + $0x15e8] sm:$0xff] }
0x1b70   : > { %7376 = vmatpush.msra.mxu1 %v7262_v15  ;;  %7539 = vmatpush.msrb.mxu0 %v7500_v24  ;;  %v7518_v15 = vld [vmem:[#allocation14 + $0x1580] sm:$0xff]  ;;  %v7481_v24 = vld [vmem:[#allocation14 + $0x1458] sm:$0xff] }
0x1b72   : > { %7377 = vmatpush.msra.mxu1 %v7260_v33  ;;  %7540 = vmatpush.msrb.mxu0 %v7498_v11  ;;  %v7507_v11 = vld [vmem:[#allocation14 + $0x1528] sm:$0xff] }
0x1b74   : > { %7378 = vmatpush.msra.mxu1 %v7258_v37  ;;  %7541 = vmatpush.msrb.mxu0 %v7496_v13  ;;  %v7479_v13 = vld [vmem:[#allocation14 + $0x1448] sm:$0xff] }
0x1b76   : > { %7562 = vmatpush.msrb.mxu1 %v7532_v17  ;;  %7542 = vmatpush.msrb.mxu0 %v7494_v40  ;;  %v7509_v17 = vld [vmem:[#allocation14 + $0x1538] sm:$0xff]  ;;  %v7502_v40 = vld [vmem:[#allocation14 + $0x1500] sm:$0xff] }
0x1b78   : > { %7563 = vmatpush.msrb.mxu1 %v7530_v7  ;;  %7543 = vmatpush.msrb.mxu0 %v7492_v27  ;;  %v7480_v7 = vld [vmem:[#allocation14 + $0x1450] sm:$0xff]  ;;  %v7503_v27 = vld [vmem:[#allocation14 + $0x1508] sm:$0xff] }
0x1b7a   : > { %7564 = vmatpush.msrb.mxu1 %v7528_v8  ;;  %v7506_v8 = vld [vmem:[#allocation14 + $0x1520] sm:$0xff] }
0x1b7c   : > { %7565 = vmatpush.msrb.mxu1 %v7526_v30  ;;  %v7504_v30 = vld [vmem:[#allocation14 + $0x1510] sm:$0xff] }
0x1b7e   : > { %7566 = vmatpush.msrb.mxu1 %v7524_v16  ;;  %v7476_v16 = vld [vmem:[#allocation14 + $0x1430] sm:$0xff] }
0x1b80   : > { %7567 = vmatpush.msrb.mxu1 %v7522_v18  ;;  %v7477_v18 = vld [vmem:[#allocation14 + $0x1438] sm:$0xff] }
0x1b82   : > { %7568 = vmatpush.msrb.mxu1 %v7520_v26  ;;  %v7472_v26 = vld [vmem:[#allocation14 + $0x1410] sm:$0xff] }
0x1b84   : > { %7569 = vmatpush.msrb.mxu1 %v7518_v15  ;;  %v7470_v15 = vld [vmem:[#allocation14 + $0x1400] sm:$0xff] }
0x1bcc   : > { %v7173_v29 = vpop.f32.mrf.mxu0 }
0x1bcd   : > { %v7174_v60 = vadd.f32 %v7173_v29, %v7146_v41  ;;  %v7501_v29 = vld [vmem:[#allocation14 + $0x14f8] sm:$0xff] }
0x1bcf   : > { %v7207_v46 = vmul.f32 %v7203_v42, %v7174_v60  ;;  %v7527_v42 = vld [vmem:[#allocation14 + $0x15c8] sm:$0xff]  ;;  %v7291_v60 = vld [vmem:[#allocation23 + $0x98] sm:$0xff] }
0x1bd1   : > { %v7216_v57 = vadd.f32 %v7212_v54, %v7207_v46  ;;  %v7499_v54 = vld [vmem:[#allocation14 + $0x14e8] sm:$0xff]  ;;  %v7525_v46 = vld [vmem:[#allocation14 + $0x15b8] sm:$0xff] }
0x1bd2   : > { %v7196_v28 = vpop.f32.mrf.mxu1 }
0x1bd3   : > { %9593 = vtanh.f32 %v7216_v57  ;;  %v7197_v10 = vadd.f32 %v7196_v28, %v7147_v47  ;;  %v7523_v57 = vld [vmem:[#allocation14 + $0x15a8] sm:$0xff] }
0x1bd4   : > { %v7176_v43 = vpop.f32.mrf.mxu0  ;;  %v7495_v28 = vld [vmem:[#allocation14 + $0x14c8] sm:$0xff] }
0x1bd5   : > { %v7208_v53 = vmul.f32 %v7204_v50, %v7197_v10  ;;  %v7177_v51 = vadd.f32 %v7176_v43, %v7146_v41  ;;  %v7521_v50 = vld [vmem:[#allocation14 + $0x1598] sm:$0xff]  ;;  %v7490_v43 = vld [vmem:[#allocation14 + $0x14a0] sm:$0xff] }
0x1bd6   : > { %v7493_v10 = vld [vmem:[#allocation14 + $0x14b8] sm:$0xff]  ;;  %7544 = vmatpush.msrb.mxu0 %v7490_v43 }
0x1bd7   : > { %v7217_v20 = vadd.f32 %v7213_v0, %v7208_v53  ;;  %v7209_v2 = vmul.f32 %v7205_v56, %v7177_v51  ;;  %v7519_v0 = vld [vmem:[#allocation14 + $0x1588] sm:$0xff]  ;;  %v7516_v56 = vld [vmem:[#allocation14 + $0x1570] sm:$0xff]  ;;  %v7517_v51 = vld [vmem:[#allocation14 + $0x1578] sm:$0xff] }
0x1bd8   : > { %7570 = vmatpush.msrb.mxu1 %v7516_v56  ;;  %v7491_v53 = vld [vmem:[#allocation14 + $0x14a8] sm:$0xff] }
0x1bd9   : > { %v9594_v58 = vpop.eup %9593  ;;  %9595 = vtanh.f32 %v7217_v20  ;;  %v7218_v48 = vadd.f32 %v7214_v55, %v7209_v2  ;;  %v7488_v55 = vld [vmem:[#allocation14 + $0x1490] sm:$0xff]  ;;  %v7514_v20 = vld [vmem:[#allocation14 + $0x1560] sm:$0xff]  ;;  %v7489_v2 = vld [vmem:[#allocation14 + $0x1498] sm:$0xff] }
0x1bda   : > { %v7199_v6 = vpop.f32.mrf.mxu1  ;;  %7310 = vmatmul.f32.vlgmr.msra.gmra.mxu2 %v9594_v58  ;;  %7356 = vmatmul.f32.vlgmr.msra.gmra.mxu0 %v9594_v58  ;;  %v7515_v58 = vld [vmem:[#allocation14 + $0x1568] sm:$0xff] }
0x1bdb   : > { %9597 = vtanh.f32 %v7218_v48  ;;  %v7200_v61 = vadd.f32 %v7199_v6, %v7147_v47  ;;  %v7497_v47 = vld [vmem:[#allocation14 + $0x14d8] sm:$0xff]  ;;  %7545 = vmatpush.msrb.mxu0 %v7488_v55  ;;  %7571 = vmatpush.msrb.mxu1 %v7514_v20  ;;  %v7486_v48 = vld [vmem:[#allocation14 + $0x1480] sm:$0xff]  ;;  %v7512_v6 = vld [vmem:[#allocation14 + $0x1550] sm:$0xff] }
0x1bdd   : > { %v7210_v14 = vmul.f32 %v7206_v59, %v7200_v61  ;;  %v7487_v59 = vld [vmem:[#allocation14 + $0x1488] sm:$0xff]  ;;  %7546 = vmatpush.msrb.mxu0 %v7486_v48  ;;  %7572 = vmatpush.msrb.mxu1 %v7512_v6  ;;  %v7513_v61 = vld [vmem:[#allocation14 + $0x1558] sm:$0xff] }
0x1bdf   : > { %v9596_v63 = vpop.eup %9595  ;;  %v7219_v5 = vadd.f32 %v7215_v62, %v7210_v14  ;;  %v7484_v62 = vld [vmem:[#allocation14 + $0x1470] sm:$0xff]  ;;  %v7510_v14 = vld [vmem:[#allocation14 + $0x1540] sm:$0xff] }
0x1be0   : > { %7333 = vmatmul.f32.vlgmr.msrb.gmra.mxu3 %v9596_v63  ;;  %7379 = vmatmul.f32.vlgmr.msra.gmra.mxu1 %v9596_v63  ;;  %v7485_v63 = vld [vmem:[#allocation14 + $0x1478] sm:$0xff] }
0x1be1   : > { %v9598_v1 = vpop.eup %9597  ;;  %9599 = vtanh.f32 %v7219_v5  ;;  %7547 = vmatpush.msrb.mxu0 %v7484_v62  ;;  %7573 = vmatpush.msrb.mxu1 %v7510_v14  ;;  %v7511_v5 = vld [vmem:[#allocation14 + $0x1548] sm:$0xff] }
0x1be2   : > { %7313 = vmatmul.f32.gmra.mxu2 %v9598_v1  ;;  %7359 = vmatmul.f32.gmra.mxu0 %v9598_v1  ;;  %v7482_v1 = vld [vmem:[#allocation14 + $0x1460] sm:$0xff] }
0x1be3   : > { %7548 = vmatpush.msrb.mxu0 %v7482_v1  ;;  %v7771_v1 = vld [vmem:[#allocation22 + $0x15e0] sm:$0xff] }
0x1be5   : > { %7549 = vmatpush.msrb.mxu0 %v7480_v7  ;;  %v7735_v7 = vld [vmem:[#allocation22 + $0x14c0] sm:$0xff] }
0x1be7   : > { %v9600_v3 = vpop.eup %9599 }
0x1be8   : > { %7336 = vmatmul.f32.gmra.mxu3 %v9600_v3  ;;  %7382 = vmatmul.f32.gmra.mxu1 %v9600_v3  ;;  %v7508_v3 = vld [vmem:[#allocation14 + $0x1530] sm:$0xff] }
0x1be9   : > { %7574 = vmatpush.msrb.mxu1 %v7508_v3  ;;  %v7737_v3 = vld [vmem:[#allocation22 + $0x14d0] sm:$0xff] }
0x1beb   : > { %7575 = vmatpush.msrb.mxu1 %v7506_v8  ;;  %v7767_v8 = vld [vmem:[#allocation22 + $0x15c0] sm:$0xff] }
0x1bed   : > { %7576 = vmatpush.msrb.mxu1 %v7504_v30  ;;  %v7763_v30 = vld [vmem:[#allocation22 + $0x15a0] sm:$0xff] }
0x1bef   : > { %7577 = vmatpush.msrb.mxu1 %v7502_v40 }
0x1c57   : > { %v7357_v22 = vpop.f32.mrf.mxu0 }
0x1c5d   : > { %v7380_v12 = vpop.f32.mrf.mxu1  ;;  %v7311_v21 = vpop.f32.mrf.mxu2 }
0x1c5e   : > { %v7381_v32 = vadd.f32 %v7380_v12, %v7357_v22  ;;  %v7483_v22 = vld [vmem:[#allocation14 + $0x1468] sm:$0xff]  ;;  %v7478_v12 = vld [vmem:[#allocation14 + $0x1440] sm:$0xff] }
0x1c5f   : > { %v7360_v25 = vpop.f32.mrf.mxu0  ;;  %7550 = vmatpush.msrb.mxu0 %v7478_v12  ;;  %v7731_v12 = vld [vmem:[#allocation22 + $0x14a0] sm:$0xff] }
0x1c61   : > { %7551 = vmatpush.msrb.mxu0 %v7476_v16  ;;  %v7761_v16 = vld [vmem:[#allocation22 + $0x1590] sm:$0xff] }
0x1c63   : > { %v7334_v23 = vpop.f32.mrf.mxu3 }
0x1c64   : > { %v7335_v41 = vadd.f32 %v7334_v23, %v7311_v21  ;;  %v7505_v21 = vld [vmem:[#allocation14 + $0x1518] sm:$0xff]  ;;  %v7474_v23 = vld [vmem:[#allocation14 + $0x1420] sm:$0xff] }
0x1c65   : > { %v7383_v49 = vpop.f32.mrf.mxu1  ;;  %v7314_v33 = vpop.f32.mrf.mxu2  ;;  %7552 = vmatpush.msrb.mxu0 %v7474_v23 }
0x1c66   : > { %v7384_v31 = vadd.f32 %v7383_v49, %v7360_v25  ;;  %v7475_v25 = vld [vmem:[#allocation14 + $0x1428] sm:$0xff]  ;;  %v7473_v49 = vld [vmem:[#allocation14 + $0x1418] sm:$0xff] }
0x1c67   : > { %7553 = vmatpush.msrb.mxu0 %v7472_v26  ;;  %v7725_v26 = vld [vmem:[#allocation22 + $0x1470] sm:$0xff] }
0x1c68   : > { %7434 = vmatpush.msra.mxu3 %v7384_v31  ;;  %v7471_v31 = vld [vmem:[#allocation14 + $0x1408] sm:$0xff] }
0x1c69   : > { %7554 = vmatpush.msrb.mxu0 %v7470_v15  ;;  %v7535_v15 = vld [vmem:[#allocation16 + $0xa0] sm:$0xff] }
0x1c6a   : > { %7435 = vmatpush.msra.mxu3 %v7381_v32  ;;  %v7293_v32 = vld [vmem:[#allocation25 + $0x12] sm:$0x3] }
0x1c6b   : > { %v7337_v36 = vpop.f32.mrf.mxu3  ;;  %9148 = vmatmul.msk.f32.vlgmr.msra.gmra.mxu3 %vm1199_vm0, %v7290_v45 }
0x1c6c   : > { %v7338_v37 = vadd.f32 %v7337_v36, %v7314_v33  ;;  %7608 = vmatpush.msrb.mxu3 %v7533_v35  ;;  %v7445_v35 = vld [vmem:[#allocation26 + $0x128] sm:$0xff] }
0x1c6e   : > { %7411 = vmatpush.msrb.mxu2 %v7338_v37  ;;  %7609 = vmatpush.msrb.mxu3 %v7531_v52  ;;  %v7454_v52 = vld [vmem:[#allocation28 + $0x128] sm:$0xff] }
0x1c70   : > { %7412 = vmatpush.msrb.mxu2 %v7335_v41  ;;  %7610 = vmatpush.msrb.mxu3 %v7529_v44  ;;  %v7387_v44 = vperm.slane %v7293_v32, 0 }
0x1c71   : > { %9146 = vmatmul.msk.f32.vlgmr.msrb.gmra.mxu2 %vm1199_vm0, %v7290_v45  ;;  %v7388_v45 = vperm.slane %v7293_v32, 1  ;;  %v7742_v32 = vld [vmem:[#allocation22 + $0x14f8] sm:$0xff] }
0x1c72   : > { %7585 = vmatpush.msra.mxu2 %v7501_v29  ;;  %7611 = vmatpush.msrb.mxu3 %v7527_v42  ;;  %v7444_v42 = vld [vmem:[#allocation26 + $0x120] sm:$0xff] }
0x1c73   : > { %9149 = vmatmul.msk.f32.gmra.mxu3 %vm1199_vm0, %v7291_v60 }
0x1c74   : > { %7586 = vmatpush.msra.mxu2 %v7499_v54  ;;  %7612 = vmatpush.msrb.mxu3 %v7525_v46  ;;  %v7453_v54 = vld [vmem:[#allocation28 + $0x120] sm:$0xff] }
0x1c76   : > { %7587 = vmatpush.msra.mxu2 %v7497_v47  ;;  %7613 = vmatpush.msrb.mxu3 %v7523_v57  ;;  %v7447_v47 = vld [vmem:[#allocation26 + $0x138] sm:$0xff] }
0x1c78   : > { %7588 = vmatpush.msra.mxu2 %v7495_v28  ;;  %7614 = vmatpush.msrb.mxu3 %v7521_v50  ;;  %v7456_v50 = vld [vmem:[#allocation28 + $0x138] sm:$0xff] }
0x1c79   : > { %9147 = vmatmul.msk.f32.gmra.mxu2 %vm1199_vm0, %v7291_v60 }
0x1c7a   : > { %7589 = vmatpush.msra.mxu2 %v7493_v10  ;;  %7615 = vmatpush.msrb.mxu3 %v7519_v0 }
0x1c7c   : > { %7590 = vmatpush.msra.mxu2 %v7491_v53  ;;  %7616 = vmatpush.msrb.mxu3 %v7517_v51  ;;  %v7446_v51 = vld [vmem:[#allocation26 + $0x130] sm:$0xff] }
0x1c7e   : > { %7591 = vmatpush.msra.mxu2 %v7489_v2  ;;  %7617 = vmatpush.msrb.mxu3 %v7515_v58  ;;  %v7455_v2 = vld [vmem:[#allocation28 + $0x130] sm:$0xff] }
0x1c80   : > { %7592 = vmatpush.msra.mxu2 %v7487_v59  ;;  %7618 = vmatpush.msrb.mxu3 %v7513_v61 }
0x1c82   : > { %7593 = vmatpush.msra.mxu2 %v7485_v63  ;;  %7619 = vmatpush.msrb.mxu3 %v7511_v5  ;;  %v7773_v63 = vld [vmem:[#allocation22 + $0x15f0] sm:$0xff]  ;;  %v7739_v5 = vld [vmem:[#allocation22 + $0x14e0] sm:$0xff] }
0x1c84   : > { %7594 = vmatpush.msra.mxu2 %v7483_v22  ;;  %7620 = vmatpush.msrb.mxu3 %v7509_v17  ;;  %v7769_v22 = vld [vmem:[#allocation22 + $0x15d0] sm:$0xff] }
0x1c86   : > { %7595 = vmatpush.msra.mxu2 %v7481_v24  ;;  %7621 = vmatpush.msrb.mxu3 %v7507_v11  ;;  %v7765_v24 = vld [vmem:[#allocation22 + $0x15b0] sm:$0xff] }
0x1c88   : > { %7596 = vmatpush.msra.mxu2 %v7479_v13  ;;  %7622 = vmatpush.msrb.mxu3 %v7505_v21  ;;  %v7729_v21 = vld [vmem:[#allocation22 + $0x1490] sm:$0xff] }
0x1c8a   : > { %7597 = vmatpush.msra.mxu2 %v7477_v18  ;;  %7623 = vmatpush.msrb.mxu3 %v7503_v27  ;;  %v7727_v27 = vld [vmem:[#allocation22 + $0x1480] sm:$0xff] }
0x1c8c   : > { %7598 = vmatpush.msra.mxu2 %v7475_v25  ;;  %7803 = vmatpush.msra.mxu3 %v7773_v63  ;;  %v7759_v25 = vld [vmem:[#allocation22 + $0x1580] sm:$0xff] }
0x1c8d   : > { %v7751_v63 = vld [vmem:[#allocation22 + $0x1540] sm:$0xff] }
0x1c8e   : > { %7599 = vmatpush.msra.mxu2 %v7473_v49  ;;  %7804 = vmatpush.msra.mxu3 %v7771_v1  ;;  %v7752_v1 = vld [vmem:[#allocation22 + $0x1548] sm:$0xff] }
0x1c90   : > { %7600 = vmatpush.msra.mxu2 %v7471_v31  ;;  %7805 = vmatpush.msra.mxu3 %v7769_v22  ;;  %v7757_v31 = vld [vmem:[#allocation22 + $0x1570] sm:$0xff]  ;;  %v7718_v22 = vld [vmem:[#allocation22 + $0x1438] sm:$0xff] }
0x1c92   : > { %7806 = vmatpush.msra.mxu3 %v7767_v8  ;;  %v7747_v8 = vld [vmem:[#allocation22 + $0x1520] sm:$0xff] }
0x1c94   : > { %7807 = vmatpush.msra.mxu3 %v7765_v24  ;;  %v7748_v24 = vld [vmem:[#allocation22 + $0x1528] sm:$0xff] }
0x1c96   : > { %7808 = vmatpush.msra.mxu3 %v7763_v30  ;;  %v7714_v30 = vld [vmem:[#allocation22 + $0x1418] sm:$0xff] }
0x1c98   : > { %7809 = vmatpush.msra.mxu3 %v7761_v16  ;;  %v7743_v16 = vld [vmem:[#allocation22 + $0x1500] sm:$0xff] }
0x1c9a   : > { %7810 = vmatpush.msra.mxu3 %v7759_v25 }
0x1c9c   : > { %7811 = vmatpush.msra.mxu3 %v7757_v31 }
0x1cee   : > { %v7437_v33 = vpop.f32.mrf.mxu3 }
0x1cef   : > { %v7438_v36 = vadd.f32 %v7437_v33, %v7388_v45 }
0x1cf1   : > { %v7449_v37 = vmul.f32 %v7445_v35, %v7438_v36  ;;  %v7740_v35 = vld [vmem:[#allocation22 + $0x14e8] sm:$0xff] }
0x1cf3   : > { %v7458_v41 = vadd.f32 %v7454_v52, %v7449_v37  ;;  %v7738_v52 = vld [vmem:[#allocation22 + $0x14d8] sm:$0xff] }
0x1cf4   : > { %v7414_v29 = vpop.f32.mrf.mxu2 }
0x1cf5   : > { %9601 = vtanh.f32 %v7458_v41  ;;  %v7415_v60 = vadd.f32 %v7414_v29, %v7387_v44  ;;  %v7736_v41 = vld [vmem:[#allocation22 + $0x14c8] sm:$0xff]  ;;  %v7536_v29 = vld [vmem:[#allocation16 + $0xa8] sm:$0xff] }
0x1cf6   : > { %v7440_v46 = vpop.f32.mrf.mxu3 }
0x1cf7   : > { %v7448_v57 = vmul.f32 %v7444_v42, %v7415_v60  ;;  %v7441_v28 = vadd.f32 %v7440_v46, %v7388_v45  ;;  %v7772_v42 = vld [vmem:[#allocation22 + $0x15e8] sm:$0xff]  ;;  %v7734_v60 = vld [vmem:[#allocation22 + $0x14b8] sm:$0xff] }
0x1cf8   : > { %v7732_v46 = vld [vmem:[#allocation22 + $0x14a8] sm:$0xff] }
0x1cf9   : > { %v7457_v10 = vadd.f32 %v7453_v54, %v7448_v57  ;;  %v7451_v0 = vmul.f32 %v7447_v47, %v7441_v28  ;;  %v7770_v54 = vld [vmem:[#allocation22 + $0x15d8] sm:$0xff]  ;;  %v7768_v47 = vld [vmem:[#allocation22 + $0x15c8] sm:$0xff] }
0x1cfa   : > { %v7730_v57 = vld [vmem:[#allocation22 + $0x1498] sm:$0xff] }
0x1cfb   : > { %v9602_v43 = vpop.eup %9601  ;;  %9603 = vtanh.f32 %v7457_v10  ;;  %v7460_v56 = vadd.f32 %v7456_v50, %v7451_v0  ;;  %v7766_v28 = vld [vmem:[#allocation22 + $0x15b8] sm:$0xff]  ;;  %v7728_v50 = vld [vmem:[#allocation22 + $0x1488] sm:$0xff] }
0x1cfc   : > { %v7417_v53 = vpop.f32.mrf.mxu2  ;;  %v12008_v55 = vadd.f32 %v9602_v43, %v11980_v4  ;;  %v7764_v10 = vld [vmem:[#allocation22 + $0x15a8] sm:$0xff]  ;;  %v7726_v0 = vld [vmem:[#allocation22 + $0x1478] sm:$0xff] }
0x1cfd   : > { %9605 = vtanh.f32 %v7460_v56  ;;  %v7418_v20 = vadd.f32 %v7417_v53, %v7387_v44  ;;  %v7774_v44 = vld [vmem:[#allocation22 + $0x15f8] sm:$0xff]  ;;  %v7760_v56 = vld [vmem:[#allocation22 + $0x1588] sm:$0xff] }
0x1cfe   : > { %7578 = vmatmul.f32.vlgmr.msrb.gmra.mxu1 %v12008_v55  ;;  %7624 = vmatmul.f32.vlgmr.msrb.gmra.mxu3 %v12008_v55  ;;  %v7762_v43 = vld [vmem:[#allocation22 + $0x1598] sm:$0xff] }
0x1cff   : > { %v7450_v58 = vmul.f32 %v7446_v51, %v7418_v20  ;;  %v7758_v53 = vld [vmem:[#allocation22 + $0x1578] sm:$0xff]  ;;  %v7723_v51 = vld [vmem:[#allocation22 + $0x1460] sm:$0xff] }
0x1d00   : > { %v7755_v20 = vld [vmem:[#allocation22 + $0x1560] sm:$0xff] }
0x1d01   : > { %v9604_v48 = vpop.eup %9603  ;;  %v7459_v6 = vadd.f32 %v7455_v2, %v7450_v58  ;;  %7812 = vmatpush.msra.mxu3 %v7755_v20  ;;  %v7724_v2 = vld [vmem:[#allocation22 + $0x1468] sm:$0xff] }
0x1d02   : > { %v12013_v59 = vadd.f32 %v9604_v48, %v11985_v9  ;;  %v7741_v9 = vld [vmem:[#allocation22 + $0x14f0] sm:$0xff]  ;;  %v7756_v58 = vld [vmem:[#allocation22 + $0x1568] sm:$0xff] }
0x1d03   : > { %v9606_v61 = vpop.eup %9605  ;;  %9607 = vtanh.f32 %v7459_v6  ;;  %7780 = vmatpush.msrb.mxu2 %v7741_v9  ;;  %v7721_v48 = vld [vmem:[#allocation22 + $0x1450] sm:$0xff]  ;;  %v7719_v9 = vld [vmem:[#allocation22 + $0x1440] sm:$0xff] }
0x1d04   : > { %7555 = vmatmul.f32.vlgmr.msrb.gmra.mxu0 %v12013_v59  ;;  %7601 = vmatmul.f32.vlgmr.msra.gmra.mxu2 %v12013_v59  ;;  %v12018_v4 = vadd.f32 %v9606_v61, %v11990_v19  ;;  %v7753_v6 = vld [vmem:[#allocation22 + $0x1550] sm:$0xff]  ;;  %v7722_v61 = vld [vmem:[#allocation22 + $0x1458] sm:$0xff] }
0x1d05   : > { %7781 = vmatpush.msrb.mxu2 %v7739_v5  ;;  %7813 = vmatpush.msra.mxu3 %v7753_v6  ;;  %v7720_v5 = vld [vmem:[#allocation22 + $0x1448] sm:$0xff]  ;;  %v7986_v6 = vld [vmem:[#allocation14 + $0x16f0] sm:$0xff] }
0x1d06   : > { %7581 = vmatmul.f32.gmra.mxu1 %v12018_v4  ;;  %7627 = vmatmul.f32.gmra.mxu3 %v12018_v4 }
0x1d07   : > { %7782 = vmatpush.msrb.mxu2 %v7737_v3  ;;  %7814 = vmatpush.msra.mxu3 %v7751_v63  ;;  %v7749_v3 = vld [vmem:[#allocation22 + $0x1530] sm:$0xff]  ;;  %v7982_v63 = vld [vmem:[#allocation14 + $0x16d0] sm:$0xff] }
0x1d09   : > { %v9608_v62 = vpop.eup %9607  ;;  %7783 = vmatpush.msrb.mxu2 %v7735_v7  ;;  %7815 = vmatpush.msra.mxu3 %v7749_v3  ;;  %v7715_v7 = vld [vmem:[#allocation22 + $0x1420] sm:$0xff]  ;;  %v8008_v3 = vld [vmem:[#allocation14 + $0x17a0] sm:$0xff] }
0x1d0a   : > { %v12023_v14 = vadd.f32 %v9608_v62, %v11995_v34  ;;  %v7733_v34 = vld [vmem:[#allocation22 + $0x14b0] sm:$0xff]  ;;  %v7754_v62 = vld [vmem:[#allocation22 + $0x1558] sm:$0xff] }
0x1d0b   : > { %7784 = vmatpush.msrb.mxu2 %v7733_v34  ;;  %7816 = vmatpush.msra.mxu3 %v7747_v8  ;;  %v7716_v34 = vld [vmem:[#allocation22 + $0x1428] sm:$0xff]  ;;  %v8006_v8 = vld [vmem:[#allocation14 + $0x1790] sm:$0xff] }
0x1d0c   : > { %7558 = vmatmul.f32.gmra.mxu0 %v12023_v14  ;;  %7604 = vmatmul.f32.gmra.mxu2 %v12023_v14 }
0x1d0d   : > { %7785 = vmatpush.msrb.mxu2 %v7731_v12  ;;  %v7745_v12 = vld [vmem:[#allocation22 + $0x1510] sm:$0xff] }
0x1d0e   : > { %7817 = vmatpush.msra.mxu3 %v7745_v12 }
0x1d0f   : > { %7786 = vmatpush.msrb.mxu2 %v7729_v21  ;;  %v7711_v21 = vld [vmem:[#allocation22 + $0x1400] sm:$0xff] }
0x1d10   : > { %7818 = vmatpush.msra.mxu3 %v7743_v16 }
0x1d11   : > { %7787 = vmatpush.msrb.mxu2 %v7727_v27  ;;  %v7538_v27 = vld [vmem:[#allocation17 + $0x14] sm:$0x3] }
0x1d13   : > { %7788 = vmatpush.msrb.mxu2 %v7725_v26  ;;  %v7689_v26 = vld [vmem:[#allocation19 + $0x140] sm:$0xff] }
0x1d15   : > { %7789 = vmatpush.msrb.mxu2 %v7723_v51 }
0x1d17   : > { %7790 = vmatpush.msrb.mxu2 %v7721_v48  ;;  %v8014_v48 = vld [vmem:[#allocation14 + $0x17d0] sm:$0xff] }
0x1d19   : > { %7791 = vmatpush.msrb.mxu2 %v7719_v9  ;;  %v8012_v9 = vld [vmem:[#allocation14 + $0x17c0] sm:$0xff] }
0x1d7b   : > { %v7579_v19 = vpop.f32.mrf.mxu1 }
0x1d81   : > { %v7556_v17 = vpop.f32.mrf.mxu0  ;;  %v7625_v11 = vpop.f32.mrf.mxu3 }
0x1d82   : > { %v7580_v49 = vadd.f32 %v7579_v19, %v7556_v17  ;;  %v7717_v19 = vld [vmem:[#allocation22 + $0x1430] sm:$0xff]  ;;  %v7750_v17 = vld [vmem:[#allocation22 + $0x1538] sm:$0xff] }
0x1d83   : > { %v7582_v40 = vpop.f32.mrf.mxu1  ;;  %7792 = vmatpush.msrb.mxu2 %v7717_v19  ;;  %v7980_v19 = vld [vmem:[#allocation14 + $0x16c0] sm:$0xff] }
0x1d85   : > { %7793 = vmatpush.msrb.mxu2 %v7715_v7 }
0x1d87   : > { %v7602_v13 = vpop.f32.mrf.mxu2 }
0x1d88   : > { %v7626_v37 = vadd.f32 %v7625_v11, %v7602_v13  ;;  %v7713_v11 = vld [vmem:[#allocation22 + $0x1410] sm:$0xff]  ;;  %v7746_v13 = vld [vmem:[#allocation22 + $0x1518] sm:$0xff] }
0x1d89   : > { %v7559_v18 = vpop.f32.mrf.mxu0  ;;  %v7628_v45 = vpop.f32.mrf.mxu3  ;;  %7794 = vmatpush.msrb.mxu2 %v7713_v11 }
0x1d8a   : > { %v7583_v23 = vadd.f32 %v7582_v40, %v7559_v18  ;;  %v7712_v40 = vld [vmem:[#allocation22 + $0x1408] sm:$0xff] }
0x1d8b   : > { %7795 = vmatpush.msrb.mxu2 %v7711_v21  ;;  %v7744_v18 = vld [vmem:[#allocation22 + $0x1508] sm:$0xff]  ;;  %v8019_v21 = vld [vmem:[#allocation14 + $0x17f8] sm:$0xff] }
0x1d8c   : > { %7656 = vmatpush.msra.mxu0 %v7583_v23  ;;  %v7632_v23 = vperm.slane %v7538_v27, 0 }
0x1d8e   : > { %7657 = vmatpush.msra.mxu0 %v7580_v49 }
0x1d8f   : > { %v7605_v33 = vpop.f32.mrf.mxu2  ;;  %9150 = vmatmul.msk.f32.vlgmr.msra.gmra.mxu0 %vm1199_vm0, %v7535_v15 }
0x1d90   : > { %v7629_v36 = vadd.f32 %v7628_v45, %v7605_v33  ;;  %7826 = vmatpush.msrb.mxu0 %v7742_v32  ;;  %v7633_v32 = vperm.slane %v7538_v27, 1  ;;  %v8015_v27 = vld [vmem:[#allocation14 + $0x17d8] sm:$0xff] }
0x1d92   : > { %7679 = vmatpush.msra.mxu1 %v7629_v36  ;;  %7827 = vmatpush.msrb.mxu0 %v7740_v35  ;;  %v7690_v35 = vld [vmem:[#allocation19 + $0x148] sm:$0xff] }
0x1d94   : > { %7680 = vmatpush.msra.mxu1 %v7626_v37  ;;  %7828 = vmatpush.msrb.mxu0 %v7738_v52  ;;  %v7699_v52 = vld [vmem:[#allocation20 + $0x148] sm:$0xff] }
0x1d95   : > { %9152 = vmatmul.msk.f32.vlgmr.msra.gmra.mxu1 %vm1199_vm0, %v7535_v15  ;;  %v7698_v15 = vld [vmem:[#allocation20 + $0x140] sm:$0xff] }
0x1d96   : > { %7849 = vmatpush.msrb.mxu1 %v7774_v44  ;;  %7829 = vmatpush.msrb.mxu0 %v7736_v41  ;;  %v7691_v44 = vld [vmem:[#allocation19 + $0x150] sm:$0xff] }
0x1d97   : > { %9151 = vmatmul.msk.f32.gmra.mxu0 %vm1199_vm0, %v7536_v29 }
0x1d98   : > { %7850 = vmatpush.msrb.mxu1 %v7772_v42  ;;  %7830 = vmatpush.msrb.mxu0 %v7734_v60  ;;  %v7700_v42 = vld [vmem:[#allocation20 + $0x150] sm:$0xff] }
0x1d9a   : > { %7851 = vmatpush.msrb.mxu1 %v7770_v54  ;;  %7831 = vmatpush.msrb.mxu0 %v7732_v46 }
0x1d9c   : > { %7852 = vmatpush.msrb.mxu1 %v7768_v47  ;;  %7832 = vmatpush.msrb.mxu0 %v7730_v57 }
0x1d9d   : > { %9153 = vmatmul.msk.f32.gmra.mxu1 %vm1199_vm0, %v7536_v29 }
0x1d9e   : > { %7853 = vmatpush.msrb.mxu1 %v7766_v28  ;;  %7833 = vmatpush.msrb.mxu0 %v7728_v50  ;;  %v7692_v28 = vld [vmem:[#allocation19 + $0x158] sm:$0xff] }
0x1da0   : > { %7854 = vmatpush.msrb.mxu1 %v7764_v10  ;;  %7834 = vmatpush.msrb.mxu0 %v7726_v0  ;;  %v7701_v10 = vld [vmem:[#allocation20 + $0x158] sm:$0xff] }
0x1da2   : > { %7855 = vmatpush.msrb.mxu1 %v7762_v43  ;;  %7835 = vmatpush.msrb.mxu0 %v7724_v2  ;;  %v8018_v2 = vld [vmem:[#allocation14 + $0x17f0] sm:$0xff] }
0x1da4   : > { %7856 = vmatpush.msrb.mxu1 %v7760_v56  ;;  %7836 = vmatpush.msrb.mxu0 %v7722_v61  ;;  %v7984_v61 = vld [vmem:[#allocation14 + $0x16e0] sm:$0xff] }
0x1da6   : > { %7857 = vmatpush.msrb.mxu1 %v7758_v53  ;;  %7837 = vmatpush.msrb.mxu0 %v7720_v5 }
0x1da8   : > { %7858 = vmatpush.msrb.mxu1 %v7756_v58  ;;  %7838 = vmatpush.msrb.mxu0 %v7718_v22  ;;  %v8016_v58 = vld [vmem:[#allocation14 + $0x17e0] sm:$0xff]  ;;  %v7978_v22 = vld [vmem:[#allocation14 + $0x16b0] sm:$0xff] }
0x1daa   : > { %7859 = vmatpush.msrb.mxu1 %v7754_v62  ;;  %7839 = vmatpush.msrb.mxu0 %v7716_v34 }
0x1dac   : > { %7860 = vmatpush.msrb.mxu1 %v7752_v1  ;;  %7840 = vmatpush.msrb.mxu0 %v7714_v30  ;;  %v8010_v1 = vld [vmem:[#allocation14 + $0x17b0] sm:$0xff]  ;;  %v7776_v30 = vld [vmem:[#allocation23 + $0xa0] sm:$0xff] }
0x1dae   : > { %7861 = vmatpush.msrb.mxu1 %v7750_v17  ;;  %7841 = vmatpush.msrb.mxu0 %v7712_v40  ;;  %v8017_v40 = vld [vmem:[#allocation14 + $0x17e8] sm:$0xff] }
0x1db0   : > { %7862 = vmatpush.msrb.mxu1 %v7748_v24  ;;  %8025 = vmatpush.msra.mxu0 %v7986_v6  ;;  %v8004_v24 = vld [vmem:[#allocation14 + $0x1780] sm:$0xff]  ;;  %v7967_v6 = vld [vmem:[#allocation14 + $0x1658] sm:$0xff] }
0x1db2   : > { %7863 = vmatpush.msrb.mxu1 %v7746_v13  ;;  %8026 = vmatpush.msra.mxu0 %v7984_v61  ;;  %v7993_v61 = vld [vmem:[#allocation14 + $0x1728] sm:$0xff] }
0x1db4   : > { %7864 = vmatpush.msrb.mxu1 %v7744_v18  ;;  %8027 = vmatpush.msra.mxu0 %v7982_v63  ;;  %v7965_v63 = vld [vmem:[#allocation14 + $0x1648] sm:$0xff] }
0x1db6   : > { %8048 = vmatpush.msra.mxu1 %v8018_v2  ;;  %8028 = vmatpush.msra.mxu0 %v7980_v19  ;;  %v7995_v2 = vld [vmem:[#allocation14 + $0x1738] sm:$0xff]  ;;  %v7988_v19 = vld [vmem:[#allocation14 + $0x1700] sm:$0xff] }
0x1db8   : > { %8049 = vmatpush.msra.mxu1 %v8016_v58  ;;  %8029 = vmatpush.msra.mxu0 %v7978_v22  ;;  %v7966_v58 = vld [vmem:[#allocation14 + $0x1650] sm:$0xff]  ;;  %v7989_v22 = vld [vmem:[#allocation14 + $0x1708] sm:$0xff] }
0x1dba   : > { %8050 = vmatpush.msra.mxu1 %v8014_v48  ;;  %v7992_v48 = vld [vmem:[#allocation14 + $0x1720] sm:$0xff] }
0x1dbc   : > { %8051 = vmatpush.msra.mxu1 %v8012_v9  ;;  %v7990_v9 = vld [vmem:[#allocation14 + $0x1710] sm:$0xff] }
0x1dbe   : > { %8052 = vmatpush.msra.mxu1 %v8010_v1  ;;  %v7962_v1 = vld [vmem:[#allocation14 + $0x1630] sm:$0xff] }
0x1dc0   : > { %8053 = vmatpush.msra.mxu1 %v8008_v3  ;;  %v7963_v3 = vld [vmem:[#allocation14 + $0x1638] sm:$0xff] }
0x1dc2   : > { %8054 = vmatpush.msra.mxu1 %v8006_v8  ;;  %v7958_v8 = vld [vmem:[#allocation14 + $0x1610] sm:$0xff] }
0x1dc4   : > { %8055 = vmatpush.msra.mxu1 %v8004_v24  ;;  %v7956_v24 = vld [vmem:[#allocation14 + $0x1600] sm:$0xff] }
0x1e0c   : > { %v7659_v25 = vpop.f32.mrf.mxu0 }
0x1e0d   : > { %v7660_v49 = vadd.f32 %v7659_v25, %v7632_v23  ;;  %v7987_v25 = vld [vmem:[#allocation14 + $0x16f8] sm:$0xff] }
0x1e0f   : > { %v7693_v31 = vmul.f32 %v7689_v26, %v7660_v49  ;;  %v8013_v26 = vld [vmem:[#allocation14 + $0x17c8] sm:$0xff]  ;;  %v7777_v49 = vld [vmem:[#allocation23 + $0xa8] sm:$0xff] }
0x1e11   : > { %v7702_v45 = vadd.f32 %v7698_v15, %v7693_v31  ;;  %v7985_v15 = vld [vmem:[#allocation14 + $0x16e8] sm:$0xff]  ;;  %v8011_v31 = vld [vmem:[#allocation14 + $0x17b8] sm:$0xff] }
0x1e12   : > { %v7682_v33 = vpop.f32.mrf.mxu1 }
0x1e13   : > { %9609 = vtanh.f32 %v7702_v45  ;;  %v7683_v36 = vadd.f32 %v7682_v33, %v7633_v32  ;;  %v8009_v45 = vld [vmem:[#allocation14 + $0x17a8] sm:$0xff] }
0x1e14   : > { %v7662_v37 = vpop.f32.mrf.mxu0  ;;  %v7981_v33 = vld [vmem:[#allocation14 + $0x16c8] sm:$0xff] }
0x1e15   : > { %v7694_v41 = vmul.f32 %v7690_v35, %v7683_v36  ;;  %v7663_v29 = vadd.f32 %v7662_v37, %v7632_v23  ;;  %v8007_v35 = vld [vmem:[#allocation14 + $0x1798] sm:$0xff]  ;;  %v7976_v37 = vld [vmem:[#allocation14 + $0x16a0] sm:$0xff] }
0x1e16   : > { %v7979_v36 = vld [vmem:[#allocation14 + $0x16b8] sm:$0xff]  ;;  %8030 = vmatpush.msra.mxu0 %v7976_v37 }
0x1e17   : > { %v7703_v60 = vadd.f32 %v7699_v52, %v7694_v41  ;;  %v7695_v54 = vmul.f32 %v7691_v44, %v7663_v29  ;;  %v8005_v52 = vld [vmem:[#allocation14 + $0x1788] sm:$0xff]  ;;  %v8002_v44 = vld [vmem:[#allocation14 + $0x1770] sm:$0xff]  ;;  %v8003_v29 = vld [vmem:[#allocation14 + $0x1778] sm:$0xff] }
0x1e18   : > { %8056 = vmatpush.msra.mxu1 %v8002_v44  ;;  %v7977_v41 = vld [vmem:[#allocation14 + $0x16a8] sm:$0xff] }
0x1e19   : > { %v9610_v46 = vpop.eup %9609  ;;  %9611 = vtanh.f32 %v7703_v60  ;;  %v7704_v47 = vadd.f32 %v7700_v42, %v7695_v54  ;;  %v7974_v42 = vld [vmem:[#allocation14 + $0x1690] sm:$0xff]  ;;  %v8000_v60 = vld [vmem:[#allocation14 + $0x1760] sm:$0xff]  ;;  %v7975_v54 = vld [vmem:[#allocation14 + $0x1698] sm:$0xff] }
0x1e1a   : > { %v7685_v57 = vpop.f32.mrf.mxu1  ;;  %7796 = vmatmul.f32.vlgmr.msrb.gmra.mxu2 %v9610_v46  ;;  %7842 = vmatmul.f32.vlgmr.msrb.gmra.mxu0 %v9610_v46  ;;  %v8001_v46 = vld [vmem:[#allocation14 + $0x1768] sm:$0xff] }
0x1e1b   : > { %9613 = vtanh.f32 %v7704_v47  ;;  %v7686_v50 = vadd.f32 %v7685_v57, %v7633_v32  ;;  %v7983_v32 = vld [vmem:[#allocation14 + $0x16d8] sm:$0xff]  ;;  %8031 = vmatpush.msra.mxu0 %v7974_v42  ;;  %8057 = vmatpush.msra.mxu1 %v8000_v60  ;;  %v7972_v47 = vld [vmem:[#allocation14 + $0x1680] sm:$0xff]  ;;  %v7998_v57 = vld [vmem:[#allocation14 + $0x1750] sm:$0xff] }
0x1e1d   : > { %v7696_v0 = vmul.f32 %v7692_v28, %v7686_v50  ;;  %v7973_v28 = vld [vmem:[#allocation14 + $0x1688] sm:$0xff]  ;;  %8032 = vmatpush.msra.mxu0 %v7972_v47  ;;  %8058 = vmatpush.msra.mxu1 %v7998_v57  ;;  %v7999_v50 = vld [vmem:[#allocation14 + $0x1758] sm:$0xff] }
0x1e1f   : > { %v9612_v43 = vpop.eup %9611  ;;  %v7705_v56 = vadd.f32 %v7701_v10, %v7696_v0  ;;  %v7970_v10 = vld [vmem:[#allocation14 + $0x1670] sm:$0xff]  ;;  %v7996_v0 = vld [vmem:[#allocation14 + $0x1740] sm:$0xff] }
0x1e20   : > { %7819 = vmatmul.f32.vlgmr.msra.gmra.mxu3 %v9612_v43  ;;  %7865 = vmatmul.f32.vlgmr.msrb.gmra.mxu1 %v9612_v43  ;;  %v7971_v43 = vld [vmem:[#allocation14 + $0x1678] sm:$0xff] }
0x1e21   : > { %v9614_v53 = vpop.eup %9613  ;;  %9615 = vtanh.f32 %v7705_v56  ;;  %8033 = vmatpush.msra.mxu0 %v7970_v10  ;;  %8059 = vmatpush.msra.mxu1 %v7996_v0  ;;  %v7997_v56 = vld [vmem:[#allocation14 + $0x1748] sm:$0xff] }
0x1e22   : > { %7799 = vmatmul.f32.gmra.mxu2 %v9614_v53  ;;  %7845 = vmatmul.f32.gmra.mxu0 %v9614_v53  ;;  %v7968_v53 = vld [vmem:[#allocation14 + $0x1660] sm:$0xff] }
0x1e23   : > { %8034 = vmatpush.msra.mxu0 %v7968_v53  ;;  %v8257_v53 = vld [vmem:[#allocation22 + $0x17e0] sm:$0xff] }
0x1e25   : > { %8035 = vmatpush.msra.mxu0 %v7966_v58  ;;  %v8221_v58 = vld [vmem:[#allocation22 + $0x16c0] sm:$0xff] }
0x1e27   : > { %v9616_v51 = vpop.eup %9615 }
0x1e28   : > { %7822 = vmatmul.f32.gmra.mxu3 %v9616_v51  ;;  %7868 = vmatmul.f32.gmra.mxu1 %v9616_v51  ;;  %v7994_v51 = vld [vmem:[#allocation14 + $0x1730] sm:$0xff] }
0x1e29   : > { %8060 = vmatpush.msra.mxu1 %v7994_v51  ;;  %v8223_v51 = vld [vmem:[#allocation22 + $0x16d0] sm:$0xff] }
0x1e2b   : > { %8061 = vmatpush.msra.mxu1 %v7992_v48  ;;  %v8253_v48 = vld [vmem:[#allocation22 + $0x17c0] sm:$0xff] }
0x1e2d   : > { %8062 = vmatpush.msra.mxu1 %v7990_v9  ;;  %v8249_v9 = vld [vmem:[#allocation22 + $0x17a0] sm:$0xff] }
0x1e2f   : > { %8063 = vmatpush.msra.mxu1 %v7988_v19 }
0x1e97   : > { %v7843_v20 = vpop.f32.mrf.mxu0 }
0x1e9d   : > { %v7866_v62 = vpop.f32.mrf.mxu1  ;;  %v7797_v5 = vpop.f32.mrf.mxu2 }
0x1e9e   : > { %v7867_v12 = vadd.f32 %v7866_v62, %v7843_v20  ;;  %v7969_v20 = vld [vmem:[#allocation14 + $0x1668] sm:$0xff]  ;;  %v7964_v62 = vld [vmem:[#allocation14 + $0x1640] sm:$0xff] }
0x1e9f   : > { %v7846_v7 = vpop.f32.mrf.mxu0  ;;  %8036 = vmatpush.msra.mxu0 %v7964_v62  ;;  %v8217_v62 = vld [vmem:[#allocation22 + $0x16a0] sm:$0xff] }
0x1ea1   : > { %8037 = vmatpush.msra.mxu0 %v7962_v1  ;;  %v8247_v1 = vld [vmem:[#allocation22 + $0x1790] sm:$0xff] }
0x1ea3   : > { %v7820_v17 = vpop.f32.mrf.mxu3 }
0x1ea4   : > { %v7821_v23 = vadd.f32 %v7820_v17, %v7797_v5  ;;  %v7991_v5 = vld [vmem:[#allocation14 + $0x1718] sm:$0xff]  ;;  %v7960_v17 = vld [vmem:[#allocation14 + $0x1620] sm:$0xff] }
0x1ea5   : > { %v7869_v34 = vpop.f32.mrf.mxu1  ;;  %v7800_v13 = vpop.f32.mrf.mxu2  ;;  %8038 = vmatpush.msra.mxu0 %v7960_v17 }
0x1ea6   : > { %v7870_v11 = vadd.f32 %v7869_v34, %v7846_v7  ;;  %v7961_v7 = vld [vmem:[#allocation14 + $0x1628] sm:$0xff]  ;;  %v7959_v34 = vld [vmem:[#allocation14 + $0x1618] sm:$0xff] }
0x1ea7   : > { %8039 = vmatpush.msra.mxu0 %v7958_v8  ;;  %v8211_v8 = vld [vmem:[#allocation22 + $0x1670] sm:$0xff] }
0x1ea8   : > { %7920 = vmatpush.msrb.mxu3 %v7870_v11  ;;  %v7957_v11 = vld [vmem:[#allocation14 + $0x1608] sm:$0xff] }
0x1ea9   : > { %8040 = vmatpush.msra.mxu0 %v7956_v24  ;;  %v8021_v24 = vld [vmem:[#allocation16 + $0xb0] sm:$0xff] }
0x1eaa   : > { %7921 = vmatpush.msrb.mxu3 %v7867_v12  ;;  %v7779_v12 = vld [vmem:[#allocation25 + $0x14] sm:$0x3] }
0x1eab   : > { %v7823_v16 = vpop.f32.mrf.mxu3  ;;  %9156 = vmatmul.msk.f32.vlgmr.msrb.gmra.mxu3 %vm1199_vm0, %v7776_v30 }
0x1eac   : > { %v7824_v18 = vadd.f32 %v7823_v16, %v7800_v13  ;;  %8094 = vmatpush.msra.mxu3 %v8019_v21  ;;  %v7931_v21 = vld [vmem:[#allocation26 + $0x148] sm:$0xff] }
0x1eae   : > { %7897 = vmatpush.msra.mxu2 %v7824_v18  ;;  %8095 = vmatpush.msra.mxu3 %v8017_v40  ;;  %v7940_v40 = vld [vmem:[#allocation28 + $0x148] sm:$0xff] }
0x1eb0   : > { %7898 = vmatpush.msra.mxu2 %v7821_v23  ;;  %8096 = vmatpush.msra.mxu3 %v8015_v27  ;;  %v7873_v27 = vperm.slane %v7779_v12, 0 }
0x1eb1   : > { %9154 = vmatmul.msk.f32.vlgmr.msra.gmra.mxu2 %vm1199_vm0, %v7776_v30  ;;  %v7874_v30 = vperm.slane %v7779_v12, 1  ;;  %v8228_v12 = vld [vmem:[#allocation22 + $0x16f8] sm:$0xff] }
0x1eb2   : > { %8071 = vmatpush.msrb.mxu2 %v7987_v25  ;;  %8097 = vmatpush.msra.mxu3 %v8013_v26  ;;  %v7930_v26 = vld [vmem:[#allocation26 + $0x140] sm:$0xff] }
0x1eb3   : > { %9157 = vmatmul.msk.f32.gmra.mxu3 %vm1199_vm0, %v7777_v49 }
0x1eb4   : > { %8072 = vmatpush.msrb.mxu2 %v7985_v15  ;;  %8098 = vmatpush.msra.mxu3 %v8011_v31  ;;  %v7939_v15 = vld [vmem:[#allocation28 + $0x140] sm:$0xff] }
0x1eb6   : > { %8073 = vmatpush.msrb.mxu2 %v7983_v32  ;;  %8099 = vmatpush.msra.mxu3 %v8009_v45  ;;  %v7933_v32 = vld [vmem:[#allocation26 + $0x158] sm:$0xff] }
0x1eb8   : > { %8074 = vmatpush.msrb.mxu2 %v7981_v33  ;;  %8100 = vmatpush.msra.mxu3 %v8007_v35  ;;  %v7942_v35 = vld [vmem:[#allocation28 + $0x158] sm:$0xff] }
0x1eb9   : > { %9155 = vmatmul.msk.f32.gmra.mxu2 %vm1199_vm0, %v7777_v49 }
0x1eba   : > { %8075 = vmatpush.msrb.mxu2 %v7979_v36  ;;  %8101 = vmatpush.msra.mxu3 %v8005_v52 }
0x1ebc   : > { %8076 = vmatpush.msrb.mxu2 %v7977_v41  ;;  %8102 = vmatpush.msra.mxu3 %v8003_v29  ;;  %v7932_v29 = vld [vmem:[#allocation26 + $0x150] sm:$0xff] }
0x1ebe   : > { %8077 = vmatpush.msrb.mxu2 %v7975_v54  ;;  %8103 = vmatpush.msra.mxu3 %v8001_v46  ;;  %v7941_v54 = vld [vmem:[#allocation28 + $0x150] sm:$0xff] }
0x1ec0   : > { %8078 = vmatpush.msrb.mxu2 %v7973_v28  ;;  %8104 = vmatpush.msra.mxu3 %v7999_v50 }
0x1ec2   : > { %8079 = vmatpush.msrb.mxu2 %v7971_v43  ;;  %8105 = vmatpush.msra.mxu3 %v7997_v56  ;;  %v8259_v43 = vld [vmem:[#allocation22 + $0x17f0] sm:$0xff]  ;;  %v8225_v56 = vld [vmem:[#allocation22 + $0x16e0] sm:$0xff] }
0x1ec4   : > { %8080 = vmatpush.msrb.mxu2 %v7969_v20  ;;  %8106 = vmatpush.msra.mxu3 %v7995_v2  ;;  %v8255_v20 = vld [vmem:[#allocation22 + $0x17d0] sm:$0xff] }
0x1ec6   : > { %8081 = vmatpush.msrb.mxu2 %v7967_v6  ;;  %8107 = vmatpush.msra.mxu3 %v7993_v61  ;;  %v8251_v6 = vld [vmem:[#allocation22 + $0x17b0] sm:$0xff] }
0x1ec8   : > { %8082 = vmatpush.msrb.mxu2 %v7965_v63  ;;  %8108 = vmatpush.msra.mxu3 %v7991_v5  ;;  %v8215_v5 = vld [vmem:[#allocation22 + $0x1690] sm:$0xff] }
0x1eca   : > { %8083 = vmatpush.msrb.mxu2 %v7963_v3  ;;  %8109 = vmatpush.msra.mxu3 %v7989_v22  ;;  %v8213_v22 = vld [vmem:[#allocation22 + $0x1680] sm:$0xff] }
0x1ecc   : > { %8084 = vmatpush.msrb.mxu2 %v7961_v7  ;;  %8289 = vmatpush.msrb.mxu3 %v8259_v43  ;;  %v8245_v7 = vld [vmem:[#allocation22 + $0x1780] sm:$0xff] }
0x1ecd   : > { %v8237_v43 = vld [vmem:[#allocation22 + $0x1740] sm:$0xff] }
0x1ece   : > { %8085 = vmatpush.msrb.mxu2 %v7959_v34  ;;  %8290 = vmatpush.msrb.mxu3 %v8257_v53  ;;  %v8238_v53 = vld [vmem:[#allocation22 + $0x1748] sm:$0xff] }
0x1ed0   : > { %8086 = vmatpush.msrb.mxu2 %v7957_v11  ;;  %8291 = vmatpush.msrb.mxu3 %v8255_v20  ;;  %v8243_v11 = vld [vmem:[#allocation22 + $0x1770] sm:$0xff]  ;;  %v8204_v20 = vld [vmem:[#allocation22 + $0x1638] sm:$0xff] }
0x1ed2   : > { %8292 = vmatpush.msrb.mxu3 %v8253_v48  ;;  %v8233_v48 = vld [vmem:[#allocation22 + $0x1720] sm:$0xff] }
0x1ed4   : > { %8293 = vmatpush.msrb.mxu3 %v8251_v6  ;;  %v8234_v6 = vld [vmem:[#allocation22 + $0x1728] sm:$0xff] }
0x1ed6   : > { %8294 = vmatpush.msrb.mxu3 %v8249_v9  ;;  %v8200_v9 = vld [vmem:[#allocation22 + $0x1618] sm:$0xff] }
0x1ed8   : > { %8295 = vmatpush.msrb.mxu3 %v8247_v1  ;;  %v8229_v1 = vld [vmem:[#allocation22 + $0x1700] sm:$0xff] }
0x1eda   : > { %8296 = vmatpush.msrb.mxu3 %v8245_v7 }
0x1edc   : > { %8297 = vmatpush.msrb.mxu3 %v8243_v11 }
0x1f2e   : > { %v7923_v13 = vpop.f32.mrf.mxu3 }
0x1f2f   : > { %v7924_v16 = vadd.f32 %v7923_v13, %v7874_v30 }
0x1f31   : > { %v7935_v18 = vmul.f32 %v7931_v21, %v7924_v16  ;;  %v8226_v21 = vld [vmem:[#allocation22 + $0x16e8] sm:$0xff] }
0x1f33   : > { %v7944_v23 = vadd.f32 %v7940_v40, %v7935_v18  ;;  %v8224_v40 = vld [vmem:[#allocation22 + $0x16d8] sm:$0xff] }
0x1f34   : > { %v7900_v25 = vpop.f32.mrf.mxu2 }
0x1f35   : > { %9617 = vtanh.f32 %v7944_v23  ;;  %v7901_v49 = vadd.f32 %v7900_v25, %v7873_v27  ;;  %v8222_v23 = vld [vmem:[#allocation22 + $0x16c8] sm:$0xff]  ;;  %v8022_v25 = vld [vmem:[#allocation16 + $0xb8] sm:$0xff] }
0x1f36   : > { %v7926_v31 = vpop.f32.mrf.mxu3 }
0x1f37   : > { %v7934_v45 = vmul.f32 %v7930_v26, %v7901_v49  ;;  %v7927_v33 = vadd.f32 %v7926_v31, %v7874_v30  ;;  %v8258_v26 = vld [vmem:[#allocation22 + $0x17e8] sm:$0xff]  ;;  %v8220_v49 = vld [vmem:[#allocation22 + $0x16b8] sm:$0xff] }
0x1f38   : > { %v8218_v31 = vld [vmem:[#allocation22 + $0x16a8] sm:$0xff] }
0x1f39   : > { %v7943_v36 = vadd.f32 %v7939_v15, %v7934_v45  ;;  %v7937_v52 = vmul.f32 %v7933_v32, %v7927_v33  ;;  %v8256_v15 = vld [vmem:[#allocation22 + $0x17d8] sm:$0xff]  ;;  %v8254_v32 = vld [vmem:[#allocation22 + $0x17c8] sm:$0xff] }
0x1f3a   : > { %v8216_v45 = vld [vmem:[#allocation22 + $0x1698] sm:$0xff] }
0x1f3b   : > { %v9618_v37 = vpop.eup %9617  ;;  %9619 = vtanh.f32 %v7943_v36  ;;  %v7946_v44 = vadd.f32 %v7942_v35, %v7937_v52  ;;  %v8252_v33 = vld [vmem:[#allocation22 + $0x17b8] sm:$0xff]  ;;  %v8214_v35 = vld [vmem:[#allocation22 + $0x1688] sm:$0xff] }
0x1f3c   : > { %v7903_v41 = vpop.f32.mrf.mxu2  ;;  %v12036_v42 = vadd.f32 %v9618_v37, %v12008_v55  ;;  %v8250_v36 = vld [vmem:[#allocation22 + $0x17a8] sm:$0xff]  ;;  %v8212_v52 = vld [vmem:[#allocation22 + $0x1678] sm:$0xff] }
0x1f3d   : > { %9621 = vtanh.f32 %v7946_v44  ;;  %v7904_v60 = vadd.f32 %v7903_v41, %v7873_v27  ;;  %v8260_v27 = vld [vmem:[#allocation22 + $0x17f8] sm:$0xff]  ;;  %v8246_v44 = vld [vmem:[#allocation22 + $0x1788] sm:$0xff] }
0x1f3e   : > { %8064 = vmatmul.f32.vlgmr.msra.gmra.mxu1 %v12036_v42  ;;  %8110 = vmatmul.f32.vlgmr.msra.gmra.mxu3 %v12036_v42  ;;  %v8248_v37 = vld [vmem:[#allocation22 + $0x1798] sm:$0xff] }
0x1f3f   : > { %v7936_v46 = vmul.f32 %v7932_v29, %v7904_v60  ;;  %v8244_v41 = vld [vmem:[#allocation22 + $0x1778] sm:$0xff]  ;;  %v8209_v29 = vld [vmem:[#allocation22 + $0x1660] sm:$0xff] }
0x1f40   : > { %v8241_v60 = vld [vmem:[#allocation22 + $0x1760] sm:$0xff] }
0x1f41   : > { %v9620_v47 = vpop.eup %9619  ;;  %v7945_v57 = vadd.f32 %v7941_v54, %v7936_v46  ;;  %8298 = vmatpush.msrb.mxu3 %v8241_v60  ;;  %v8210_v54 = vld [vmem:[#allocation22 + $0x1668] sm:$0xff] }
0x1f42   : > { %v12041_v28 = vadd.f32 %v9620_v47, %v12013_v59  ;;  %v8227_v59 = vld [vmem:[#allocation22 + $0x16f0] sm:$0xff]  ;;  %v8242_v46 = vld [vmem:[#allocation22 + $0x1768] sm:$0xff] }
0x1f43   : > { %v9622_v50 = vpop.eup %9621  ;;  %9623 = vtanh.f32 %v7945_v57  ;;  %8266 = vmatpush.msra.mxu2 %v8227_v59  ;;  %v8207_v47 = vld [vmem:[#allocation22 + $0x1650] sm:$0xff]  ;;  %v8205_v59 = vld [vmem:[#allocation22 + $0x1640] sm:$0xff] }
0x1f44   : > { %8041 = vmatmul.f32.vlgmr.msra.gmra.mxu0 %v12041_v28  ;;  %8087 = vmatmul.f32.vlgmr.msrb.gmra.mxu2 %v12041_v28  ;;  %v12046_v55 = vadd.f32 %v9622_v50, %v12018_v4  ;;  %v8239_v57 = vld [vmem:[#allocation22 + $0x1750] sm:$0xff]  ;;  %v8208_v50 = vld [vmem:[#allocation22 + $0x1658] sm:$0xff] }
0x1f45   : > { %8267 = vmatpush.msra.mxu2 %v8225_v56  ;;  %8299 = vmatpush.msrb.mxu3 %v8239_v57  ;;  %v8206_v56 = vld [vmem:[#allocation22 + $0x1648] sm:$0xff] }
0x1f46   : > { %8067 = vmatmul.f32.gmra.mxu1 %v12046_v55  ;;  %8113 = vmatmul.f32.gmra.mxu3 %v12046_v55  ;;  %v8455_v57 = vld [vmem:[%s12329_s12 + $0x70] sm:$0xff] }
0x1f47   : > { %8268 = vmatpush.msra.mxu2 %v8223_v51  ;;  %8300 = vmatpush.msrb.mxu3 %v8237_v43  ;;  %v8235_v51 = vld [vmem:[#allocation22 + $0x1730] sm:$0xff] }
0x1f48   : > { %v8469_v43 = vld [vmem:[%s12329_s12 + $0xe0] sm:$0xff] }
0x1f49   : > { %v9624_v10 = vpop.eup %9623  ;;  %8269 = vmatpush.msra.mxu2 %v8221_v58  ;;  %8301 = vmatpush.msrb.mxu3 %v8235_v51  ;;  %v8201_v58 = vld [vmem:[#allocation22 + $0x1620] sm:$0xff]  ;;  %v8452_v51 = vld [vmem:[%s12329_s12 + $0x58] sm:$0xff] }
0x1f4a   : > { %v12051_v0 = vadd.f32 %v9624_v10, %v12023_v14  ;;  %v8219_v14 = vld [vmem:[#allocation22 + $0x16b0] sm:$0xff]  ;;  %v8240_v10 = vld [vmem:[#allocation22 + $0x1758] sm:$0xff] }
0x1f4b   : > { %8270 = vmatpush.msra.mxu2 %v8219_v14  ;;  %8302 = vmatpush.msrb.mxu3 %v8233_v48  ;;  %v8202_v14 = vld [vmem:[#allocation22 + $0x1628] sm:$0xff]  ;;  %v8466_v48 = vld [vmem:[%s12329_s12 + $0xc8] sm:$0xff] }
0x1f4c   : > { %8044 = vmatmul.f32.gmra.mxu0 %v12051_v0  ;;  %8090 = vmatmul.f32.gmra.mxu2 %v12051_v0 }
0x1f4d   : > { %8271 = vmatpush.msra.mxu2 %v8217_v62  ;;  %v8231_v62 = vld [vmem:[#allocation22 + $0x1710] sm:$0xff] }
0x1f4e   : > { %8303 = vmatpush.msrb.mxu3 %v8231_v62 }
0x1f4f   : > { %8272 = vmatpush.msra.mxu2 %v8215_v5  ;;  %v8197_v5 = vld [vmem:[#allocation22 + $0x1600] sm:$0xff] }
0x1f50   : > { %8304 = vmatpush.msrb.mxu3 %v8229_v1 }
0x1f51   : > { %8273 = vmatpush.msra.mxu2 %v8213_v22  ;;  %v8024_v22 = vld [vmem:[#allocation17 + $0x16] sm:$0x3] }
0x1f53   : > { %8274 = vmatpush.msra.mxu2 %v8211_v8  ;;  %v8175_v8 = vld [vmem:[#allocation19 + $0x160] sm:$0xff] }
0x1f55   : > { %8275 = vmatpush.msra.mxu2 %v8209_v29 }
0x1f57   : > { %8276 = vmatpush.msra.mxu2 %v8207_v47  ;;  %v8456_v47 = vld [vmem:[%s12329_s12 + $0x78] sm:$0xff] }
0x1f59   : > { %8277 = vmatpush.msra.mxu2 %v8205_v59 }
0x1fbb   : > { %v8065_v4 = vpop.f32.mrf.mxu1 }
0x1fc1   : > { %v8042_v2 = vpop.f32.mrf.mxu0  ;;  %v8111_v61 = vpop.f32.mrf.mxu3 }
0x1fc2   : > { %v8066_v34 = vadd.f32 %v8065_v4, %v8042_v2  ;;  %v8203_v4 = vld [vmem:[#allocation22 + $0x1630] sm:$0xff]  ;;  %v8236_v2 = vld [vmem:[#allocation22 + $0x1738] sm:$0xff] }
0x1fc3   : > { %v8068_v19 = vpop.f32.mrf.mxu1  ;;  %8278 = vmatpush.msra.mxu2 %v8203_v4  ;;  %v8468_v4 = vld [vmem:[%s12329_s12 + $0xd8] sm:$0xff] }
0x1fc5   : > { %8279 = vmatpush.msra.mxu2 %v8201_v58 }
0x1fc7   : > { %v8088_v63 = vpop.f32.mrf.mxu2 }
0x1fc8   : > { %v8112_v18 = vadd.f32 %v8111_v61, %v8088_v63  ;;  %v8199_v61 = vld [vmem:[#allocation22 + $0x1610] sm:$0xff]  ;;  %v8232_v63 = vld [vmem:[#allocation22 + $0x1718] sm:$0xff] }
0x1fc9   : > { %v8045_v3 = vpop.f32.mrf.mxu0  ;;  %v8114_v30 = vpop.f32.mrf.mxu3  ;;  %8280 = vmatpush.msra.mxu2 %v8199_v61 }
0x1fca   : > { %v8069_v17 = vadd.f32 %v8068_v19, %v8045_v3  ;;  %v8198_v19 = vld [vmem:[#allocation22 + $0x1608] sm:$0xff] }
0x1fcb   : > { %8281 = vmatpush.msra.mxu2 %v8197_v5  ;;  %v8230_v3 = vld [vmem:[#allocation22 + $0x1708] sm:$0xff] }
0x1fcc   : > { %8142 = vmatpush.msrb.mxu0 %v8069_v17  ;;  %v8118_v17 = vperm.slane %v8024_v22, 0 }
0x1fce   : > { %8143 = vmatpush.msrb.mxu0 %v8066_v34 }
0x1fcf   : > { %v8091_v13 = vpop.f32.mrf.mxu2  ;;  %9158 = vmatmul.msk.f32.vlgmr.msrb.gmra.mxu0 %vm1199_vm0, %v8021_v24 }
0x1fd0   : > { %v8115_v16 = vadd.f32 %v8114_v30, %v8091_v13  ;;  %8312 = vmatpush.msra.mxu0 %v8228_v12  ;;  %v8119_v12 = vperm.slane %v8024_v22, 1  ;;  %v8451_v22 = vld [vmem:[%s12329_s12 + $0x50] sm:$0xff] }
0x1fd2   : > { %8165 = vmatpush.msrb.mxu1 %v8115_v16  ;;  %8313 = vmatpush.msra.mxu0 %v8226_v21  ;;  %v8176_v21 = vld [vmem:[#allocation19 + $0x168] sm:$0xff] }
0x1fd4   : > { %8166 = vmatpush.msrb.mxu1 %v8112_v18  ;;  %8314 = vmatpush.msra.mxu0 %v8224_v40  ;;  %v8185_v40 = vld [vmem:[#allocation20 + $0x168] sm:$0xff] }
0x1fd5   : > { %9160 = vmatmul.msk.f32.vlgmr.msrb.gmra.mxu1 %vm1199_vm0, %v8021_v24  ;;  %v8184_v24 = vld [vmem:[#allocation20 + $0x160] sm:$0xff] }
0x1fd6   : > { %8335 = vmatpush.msra.mxu1 %v8260_v27  ;;  %8315 = vmatpush.msra.mxu0 %v8222_v23  ;;  %v8177_v27 = vld [vmem:[#allocation19 + $0x170] sm:$0xff] }
0x1fd7   : > { %9159 = vmatmul.msk.f32.gmra.mxu0 %vm1199_vm0, %v8022_v25 }
0x1fd8   : > { %8336 = vmatpush.msra.mxu1 %v8258_v26  ;;  %8316 = vmatpush.msra.mxu0 %v8220_v49  ;;  %v8186_v26 = vld [vmem:[#allocation20 + $0x170] sm:$0xff] }
0x1fda   : > { %8337 = vmatpush.msra.mxu1 %v8256_v15  ;;  %8317 = vmatpush.msra.mxu0 %v8218_v31 }
0x1fdc   : > { %8338 = vmatpush.msra.mxu1 %v8254_v32  ;;  %8318 = vmatpush.msra.mxu0 %v8216_v45 }
0x1fdd   : > { %9161 = vmatmul.msk.f32.gmra.mxu1 %vm1199_vm0, %v8022_v25 }
0x1fde   : > { %8339 = vmatpush.msra.mxu1 %v8252_v33  ;;  %8319 = vmatpush.msra.mxu0 %v8214_v35  ;;  %v8178_v33 = vld [vmem:[#allocation19 + $0x178] sm:$0xff] }
0x1fe0   : > { %8340 = vmatpush.msra.mxu1 %v8250_v36  ;;  %8320 = vmatpush.msra.mxu0 %v8212_v52  ;;  %v8187_v36 = vld [vmem:[#allocation20 + $0x178] sm:$0xff] }
0x1fe2   : > { %8341 = vmatpush.msra.mxu1 %v8248_v37  ;;  %8321 = vmatpush.msra.mxu0 %v8210_v54  ;;  %v8472_v54 = vld [vmem:[%s12329_s12 + $0xf8] sm:$0xff] }
0x1fe4   : > { %8342 = vmatpush.msra.mxu1 %v8246_v44  ;;  %8322 = vmatpush.msra.mxu0 %v8208_v50  ;;  %v8470_v50 = vld [vmem:[%s12329_s12 + $0xe8] sm:$0xff] }
0x1fe6   : > { %8343 = vmatpush.msra.mxu1 %v8244_v41  ;;  %8323 = vmatpush.msra.mxu0 %v8206_v56  ;;  %v8453_v56 = vld [vmem:[%s12329_s12 + $0x60] sm:$0xff] }
0x1fe8   : > { %8344 = vmatpush.msra.mxu1 %v8242_v46  ;;  %8324 = vmatpush.msra.mxu0 %v8204_v20  ;;  %v8471_v46 = vld [vmem:[%s12329_s12 + $0xf0] sm:$0xff] }
0x1fe9   : > { %v8467_v20 = vld [vmem:[%s12329_s12 + $0xd0] sm:$0xff] }
0x1fea   : > { %8345 = vmatpush.msra.mxu1 %v8240_v10  ;;  %8325 = vmatpush.msra.mxu0 %v8202_v14  ;;  %v8454_v10 = vld [vmem:[%s12329_s12 + $0x68] sm:$0xff] }
0x1fec   : > { %8346 = vmatpush.msra.mxu1 %v8238_v53  ;;  %8326 = vmatpush.msra.mxu0 %v8200_v9  ;;  %v8262_v9 = vld [vmem:[#allocation23 + $0xb0] sm:$0xff] }
0x1fee   : > { %8347 = vmatpush.msra.mxu1 %v8236_v2  ;;  %8327 = vmatpush.msra.mxu0 %v8198_v19 }
0x1ff0   : > { %8348 = vmatpush.msra.mxu1 %v8234_v6  ;;  %8476 = vmatpush.msrb.mxu0 %v8456_v47  ;;  %v8465_v6 = vld [vmem:[%s12329_s12 + $0xc0] sm:$0xff] }
0x1ff2   : > { %8349 = vmatpush.msra.mxu1 %v8232_v63  ;;  %8477 = vmatpush.msrb.mxu0 %v8455_v57 }
0x1ff4   : > { %8350 = vmatpush.msra.mxu1 %v8230_v3  ;;  %8478 = vmatpush.msrb.mxu0 %v8454_v10  ;;  %v8263_v3 = vld [vmem:[#allocation23 + $0xb8] sm:$0xff] }
0x1ff6   : > { %8499 = vmatpush.msrb.mxu1 %v8472_v54  ;;  %8479 = vmatpush.msrb.mxu0 %v8453_v56 }
0x1ff8   : > { %8500 = vmatpush.msrb.mxu1 %v8471_v46  ;;  %8480 = vmatpush.msrb.mxu0 %v8452_v51  ;;  %v8419_v46 = vld [vmem:[#allocation26 + $0x178] sm:$0xff] }
0x1ffa   : > { %8501 = vmatpush.msrb.mxu1 %v8470_v50  ;;  %8481 = vmatpush.msrb.mxu0 %v8451_v22  ;;  %v8428_v50 = vld [vmem:[#allocation28 + $0x178] sm:$0xff] }
0x1ffc   : > { %8502 = vmatpush.msrb.mxu1 %v8469_v43 }
0x1ffe   : > { %8503 = vmatpush.msrb.mxu1 %v8468_v4  ;;  %v8418_v4 = vld [vmem:[#allocation26 + $0x170] sm:$0xff] }
0x2000   : > { %8504 = vmatpush.msrb.mxu1 %v8467_v20 }
0x2002   : > { %8505 = vmatpush.msrb.mxu1 %v8466_v48 }
0x2004   : > { %8506 = vmatpush.msrb.mxu1 %v8465_v6 }
0x204c   : > { %v8145_v7 = vpop.f32.mrf.mxu0 }
0x204d   : > { %v8146_v34 = vadd.f32 %v8145_v7, %v8118_v17  ;;  %v8450_v7 = vld [vmem:[%s12329_s12 + $0x48] sm:$0xff] }
0x204e   : > { %8482 = vmatpush.msrb.mxu0 %v8450_v7  ;;  %v9438_v7 = vld [vmem:[#allocation31] ss:$0 sm:$0xff] }
0x204f   : > { %v8179_v11 = vmul.f32 %v8175_v8, %v8146_v34  ;;  %v8463_v8 = vld [vmem:[%s12329_s12 + $0xb0] sm:$0xff]  ;;  %v8449_v34 = vld [vmem:[%s12329_s12 + $0x40] sm:$0xff] }
0x2050   : > { %8483 = vmatpush.msrb.mxu0 %v8449_v34 }
0x2051   : > { %v8188_v30 = vadd.f32 %v8184_v24, %v8179_v11  ;;  %v8462_v24 = vld [vmem:[%s12329_s12 + $0xa8] sm:$0xff]  ;;  %v8448_v11 = vld [vmem:[%s12329_s12 + $0x38] sm:$0xff] }
0x2052   : > { %v8168_v13 = vpop.f32.mrf.mxu1  ;;  %8484 = vmatpush.msrb.mxu0 %v8448_v11 }
0x2053   : > { %9625 = vtanh.f32 %v8188_v30  ;;  %v8169_v16 = vadd.f32 %v8168_v13, %v8119_v12  ;;  %v8447_v30 = vld [vmem:[%s12329_s12 + $0x30] sm:$0xff]  ;;  %v8460_v13 = vld [vmem:[%s12329_s12 + $0x98] sm:$0xff] }
0x2054   : > { %v8148_v18 = vpop.f32.mrf.mxu0  ;;  %8485 = vmatpush.msrb.mxu0 %v8447_v30 }
0x2055   : > { %v8180_v23 = vmul.f32 %v8176_v21, %v8169_v16  ;;  %v8149_v25 = vadd.f32 %v8148_v18, %v8118_v17  ;;  %v8464_v17 = vld [vmem:[%s12329_s12 + $0xb8] sm:$0xff]  ;;  %v8446_v21 = vld [vmem:[%s12329_s12 + $0x28] sm:$0xff]  ;;  %v8459_v16 = vld [vmem:[%s12329_s12 + $0x90] sm:$0xff] }
0x2056   : > { %8507 = vmatpush.msrb.mxu1 %v8464_v17  ;;  %8486 = vmatpush.msrb.mxu0 %v8446_v21  ;;  %v8458_v18 = vld [vmem:[%s12329_s12 + $0x88] sm:$0xff] }
0x2057   : > { %v8189_v49 = vadd.f32 %v8185_v40, %v8180_v23  ;;  %v8181_v15 = vmul.f32 %v8177_v27, %v8149_v25  ;;  %v8445_v40 = vld [vmem:[%s12329_s12 + $0x20] sm:$0xff]  ;;  %v8444_v27 = vld [vmem:[%s12329_s12 + $0x18] sm:$0xff]  ;;  %v8443_v25 = vld [vmem:[%s12329_s12 + $0x10] sm:$0xff] }
0x2058   : > { %8508 = vmatpush.msrb.mxu1 %v8463_v8  ;;  %8487 = vmatpush.msrb.mxu0 %v8445_v40  ;;  %v8457_v23 = vld [vmem:[%s12329_s12 + $0x80] sm:$0xff] }
0x2059   : > { %v9626_v31 = vpop.eup %9625  ;;  %9627 = vtanh.f32 %v8189_v49  ;;  %v8190_v32 = vadd.f32 %v8186_v26, %v8181_v15  ;;  %v8442_v26 = vld [vmem:[%s12329_s12 + $0x8] sm:$0xff]  ;;  %v8441_v49 = vld [vmem:[%s12329_s12] sm:$0xff] }
0x205a   : > { %v8171_v45 = vpop.f32.mrf.mxu1  ;;  %8282 = vmatmul.f32.vlgmr.msra.gmra.mxu2 %v9626_v31  ;;  %8328 = vmatmul.f32.vlgmr.msra.gmra.mxu0 %v9626_v31  ;;  %v8265_v15 = vld [vmem:[#allocation25 + $0x16] sm:$0x3]  ;;  %v8473_v17 = vld [vmem:[#allocation29] sm:$0xff] }
0x205b   : > { %9629 = vtanh.f32 %v8190_v32  ;;  %v8172_v35 = vadd.f32 %v8171_v45, %v8119_v12  ;;  %8509 = vmatpush.msrb.mxu1 %v8462_v24  ;;  %v8461_v12 = vld [vmem:[%s12329_s12 + $0xa0] sm:$0xff]  ;;  %8488 = vmatpush.msrb.mxu0 %v8444_v27  ;;  %v8360_v31 = vperm.slane %v8265_v15, 1  ;;  %v8417_v45 = vld [vmem:[#allocation26 + $0x168] sm:$0xff]  ;;  %s8602_s12 = sshll.u32 %s8598_s6, 4  ;;  %s8603_s12 = int_to_ptr.hbm [resolvable:$true] %s8602_s12 }
0x205c   : > { %s10225_s1 = sshra.s32 %s8603_s12, 4  ;;  %s10226_s1 = int_to_ptr.hbm [resolvable:$true] %s10225_s1 }
0x205d   : > { %v8182_v52 = vmul.f32 %v8178_v33, %v8172_v35  ;;  %8510 = vmatpush.msrb.mxu1 %v8461_v12  ;;  %8489 = vmatpush.msrb.mxu0 %v8443_v25  ;;  %v8426_v35 = vld [vmem:[#allocation28 + $0x168] sm:$0xff]  ;;  %v8556_v12 = vld [vmem:[%s12330_s8] sm:$0xff]  ;;  %s10227_s5 = scalar_lea.hbm %s10226_s1, 8  ;;  %p10232_p7 = scmp.lt.s32.totalorder %s10226_s1, %s12331_s4 }
0x205e   : > { %p10228_p1 = scmp.ne.s32.totalorder %s10226_s1, %s10227_s5  ;;  %p10233_p8 = scmp.lt.s32.totalorder %s10231_s15, %s10227_s5 }
0x205f   : > { %v9628_v37 = vpop.eup %9627  ;;  %v8191_v44 = vadd.f32 %v8187_v36, %v8182_v52  ;;  %8511 = vmatpush.msrb.mxu1 %v8460_v13  ;;  %8490 = vmatpush.msrb.mxu0 %v8442_v26  ;;  %v8359_v52 = vperm.slane %v8265_v15, 0 }
0x2060   : > { %8305 = vmatmul.f32.vlgmr.msrb.gmra.mxu3 %v9628_v37  ;;  %8351 = vmatmul.f32.vlgmr.msra.gmra.mxu1 %v9628_v37  ;;  %p10229_p5 = pnand %p10228_p1, %p10697_p4  ;;  %p10234_p9 = por %p10233_p8, %p10232_p7 }
0x2061   : > { %v9630_v41 = vpop.eup %9629  ;;  %9631 = vtanh.f32 %v8191_v44  ;;  %8512 = vmatpush.msrb.mxu1 %v8459_v16  ;;  %8491 = vmatpush.msrb.mxu0 %v8441_v49 }
0x2062   : > { %8285 = vmatmul.f32.gmra.mxu2 %v9630_v41  ;;  %8331 = vmatmul.f32.gmra.mxu0 %v9630_v41  ;;  %v8416_v41 = vld [vmem:[#allocation26 + $0x160] sm:$0xff]  ;;  %p10230_p12 = pneg %p10229_p5 }
0x2063   : > { %8513 = vmatpush.msrb.mxu1 %v8458_v18 }
0x2064   : > { %p10235_p10 = pnand %p10234_p9, %p10230_p12 }
0x2065   : > { %8514 = vmatpush.msrb.mxu1 %v8457_v23 }
0x2067   : > { %v9632_v29 = vpop.eup %9631 }
0x2068   : > { %8308 = vmatmul.f32.gmra.mxu3 %v9632_v29  ;;  %8354 = vmatmul.f32.gmra.mxu1 %v9632_v29 }
0x20d7   : > { %v8329_v60 = vpop.f32.mrf.mxu0 }
0x20dd   : > { %v8352_v59 = vpop.f32.mrf.mxu1  ;;  %v8283_v53 = vpop.f32.mrf.mxu2 }
0x20de   : > { %v8353_v62 = vadd.f32 %v8352_v59, %v8329_v60  ;;  %v8425_v60 = vld [vmem:[#allocation28 + $0x160] sm:$0xff] }
0x20df   : > { %v8332_v58 = vpop.f32.mrf.mxu0 }
0x20e3   : > { %v8306_v2 = vpop.f32.mrf.mxu3 }
0x20e4   : > { %v8307_v19 = vadd.f32 %v8306_v2, %v8283_v53  ;;  %v8427_v2 = vld [vmem:[#allocation28 + $0x170] sm:$0xff] }
0x20e5   : > { %v8355_v14 = vpop.f32.mrf.mxu1  ;;  %v8286_v63 = vpop.f32.mrf.mxu2 }
0x20e6   : > { %v8356_v61 = vadd.f32 %v8355_v14, %v8332_v58 }
0x20e8   : > { %8406 = vmatpush.msra.mxu3 %v8356_v61 }
0x20ea   : > { %8407 = vmatpush.msra.mxu3 %v8353_v62 }
0x20eb   : > { %v8309_v5 = vpop.f32.mrf.mxu3  ;;  %9164 = vmatmul.msk.f32.vlgmr.msra.gmra.mxu3 %vm1199_vm0, %v8262_v9 }
0x20ec   : > { %v8310_v1 = vadd.f32 %v8309_v5, %v8286_v63 }
0x20ee   : > { %8383 = vmatpush.msrb.mxu2 %v8310_v1 }
0x20f0   : > { %8384 = vmatpush.msrb.mxu2 %v8307_v19 }
0x20f1   : > { %9162 = vmatmul.msk.f32.vlgmr.msrb.gmra.mxu2 %vm1199_vm0, %v8262_v9 }
0x20f3   : > { %9165 = vmatmul.msk.f32.gmra.mxu3 %vm1199_vm0, %v8263_v3 }
0x20f9   : > { %9163 = vmatmul.msk.f32.gmra.mxu2 %vm1199_vm0, %v8263_v3 }
0x216e   : > { %v8409_v32 = vpop.f32.mrf.mxu3 }
0x216f   : > { %v8410_v33 = vadd.f32 %v8409_v32, %v8360_v31 }
0x2171   : > { %v8421_v36 = vmul.f32 %v8417_v45, %v8410_v33 }
0x2173   : > { %v8430_v37 = vadd.f32 %v8426_v35, %v8421_v36 }
0x2174   : > { %v8386_v44 = vpop.f32.mrf.mxu2 }
0x2175   : > { %9633 = vtanh.f32 %v8430_v37  ;;  %v8387_v29 = vadd.f32 %v8386_v44, %v8359_v52 }
0x2176   : > { %v8412_v54 = vpop.f32.mrf.mxu3 }
0x2177   : > { %v8420_v47 = vmul.f32 %v8416_v41, %v8387_v29  ;;  %v8413_v57 = vadd.f32 %v8412_v54, %v8360_v31 }
0x2179   : > { %v8429_v10 = vadd.f32 %v8425_v60, %v8420_v47  ;;  %v8423_v59 = vmul.f32 %v8419_v46, %v8413_v57 }
0x217b   : > { %v9634_v43 = vpop.eup %9633  ;;  %9635 = vtanh.f32 %v8429_v10  ;;  %v8432_v56 = vadd.f32 %v8428_v50, %v8423_v59 }
0x217c   : > { %v8389_v53 = vpop.f32.mrf.mxu2  ;;  %v8438_v51 = vadd.f32 %v9634_v43, %v12036_v42 }
0x217d   : > { %9637 = vtanh.f32 %v8432_v56  ;;  %v8390_v20 = vadd.f32 %v8389_v53, %v8359_v52 }
0x217e   : > { %8515 = vmatmul.f32.vlgmr.msrb.gmra.mxu1 %v8438_v51 }
0x217f   : > { %v8422_v58 = vmul.f32 %v8418_v4, %v8390_v20 }
0x2181   : > { %v9636_v48 = vpop.eup %9635  ;;  %v8431_v14 = vadd.f32 %v8427_v2, %v8422_v58 }
0x2182   : > { %v8437_v6 = vadd.f32 %v9636_v48, %v12041_v28  ;;  %v8474_v28 = vld [vmem:[#allocation29 + $0x8] sm:$0xff] }
0x2183   : > { %v9638_v61 = vpop.eup %9637  ;;  %9639 = vtanh.f32 %v8431_v14 }
0x2184   : > { %8492 = vmatmul.f32.vlgmr.msrb.gmra.mxu0 %v8437_v6  ;;  %v8440_v62 = vadd.f32 %v9638_v61, %v12046_v55 }
0x2186   : > { %8518 = vmatmul.f32.gmra.mxu1 %v8440_v62 }
0x2189   : > { %v9640_v9 = vpop.eup %9639 }
0x218a   : > { %v8439_v63 = vadd.f32 %v9640_v9, %v12051_v0 }
0x218c   : > { %8495 = vmatmul.f32.gmra.mxu0 %v8439_v63 }
0x21fb   : > { %v8516_v42 = vpop.f32.mrf.mxu1 }
0x2201   : > { %v8493_v5 = vpop.f32.mrf.mxu0 }
0x2202   : > { %v8517_v22 = vadd.f32 %v8516_v42, %v8493_v5 }
0x2203   : > { %v8519_v1 = vpop.f32.mrf.mxu1 }
0x2209   : > { %v8496_v19 = vpop.f32.mrf.mxu0 }
0x220a   : > { %v8520_v3 = vadd.f32 %v8519_v1, %v8496_v19 }
0x220c   : > { %8545 = vmatpush.msra.mxu2 %v8520_v3 }
0x220e   : > { %8546 = vmatpush.msra.mxu2 %v8517_v22 }
0x220f   : > { %9166 = vmatmul.msk.f32.vlgmr.msra.gmra.mxu2 %vm1199_vm0, %v8473_v17 }
0x2217   : > { %9167 = vmatmul.msk.f32.gmra.mxu2 %vm1199_vm0, %v8474_v28 }
0x2292   : > { %v8548_v55 = vpop.f32.mrf.mxu2 }
0x2293   : > { %v8549_v34 = vadd.f32 %v9438_v7, %v8548_v55 }
0x2295   : > { %v8554_v11 = vadd.f32 %v8549_v34, %v11711_v38 }
0x229a   : > { %v8551_v0 = vpop.f32.mrf.mxu2 }
0x229b   : > { %v8552_v8 = vadd.f32 %v9438_v7, %v8551_v0 }
0x229d   : > { %v8555_v24 = vadd.f32 %v8552_v8, %v11717_v39 }
0x229f   : > { %9168 = vmatpush.xpose.msk.msrb.mxu3 %vm2345_vm10, %v8555_v24 }
0x22a3   : > { %9169 = vmatpush.xpose.msk.msrb.mxu3 %vm2345_vm10, %v8554_v11 }
0x22a6   : > { %9170 = vmatmul.msk.f32.vlgmr.msrb.gmra.mxu3 %vm2345_vm10, %v8556_v12 }
0x2329   : > { %v8583_v38 = vpop.f32.mrf.mxu3 }
0x232a   : > { %8586 = vst.msk [vmem:[%s1173_s3] sm:$0xff] %vm1199_vm0, %v8583_v38 }
0x232b   : > { %10238 = shalt.err (!%p10235_p10)
}
0x232c   : > { %9271 = dma.vmem_to_hbm [thread:$0]  (%p10697_p4), %s8601_s2, 128, %s8603_s12, %s8588_s14  }
0x232d PF: > { %s12332_s11 = sld [smem:[#allocation44_spill]]  ;;  %p12333_p13 = scmp.ge.s32.totalorder %s10313_s30, 2 }
0x232f   : > { %p9333_p11 = pnand %p12333_p13, %p10701_p6 }
0x2331   : > { %p9334_p0 = pneg %p9333_p11 }
0x2333   : > { %s8614_s13 = sand.u32 1, %s12332_s11  }
0x2334   : > { %s8615_s6 = scalar_lea.sflag [#allocation4], %s8614_s13 }
0x2335   : > { %10296 = dma.done.wait (%p9334_p0), %s8615_s6, 128  }
0x2336   : > { %10298 = vsyncadd (%p9334_p0), %s8615_s6, 4294967168  ;;  %s12334_s8 = sld [smem:[#allocation45_spill]]  ;;  %p50_p2 = scmp.ge.s32.totalorder %s10671_s10, 4  }
0x2337   : > { %s12335_s5 = smov %s10309_s9  ;;  %s12336_s9 = smov %s10682_s25 }
0x2338   : > { %s12337_s30 = smov %s10671_s10  ;;  %52 = sbr.rel (!%p50_p2) target bundleno = 37 (0x25), region = 368 }
0x233d   :  { %8621 = vsyncpa [#allocation3], 1 }
0x233e   :  { %8623 = vsyncpa [#allocation3 + $0x1], 1 }
0x233f   :  { %8624 = vsyncpa [#allocation6], 1 }
0x2340   :  { %8625 = vsyncpa [#allocation9], 1 }
0x2341   :  { %8626 = vsyncpa [#allocation12], 1 }
0x2342   :  { %8627 = vsyncpa [#allocation15], 1 }
0x2343   :  { %8628 = vsyncpa [#allocation18], 1 }
0x2344   :  { %8629 = vsyncpa [#allocation21], 1 }
0x2345   :  { %8630 = vsyncpa [#allocation24], 1 }
0x2346   :  { %8631 = vsyncpa [#allocation27], 1 }
0x2347   :  { %8632 = vsyncpa [#allocation30], 1 }
0x2348   :  { %8633 = vsyncpa [#allocation4], 1 }
0x2349   :  { %8635 = vsyncpa [#allocation4 + $0x1], 1 }

</bundles_post_ra>
